<compile_context>
chip_gen: v6e
topology: v6e:2x2x1
jax: 0.10.0
libtpu: 0.0.40
codegen_flags: <defaults>
</compile_context>

<pallas_src>
import functools

import jax
import jax.numpy as jnp
from jax.experimental import pallas as pl
from jax.experimental.pallas import tpu as pltpu

LANES = 128
SUBLANES = 8
TILE_ROWS = 2048   # rows of 128 lanes per grid step (1 MiB f32 per input)
NSPLIT = 2         # leading 'parallel' grid axis (v7x: 2 TensorCores/chip)


def _mse_partial_kernel(x_ref, t_ref, o_ref, acc_ref, *, total_rows):
    """Squared-error partial sums into an (8,128) f32 VMEM accumulator."""
    c = pl.program_id(0)            # core-split index
    i = pl.program_id(1)            # block index within the split
    n_inner = pl.num_programs(1)

    @pl.when(i == 0)
    def _init():
        acc_ref[...] = jnp.zeros_like(acc_ref)

    x = x_ref[...]
    # torch.nan_to_num(input, nan=0.0) in the *original* dtype:
    #   nan -> 0, +inf -> finfo.max, -inf -> finfo.min
    finfo = jnp.finfo(x.dtype)
    x = jnp.where(jnp.isnan(x), jnp.zeros_like(x), x)
    x = jnp.where(x == jnp.inf, jnp.full_like(x, finfo.max), x)
    x = jnp.where(x == -jnp.inf, jnp.full_like(x, finfo.min), x)

    d = x.astype(jnp.float32) - t_ref[...].astype(jnp.float32)
    d2 = d * d

    # Mask rows that lie past the end of the real (lane-padded) data; the
    # lane-padding inside the last valid row is exact zeros in both operands
    # and contributes nothing.
    global_block = c * n_inner + i
    row_start = global_block * TILE_ROWS
    row_ids = jax.lax.broadcasted_iota(jnp.int32, (TILE_ROWS, LANES), 0)
    d2 = jnp.where(row_ids < (total_rows - row_start), d2, 0.0)

    # Reduce the (2048,128) block to one (8,128) vreg with pure VPU adds
    # (reduction over the leading, non-tiled axis -> no XLU in the hot loop).
    acc_ref[...] += jnp.sum(
        d2.reshape(TILE_ROWS // SUBLANES, SUBLANES, LANES), axis=0)

    @pl.when(i == n_inner - 1)
    def _finalize():
        o_ref[...] = acc_ref[...]


def _as_lane_major(flat: jax.Array) -> jax.Array:
    """Reshape a flat vector to (rows, 128); pad (with zeros) only if needed."""
    n = flat.shape[0]
    pad = (-n) % LANES
    if pad:  # static decision; skipped when already lane-aligned (free reshape)
        flat = jnp.pad(flat, (0, pad))
    return flat.reshape(-1, LANES)


@functools.partial(jax.jit, static_argnames=("reduction",))
def ddp_loss_forward(inputs: jax.Array,
                     target: jax.Array,
                     natoms: jax.Array,
                     reduction: str = "mean") -> jax.Array:
    """Pallas implementation of DDPLoss(loss_name='mse', reduction=...).forward."""
    assert inputs.shape == target.shape, (
        f"Mismatched shapes: {inputs.shape} and {target.shape}")
    # natoms is accepted for API parity; the elementwise MSE loss ignores it.
    del natoms

    num_samples = inputs.size  # loss.numel()

    x2d = _as_lane_major(inputs.reshape(-1))
    t2d = _as_lane_major(target.reshape(-1))
    rows = x2d.shape[0]

    total_blocks = pl.cdiv(rows, TILE_ROWS)
    inner = pl.cdiv(total_blocks, NSPLIT)
    last_block = total_blocks - 1

    def in_map(c, i):
        # Clamp so splits that run past the end re-read the last block; the
        # in-kernel row mask zeroes their contribution.
        return (jnp.minimum(c * inner + i, last_block), 0)

    partials = pl.pallas_call(
        functools.partial(_mse_partial_kernel, total_rows=rows),
        out_shape=jax.ShapeDtypeStruct((NSPLIT, SUBLANES, LANES), jnp.float32),
        grid_spec=pltpu.PrefetchScalarGridSpec(
            num_scalar_prefetch=0,
            grid=(NSPLIT, inner),
            in_specs=[
                pl.BlockSpec((TILE_ROWS, LANES), in_map),
                pl.BlockSpec((TILE_ROWS, LANES), in_map),
            ],
            out_specs=pl.BlockSpec((None, SUBLANES, LANES),
                                   lambda c, i: (c, 0, 0)),
            scratch_shapes=[pltpu.VMEM((SUBLANES, LANES), jnp.float32)],
        ),
        compiler_params=pltpu.CompilerParams(
            dimension_semantics=("parallel", "arbitrary")),
    )(x2d, t2d)

    loss_sum = jnp.sum(partials)  # tiny (2,8,128) reduce in the wrapper

    if reduction == "sum":
        return loss_sum

    # 'mean' with DDP correction: loss * world_size / all_reduce(num_samples).
    # TODO(synk): cross-replica all_reduce of num_samples (distutils.all_reduce)
    # has no single-chip Pallas equivalent; with world_size == 1 it is num_samples.
    world_size = 1
    return loss_sum * world_size / jnp.float32(num_samples * world_size)


def _reference(inputs, target, reduction):
    x = jnp.nan_to_num(inputs, nan=0.0)
    loss = (x.astype(jnp.float32) - target.astype(jnp.float32)) ** 2
    s = jnp.sum(loss)
    return s if reduction == "sum" else s / loss.size


if __name__ == "__main__":
    key = jax.random.PRNGKey(0)
    k1, k2 = jax.random.split(key)

    # Forces-style shapes: N atoms x 3 components (ragged vs. 128 lanes).
    N = 300
    inputs = jax.random.normal(k1, (N, 3), dtype=jnp.float32)
    target = jax.random.normal(k2, (N, 3), dtype=jnp.float32)
    # Inject a NaN to exercise the nan_to_num path.
    inputs = inputs.at[0, 0].set(jnp.nan)
    natoms = jnp.array([180, 120], dtype=jnp.int32)  # per-sample atom counts

    out_mean = jax.block_until_ready(
        ddp_loss_forward(inputs, target, natoms, reduction="mean"))
    out_sum = jax.block_until_ready(
        ddp_loss_forward(inputs, target, natoms, reduction="sum"))

    ref_mean = _reference(inputs, target, "mean")
    ref_sum = _reference(inputs, target, "sum")

    assert jnp.allclose(out_mean, ref_mean, rtol=1e-5, atol=1e-6), (out_mean, ref_mean)
    assert jnp.allclose(out_sum, ref_sum, rtol=1e-5, atol=1e-6), (out_sum, ref_sum)

    print("KERNEL_OK")
</pallas_src>

<mosaic_0001>
module attributes {stable_mosaic.version = 11 : i64} {
  func.func @_mse_partial_kernel(%arg0: i32, %arg1: i32, %arg2: memref<2048x128xf32, #tpu.memory_space<vmem>>, %arg3: memref<2048x128xf32, #tpu.memory_space<vmem>>, %arg4: memref<1x8x128xf32, #tpu.memory_space<vmem>>, %arg5: memref<8x128xf32, #tpu.memory_space<vmem>>) attributes {dimension_semantics = [#tpu.dimension_semantics<parallel>, #tpu.dimension_semantics<arbitrary>], iteration_bounds = array<i64: 2, 1>, scalar_prefetch = 0 : i64, scratch_operands = 1 : i64, tpu.core_type = #tpu.core_type<tc>, window_params = [{transform_indices = @transform_0, window_bounds = array<i64: 2048, 128>}, {transform_indices = @transform_1, window_bounds = array<i64: 2048, 128>}, {transform_indices = @transform_2, window_bounds = array<i64: 1, 8, 128>}]} {
    %c0_i32 = arith.constant 0 : i32
    %0 = arith.cmpi eq, %arg1, %c0_i32 : i32
    %1 = arith.extui %0 : i1 to i32
    %c0_i32_0 = arith.constant 0 : i32
    %2 = arith.cmpi ne, %1, %c0_i32_0 : i32
    scf.if %2 {
      %cst_16 = arith.constant 0.000000e+00 : f32
      %35 = vector.broadcast %cst_16 : f32 to vector<8x128xf32>
      %c0_17 = arith.constant 0 : index
      %c0_18 = arith.constant 0 : index
      %36 = vector.load %arg5[%c0_17, %c0_18] : memref<8x128xf32, #tpu.memory_space<vmem>>, vector<8x128xf32>
      tpu.vector_store %arg5[%c0_17, %c0_18], %35 {strides = array<i32>} : memref<8x128xf32, #tpu.memory_space<vmem>>, vector<8x128xf32>,
    } else {
    }
    %c0 = arith.constant 0 : index
    %c0_1 = arith.constant 0 : index
    %3 = vector.load %arg2[%c0, %c0_1] : memref<2048x128xf32, #tpu.memory_space<vmem>>, vector<2048x128xf32>
    %4 = arith.cmpf one, %3, %3 : vector<2048x128xf32>
    %cst = arith.constant 0.000000e+00 : f32
    %5 = vector.broadcast %cst : f32 to vector<2048x128xf32>
    %6 = arith.select %4, %5, %3 : vector<2048x128xi1>, vector<2048x128xf32>
    %cst_2 = arith.constant 0x7F800000 : f32
    %7 = vector.broadcast %cst_2 : f32 to vector<2048x128xf32>
    %8 = arith.cmpf oeq, %6, %7 : vector<2048x128xf32>
    %cst_3 = arith.constant 3.40282347E+38 : f32
    %9 = vector.broadcast %cst_3 : f32 to vector<2048x128xf32>
    %10 = arith.select %8, %9, %6 : vector<2048x128xi1>, vector<2048x128xf32>
    %cst_4 = arith.constant 0xFF800000 : f32
    %11 = vector.broadcast %cst_4 : f32 to vector<2048x128xf32>
    %12 = arith.cmpf oeq, %10, %11 : vector<2048x128xf32>
    %cst_5 = arith.constant -3.40282347E+38 : f32
    %13 = vector.broadcast %cst_5 : f32 to vector<2048x128xf32>
    %14 = arith.select %12, %13, %10 : vector<2048x128xi1>, vector<2048x128xf32>
    %c0_6 = arith.constant 0 : index
    %c0_7 = arith.constant 0 : index
    %15 = vector.load %arg3[%c0_6, %c0_7] : memref<2048x128xf32, #tpu.memory_space<vmem>>, vector<2048x128xf32>
    %16 = arith.subf %14, %15 : vector<2048x128xf32>
    %17 = arith.mulf %16, %16 : vector<2048x128xf32>
    %c1_i32 = arith.constant 1 : i32
    %18 = arith.muli %arg0, %c1_i32 : i32
    %19 = arith.addi %18, %arg1 : i32
    %c2048_i32 = arith.constant 2048 : i32
    %20 = arith.muli %19, %c2048_i32 : i32
    %21 = tpu.iota {dimensions = array<i32: 0>} : vector<2048x128xi32>
    %c8_i32 = arith.constant 8 : i32
    %22 = arith.subi %c8_i32, %20 : i32
    %23 = vector.broadcast %22 : i32 to vector<2048x128xi32>
    %24 = arith.cmpi slt, %21, %23 : vector<2048x128xi32>
    %cst_8 = arith.constant 0.000000e+00 : f32
    %25 = vector.broadcast %cst_8 : f32 to vector<2048x128xf32>
    %26 = arith.select %24, %17, %25 : vector<2048x128xi1>, vector<2048x128xf32>
    %c0_9 = arith.constant 0 : index
    %c0_10 = arith.constant 0 : index
    %27 = vector.load %arg5[%c0_9, %c0_10] : memref<8x128xf32, #tpu.memory_space<vmem>>, vector<8x128xf32>
    %28 = vector.shape_cast %26 : vector<2048x128xf32> to vector<256x8x128xf32>
    %cst_11 = arith.constant dense<0.000000e+00> : vector<8x128xf32>
    %29 = vector.multi_reduction <add>, %28, %cst_11 [0] : vector<256x8x128xf32> to vector<8x128xf32>
    %30 = arith.addf %27, %29 : vector<8x128xf32>
    %c0_12 = arith.constant 0 : index
    %c0_13 = arith.constant 0 : index
    %31 = vector.load %arg5[%c0_12, %c0_13] : memref<8x128xf32, #tpu.memory_space<vmem>>, vector<8x128xf32>
    tpu.vector_store %arg5[%c0_12, %c0_13], %30 {strides = array<i32>} : memref<8x128xf32, #tpu.memory_space<vmem>>, vector<8x128xf32>,
    %c0_i32_14 = arith.constant 0 : i32
    %32 = arith.cmpi eq, %arg1, %c0_i32_14 : i32
    %33 = arith.extui %32 : i1 to i32
    %c0_i32_15 = arith.constant 0 : i32
    %34 = arith.cmpi ne, %33, %c0_i32_15 : i32
    scf.if %34 {
      %c0_16 = arith.constant 0 : index
      %c0_17 = arith.constant 0 : index
      %35 = vector.load %arg5[%c0_16, %c0_17] : memref<8x128xf32, #tpu.memory_space<vmem>>, vector<8x128xf32>
      %c0_18 = arith.constant 0 : index
      %c0_19 = arith.constant 0 : index
      %c0_20 = arith.constant 0 : index
      %36 = vector.load %arg4[%c0_18, %c0_19, %c0_20] : memref<1x8x128xf32, #tpu.memory_space<vmem>>, vector<1x8x128xf32>
      %37 = vector.shape_cast %36 : vector<1x8x128xf32> to vector<8x128xf32>
      %38 = vector.shape_cast %35 : vector<8x128xf32> to vector<1x8x128xf32>
      tpu.vector_store %arg4[%c0_18, %c0_19, %c0_20], %38 {strides = array<i32>} : memref<1x8x128xf32, #tpu.memory_space<vmem>>, vector<1x8x128xf32>,
    } else {
    }
    return
  }
  func.func @transform_0(%arg0: i32, %arg1: i32) -> (i32, i32) {
    %c1_i32 = arith.constant 1 : i32
    %0 = arith.muli %arg0, %c1_i32 : i32
    %1 = arith.addi %0, %arg1 : i32
    %c0_i32 = arith.constant 0 : i32
    %2 = arith.minsi %1, %c0_i32 : i32
    %c0_i32_0 = arith.constant 0 : i32
    %c0_i32_1 = arith.constant 0 : i32
    return %2, %c0_i32_0 : i32, i32
  }
  func.func @transform_1(%arg0: i32, %arg1: i32) -> (i32, i32) {
    %c1_i32 = arith.constant 1 : i32
    %0 = arith.muli %arg0, %c1_i32 : i32
    %1 = arith.addi %0, %arg1 : i32
    %c0_i32 = arith.constant 0 : i32
    %2 = arith.minsi %1, %c0_i32 : i32
    %c0_i32_0 = arith.constant 0 : i32
    %c0_i32_1 = arith.constant 0 : i32
    return %2, %c0_i32_0 : i32, i32
  }
  func.func @transform_2(%arg0: i32, %arg1: i32) -> (i32, i32, i32) {
    %c0_i32 = arith.constant 0 : i32
    %c0_i32_0 = arith.constant 0 : i32
    %c0_i32_1 = arith.constant 0 : i32
    return %arg0, %c0_i32, %c0_i32_0 : i32, i32, i32
  }
}

</mosaic_0001>

<bundles_post_ra>
// kernel: ddp_loss_forward.1
= control target key start
LH: loop header
LB: loop body
LE: loop exit
PB: predicated region body
PF: predicated region fallthrough
CT: control target
= control target key end

     0   :  { %s3990_s9 = smov 0   ;;  %s3992_s10 = smov 0   ;;  %s10099_s0 = inlined_call_operand.vmem [shape: f32[8,128], index: 0, kind: input, shape index: {}]   ;;  %s10100_s1 = inlined_call_operand.vmem [shape: f32[8,128], index: 1, kind: input, shape index: {}]   ;;  %s10101_s2 = inlined_call_operand.vmem [shape: f32[2,8,128], index: 2, kind: output, shape index: {}]  }
   0x1   :  { %s3994_s11 = smov 0  }
   0x2 LB: > { %s24_s12 = sadd.s32 1, %s3969_s10  ;;  %p3918_p0 = scmp.ge.s32.totalorder %s3973_s11, 1  ;;  %s3973_s11 = sphi %s3994_s11, %s12_s11   ;;  %s3969_s10 = sphi %s3992_s10, %s12205_s10   ;;  %s3965_s9 = sphi %s3990_s9, %s12204_s9  }
   0x3   : > { %p26_p1 = scmp.ge.s32.totalorder %s24_s12, 2  ;;  %p168_p2 = scmp.lt.s32.totalorder %s3973_s11, 3 }
   0x5   : > { %s12207_s12 = smov (%p26_p1, %s24_s12), 0  ;;  %p169_p3 = pnand %p3918_p0, %p168_p2 }
   0x7   : > { %172 = sbr.rel (%p169_p3) target bundleno = 891 (0x37b), region = 28 }
   0xc   : > { %p205_p4 = scmp.lt.s32.totalorder %s3965_s9, 0  ;;  %s3924_s19 = sshll.u32 %s3965_s9, 11 }
   0xd   : > { %s3064_s20 = ssub.s32 8, %s3924_s19  ;;  %p236_p6 = scmp.lt.s32.totalorder %s3965_s9, 1 }
   0xe   : > { %s206_s13 = scalar_select %p205_p4, %s3965_s9, 0 }
   0xf   : > { %s12211_s9 = smov (!%p236_p6, %s3965_s9), 1 }
  0x10   : > { %s3919_s14 = sshll.u32 %s206_s13, 8  ;;  %s3923_s24 = sshll.u32 %s12211_s9, 3 }
  0x11   : > { %p210_p5 = scmp.lt.s32.totalorder %s3919_s14, 0  ;;  %s239_s27 = scalar_lea.vmem %s10101_s2, %s3923_s24 }
  0x13   : > { %s12209_s14 = smov (!%p210_p5, %s3919_s14), 0 }
  0x14   : > { %s3920_s15 = sshll.u32 %s12209_s14, 3 }
  0x15   : > { %s4020_s18 = scalar_lea.vmem %s10099_s0, %s3920_s15  ;;  %s8058_s23 = scalar_lea.vmem %s10100_s1, %s3920_s15 }
  0x16   : > { %v245_v0 = vld [vmem:[%s4020_s18] sm:$0xff]  ;;  %v246_v1 = vld [vmem:[%s4020_s18 + $0x8] sm:$0xff]  ;;  %v247_v2 = vld [vmem:[%s4020_s18 + $0x10] sm:$0xff] }
  0x17   : > { %v248_v3 = vld [vmem:[%s4020_s18 + $0x18] sm:$0xff]  ;;  %v249_v4 = vld [vmem:[%s4020_s18 + $0x20] sm:$0xff]  ;;  %v4028_v5 = vld [vmem:[%s4020_s18 + $0x28] sm:$0xff]  ;;  %vm501_vm0 = vcmp.ne.f32.partialorder %v245_v0, %v245_v0  ;;  %vm502_vm1 = vcmp.ne.f32.partialorder %v246_v1, %v246_v1  ;;  %vm503_vm2 = vcmp.ne.f32.partialorder %v247_v2, %v247_v2 }
  0x18   : > { %v4031_v6 = vld [vmem:[%s4020_s18 + $0x30] sm:$0xff]  ;;  %v4034_v7 = vld [vmem:[%s4020_s18 + $0x38] sm:$0xff]  ;;  %v4037_v8 = vld [vmem:[%s4020_s18 + $0x40] sm:$0xff]  ;;  %vm504_vm3 = vcmp.ne.f32.partialorder %v248_v3, %v248_v3  ;;  %vm505_vm4 = vcmp.ne.f32.partialorder %v249_v4, %v249_v4  ;;  %vm506_vm5 = vcmp.ne.f32.partialorder %v4028_v5, %v4028_v5  ;;  %v4088_v23 = vsel %vm501_vm0, 0.0, %v245_v0 }
  0x19   : > { %v4040_v9 = vld [vmem:[%s4020_s18 + $0x48] sm:$0xff]  ;;  %v4043_v10 = vld [vmem:[%s4020_s18 + $0x50] sm:$0xff]  ;;  %v4046_v11 = vld [vmem:[%s4020_s18 + $0x58] sm:$0xff]  ;;  %vm507_vm6 = vcmp.ne.f32.partialorder %v4031_v6, %v4031_v6  ;;  %vm508_vm7 = vcmp.ne.f32.partialorder %v4034_v7, %v4034_v7  ;;  %10630 = vst [vmem:[#allocation3_spill] sm:$0xff] %v4088_v23  ;;  %vm509_vm8 = vcmp.ne.f32.partialorder %v4037_v8, %v4037_v8  ;;  %v4106_v27 = vsel %vm502_vm1, 0.0, %v246_v1 }
  0x1a   : > { %v4049_v12 = vld [vmem:[%s4020_s18 + $0x60] sm:$0xff]  ;;  %v4052_v13 = vld [vmem:[%s4020_s18 + $0x68] sm:$0xff]  ;;  %v4055_v14 = vld [vmem:[%s4020_s18 + $0x70] sm:$0xff]  ;;  %vm510_vm9 = vcmp.ne.f32.partialorder %v4040_v9, %v4040_v9  ;;  %vm511_vm10 = vcmp.ne.f32.partialorder %v4043_v10, %v4043_v10  ;;  %10631 = vst [vmem:[#allocation4_spill] sm:$0xff] %v4106_v27  ;;  %vm512_vm11 = vcmp.ne.f32.partialorder %v4046_v11, %v4046_v11  ;;  %v4124_v31 = vsel %vm503_vm2, 0.0, %v247_v2 }
  0x1b   : > { %v4058_v15 = vld [vmem:[%s4020_s18 + $0x78] sm:$0xff]  ;;  %v4061_v16 = vld [vmem:[%s4020_s18 + $0x80] sm:$0xff]  ;;  %v4064_v17 = vld [vmem:[%s4020_s18 + $0x88] sm:$0xff]  ;;  %vm513_vm12 = vcmp.ne.f32.partialorder %v4049_v12, %v4049_v12  ;;  %vm514_vm13 = vcmp.ne.f32.partialorder %v4052_v13, %v4052_v13  ;;  %10632 = vst [vmem:[#allocation5_spill] sm:$0xff] %v4124_v31  ;;  %vm515_vm14 = vcmp.ne.f32.partialorder %v4055_v14, %v4055_v14  ;;  %v4145_v36 = vsel %vm504_vm3, 0.0, %v248_v3 }
  0x1c   : > { %v4067_v18 = vld [vmem:[%s4020_s18 + $0x90] sm:$0xff]  ;;  %v4070_v19 = vld [vmem:[%s4020_s18 + $0x98] sm:$0xff]  ;;  %v4073_v20 = vld [vmem:[%s4020_s18 + $0xa0] sm:$0xff]  ;;  %vm516_vm15 = vcmp.ne.f32.partialorder %v4058_v15, %v4058_v15  ;;  %vm517_vm0 = vcmp.ne.f32.partialorder %v4061_v16, %v4061_v16  ;;  %10633 = vst [vmem:[#allocation6_spill] sm:$0xff] %v4145_v36  ;;  %vm518_vm1 = vcmp.ne.f32.partialorder %v4064_v17, %v4064_v17  ;;  %v4166_v41 = vsel %vm505_vm4, 0.0, %v249_v4 }
  0x1d   : > { %v4076_v21 = vld [vmem:[%s4020_s18 + $0xa8] sm:$0xff]  ;;  %v4079_v22 = vld [vmem:[%s4020_s18 + $0xb0] sm:$0xff]  ;;  %v4091_v24 = vld [vmem:[%s4020_s18 + $0xb8] sm:$0xff]  ;;  %10634 = vst [vmem:[#allocation7_spill] sm:$0xff] %v4166_v41  ;;  %vm521_vm2 = vcmp.ne.f32.partialorder %v4073_v20, %v4073_v20  ;;  %v4190_v46 = vsel %vm506_vm5, 0.0, %v4028_v5  ;;  %v4214_v51 = vsel %vm507_vm6, 0.0, %v4031_v6 }
  0x1e   : > { %v4094_v25 = vld [vmem:[%s4020_s18 + $0xc0] sm:$0xff]  ;;  %v4097_v26 = vld [vmem:[%s4020_s18 + $0xc8] sm:$0xff]  ;;  %v4109_v28 = vld [vmem:[%s4020_s18 + $0xd0] sm:$0xff]  ;;  %10635 = vst [vmem:[#allocation8_spill] sm:$0xff] %v4190_v46  ;;  %vm524_vm4 = vcmp.ne.f32.partialorder %v4091_v24, %v4091_v24  ;;  %v4238_v56 = vsel %vm508_vm7, 0.0, %v4034_v7  ;;  %v4244_v57 = vsel %vm509_vm8, 0.0, %v4037_v8 }
  0x1f   : > { %v4112_v29 = vld [vmem:[%s4020_s18 + $0xd8] sm:$0xff]  ;;  %v4115_v30 = vld [vmem:[%s4020_s18 + $0xe0] sm:$0xff]  ;;  %v4127_v32 = vld [vmem:[%s4020_s18 + $0xe8] sm:$0xff]  ;;  %10636 = vst [vmem:[#allocation9_spill] sm:$0xff] %v4214_v51  ;;  %vm527_vm3 = vcmp.ne.f32.partialorder %v4109_v28, %v4109_v28  ;;  %v4270_v62 = vsel %vm510_vm9, 0.0, %v4040_v9  ;;  %v4296_v3 = vsel %vm511_vm10, 0.0, %v4043_v10  ;;  %vm10656_vm10 = vcmp.ne.f32.partialorder %v4067_v18, %v4067_v18 }
  0x20   : > { %v4130_v33 = vld [vmem:[%s4020_s18 + $0xf0] sm:$0xff]  ;;  %v4133_v34 = vld [vmem:[%s4020_s18 + $0xf8] sm:$0xff]  ;;  %v4136_v35 = vld [vmem:[%s4020_s18 + $0x100] sm:$0xff]  ;;  %10637 = vst [vmem:[#allocation10_spill] sm:$0xff] %v4238_v56  ;;  %vm530_vm7 = vcmp.ne.f32.partialorder %v4127_v32, %v4127_v32  ;;  %v4322_v8 = vsel %vm512_vm11, 0.0, %v4046_v11  ;;  %v4328_v9 = vsel %vm513_vm12, 0.0, %v4049_v12 }
  0x21   : > { %v4148_v37 = vld [vmem:[%s4020_s18 + $0x108] sm:$0xff]  ;;  %v4151_v38 = vld [vmem:[%s4020_s18 + $0x110] sm:$0xff]  ;;  %v4154_v39 = vld [vmem:[%s4020_s18 + $0x118] sm:$0xff]  ;;  %10638 = vst [vmem:[#allocation11_spill] sm:$0xff] %v4244_v57  ;;  %v4354_v11 = vsel %vm514_vm13, 0.0, %v4052_v13  ;;  %v4380_v13 = vsel %vm515_vm14, 0.0, %v4055_v14 }
  0x22   : > { %v4157_v40 = vld [vmem:[%s4020_s18 + $0x120] sm:$0xff]  ;;  %v4169_v42 = vld [vmem:[%s4020_s18 + $0x128] sm:$0xff]  ;;  %v4172_v43 = vld [vmem:[%s4020_s18 + $0x130] sm:$0xff]  ;;  %10639 = vst [vmem:[#allocation12_spill] sm:$0xff] %v4270_v62  ;;  %vm534_vm8 = vcmp.ne.f32.partialorder %v4148_v37, %v4148_v37  ;;  %v4406_v14 = vsel %vm516_vm15, 0.0, %v4058_v15  ;;  %v4438_v15 = vsel %vm518_vm1, 0.0, %v4064_v17  ;;  %vm10661_vm1 = vcmp.ne.f32.partialorder %v4076_v21, %v4076_v21 }
  0x23   : > { %v4175_v44 = vld [vmem:[%s4020_s18 + $0x138] sm:$0xff]  ;;  %v4178_v45 = vld [vmem:[%s4020_s18 + $0x140] sm:$0xff]  ;;  %v4193_v47 = vld [vmem:[%s4020_s18 + $0x148] sm:$0xff]  ;;  %10641 = vst [vmem:[#allocation14_spill] sm:$0xff] %v4296_v3  ;;  %vm538_vm9 = vcmp.ne.f32.partialorder %v4169_v42, %v4169_v42  ;;  %vm539_vm6 = vcmp.ne.f32.partialorder %v4172_v43, %v4172_v43  ;;  %v4464_v17 = vsel %vm10656_vm10, 0.0, %v4067_v18  ;;  %v4496_v18 = vsel %vm521_vm2, 0.0, %v4073_v20 }
  0x24   : > { %v4196_v48 = vld [vmem:[%s4020_s18 + $0x150] sm:$0xff]  ;;  %v4199_v49 = vld [vmem:[%s4020_s18 + $0x158] sm:$0xff]  ;;  %v4202_v50 = vld [vmem:[%s4020_s18 + $0x160] sm:$0xff]  ;;  %10646 = vst [vmem:[#allocation19_spill] sm:$0xff] %v4322_v8  ;;  %vm542_vm11 = vcmp.ne.f32.partialorder %v4193_v47, %v4193_v47  ;;  %vm10663_vm15 = vcmp.ne.f32.partialorder %v4079_v22, %v4079_v22  ;;  %vm10666_vm2 = vcmp.ne.f32.partialorder %v4094_v25, %v4094_v25 }
  0x25   : > { %v4217_v52 = vld [vmem:[%s4020_s18 + $0x168] sm:$0xff]  ;;  %v4220_v53 = vld [vmem:[%s4020_s18 + $0x170] sm:$0xff]  ;;  %v4223_v54 = vld [vmem:[%s4020_s18 + $0x178] sm:$0xff]  ;;  %10647 = vst [vmem:[#allocation20_spill] sm:$0xff] %v4328_v9 }
  0x26   : > { %v4226_v55 = vld [vmem:[%s4020_s18 + $0x180] sm:$0xff]  ;;  %v4247_v58 = vld [vmem:[%s4020_s18 + $0x188] sm:$0xff]  ;;  %v4250_v59 = vld [vmem:[%s4020_s18 + $0x190] sm:$0xff]  ;;  %10649 = vst [vmem:[#allocation22_spill] sm:$0xff] %v4354_v11  ;;  %vm546_vm12 = vcmp.ne.f32.partialorder %v4217_v52, %v4217_v52 }
  0x27   : > { %v4253_v60 = vld [vmem:[%s4020_s18 + $0x198] sm:$0xff]  ;;  %v4256_v61 = vld [vmem:[%s4020_s18 + $0x1a0] sm:$0xff]  ;;  %v4273_v63 = vld [vmem:[%s4020_s18 + $0x1a8] sm:$0xff]  ;;  %10651 = vst [vmem:[#allocation24_spill] sm:$0xff] %v4380_v13  ;;  %vm550_vm13 = vcmp.ne.f32.partialorder %v4247_v58, %v4247_v58  ;;  %vm551_vm5 = vcmp.ne.f32.partialorder %v4250_v59, %v4250_v59  ;;  %v4412_v13 = vsel %vm517_vm0, 0.0, %v4061_v16  ;;  %vm10658_vm0 = vcmp.ne.f32.partialorder %v4070_v19, %v4070_v19 }
  0x28   : > { %v4276_v0 = vld [vmem:[%s4020_s18 + $0x1b0] sm:$0xff]  ;;  %v4279_v1 = vld [vmem:[%s4020_s18 + $0x1b8] sm:$0xff]  ;;  %v4282_v2 = vld [vmem:[%s4020_s18 + $0x1c0] sm:$0xff]  ;;  %10653 = vst [vmem:[#allocation26_spill] sm:$0xff] %v4406_v14 }
  0x29   : > { %10640 = vst [vmem:[#allocation13_spill] sm:$0xff] %v4276_v0  ;;  %v4299_v4 = vld [vmem:[%s4020_s18 + $0x1c8] sm:$0xff]  ;;  %v4302_v5 = vld [vmem:[%s4020_s18 + $0x1d0] sm:$0xff]  ;;  %v4305_v6 = vld [vmem:[%s4020_s18 + $0x1d8] sm:$0xff] }
  0x2a   : > { %10642 = vst [vmem:[#allocation15_spill] sm:$0xff] %v4299_v4  ;;  %10643 = vst [vmem:[#allocation16_spill] sm:$0xff] %v4302_v5  ;;  %v4308_v7 = vld [vmem:[%s4020_s18 + $0x1e0] sm:$0xff]  ;;  %v4331_v10 = vld [vmem:[%s4020_s18 + $0x1e8] sm:$0xff]  ;;  %vm559_vm14 = vcmp.ne.f32.partialorder %v4302_v5, %v4302_v5 }
  0x2b   : > { %10644 = vst [vmem:[#allocation17_spill] sm:$0xff] %v4305_v6  ;;  %10645 = vst [vmem:[#allocation18_spill] sm:$0xff] %v4308_v7  ;;  %v4334_v3 = vld [vmem:[%s4020_s18 + $0x1f0] sm:$0xff]  ;;  %v4337_v62 = vld [vmem:[%s4020_s18 + $0x1f8] sm:$0xff] }
  0x2c   : > { %v4340_v57 = vld [vmem:[%s4020_s18 + $0x200] sm:$0xff]  ;;  %v4357_v12 = vld [vmem:[%s4020_s18 + $0x208] sm:$0xff]  ;;  %v4360_v9 = vld [vmem:[%s4020_s18 + $0x210] sm:$0xff]  ;;  %10654 = vst [vmem:[#allocation27_spill] sm:$0xff] %v4412_v13  ;;  %vm563_vm10 = vcmp.ne.f32.partialorder %v4334_v3, %v4334_v3 }
  0x2d   : > { %10648 = vst [vmem:[#allocation21_spill] sm:$0xff] %v4340_v57  ;;  %v4363_v8 = vld [vmem:[%s4020_s18 + $0x218] sm:$0xff]  ;;  %v4366_v56 = vld [vmem:[%s4020_s18 + $0x220] sm:$0xff]  ;;  %v4383_v11 = vld [vmem:[%s4020_s18 + $0x228] sm:$0xff] }
  0x2e   : > { %10650 = vst [vmem:[#allocation23_spill] sm:$0xff] %v4366_v56  ;;  %v4386_v51 = vld [vmem:[%s4020_s18 + $0x230] sm:$0xff]  ;;  %v4389_v46 = vld [vmem:[%s4020_s18 + $0x238] sm:$0xff]  ;;  %v4392_v41 = vld [vmem:[%s4020_s18 + $0x240] sm:$0xff] }
  0x2f   : > { %10652 = vst [vmem:[#allocation25_spill] sm:$0xff] %v4392_v41  ;;  %v4415_v36 = vld [vmem:[%s4020_s18 + $0x248] sm:$0xff]  ;;  %v4418_v31 = vld [vmem:[%s4020_s18 + $0x250] sm:$0xff]  ;;  %v4421_v27 = vld [vmem:[%s4020_s18 + $0x258] sm:$0xff] }
  0x30   : > { %v4424_v23 = vld [vmem:[%s4020_s18 + $0x260] sm:$0xff]  ;;  %10655 = vst [vmem:[#allocation28_spill] sm:$0xff] %v4438_v15  ;;  %v4441_v16 = vld [vmem:[%s4020_s18 + $0x268] sm:$0xff]  ;;  %v4444_v13 = vld [vmem:[%s4020_s18 + $0x270] sm:$0xff]  ;;  %v4470_v15 = vsel %vm10658_vm0, 0.0, %v4070_v19  ;;  %v4502_v19 = vsel %vm10661_vm1, 0.0, %v4076_v21  ;;  %vm567_vm1 = vcmp.ne.f32.partialorder %v4360_v9, %v4360_v9  ;;  %vm10668_vm0 = vcmp.ne.f32.partialorder %v4097_v26, %v4097_v26 }
  0x31   : > { %v4447_v14 = vld [vmem:[%s4020_s18 + $0x278] sm:$0xff]  ;;  %v4450_v0 = vld [vmem:[%s4020_s18 + $0x280] sm:$0xff]  ;;  %10657 = vst [vmem:[#allocation29_spill] sm:$0xff] %v4464_v17  ;;  %10659 = vst [vmem:[#allocation30_spill] sm:$0xff] %v4470_v15  ;;  %v4508_v15 = vsel %vm10663_vm15, 0.0, %v4079_v22  ;;  %v4534_v21 = vsel %vm524_vm4, 0.0, %v4091_v24  ;;  %vm10671_vm4 = vcmp.ne.f32.partialorder %v4112_v29, %v4112_v29  ;;  %vm10673_vm15 = vcmp.ne.f32.partialorder %v4115_v30, %v4115_v30 }
  0x32   : > { %v4473_v5 = vld [vmem:[%s4020_s18 + $0x288] sm:$0xff]  ;;  %v4476_v6 = vld [vmem:[%s4020_s18 + $0x290] sm:$0xff]  ;;  %v4479_v4 = vld [vmem:[%s4020_s18 + $0x298] sm:$0xff]  ;;  %10660 = vst [vmem:[#allocation31_spill] sm:$0xff] %v4496_v18  ;;  %v4540_v22 = vsel %vm10666_vm2, 0.0, %v4094_v25  ;;  %v4572_v25 = vsel %vm527_vm3, 0.0, %v4109_v28  ;;  %vm574_vm3 = vcmp.ne.f32.partialorder %v4415_v36, %v4415_v36  ;;  %vm10676_vm2 = vcmp.ne.f32.partialorder %v4130_v33, %v4130_v33 }
  0x33   : > { %v4482_v7 = vld [vmem:[%s4020_s18 + $0x2a0] sm:$0xff]  ;;  %10662 = vst [vmem:[#allocation32_spill] sm:$0xff] %v4502_v19  ;;  %10664 = vst [vmem:[#allocation33_spill] sm:$0xff] %v4508_v15  ;;  %v4511_v17 = vld [vmem:[%s4020_s18 + $0x2a8] sm:$0xff]  ;;  %v4546_v15 = vsel %vm10668_vm0, 0.0, %v4097_v26  ;;  %v4578_v26 = vsel %vm10671_vm4, 0.0, %v4112_v29  ;;  %vm10678_vm0 = vcmp.ne.f32.partialorder %v4133_v34, %v4133_v34  ;;  %vm10683_vm4 = vcmp.ne.f32.partialorder %v4151_v38, %v4151_v38 }
  0x34   : > { %v4514_v57 = vld [vmem:[%s4020_s18 + $0x2b0] sm:$0xff]  ;;  %v4517_v20 = vld [vmem:[%s4020_s18 + $0x2b8] sm:$0xff]  ;;  %v4520_v18 = vld [vmem:[%s4020_s18 + $0x2c0] sm:$0xff]  ;;  %10665 = vst [vmem:[#allocation34_spill] sm:$0xff] %v4534_v21  ;;  %v4610_v29 = vsel %vm530_vm7, 0.0, %v4127_v32  ;;  %vm578_vm7 = vcmp.ne.f32.partialorder %v4441_v16, %v4441_v16 }
  0x35   : > { %10667 = vst [vmem:[#allocation35_spill] sm:$0xff] %v4540_v22  ;;  %10669 = vst [vmem:[#allocation36_spill] sm:$0xff] %v4546_v15  ;;  %v4549_v19 = vld [vmem:[%s4020_s18 + $0x2c8] sm:$0xff]  ;;  %v4552_v56 = vld [vmem:[%s4020_s18 + $0x2d0] sm:$0xff]  ;;  %v4584_v15 = vsel %vm10673_vm15, 0.0, %v4115_v30  ;;  %v4616_v30 = vsel %vm10676_vm2, 0.0, %v4130_v33  ;;  %vm10680_vm15 = vcmp.ne.f32.partialorder %v4136_v35, %v4136_v35  ;;  %vm579_vm2 = vcmp.ne.f32.partialorder %v4444_v13, %v4444_v13 }
  0x36   : > { %v4555_v24 = vld [vmem:[%s4020_s18 + $0x2d8] sm:$0xff]  ;;  %v4558_v21 = vld [vmem:[%s4020_s18 + $0x2e0] sm:$0xff]  ;;  %10670 = vst [vmem:[#allocation37_spill] sm:$0xff] %v4572_v25  ;;  %10672 = vst [vmem:[#allocation38_spill] sm:$0xff] %v4578_v26  ;;  %v4628_v32 = vsel %vm10680_vm15, 0.0, %v4136_v35  ;;  %v4660_v35 = vsel %vm10683_vm4, 0.0, %v4151_v38  ;;  %vm10687_vm15 = vcmp.ne.f32.partialorder %v4157_v40, %v4157_v40  ;;  %vm10701_vm4 = vcmp.ne.f32.partialorder %v4202_v50, %v4202_v50 }
  0x37   : > { %10674 = vst [vmem:[#allocation39_spill] sm:$0xff] %v4584_v15  ;;  %v4587_v22 = vld [vmem:[%s4020_s18 + $0x2e8] sm:$0xff]  ;;  %v4590_v41 = vld [vmem:[%s4020_s18 + $0x2f0] sm:$0xff]  ;;  %v4593_v28 = vld [vmem:[%s4020_s18 + $0x2f8] sm:$0xff]  ;;  %v4622_v15 = vsel %vm10678_vm0, 0.0, %v4133_v34  ;;  %v4654_v34 = vsel %vm534_vm8, 0.0, %v4148_v37  ;;  %vm10685_vm0 = vcmp.ne.f32.partialorder %v4154_v39, %v4154_v39  ;;  %vm582_vm8 = vcmp.ne.f32.partialorder %v4473_v5, %v4473_v5 }
  0x38   : > { %v4596_v25 = vld [vmem:[%s4020_s18 + $0x300] sm:$0xff]  ;;  %10675 = vst [vmem:[#allocation40_spill] sm:$0xff] %v4610_v29  ;;  %10677 = vst [vmem:[#allocation41_spill] sm:$0xff] %v4616_v30  ;;  %v4631_v29 = vld [vmem:[%s4020_s18 + $0x308] sm:$0xff]  ;;  %v4672_v37 = vsel %vm10687_vm15, 0.0, %v4157_v40  ;;  %v4704_v40 = vsel %vm539_vm6, 0.0, %v4172_v43  ;;  %vm10694_vm15 = vcmp.ne.f32.partialorder %v4178_v45, %v4178_v45  ;;  %vm586_vm6 = vcmp.ne.f32.partialorder %v4511_v17, %v4511_v17 }
  0x39   : > { %10679 = vst [vmem:[#allocation42_spill] sm:$0xff] %v4622_v15  ;;  %10681 = vst [vmem:[#allocation43_spill] sm:$0xff] %v4628_v32  ;;  %v4634_v26 = vld [vmem:[%s4020_s18 + $0x310] sm:$0xff]  ;;  %v4637_v33 = vld [vmem:[%s4020_s18 + $0x318] sm:$0xff]  ;;  %v4666_v32 = vsel %vm10685_vm0, 0.0, %v4154_v39  ;;  %v4698_v39 = vsel %vm538_vm9, 0.0, %v4169_v42  ;;  %vm10692_vm0 = vcmp.ne.f32.partialorder %v4175_v44, %v4175_v44  ;;  %vm10704_vm9 = vcmp.ne.f32.partialorder %v4220_v53, %v4220_v53 }
  0x3a   : > { %v4640_v30 = vld [vmem:[%s4020_s18 + $0x320] sm:$0xff]  ;;  %10682 = vst [vmem:[#allocation44_spill] sm:$0xff] %v4654_v34  ;;  %10684 = vst [vmem:[#allocation45_spill] sm:$0xff] %v4660_v35  ;;  %v4675_v34 = vld [vmem:[%s4020_s18 + $0x328] sm:$0xff]  ;;  %v4716_v42 = vsel %vm10694_vm15, 0.0, %v4178_v45  ;;  %vm10697_vm15 = vcmp.ne.f32.partialorder %v4196_v48, %v4196_v48 }
  0x3b   : > { %10686 = vst [vmem:[#allocation46_spill] sm:$0xff] %v4666_v32  ;;  %10688 = vst [vmem:[#allocation47_spill] sm:$0xff] %v4672_v37  ;;  %v4678_v15 = vld [vmem:[%s4020_s18 + $0x330] sm:$0xff]  ;;  %v4681_v38 = vld [vmem:[%s4020_s18 + $0x338] sm:$0xff]  ;;  %v4710_v37 = vsel %vm10692_vm0, 0.0, %v4175_v44  ;;  %v4739_v44 = vsel %vm542_vm11, 0.0, %v4193_v47  ;;  %vm10699_vm0 = vcmp.ne.f32.partialorder %v4199_v49, %v4199_v49  ;;  %vm590_vm11 = vcmp.ne.f32.partialorder %v4549_v19, %v4549_v19 }
  0x3c   : > { %v4684_v35 = vld [vmem:[%s4020_s18 + $0x340] sm:$0xff]  ;;  %10690 = vst [vmem:[#allocation49_spill] sm:$0xff] %v4698_v39  ;;  %10691 = vst [vmem:[#allocation50_spill] sm:$0xff] %v4704_v40  ;;  %v4719_v39 = vld [vmem:[%s4020_s18 + $0x348] sm:$0xff]  ;;  %v4745_v45 = vsel %vm10697_vm15, 0.0, %v4196_v48  ;;  %v4757_v47 = vsel %vm10701_vm4, 0.0, %v4202_v50  ;;  %vm10706_vm15 = vcmp.ne.f32.partialorder %v4223_v54, %v4223_v54  ;;  %vm10708_vm4 = vcmp.ne.f32.partialorder %v4226_v55, %v4226_v55 }
  0x3d   : > { %10689 = vst [vmem:[#allocation48_spill] sm:$0xff] %v4684_v35  ;;  %10693 = vst [vmem:[#allocation51_spill] sm:$0xff] %v4710_v37  ;;  %v4722_v32 = vld [vmem:[%s4020_s18 + $0x350] sm:$0xff]  ;;  %v4725_v43 = vld [vmem:[%s4020_s18 + $0x358] sm:$0xff]  ;;  %v4789_v50 = vsel %vm10704_vm9, 0.0, %v4220_v53  ;;  %vm10716_vm9 = vcmp.ne.f32.partialorder %v4273_v63, %v4273_v63 }
  0x3e   : > { %10695 = vst [vmem:[#allocation52_spill] sm:$0xff] %v4716_v42  ;;  %10696 = vst [vmem:[#allocation53_spill] sm:$0xff] %v4739_v44  ;;  %v4751_v42 = vsel %vm10699_vm0, 0.0, %v4199_v49  ;;  %v4760_v44 = vld [vmem:[%s4020_s18 + $0x360] sm:$0xff]  ;;  %v4763_v37 = vld [vmem:[%s4020_s18 + $0x368] sm:$0xff]  ;;  %vm591_vm0 = vcmp.ne.f32.partialorder %v4552_v56, %v4552_v56  ;;  %v4783_v49 = vsel %vm546_vm12, 0.0, %v4217_v52  ;;  %vm594_vm12 = vcmp.ne.f32.partialorder %v4587_v22, %v4587_v22 }
  0x3f   : > { %10698 = vst [vmem:[#allocation54_spill] sm:$0xff] %v4745_v45  ;;  %10700 = vst [vmem:[#allocation55_spill] sm:$0xff] %v4751_v42  ;;  %v4766_v48 = vld [vmem:[%s4020_s18 + $0x370] sm:$0xff]  ;;  %v4769_v45 = vld [vmem:[%s4020_s18 + $0x378] sm:$0xff]  ;;  %v4801_v52 = vsel %vm10708_vm4, 0.0, %v4226_v55  ;;  %v4833_v55 = vsel %vm551_vm5, 0.0, %v4250_v59  ;;  %vm10714_vm4 = vcmp.ne.f32.partialorder %v4256_v61, %v4256_v61 }
  0x40   : > { %10702 = vst [vmem:[#allocation56_spill] sm:$0xff] %v4757_v47  ;;  %10703 = vst [vmem:[#allocation57_spill] sm:$0xff] %v4783_v49  ;;  %v4795_v47 = vsel %vm10706_vm15, 0.0, %v4223_v54  ;;  %v4804_v49 = vld [vmem:[%s4020_s18 + $0x380] sm:$0xff]  ;;  %v4807_v42 = vld [vmem:[%s4020_s18 + $0x388] sm:$0xff]  ;;  %v4827_v54 = vsel %vm550_vm13, 0.0, %v4247_v58  ;;  %vm10712_vm15 = vcmp.ne.f32.partialorder %v4253_v60, %v4253_v60 }
  0x41   : > { %10705 = vst [vmem:[#allocation58_spill] sm:$0xff] %v4789_v50  ;;  %10707 = vst [vmem:[#allocation59_spill] sm:$0xff] %v4795_v47  ;;  %v4810_v53 = vld [vmem:[%s4020_s18 + $0x390] sm:$0xff]  ;;  %v4813_v50 = vld [vmem:[%s4020_s18 + $0x398] sm:$0xff]  ;;  %v4845_v47 = vsel %vm10714_vm4, 0.0, %v4256_v61  ;;  %v4868_v59 = vsel %vm10716_vm9, 0.0, %v4273_v63  ;;  %vm10723_vm4 = vcmp.ne.f32.partialorder %v4282_v2, %v4282_v2  ;;  %vm602_vm9 = vcmp.ne.f32.partialorder %v4675_v34, %v4675_v34 }
  0x42   : > { %10709 = vst [vmem:[#allocation60_spill] sm:$0xff] %v4801_v52  ;;  %10710 = vst [vmem:[#allocation61_spill] sm:$0xff] %v4827_v54  ;;  %v4839_v52 = vsel %vm10712_vm15, 0.0, %v4253_v60  ;;  %v4848_v58 = vld [vmem:[%s4020_s18 + $0x3a0] sm:$0xff]  ;;  %v4851_v54 = vld [vmem:[%s4020_s18 + $0x3a8] sm:$0xff]  ;;  %vm10721_vm15 = vcmp.ne.f32.partialorder %v4279_v1, %v4279_v1 }
  0x43   : > { %10711 = vst [vmem:[#allocation62_spill] sm:$0xff] %v4833_v55  ;;  %10713 = vst [vmem:[#allocation63_spill] sm:$0xff] %v4839_v52  ;;  %v4854_v40 = vld [vmem:[%s4020_s18 + $0x3b0] sm:$0xff]  ;;  %v4886_v52 = vsel %vm10723_vm4, 0.0, %v4282_v2  ;;  %v4889_v63 = vld [vmem:[%s4020_s18 + $0x3b8] sm:$0xff] }
  0x44   : > { %10715 = vst [vmem:[#allocation64_spill] sm:$0xff] %v4845_v47  ;;  %10717 = vst [vmem:[#allocation65_spill] sm:$0xff] %v4868_v59  ;;  %v10718_v60 = vld [vmem:[#allocation13_spill] sm:$0xff]  ;;  %v4880_v47 = vsel %vm10721_vm15, 0.0, %v4279_v1  ;;  %v4892_v59 = vld [vmem:[%s4020_s18 + $0x3c0] sm:$0xff] }
  0x45   : > { %vm10719_vm5 = vcmp.ne.f32.partialorder %v10718_v60, %v10718_v60  ;;  %10722 = vst [vmem:[#allocation66_spill] sm:$0xff] %v4880_v47  ;;  %10724 = vst [vmem:[#allocation67_spill] sm:$0xff] %v4886_v52  ;;  %v10725_v1 = vld [vmem:[#allocation15_spill] sm:$0xff]  ;;  %v10730_v47 = vld [vmem:[#allocation17_spill] sm:$0xff] }
  0x46   : > { %v4874_v61 = vsel %vm10719_vm5, 0.0, %v10718_v60  ;;  %vm10726_vm4 = vcmp.ne.f32.partialorder %v10725_v1, %v10725_v1  ;;  %v10728_v60 = vld [vmem:[#allocation16_spill] sm:$0xff]  ;;  %vm10731_vm15 = vcmp.ne.f32.partialorder %v10730_v47, %v10730_v47  ;;  %v10733_v55 = vld [vmem:[#allocation18_spill] sm:$0xff]  ;;  %vm10736_vm5 = vcmp.ne.f32.partialorder %v4331_v10, %v4331_v10 }
  0x47   : > { %10720 = vst [vmem:[#allocation13_spill] sm:$0xff] %v4874_v61  ;;  %v4906_v2 = vsel %vm10726_vm4, 0.0, %v10725_v1  ;;  %v4912_v52 = vsel %vm559_vm14, 0.0, %v10728_v60  ;;  %v4918_v61 = vsel %vm10731_vm15, 0.0, %v10730_v47  ;;  %vm10734_vm13 = vcmp.ne.f32.partialorder %v10733_v55, %v10733_v55  ;;  %v4927_v1 = vld [vmem:[%s4020_s18 + $0x3c8] sm:$0xff] }
  0x48   : > { %10727 = vst [vmem:[#allocation15_spill] sm:$0xff] %v4906_v2  ;;  %10729 = vst [vmem:[#allocation16_spill] sm:$0xff] %v4912_v52  ;;  %v4924_v35 = vsel %vm10734_vm13, 0.0, %v10733_v55  ;;  %v4930_v2 = vld [vmem:[%s4020_s18 + $0x3d0] sm:$0xff]  ;;  %vm606_vm14 = vcmp.ne.f32.partialorder %v4719_v39, %v4719_v39  ;;  %v4942_v47 = vsel %vm10736_vm5, 0.0, %v4331_v10  ;;  %v4948_v55 = vsel %vm563_vm10, 0.0, %v4334_v3 }
  0x49   : > { %10732 = vst [vmem:[#allocation17_spill] sm:$0xff] %v4918_v61  ;;  %10735 = vst [vmem:[#allocation18_spill] sm:$0xff] %v4924_v35  ;;  %vm10739_vm13 = vcmp.ne.f32.partialorder %v4337_v62, %v4337_v62  ;;  %v10741_v35 = vld [vmem:[#allocation21_spill] sm:$0xff]  ;;  %v4963_v10 = vld [vmem:[%s4020_s18 + $0x3d8] sm:$0xff]  ;;  %v4986_v3 = vsel %vm567_vm1, 0.0, %v4360_v9  ;;  %vm10747_vm5 = vcmp.ne.f32.partialorder %v4363_v8, %v4363_v8  ;;  %vm10754_vm10 = vcmp.ne.f32.partialorder %v4386_v51, %v4386_v51 }
  0x4a   : > { %10737 = vst [vmem:[#allocation68_spill] sm:$0xff] %v4942_v47  ;;  %10738 = vst [vmem:[#allocation69_spill] sm:$0xff] %v4948_v55  ;;  %v4954_v60 = vsel %vm10739_vm13, 0.0, %v4337_v62  ;;  %vm10742_vm15 = vcmp.ne.f32.partialorder %v10741_v35, %v10741_v35  ;;  %v4966_v47 = vld [vmem:[%s4020_s18 + $0x3e0] sm:$0xff]  ;;  %v5024_v9 = vsel %vm10754_vm10, 0.0, %v4386_v51  ;;  %vm10766_vm1 = vcmp.ne.f32.partialorder %v4424_v23, %v4424_v23 }
  0x4b   : > { %10740 = vst [vmem:[#allocation70_spill] sm:$0xff] %v4954_v60  ;;  %v4960_v61 = vsel %vm10742_vm15, 0.0, %v10741_v35  ;;  %vm10744_vm15 = vcmp.ne.f32.partialorder %v4357_v12, %v4357_v12  ;;  %10746 = vst [vmem:[#allocation72_spill] sm:$0xff] %v4986_v3  ;;  %v4992_v35 = vsel %vm10747_vm5, 0.0, %v4363_v8  ;;  %vm618_vm5 = vcmp.ne.f32.partialorder %v4851_v54, %v4851_v54 }
  0x4c   : > { %10743 = vst [vmem:[#allocation21_spill] sm:$0xff] %v4960_v61  ;;  %v4980_v62 = vsel %vm10744_vm15, 0.0, %v4357_v12  ;;  %10748 = vst [vmem:[#allocation73_spill] sm:$0xff] %v4992_v35  ;;  %v10749_v61 = vld [vmem:[#allocation23_spill] sm:$0xff]  ;;  %v5001_v12 = vld [vmem:[%s4020_s18 + $0x3e8] sm:$0xff]  ;;  %vm10756_vm15 = vcmp.ne.f32.partialorder %v4389_v46, %v4389_v46  ;;  %vm10779_vm10 = vcmp.ne.f32.partialorder %v4482_v7, %v4482_v7 }
  0x4d   : > { %10745 = vst [vmem:[#allocation71_spill] sm:$0xff] %v4980_v62  ;;  %vm10750_vm4 = vcmp.ne.f32.partialorder %v10749_v61, %v10749_v61  ;;  %v5004_v62 = vld [vmem:[%s4020_s18 + $0x3f0] sm:$0xff]  ;;  %10755 = vst [vmem:[#allocation75_spill] sm:$0xff] %v5024_v9 }
  0x4e   : > { %v4998_v60 = vsel %vm10750_vm4, 0.0, %v10749_v61  ;;  %vm10752_vm4 = vcmp.ne.f32.partialorder %v4383_v11, %v4383_v11  ;;  %v5030_v61 = vsel %vm10756_vm15, 0.0, %v4389_v46  ;;  %v5050_v46 = vsel %vm574_vm3, 0.0, %v4415_v36 }
  0x4f   : > { %10751 = vst [vmem:[#allocation23_spill] sm:$0xff] %v4998_v60  ;;  %v5018_v8 = vsel %vm10752_vm4, 0.0, %v4383_v11  ;;  %10757 = vst [vmem:[#allocation76_spill] sm:$0xff] %v5030_v61  ;;  %v10758_v60 = vld [vmem:[#allocation25_spill] sm:$0xff]  ;;  %vm617_vm4 = vcmp.ne.f32.partialorder %v4848_v58, %v4848_v58  ;;  %vm10764_vm15 = vcmp.ne.f32.partialorder %v4421_v27, %v4421_v27  ;;  %vm621_vm3 = vcmp.ne.f32.partialorder %v4892_v59, %v4892_v59 }
  0x50   : > { %10753 = vst [vmem:[#allocation74_spill] sm:$0xff] %v5018_v8  ;;  %vm10759_vm13 = vcmp.ne.f32.partialorder %v10758_v60, %v10758_v60  ;;  %10761 = vst [vmem:[#allocation77_spill] sm:$0xff] %v5050_v46  ;;  %v5062_v11 = vsel %vm10764_vm15, 0.0, %v4421_v27  ;;  %v5080_v27 = vsel %vm578_vm7, 0.0, %v4441_v16  ;;  %vm10772_vm15 = vcmp.ne.f32.partialorder %v4450_v0, %v4450_v0 }
  0x51   : > { %v5036_v35 = vsel %vm10759_vm13, 0.0, %v10758_v60  ;;  %vm10762_vm13 = vcmp.ne.f32.partialorder %v4418_v31, %v4418_v31  ;;  %10765 = vst [vmem:[#allocation79_spill] sm:$0xff] %v5062_v11  ;;  %v5068_v60 = vsel %vm10766_vm1, 0.0, %v4424_v23  ;;  %10768 = vst [vmem:[#allocation81_spill] sm:$0xff] %v5080_v27  ;;  %v5086_v23 = vsel %vm579_vm2, 0.0, %v4444_v13 }
  0x52   : > { %10760 = vst [vmem:[#allocation25_spill] sm:$0xff] %v5036_v35  ;;  %v5056_v51 = vsel %vm10762_vm13, 0.0, %v4418_v31  ;;  %10767 = vst [vmem:[#allocation80_spill] sm:$0xff] %v5068_v60  ;;  %vm10770_vm1 = vcmp.ne.f32.partialorder %v4447_v14, %v4447_v14  ;;  %v5098_v36 = vsel %vm10772_vm15, 0.0, %v4450_v0  ;;  %vm624_vm7 = vcmp.ne.f32.partialorder %v4963_v10, %v4963_v10 }
  0x53   : > { %10763 = vst [vmem:[#allocation78_spill] sm:$0xff] %v5056_v51  ;;  %10769 = vst [vmem:[#allocation82_spill] sm:$0xff] %v5086_v23  ;;  %v5092_v31 = vsel %vm10770_vm1, 0.0, %v4447_v14  ;;  %vm625_vm13 = vcmp.ne.f32.partialorder %v4966_v47, %v4966_v47  ;;  %vm626_vm2 = vcmp.ne.f32.partialorder %v5001_v12, %v5001_v12  ;;  %v5112_v13 = vsel %vm582_vm8, 0.0, %v4473_v5 }
  0x54   : > { %10771 = vst [vmem:[#allocation83_spill] sm:$0xff] %v5092_v31  ;;  %10773 = vst [vmem:[#allocation84_spill] sm:$0xff] %v5098_v36  ;;  %vm10775_vm1 = vcmp.ne.f32.partialorder %v4476_v6, %v4476_v6  ;;  %vm10777_vm15 = vcmp.ne.f32.partialorder %v4479_v4, %v4479_v4  ;;  %v5130_v16 = vsel %vm10779_vm10, 0.0, %v4482_v7  ;;  %v5136_v5 = vsel %vm586_vm6, 0.0, %v4511_v17 }
  0x55   : > { %10774 = vst [vmem:[#allocation85_spill] sm:$0xff] %v5112_v13  ;;  %v5118_v0 = vsel %vm10775_vm1, 0.0, %v4476_v6  ;;  %v5124_v14 = vsel %vm10777_vm15, 0.0, %v4479_v4  ;;  %10780 = vst [vmem:[#allocation88_spill] sm:$0xff] %v5130_v16  ;;  %vm10782_vm8 = vcmp.ne.f32.partialorder %v4514_v57, %v4514_v57  ;;  %vm10784_vm1 = vcmp.ne.f32.partialorder %v4517_v20, %v4517_v20 }
  0x56   : > { %10776 = vst [vmem:[#allocation86_spill] sm:$0xff] %v5118_v0  ;;  %10778 = vst [vmem:[#allocation87_spill] sm:$0xff] %v5124_v14  ;;  %v5142_v6 = vsel %vm10782_vm8, 0.0, %v4514_v57  ;;  %v5148_v4 = vsel %vm10784_vm1, 0.0, %v4517_v20  ;;  %vm10786_vm10 = vcmp.ne.f32.partialorder %v4520_v18, %v4520_v18  ;;  %v5160_v17 = vsel %vm590_vm11, 0.0, %v4549_v19 }
  0x57   : > { %10781 = vst [vmem:[#allocation89_spill] sm:$0xff] %v5136_v5  ;;  %10783 = vst [vmem:[#allocation90_spill] sm:$0xff] %v5142_v6  ;;  %v5154_v7 = vsel %vm10786_vm10, 0.0, %v4520_v18  ;;  %v5166_v57 = vsel %vm591_vm0, 0.0, %v4552_v56  ;;  %vm10790_vm6 = vcmp.ne.f32.partialorder %v4555_v24, %v4555_v24  ;;  %vm10792_vm15 = vcmp.ne.f32.partialorder %v4558_v21, %v4558_v21 }
  0x58   : > { %10785 = vst [vmem:[#allocation91_spill] sm:$0xff] %v5148_v4  ;;  %10787 = vst [vmem:[#allocation92_spill] sm:$0xff] %v5154_v7  ;;  %v5172_v20 = vsel %vm10790_vm6, 0.0, %v4555_v24  ;;  %v5178_v18 = vsel %vm10792_vm15, 0.0, %v4558_v21  ;;  %v5184_v19 = vsel %vm594_vm12, 0.0, %v4587_v22  ;;  %vm10795_vm11 = vcmp.ne.f32.partialorder %v4590_v41, %v4590_v41 }
  0x59   : > { %10788 = vst [vmem:[#allocation93_spill] sm:$0xff] %v5160_v17  ;;  %10789 = vst [vmem:[#allocation94_spill] sm:$0xff] %v5166_v57  ;;  %v5190_v56 = vsel %vm10795_vm11, 0.0, %v4590_v41  ;;  %vm10797_vm0 = vcmp.ne.f32.partialorder %v4593_v28, %v4593_v28  ;;  %vm10799_vm8 = vcmp.ne.f32.partialorder %v4596_v25, %v4596_v25  ;;  %vm10801_vm12 = vcmp.ne.f32.partialorder %v4631_v29, %v4631_v29 }
  0x5a   : > { %10791 = vst [vmem:[#allocation95_spill] sm:$0xff] %v5172_v20  ;;  %10793 = vst [vmem:[#allocation96_spill] sm:$0xff] %v5178_v18  ;;  %v5196_v24 = vsel %vm10797_vm0, 0.0, %v4593_v28  ;;  %v5202_v21 = vsel %vm10799_vm8, 0.0, %v4596_v25  ;;  %v5208_v22 = vsel %vm10801_vm12, 0.0, %v4631_v29  ;;  %vm10803_vm1 = vcmp.ne.f32.partialorder %v4634_v26, %v4634_v26 }
  0x5b   : > { %10794 = vst [vmem:[#allocation97_spill] sm:$0xff] %v5184_v19  ;;  %10796 = vst [vmem:[#allocation98_spill] sm:$0xff] %v5190_v56  ;;  %v5214_v41 = vsel %vm10803_vm1, 0.0, %v4634_v26  ;;  %vm10805_vm10 = vcmp.ne.f32.partialorder %v4637_v33, %v4637_v33  ;;  %vm10807_vm6 = vcmp.ne.f32.partialorder %v4640_v30, %v4640_v30  ;;  %v5232_v29 = vsel %vm602_vm9, 0.0, %v4675_v34 }
  0x5c   : > { %10798 = vst [vmem:[#allocation99_spill] sm:$0xff] %v5196_v24  ;;  %10800 = vst [vmem:[#allocation100_spill] sm:$0xff] %v5202_v21  ;;  %v5220_v28 = vsel %vm10805_vm10, 0.0, %v4637_v33  ;;  %v5226_v25 = vsel %vm10807_vm6, 0.0, %v4640_v30  ;;  %vm10810_vm15 = vcmp.ne.f32.partialorder %v4678_v15, %v4678_v15  ;;  %vm10812_vm11 = vcmp.ne.f32.partialorder %v4681_v38, %v4681_v38  ;;  %v10814_v30 = vld [vmem:[#allocation48_spill] sm:$0xff] }
  0x5d   : > { %10802 = vst [vmem:[#allocation101_spill] sm:$0xff] %v5208_v22  ;;  %10804 = vst [vmem:[#allocation102_spill] sm:$0xff] %v5214_v41  ;;  %v5238_v26 = vsel %vm10810_vm15, 0.0, %v4678_v15  ;;  %v5244_v33 = vsel %vm10812_vm11, 0.0, %v4681_v38  ;;  %vm10815_vm0 = vcmp.ne.f32.partialorder %v10814_v30, %v10814_v30  ;;  %v5256_v34 = vsel %vm606_vm14, 0.0, %v4719_v39 }
  0x5e   : > { %10806 = vst [vmem:[#allocation103_spill] sm:$0xff] %v5220_v28  ;;  %10808 = vst [vmem:[#allocation104_spill] sm:$0xff] %v5226_v25  ;;  %v5250_v25 = vsel %vm10815_vm0, 0.0, %v10814_v30  ;;  %vm10818_vm9 = vcmp.ne.f32.partialorder %v4722_v32, %v4722_v32  ;;  %vm10820_vm8 = vcmp.ne.f32.partialorder %v4725_v43, %v4725_v43  ;;  %v2807_v30 = vlaneseq }
  0x5f   : > { %10809 = vst [vmem:[#allocation105_spill] sm:$0xff] %v5232_v29  ;;  %10811 = vst [vmem:[#allocation106_spill] sm:$0xff] %v5238_v26  ;;  %v5262_v15 = vsel %vm10818_vm9, 0.0, %v4722_v32  ;;  %v5268_v38 = vsel %vm10820_vm8, 0.0, %v4725_v43  ;;  %vm10822_vm12 = vcmp.ne.f32.partialorder %v4760_v44, %v4760_v44  ;;  %vm10824_vm14 = vcmp.ne.f32.partialorder %v4763_v37, %v4763_v37 }
  0x60   : > { %10813 = vst [vmem:[#allocation107_spill] sm:$0xff] %v5244_v33  ;;  %10816 = vst [vmem:[#allocation48_spill] sm:$0xff] %v5250_v25  ;;  %v5275_v39 = vsel %vm10822_vm12, 0.0, %v4760_v44  ;;  %v5281_v32 = vsel %vm10824_vm14, 0.0, %v4763_v37  ;;  %vm10826_vm1 = vcmp.ne.f32.partialorder %v4766_v48, %v4766_v48  ;;  %vm10828_vm10 = vcmp.ne.f32.partialorder %v4769_v45, %v4769_v45 }
  0x61   : > { %10817 = vst [vmem:[#allocation108_spill] sm:$0xff] %v5256_v34  ;;  %10819 = vst [vmem:[#allocation109_spill] sm:$0xff] %v5262_v15  ;;  %v5287_v43 = vsel %vm10826_vm1, 0.0, %v4766_v48  ;;  %vm10830_vm6 = vcmp.ne.f32.partialorder %v4804_v49, %v4804_v49  ;;  %vm10832_vm15 = vcmp.ne.f32.partialorder %v4807_v42, %v4807_v42  ;;  %vm10834_vm11 = vcmp.ne.f32.partialorder %v4810_v53, %v4810_v53 }
  0x62   : > { %10821 = vst [vmem:[#allocation110_spill] sm:$0xff] %v5268_v38  ;;  %10823 = vst [vmem:[#allocation111_spill] sm:$0xff] %v5275_v39  ;;  %v5293_v38 = vsel %vm10828_vm10, 0.0, %v4769_v45  ;;  %v5299_v44 = vsel %vm10830_vm6, 0.0, %v4804_v49  ;;  %v5305_v37 = vsel %vm10832_vm15, 0.0, %v4807_v42  ;;  %v5311_v48 = vsel %vm10834_vm11, 0.0, %v4810_v53 }
  0x63   : > { %10825 = vst [vmem:[#allocation112_spill] sm:$0xff] %v5281_v32  ;;  %10827 = vst [vmem:[#allocation113_spill] sm:$0xff] %v5287_v43  ;;  %vm10836_vm0 = vcmp.ne.f32.partialorder %v4813_v50, %v4813_v50  ;;  %v5323_v49 = vsel %vm617_vm4, 0.0, %v4848_v58  ;;  %v5329_v42 = vsel %vm618_vm5, 0.0, %v4851_v54  ;;  %vm10840_vm9 = vcmp.ne.f32.partialorder %v4854_v40, %v4854_v40 }
  0x64   : > { %10829 = vst [vmem:[#allocation114_spill] sm:$0xff] %v5293_v38  ;;  %10831 = vst [vmem:[#allocation115_spill] sm:$0xff] %v5299_v44  ;;  %v5317_v45 = vsel %vm10836_vm0, 0.0, %v4813_v50  ;;  %v5335_v53 = vsel %vm10840_vm9, 0.0, %v4854_v40  ;;  %vm10842_vm8 = vcmp.ne.f32.partialorder %v4889_v63, %v4889_v63  ;;  %v5347_v58 = vsel %vm621_vm3, 0.0, %v4892_v59 }
  0x65   : > { %10833 = vst [vmem:[#allocation116_spill] sm:$0xff] %v5305_v37  ;;  %10835 = vst [vmem:[#allocation117_spill] sm:$0xff] %v5311_v48  ;;  %v5341_v50 = vsel %vm10842_vm8, 0.0, %v4889_v63  ;;  %vm10845_vm5 = vcmp.ne.f32.partialorder %v4927_v1, %v4927_v1  ;;  %vm10847_vm4 = vcmp.ne.f32.partialorder %v4930_v2, %v4930_v2  ;;  %v5361_v63 = vshrl.u32 %v2807_v30, 7 }
  0x66   : > { %10837 = vst [vmem:[#allocation118_spill] sm:$0xff] %v5317_v45  ;;  %10838 = vst [vmem:[#allocation119_spill] sm:$0xff] %v5323_v49  ;;  %v5353_v54 = vsel %vm10845_vm5, 0.0, %v4927_v1  ;;  %v5359_v40 = vsel %vm10847_vm4, 0.0, %v4930_v2  ;;  %v5367_v59 = vsel %vm624_vm7, 0.0, %v4963_v10  ;;  %v5373_v1 = vsel %vm625_vm13, 0.0, %v4966_v47 }
  0x67   : > { %10839 = vst [vmem:[#allocation120_spill] sm:$0xff] %v5329_v42  ;;  %10841 = vst [vmem:[#allocation121_spill] sm:$0xff] %v5335_v53  ;;  %v5379_v2 = vsel %vm626_vm2, 0.0, %v5001_v12  ;;  %vm10853_vm3 = vcmp.ne.f32.partialorder %v5004_v62, %v5004_v62  ;;  %v5388_v10 = vadd.s32 264, %v5361_v63  ;;  %v5394_v47 = vadd.s32 280, %v5361_v63 }
  0x68   : > { %10843 = vst [vmem:[#allocation122_spill] sm:$0xff] %v5341_v50  ;;  %10844 = vst [vmem:[#allocation123_spill] sm:$0xff] %v5347_v58  ;;  %v5385_v30 = vsel %vm10853_vm3, 0.0, %v5004_v62  ;;  %v5399_v12 = vadd.s32 288, %v5361_v63  ;;  %v5405_v62 = vadd.s32 304, %v5361_v63  ;;  %v5417_v58 = vadd.s32 336, %v5361_v63 }
  0x69   : > { %10846 = vst [vmem:[#allocation124_spill] sm:$0xff] %v5353_v54  ;;  %10848 = vst [vmem:[#allocation125_spill] sm:$0xff] %v5359_v40  ;;  %v5411_v40 = vadd.s32 320, %v5361_v63  ;;  %v5414_v54 = vadd.s32 328, %v5361_v63  ;;  %v5420_v50 = vadd.s32 344, %v5361_v63  ;;  %v5423_v53 = vadd.s32 352, %v5361_v63 }
  0x6a   : > { %10849 = vst [vmem:[#allocation126_spill] sm:$0xff] %v5361_v63  ;;  %10850 = vst [vmem:[#allocation127_spill] sm:$0xff] %v5367_v59  ;;  %v5391_v59 = vadd.s32 272, %v5361_v63  ;;  %v5426_v42 = vadd.s32 360, %v5361_v63  ;;  %v5429_v49 = vadd.s32 368, %v5361_v63  ;;  %v5432_v45 = vadd.s32 376, %v5361_v63 }
  0x6b   : > { %10851 = vst [vmem:[#allocation128_spill] sm:$0xff] %v5373_v1  ;;  %10852 = vst [vmem:[#allocation129_spill] sm:$0xff] %v5379_v2  ;;  %v5396_v1 = vstv %s3064_s20  ;;  %v5402_v2 = vadd.s32 296, %v5361_v63  ;;  %v5435_v48 = vadd.s32 384, %v5361_v63  ;;  %v5438_v37 = vadd.s32 392, %v5361_v63 }
  0x6c   : > { %10854 = vst [vmem:[#allocation130_spill] sm:$0xff] %v5385_v30  ;;  %10855 = vst [vmem:[#allocation131_spill] sm:$0xff] %v5388_v10  ;;  %v5408_v30 = vadd.s32 312, %v5361_v63  ;;  %v5441_v44 = vadd.s32 400, %v5361_v63  ;;  %v5444_v38 = vadd.s32 408, %v5361_v63  ;;  %v5447_v43 = vadd.s32 416, %v5361_v63 }
  0x6d   : > { %10856 = vst [vmem:[#allocation132_spill] sm:$0xff] %v5391_v59  ;;  %10857 = vst [vmem:[#allocation133_spill] sm:$0xff] %v5394_v47  ;;  %v5450_v32 = vadd.s32 424, %v5361_v63  ;;  %v5453_v39 = vadd.s32 432, %v5361_v63  ;;  %v5456_v15 = vadd.s32 440, %v5361_v63  ;;  %v5459_v34 = vadd.s32 448, %v5361_v63 }
  0x6e   : > { %10858 = vst [vmem:[#allocation134_spill] sm:$0xff] %v5396_v1  ;;  %10859 = vst [vmem:[#allocation135_spill] sm:$0xff] %v5399_v12  ;;  %v5462_v25 = vadd.s32 456, %v5361_v63  ;;  %v5465_v33 = vadd.s32 464, %v5361_v63  ;;  %v5468_v26 = vadd.s32 472, %v5361_v63  ;;  %v5471_v29 = vadd.s32 480, %v5361_v63 }
  0x6f   : > { %10860 = vst [vmem:[#allocation136_spill] sm:$0xff] %v5402_v2  ;;  %10861 = vst [vmem:[#allocation137_spill] sm:$0xff] %v5405_v62  ;;  %v5474_v28 = vadd.s32 488, %v5361_v63  ;;  %v5477_v41 = vadd.s32 496, %v5361_v63  ;;  %v5480_v22 = vadd.s32 504, %v5361_v63  ;;  %v5483_v21 = vadd.s32 512, %v5361_v63 }
  0x70   : > { %10862 = vst [vmem:[#allocation138_spill] sm:$0xff] %v5408_v30  ;;  %10863 = vst [vmem:[#allocation139_spill] sm:$0xff] %v5411_v40  ;;  %v5486_v24 = vadd.s32 520, %v5361_v63  ;;  %v5489_v56 = vadd.s32 528, %v5361_v63  ;;  %v5492_v19 = vadd.s32 536, %v5361_v63  ;;  %v5495_v18 = vadd.s32 544, %v5361_v63 }
  0x71   : > { %10864 = vst [vmem:[#allocation140_spill] sm:$0xff] %v5414_v54  ;;  %10865 = vst [vmem:[#allocation141_spill] sm:$0xff] %v5417_v58  ;;  %v5498_v20 = vadd.s32 552, %v5361_v63  ;;  %v5501_v57 = vadd.s32 560, %v5361_v63  ;;  %v5504_v17 = vadd.s32 568, %v5361_v63  ;;  %v5507_v7 = vadd.s32 576, %v5361_v63 }
  0x72   : > { %10866 = vst [vmem:[#allocation142_spill] sm:$0xff] %v5420_v50  ;;  %10867 = vst [vmem:[#allocation143_spill] sm:$0xff] %v5423_v53  ;;  %v5510_v4 = vadd.s32 584, %v5361_v63  ;;  %v5513_v6 = vadd.s32 592, %v5361_v63  ;;  %v5516_v5 = vadd.s32 600, %v5361_v63  ;;  %v5519_v16 = vadd.s32 608, %v5361_v63 }
  0x73   : > { %10868 = vst [vmem:[#allocation144_spill] sm:$0xff] %v5426_v42  ;;  %10869 = vst [vmem:[#allocation145_spill] sm:$0xff] %v5429_v49  ;;  %v5522_v14 = vadd.s32 616, %v5361_v63  ;;  %v5525_v0 = vadd.s32 624, %v5361_v63  ;;  %v5528_v13 = vadd.s32 632, %v5361_v63  ;;  %v5531_v36 = vadd.s32 640, %v5361_v63 }
  0x74   : > { %10870 = vst [vmem:[#allocation146_spill] sm:$0xff] %v5432_v45  ;;  %10871 = vst [vmem:[#allocation147_spill] sm:$0xff] %v5435_v48  ;;  %v5534_v31 = vadd.s32 648, %v5361_v63  ;;  %v5537_v23 = vadd.s32 656, %v5361_v63  ;;  %v5540_v27 = vadd.s32 664, %v5361_v63  ;;  %v5543_v60 = vadd.s32 672, %v5361_v63 }
  0x75   : > { %10872 = vst [vmem:[#allocation148_spill] sm:$0xff] %v5438_v37  ;;  %10873 = vst [vmem:[#allocation149_spill] sm:$0xff] %v5441_v44  ;;  %v5546_v11 = vadd.s32 680, %v5361_v63  ;;  %v5549_v51 = vadd.s32 688, %v5361_v63  ;;  %v5552_v46 = vadd.s32 696, %v5361_v63  ;;  %v5555_v35 = vadd.s32 704, %v5361_v63 }
  0x76   : > { %10874 = vst [vmem:[#allocation150_spill] sm:$0xff] %v5444_v38  ;;  %10875 = vst [vmem:[#allocation151_spill] sm:$0xff] %v5447_v43  ;;  %v5558_v61 = vadd.s32 712, %v5361_v63  ;;  %v5561_v9 = vadd.s32 720, %v5361_v63  ;;  %v5564_v8 = vadd.s32 728, %v5361_v63  ;;  %v5567_v3 = vadd.s32 736, %v5361_v63 }
  0x77   : > { %10876 = vst [vmem:[#allocation152_spill] sm:$0xff] %v5450_v32  ;;  %10877 = vst [vmem:[#allocation153_spill] sm:$0xff] %v5453_v39  ;;  %v5570_v55 = vadd.s32 744, %v5361_v63  ;;  %v5573_v52 = vadd.s32 752, %v5361_v63  ;;  %v6540_v39 = vld [vmem:[%s4020_s18 + $0x4e0] sm:$0xff]  ;;  %v6543_v32 = vld [vmem:[%s4020_s18 + $0x4e8] sm:$0xff] }
  0x78   : > { %10878 = vst [vmem:[#allocation154_spill] sm:$0xff] %v5456_v15  ;;  %10879 = vst [vmem:[#allocation155_spill] sm:$0xff] %v5459_v34  ;;  %v6518_v34 = vld [vmem:[%s4020_s18 + $0x4d0] sm:$0xff]  ;;  %v6568_v44 = vld [vmem:[%s4020_s18 + $0x500] sm:$0xff] }
  0x79   : > { %10880 = vst [vmem:[#allocation156_spill] sm:$0xff] %v5462_v25  ;;  %10881 = vst [vmem:[#allocation157_spill] sm:$0xff] %v5465_v33  ;;  %v6512_v33 = vld [vmem:[%s4020_s18 + $0x4c0] sm:$0xff]  ;;  %v6515_v25 = vld [vmem:[%s4020_s18 + $0x4c8] sm:$0xff] }
  0x7a   : > { %10882 = vst [vmem:[#allocation158_spill] sm:$0xff] %v5468_v26  ;;  %10883 = vst [vmem:[#allocation159_spill] sm:$0xff] %v5471_v29  ;;  %v6490_v29 = vld [vmem:[%s4020_s18 + $0x4b0] sm:$0xff]  ;;  %v6549_v26 = vld [vmem:[%s4020_s18 + $0x4f8] sm:$0xff] }
  0x7b   : > { %10884 = vst [vmem:[#allocation160_spill] sm:$0xff] %v5474_v28  ;;  %10885 = vst [vmem:[#allocation161_spill] sm:$0xff] %v5477_v41  ;;  %v6484_v41 = vld [vmem:[%s4020_s18 + $0x4a0] sm:$0xff]  ;;  %v6487_v28 = vld [vmem:[%s4020_s18 + $0x4a8] sm:$0xff] }
  0x7c   : > { %10886 = vst [vmem:[#allocation162_spill] sm:$0xff] %v5480_v22  ;;  %10887 = vst [vmem:[#allocation163_spill] sm:$0xff] %v5483_v21  ;;  %v6468_v21 = vld [vmem:[%s4020_s18 + $0x490] sm:$0xff]  ;;  %v6471_v22 = vld [vmem:[%s4020_s18 + $0x498] sm:$0xff] }
  0x7d   : > { %10888 = vst [vmem:[#allocation164_spill] sm:$0xff] %v5486_v24  ;;  %10889 = vst [vmem:[#allocation165_spill] sm:$0xff] %v5489_v56  ;;  %v6462_v56 = vld [vmem:[%s4020_s18 + $0x480] sm:$0xff]  ;;  %v6465_v24 = vld [vmem:[%s4020_s18 + $0x488] sm:$0xff] }
  0x7e   : > { %10890 = vst [vmem:[#allocation166_spill] sm:$0xff] %v5492_v19  ;;  %10891 = vst [vmem:[#allocation167_spill] sm:$0xff] %v5495_v18  ;;  %v6448_v18 = vld [vmem:[%s4020_s18 + $0x470] sm:$0xff]  ;;  %v6451_v19 = vld [vmem:[%s4020_s18 + $0x478] sm:$0xff] }
  0x7f   : > { %10892 = vst [vmem:[#allocation168_spill] sm:$0xff] %v5498_v20  ;;  %10893 = vst [vmem:[#allocation169_spill] sm:$0xff] %v5501_v57  ;;  %v6442_v57 = vld [vmem:[%s4020_s18 + $0x460] sm:$0xff]  ;;  %v6445_v20 = vld [vmem:[%s4020_s18 + $0x468] sm:$0xff] }
  0x80   : > { %10894 = vst [vmem:[#allocation170_spill] sm:$0xff] %v5504_v17  ;;  %10895 = vst [vmem:[#allocation171_spill] sm:$0xff] %v5507_v7  ;;  %v6428_v7 = vld [vmem:[%s4020_s18 + $0x450] sm:$0xff]  ;;  %v6431_v17 = vld [vmem:[%s4020_s18 + $0x458] sm:$0xff] }
  0x81   : > { %10896 = vst [vmem:[#allocation172_spill] sm:$0xff] %v5510_v4  ;;  %10897 = vst [vmem:[#allocation173_spill] sm:$0xff] %v5513_v6  ;;  %v6422_v6 = vld [vmem:[%s4020_s18 + $0x440] sm:$0xff]  ;;  %v6425_v4 = vld [vmem:[%s4020_s18 + $0x448] sm:$0xff] }
  0x82   : > { %10898 = vst [vmem:[#allocation174_spill] sm:$0xff] %v5516_v5  ;;  %10899 = vst [vmem:[#allocation175_spill] sm:$0xff] %v5519_v16  ;;  %v6408_v16 = vld [vmem:[%s4020_s18 + $0x430] sm:$0xff]  ;;  %v6411_v5 = vld [vmem:[%s4020_s18 + $0x438] sm:$0xff]  ;;  %vm637_vm1 = vcmp.ne.f32.partialorder %v6422_v6, %v6422_v6 }
  0x83   : > { %10900 = vst [vmem:[#allocation176_spill] sm:$0xff] %v5522_v14  ;;  %10901 = vst [vmem:[#allocation177_spill] sm:$0xff] %v5525_v0  ;;  %v6402_v0 = vld [vmem:[%s4020_s18 + $0x420] sm:$0xff]  ;;  %v6405_v14 = vld [vmem:[%s4020_s18 + $0x428] sm:$0xff]  ;;  %vm635_vm15 = vcmp.ne.f32.partialorder %v6408_v16, %v6408_v16  ;;  %vm636_vm6 = vcmp.ne.f32.partialorder %v6411_v5, %v6411_v5 }
  0x84   : > { %10902 = vst [vmem:[#allocation178_spill] sm:$0xff] %v5528_v13  ;;  %10903 = vst [vmem:[#allocation179_spill] sm:$0xff] %v5531_v36  ;;  %v6388_v36 = vld [vmem:[%s4020_s18 + $0x410] sm:$0xff]  ;;  %v6391_v13 = vld [vmem:[%s4020_s18 + $0x418] sm:$0xff]  ;;  %vm633_vm5 = vcmp.ne.f32.partialorder %v6402_v0, %v6402_v0  ;;  %vm634_vm9 = vcmp.ne.f32.partialorder %v6405_v14, %v6405_v14 }
  0x85   : > { %10904 = vst [vmem:[#allocation180_spill] sm:$0xff] %v5534_v31  ;;  %10905 = vst [vmem:[#allocation181_spill] sm:$0xff] %v5537_v23  ;;  %v6382_v23 = vld [vmem:[%s4020_s18 + $0x400] sm:$0xff]  ;;  %vm631_vm11 = vcmp.ne.f32.partialorder %v6388_v36, %v6388_v36  ;;  %vm632_vm0 = vcmp.ne.f32.partialorder %v6391_v13, %v6391_v13  ;;  %v6546_v43 = vld [vmem:[%s4020_s18 + $0x4f0] sm:$0xff] }
  0x86   : > { %10906 = vst [vmem:[#allocation182_spill] sm:$0xff] %v5540_v27  ;;  %10907 = vst [vmem:[#allocation183_spill] sm:$0xff] %v5543_v60  ;;  %v6385_v27 = vld [vmem:[%s4020_s18 + $0x408] sm:$0xff]  ;;  %vm629_vm3 = vcmp.ne.f32.partialorder %v6382_v23, %v6382_v23  ;;  %v6574_v48 = vld [vmem:[%s4020_s18 + $0x510] sm:$0xff] }
  0x87   : > { %10908 = vst [vmem:[#allocation184_spill] sm:$0xff] %v5546_v11  ;;  %10909 = vst [vmem:[#allocation185_spill] sm:$0xff] %v5549_v51  ;;  %v6371_v11 = vld [vmem:[%s4020_s18 + $0x3f8] sm:$0xff]  ;;  %vm630_vm4 = vcmp.ne.f32.partialorder %v6385_v27, %v6385_v27  ;;  %v6571_v37 = vld [vmem:[%s4020_s18 + $0x508] sm:$0xff] }
  0x88   : > { %10910 = vst [vmem:[#allocation186_spill] sm:$0xff] %v5552_v46  ;;  %10911 = vst [vmem:[#allocation187_spill] sm:$0xff] %v5555_v35  ;;  %v5576_v35 = vadd.s32 760, %v5361_v63  ;;  %vm628_vm8 = vcmp.ne.f32.partialorder %v6371_v11, %v6371_v11  ;;  %v6493_v51 = vld [vmem:[%s4020_s18 + $0x4b8] sm:$0xff]  ;;  %v6596_v49 = vld [vmem:[%s4020_s18 + $0x520] sm:$0xff] }
  0x89   : > { %10912 = vst [vmem:[#allocation188_spill] sm:$0xff] %v5558_v61  ;;  %10913 = vst [vmem:[#allocation189_spill] sm:$0xff] %v5561_v9  ;;  %v5579_v61 = vadd.s32 768, %v5361_v63  ;;  %v5582_v9 = vadd.s32 776, %v5361_v63  ;;  %v6521_v46 = vld [vmem:[%s4020_s18 + $0x4d8] sm:$0xff]  ;;  %v6599_v42 = vld [vmem:[%s4020_s18 + $0x528] sm:$0xff] }
  0x8a   : > { %10914 = vst [vmem:[#allocation190_spill] sm:$0xff] %v5564_v8  ;;  %10915 = vst [vmem:[#allocation191_spill] sm:$0xff] %v5567_v3  ;;  %v5585_v8 = vadd.s32 784, %v5361_v63  ;;  %v5588_v3 = vadd.s32 792, %v5361_v63  ;;  %v6577_v15 = vld [vmem:[%s4020_s18 + $0x518] sm:$0xff]  ;;  %v6602_v53 = vld [vmem:[%s4020_s18 + $0x530] sm:$0xff] }
  0x8b   : > { %10916 = vst [vmem:[#allocation192_spill] sm:$0xff] %v5570_v55  ;;  %10917 = vst [vmem:[#allocation193_spill] sm:$0xff] %v5573_v52  ;;  %v5591_v55 = vadd.s32 800, %v5361_v63  ;;  %v5594_v52 = vadd.s32 808, %v5361_v63  ;;  %v6605_v38 = vld [vmem:[%s4020_s18 + $0x538] sm:$0xff]  ;;  %v6624_v58 = vld [vmem:[%s4020_s18 + $0x540] sm:$0xff]  ;;  %vm667_vm13 = vcmp.ne.f32.partialorder %v6602_v53, %v6602_v53 }
  0x8c   : > { %10918 = vst [vmem:[#allocation194_spill] sm:$0xff] %v5576_v35  ;;  %10919 = vst [vmem:[#allocation195_spill] sm:$0xff] %v5579_v61  ;;  %v5597_v35 = vadd.s32 816, %v5361_v63  ;;  %v5600_v61 = vadd.s32 824, %v5361_v63  ;;  %v6627_v54 = vld [vmem:[%s4020_s18 + $0x548] sm:$0xff]  ;;  %v6630_v40 = vld [vmem:[%s4020_s18 + $0x550] sm:$0xff]  ;;  %vm669_vm14 = vcmp.ne.f32.partialorder %v6624_v58, %v6624_v58 }
  0x8d   : > { %10920 = vst [vmem:[#allocation196_spill] sm:$0xff] %v5582_v9  ;;  %10921 = vst [vmem:[#allocation197_spill] sm:$0xff] %v5585_v8  ;;  %v5603_v9 = vadd.s32 832, %v5361_v63  ;;  %v5606_v8 = vadd.s32 840, %v5361_v63  ;;  %v6633_v45 = vld [vmem:[%s4020_s18 + $0x558] sm:$0xff]  ;;  %v6652_v62 = vld [vmem:[%s4020_s18 + $0x560] sm:$0xff] }
  0x8e   : > { %10922 = vst [vmem:[#allocation198_spill] sm:$0xff] %v5588_v3  ;;  %10923 = vst [vmem:[#allocation199_spill] sm:$0xff] %v5591_v55  ;;  %v5609_v3 = vadd.s32 848, %v5361_v63  ;;  %v5612_v55 = vadd.s32 856, %v5361_v63  ;;  %v6655_v2 = vld [vmem:[%s4020_s18 + $0x568] sm:$0xff]  ;;  %v6658_v12 = vld [vmem:[%s4020_s18 + $0x570] sm:$0xff]  ;;  %vm672_vm2 = vcmp.ne.f32.partialorder %v6633_v45, %v6633_v45 }
  0x8f   : > { %10924 = vst [vmem:[#allocation200_spill] sm:$0xff] %v5594_v52  ;;  %10925 = vst [vmem:[#allocation201_spill] sm:$0xff] %v5597_v35  ;;  %v5615_v52 = vadd.s32 864, %v5361_v63  ;;  %v5618_v35 = vadd.s32 872, %v5361_v63  ;;  %v6661_v50 = vld [vmem:[%s4020_s18 + $0x578] sm:$0xff]  ;;  %v6680_v59 = vld [vmem:[%s4020_s18 + $0x580] sm:$0xff]  ;;  %vm674_vm10 = vcmp.ne.f32.partialorder %v6655_v2, %v6655_v2  ;;  %vm675_vm12 = vcmp.ne.f32.partialorder %v6658_v12, %v6658_v12 }
  0x90   : > { %10926 = vst [vmem:[#allocation202_spill] sm:$0xff] %v5600_v61  ;;  %10927 = vst [vmem:[#allocation203_spill] sm:$0xff] %v5603_v9  ;;  %v5621_v61 = vadd.s32 880, %v5361_v63  ;;  %v5624_v9 = vadd.s32 888, %v5361_v63  ;;  %v6683_v10 = vld [vmem:[%s4020_s18 + $0x588] sm:$0xff]  ;;  %v6689_v30 = vld [vmem:[%s4020_s18 + $0x598] sm:$0xff]  ;;  %vm676_vm7 = vcmp.ne.f32.partialorder %v6661_v50, %v6661_v50 }
  0x91   : > { %10928 = vst [vmem:[#allocation204_spill] sm:$0xff] %v5606_v8  ;;  %10929 = vst [vmem:[#allocation205_spill] sm:$0xff] %v5609_v3  ;;  %v5627_v8 = vadd.s32 896, %v5361_v63  ;;  %v5630_v3 = vadd.s32 904, %v5361_v63  ;;  %v6717_v47 = vld [vmem:[%s4020_s18 + $0x5b8] sm:$0xff]  ;;  %v6767_v31 = vld [vmem:[%s4020_s18 + $0x5e8] sm:$0xff] }
  0x92   : > { %10930 = vst [vmem:[#allocation206_spill] sm:$0xff] %v5612_v55  ;;  %10931 = vst [vmem:[#allocation207_spill] sm:$0xff] %v5615_v52  ;;  %v5633_v55 = vadd.s32 912, %v5361_v63  ;;  %v5636_v52 = vadd.s32 920, %v5361_v63  ;;  %v6770_v60 = vld [vmem:[%s4020_s18 + $0x5f0] sm:$0xff] }
  0x93   : > { %10932 = vst [vmem:[#allocation208_spill] sm:$0xff] %v5618_v35  ;;  %10933 = vst [vmem:[#allocation209_spill] sm:$0xff] %v5621_v61  ;;  %v5639_v35 = vadd.s32 928, %v5361_v63  ;;  %v5642_v61 = vadd.s32 936, %v5361_v63 }
  0x94   : > { %10934 = vst [vmem:[#allocation210_spill] sm:$0xff] %v5624_v9  ;;  %10935 = vst [vmem:[#allocation211_spill] sm:$0xff] %v5627_v8  ;;  %v5645_v9 = vadd.s32 944, %v5361_v63  ;;  %v5648_v8 = vadd.s32 952, %v5361_v63 }
  0x95   : > { %10936 = vst [vmem:[#allocation212_spill] sm:$0xff] %v5630_v3  ;;  %10937 = vst [vmem:[#allocation213_spill] sm:$0xff] %v5633_v55  ;;  %v5651_v3 = vadd.s32 960, %v5361_v63  ;;  %v5654_v55 = vadd.s32 968, %v5361_v63 }
  0x96   : > { %10938 = vst [vmem:[#allocation214_spill] sm:$0xff] %v5636_v52  ;;  %10939 = vst [vmem:[#allocation215_spill] sm:$0xff] %v5639_v35  ;;  %v5657_v52 = vadd.s32 976, %v5361_v63  ;;  %v5660_v35 = vadd.s32 984, %v5361_v63 }
  0x97   : > { %10940 = vst [vmem:[#allocation216_spill] sm:$0xff] %v5642_v61  ;;  %10941 = vst [vmem:[#allocation217_spill] sm:$0xff] %v5645_v9  ;;  %v5663_v61 = vadd.s32 992, %v5361_v63  ;;  %v5666_v9 = vadd.s32 1000, %v5361_v63 }
  0x98   : > { %10942 = vst [vmem:[#allocation218_spill] sm:$0xff] %v5648_v8  ;;  %10943 = vst [vmem:[#allocation219_spill] sm:$0xff] %v5651_v3  ;;  %v5669_v8 = vadd.s32 1008, %v5361_v63  ;;  %v5672_v3 = vadd.s32 1016, %v5361_v63 }
  0x99   : > { %10944 = vst [vmem:[#allocation220_spill] sm:$0xff] %v5654_v55  ;;  %10945 = vst [vmem:[#allocation221_spill] sm:$0xff] %v5657_v52  ;;  %v5675_v55 = vadd.s32 1024, %v5361_v63  ;;  %v5678_v52 = vadd.s32 1032, %v5361_v63 }
  0x9a   : > { %10946 = vst [vmem:[#allocation222_spill] sm:$0xff] %v5660_v35  ;;  %10947 = vst [vmem:[#allocation223_spill] sm:$0xff] %v5663_v61  ;;  %v5681_v35 = vadd.s32 1040, %v5361_v63  ;;  %v5684_v61 = vadd.s32 1048, %v5361_v63 }
  0x9b   : > { %10948 = vst [vmem:[#allocation224_spill] sm:$0xff] %v5666_v9  ;;  %10949 = vst [vmem:[#allocation225_spill] sm:$0xff] %v5669_v8  ;;  %v5687_v9 = vadd.s32 1056, %v5361_v63  ;;  %v5690_v8 = vadd.s32 1064, %v5361_v63 }
  0x9c   : > { %10950 = vst [vmem:[#allocation226_spill] sm:$0xff] %v5672_v3  ;;  %10951 = vst [vmem:[#allocation227_spill] sm:$0xff] %v5675_v55  ;;  %v5693_v3 = vadd.s32 1072, %v5361_v63  ;;  %v5696_v55 = vadd.s32 1080, %v5361_v63 }
  0x9d   : > { %10952 = vst [vmem:[#allocation228_spill] sm:$0xff] %v5678_v52  ;;  %10953 = vst [vmem:[#allocation229_spill] sm:$0xff] %v5681_v35  ;;  %v5699_v52 = vadd.s32 1088, %v5361_v63  ;;  %v5702_v35 = vadd.s32 1096, %v5361_v63 }
  0x9e   : > { %10954 = vst [vmem:[#allocation230_spill] sm:$0xff] %v5684_v61  ;;  %10955 = vst [vmem:[#allocation231_spill] sm:$0xff] %v5687_v9  ;;  %v5705_v61 = vadd.s32 1104, %v5361_v63  ;;  %v5708_v9 = vadd.s32 1112, %v5361_v63 }
  0x9f   : > { %10956 = vst [vmem:[#allocation232_spill] sm:$0xff] %v5690_v8  ;;  %10957 = vst [vmem:[#allocation233_spill] sm:$0xff] %v5693_v3  ;;  %v5711_v8 = vadd.s32 1120, %v5361_v63  ;;  %v5714_v3 = vadd.s32 1128, %v5361_v63 }
  0xa0   : > { %10958 = vst [vmem:[#allocation234_spill] sm:$0xff] %v5696_v55  ;;  %10959 = vst [vmem:[#allocation235_spill] sm:$0xff] %v5699_v52  ;;  %v5717_v55 = vadd.s32 1136, %v5361_v63  ;;  %v5720_v52 = vadd.s32 1144, %v5361_v63 }
  0xa1   : > { %10960 = vst [vmem:[#allocation236_spill] sm:$0xff] %v5702_v35  ;;  %10961 = vst [vmem:[#allocation237_spill] sm:$0xff] %v5705_v61  ;;  %v5723_v35 = vadd.s32 1152, %v5361_v63  ;;  %v5726_v61 = vadd.s32 1160, %v5361_v63 }
  0xa2   : > { %10962 = vst [vmem:[#allocation238_spill] sm:$0xff] %v5708_v9  ;;  %10963 = vst [vmem:[#allocation239_spill] sm:$0xff] %v5711_v8  ;;  %v5729_v9 = vadd.s32 1168, %v5361_v63  ;;  %v5732_v8 = vadd.s32 1176, %v5361_v63 }
  0xa3   : > { %10964 = vst [vmem:[#allocation240_spill] sm:$0xff] %v5714_v3  ;;  %10965 = vst [vmem:[#allocation241_spill] sm:$0xff] %v5717_v55  ;;  %v5735_v3 = vadd.s32 1184, %v5361_v63  ;;  %v5738_v55 = vadd.s32 1192, %v5361_v63 }
  0xa4   : > { %10966 = vst [vmem:[#allocation242_spill] sm:$0xff] %v5720_v52  ;;  %10967 = vst [vmem:[#allocation243_spill] sm:$0xff] %v5723_v35  ;;  %v5741_v52 = vadd.s32 1200, %v5361_v63  ;;  %v5744_v35 = vadd.s32 1208, %v5361_v63 }
  0xa5   : > { %10968 = vst [vmem:[#allocation244_spill] sm:$0xff] %v5726_v61  ;;  %10969 = vst [vmem:[#allocation245_spill] sm:$0xff] %v5729_v9  ;;  %v5747_v61 = vadd.s32 1216, %v5361_v63  ;;  %v5750_v9 = vadd.s32 1224, %v5361_v63 }
  0xa6   : > { %10970 = vst [vmem:[#allocation246_spill] sm:$0xff] %v5732_v8  ;;  %10971 = vst [vmem:[#allocation247_spill] sm:$0xff] %v5735_v3  ;;  %v5753_v8 = vadd.s32 1232, %v5361_v63  ;;  %v5756_v3 = vadd.s32 1240, %v5361_v63 }
  0xa7   : > { %10972 = vst [vmem:[#allocation248_spill] sm:$0xff] %v5738_v55  ;;  %10973 = vst [vmem:[#allocation249_spill] sm:$0xff] %v5741_v52  ;;  %v5759_v55 = vadd.s32 1248, %v5361_v63  ;;  %v5762_v52 = vadd.s32 1256, %v5361_v63 }
  0xa8   : > { %10974 = vst [vmem:[#allocation250_spill] sm:$0xff] %v5744_v35  ;;  %10975 = vst [vmem:[#allocation251_spill] sm:$0xff] %v5747_v61  ;;  %v5765_v35 = vadd.s32 1264, %v5361_v63  ;;  %v5768_v61 = vadd.s32 1272, %v5361_v63 }
  0xa9   : > { %10976 = vst [vmem:[#allocation252_spill] sm:$0xff] %v5750_v9  ;;  %10977 = vst [vmem:[#allocation253_spill] sm:$0xff] %v5753_v8  ;;  %v5771_v9 = vadd.s32 1280, %v5361_v63  ;;  %v5774_v8 = vadd.s32 1288, %v5361_v63 }
  0xaa   : > { %10978 = vst [vmem:[#allocation254_spill] sm:$0xff] %v5756_v3  ;;  %10979 = vst [vmem:[#allocation255_spill] sm:$0xff] %v5759_v55  ;;  %v5777_v3 = vadd.s32 1296, %v5361_v63  ;;  %v5780_v55 = vadd.s32 1304, %v5361_v63 }
  0xab   : > { %10980 = vst [vmem:[#allocation256_spill] sm:$0xff] %v5762_v52  ;;  %10981 = vst [vmem:[#allocation257_spill] sm:$0xff] %v5765_v35  ;;  %v5783_v52 = vadd.s32 1312, %v5361_v63  ;;  %v5786_v35 = vadd.s32 1320, %v5361_v63 }
  0xac   : > { %10982 = vst [vmem:[#allocation258_spill] sm:$0xff] %v5768_v61  ;;  %10983 = vst [vmem:[#allocation259_spill] sm:$0xff] %v5771_v9  ;;  %v5789_v61 = vadd.s32 1328, %v5361_v63  ;;  %v5792_v9 = vadd.s32 1336, %v5361_v63 }
  0xad   : > { %10984 = vst [vmem:[#allocation260_spill] sm:$0xff] %v5774_v8  ;;  %10985 = vst [vmem:[#allocation261_spill] sm:$0xff] %v5777_v3  ;;  %v5795_v8 = vadd.s32 1344, %v5361_v63  ;;  %v5798_v3 = vadd.s32 1352, %v5361_v63 }
  0xae   : > { %10986 = vst [vmem:[#allocation262_spill] sm:$0xff] %v5780_v55  ;;  %10987 = vst [vmem:[#allocation263_spill] sm:$0xff] %v5783_v52  ;;  %v5801_v55 = vadd.s32 1360, %v5361_v63  ;;  %v5804_v52 = vadd.s32 1368, %v5361_v63 }
  0xaf   : > { %10988 = vst [vmem:[#allocation264_spill] sm:$0xff] %v5786_v35  ;;  %10989 = vst [vmem:[#allocation265_spill] sm:$0xff] %v5789_v61  ;;  %v5807_v35 = vadd.s32 1376, %v5361_v63  ;;  %v5810_v61 = vadd.s32 1384, %v5361_v63 }
  0xb0   : > { %10990 = vst [vmem:[#allocation266_spill] sm:$0xff] %v5792_v9  ;;  %10991 = vst [vmem:[#allocation267_spill] sm:$0xff] %v5795_v8  ;;  %v5813_v9 = vadd.s32 1392, %v5361_v63  ;;  %v5816_v8 = vadd.s32 1400, %v5361_v63 }
  0xb1   : > { %10992 = vst [vmem:[#allocation268_spill] sm:$0xff] %v5798_v3  ;;  %10993 = vst [vmem:[#allocation269_spill] sm:$0xff] %v5801_v55  ;;  %v5819_v3 = vadd.s32 1408, %v5361_v63  ;;  %v5822_v55 = vadd.s32 1416, %v5361_v63 }
  0xb2   : > { %10994 = vst [vmem:[#allocation270_spill] sm:$0xff] %v5804_v52  ;;  %10995 = vst [vmem:[#allocation271_spill] sm:$0xff] %v5807_v35  ;;  %v5825_v52 = vadd.s32 1424, %v5361_v63  ;;  %v5828_v35 = vadd.s32 1432, %v5361_v63 }
  0xb3   : > { %10996 = vst [vmem:[#allocation272_spill] sm:$0xff] %v5810_v61  ;;  %10997 = vst [vmem:[#allocation273_spill] sm:$0xff] %v5813_v9  ;;  %v5831_v61 = vadd.s32 1440, %v5361_v63  ;;  %v5834_v9 = vadd.s32 1448, %v5361_v63 }
  0xb4   : > { %10998 = vst [vmem:[#allocation274_spill] sm:$0xff] %v5816_v8  ;;  %10999 = vst [vmem:[#allocation275_spill] sm:$0xff] %v5819_v3  ;;  %v5837_v8 = vadd.s32 1456, %v5361_v63  ;;  %v5840_v3 = vadd.s32 1464, %v5361_v63 }
  0xb5   : > { %11000 = vst [vmem:[#allocation276_spill] sm:$0xff] %v5822_v55  ;;  %11001 = vst [vmem:[#allocation277_spill] sm:$0xff] %v5825_v52  ;;  %v5843_v55 = vadd.s32 1472, %v5361_v63  ;;  %v5846_v52 = vadd.s32 1480, %v5361_v63 }
  0xb6   : > { %11002 = vst [vmem:[#allocation278_spill] sm:$0xff] %v5828_v35  ;;  %11003 = vst [vmem:[#allocation279_spill] sm:$0xff] %v5831_v61  ;;  %v5849_v35 = vadd.s32 1488, %v5361_v63  ;;  %v5852_v61 = vadd.s32 1496, %v5361_v63 }
  0xb7   : > { %11004 = vst [vmem:[#allocation280_spill] sm:$0xff] %v5834_v9  ;;  %11005 = vst [vmem:[#allocation281_spill] sm:$0xff] %v5837_v8  ;;  %v5855_v9 = vadd.s32 1504, %v5361_v63  ;;  %v5858_v8 = vadd.s32 1512, %v5361_v63 }
  0xb8   : > { %11006 = vst [vmem:[#allocation282_spill] sm:$0xff] %v5840_v3  ;;  %11007 = vst [vmem:[#allocation283_spill] sm:$0xff] %v5843_v55  ;;  %v5861_v3 = vadd.s32 1520, %v5361_v63  ;;  %v5864_v55 = vadd.s32 1528, %v5361_v63 }
  0xb9   : > { %11008 = vst [vmem:[#allocation284_spill] sm:$0xff] %v5846_v52  ;;  %11009 = vst [vmem:[#allocation285_spill] sm:$0xff] %v5849_v35  ;;  %v5867_v52 = vadd.s32 1536, %v5361_v63  ;;  %v5870_v35 = vadd.s32 1544, %v5361_v63 }
  0xba   : > { %11010 = vst [vmem:[#allocation286_spill] sm:$0xff] %v5852_v61  ;;  %11011 = vst [vmem:[#allocation287_spill] sm:$0xff] %v5855_v9  ;;  %v5873_v61 = vadd.s32 1552, %v5361_v63  ;;  %v5876_v9 = vadd.s32 1560, %v5361_v63 }
  0xbb   : > { %11012 = vst [vmem:[#allocation288_spill] sm:$0xff] %v5858_v8  ;;  %11013 = vst [vmem:[#allocation289_spill] sm:$0xff] %v5861_v3  ;;  %v5879_v8 = vadd.s32 1568, %v5361_v63  ;;  %v5882_v3 = vadd.s32 1576, %v5361_v63 }
  0xbc   : > { %11014 = vst [vmem:[#allocation290_spill] sm:$0xff] %v5864_v55  ;;  %11015 = vst [vmem:[#allocation291_spill] sm:$0xff] %v5867_v52  ;;  %v5885_v55 = vadd.s32 1584, %v5361_v63  ;;  %v5888_v52 = vadd.s32 1592, %v5361_v63 }
  0xbd   : > { %11016 = vst [vmem:[#allocation292_spill] sm:$0xff] %v5870_v35  ;;  %11017 = vst [vmem:[#allocation293_spill] sm:$0xff] %v5873_v61  ;;  %v5891_v35 = vadd.s32 1600, %v5361_v63  ;;  %v5894_v61 = vadd.s32 1608, %v5361_v63 }
  0xbe   : > { %11018 = vst [vmem:[#allocation294_spill] sm:$0xff] %v5876_v9  ;;  %11019 = vst [vmem:[#allocation295_spill] sm:$0xff] %v5879_v8  ;;  %v5897_v9 = vadd.s32 1616, %v5361_v63  ;;  %v5900_v8 = vadd.s32 1624, %v5361_v63 }
  0xbf   : > { %11020 = vst [vmem:[#allocation296_spill] sm:$0xff] %v5882_v3  ;;  %11021 = vst [vmem:[#allocation297_spill] sm:$0xff] %v5885_v55  ;;  %v5903_v3 = vadd.s32 1632, %v5361_v63  ;;  %v5906_v55 = vadd.s32 1640, %v5361_v63 }
  0xc0   : > { %11022 = vst [vmem:[#allocation298_spill] sm:$0xff] %v5888_v52  ;;  %11023 = vst [vmem:[#allocation299_spill] sm:$0xff] %v5891_v35  ;;  %v5909_v52 = vadd.s32 1648, %v5361_v63  ;;  %v5912_v35 = vadd.s32 1656, %v5361_v63 }
  0xc1   : > { %11024 = vst [vmem:[#allocation300_spill] sm:$0xff] %v5894_v61  ;;  %11025 = vst [vmem:[#allocation301_spill] sm:$0xff] %v5897_v9  ;;  %v5915_v61 = vadd.s32 1664, %v5361_v63  ;;  %v5918_v9 = vadd.s32 1672, %v5361_v63 }
  0xc2   : > { %11026 = vst [vmem:[#allocation302_spill] sm:$0xff] %v5900_v8  ;;  %11027 = vst [vmem:[#allocation303_spill] sm:$0xff] %v5903_v3  ;;  %v5921_v8 = vadd.s32 1680, %v5361_v63  ;;  %v5924_v3 = vadd.s32 1688, %v5361_v63 }
  0xc3   : > { %11028 = vst [vmem:[#allocation304_spill] sm:$0xff] %v5906_v55  ;;  %11029 = vst [vmem:[#allocation305_spill] sm:$0xff] %v5909_v52  ;;  %v5927_v55 = vadd.s32 1696, %v5361_v63  ;;  %v5930_v52 = vadd.s32 1704, %v5361_v63 }
  0xc4   : > { %11030 = vst [vmem:[#allocation306_spill] sm:$0xff] %v5912_v35  ;;  %11031 = vst [vmem:[#allocation307_spill] sm:$0xff] %v5915_v61  ;;  %v5933_v35 = vadd.s32 1712, %v5361_v63  ;;  %v5936_v61 = vadd.s32 1720, %v5361_v63 }
  0xc5   : > { %11032 = vst [vmem:[#allocation308_spill] sm:$0xff] %v5918_v9  ;;  %11033 = vst [vmem:[#allocation309_spill] sm:$0xff] %v5921_v8  ;;  %v5939_v9 = vadd.s32 1728, %v5361_v63  ;;  %v5942_v8 = vadd.s32 1736, %v5361_v63 }
  0xc6   : > { %11034 = vst [vmem:[#allocation310_spill] sm:$0xff] %v5924_v3  ;;  %11035 = vst [vmem:[#allocation311_spill] sm:$0xff] %v5927_v55  ;;  %v5945_v3 = vadd.s32 1744, %v5361_v63  ;;  %v5948_v55 = vadd.s32 1752, %v5361_v63 }
  0xc7   : > { %11036 = vst [vmem:[#allocation312_spill] sm:$0xff] %v5930_v52  ;;  %11037 = vst [vmem:[#allocation313_spill] sm:$0xff] %v5933_v35  ;;  %v5951_v52 = vadd.s32 1760, %v5361_v63  ;;  %v5954_v35 = vadd.s32 1768, %v5361_v63 }
  0xc8   : > { %11038 = vst [vmem:[#allocation314_spill] sm:$0xff] %v5936_v61  ;;  %11039 = vst [vmem:[#allocation315_spill] sm:$0xff] %v5939_v9  ;;  %v5957_v61 = vadd.s32 1776, %v5361_v63  ;;  %v5960_v9 = vadd.s32 1784, %v5361_v63 }
  0xc9   : > { %11040 = vst [vmem:[#allocation316_spill] sm:$0xff] %v5942_v8  ;;  %11041 = vst [vmem:[#allocation317_spill] sm:$0xff] %v5945_v3  ;;  %v5963_v8 = vadd.s32 1792, %v5361_v63  ;;  %v5966_v3 = vadd.s32 1800, %v5361_v63 }
  0xca   : > { %11042 = vst [vmem:[#allocation318_spill] sm:$0xff] %v5948_v55  ;;  %11043 = vst [vmem:[#allocation319_spill] sm:$0xff] %v5951_v52  ;;  %v5969_v55 = vadd.s32 1808, %v5361_v63  ;;  %v5972_v52 = vadd.s32 1816, %v5361_v63 }
  0xcb   : > { %11044 = vst [vmem:[#allocation320_spill] sm:$0xff] %v5954_v35  ;;  %11045 = vst [vmem:[#allocation321_spill] sm:$0xff] %v5957_v61  ;;  %v5975_v35 = vadd.s32 1824, %v5361_v63  ;;  %v5978_v61 = vadd.s32 1832, %v5361_v63 }
  0xcc   : > { %11046 = vst [vmem:[#allocation322_spill] sm:$0xff] %v5960_v9  ;;  %11047 = vst [vmem:[#allocation323_spill] sm:$0xff] %v5963_v8  ;;  %v5981_v9 = vadd.s32 1840, %v5361_v63  ;;  %v5984_v8 = vadd.s32 1848, %v5361_v63 }
  0xcd   : > { %11048 = vst [vmem:[#allocation324_spill] sm:$0xff] %v5966_v3  ;;  %11049 = vst [vmem:[#allocation325_spill] sm:$0xff] %v5969_v55  ;;  %v5987_v3 = vadd.s32 1856, %v5361_v63  ;;  %v5990_v55 = vadd.s32 1864, %v5361_v63 }
  0xce   : > { %11050 = vst [vmem:[#allocation326_spill] sm:$0xff] %v5972_v52  ;;  %11051 = vst [vmem:[#allocation327_spill] sm:$0xff] %v5975_v35  ;;  %v5993_v52 = vadd.s32 1872, %v5361_v63  ;;  %v5996_v35 = vadd.s32 1880, %v5361_v63 }
  0xcf   : > { %11052 = vst [vmem:[#allocation328_spill] sm:$0xff] %v5978_v61  ;;  %11053 = vst [vmem:[#allocation329_spill] sm:$0xff] %v5981_v9  ;;  %v5999_v61 = vadd.s32 1888, %v5361_v63  ;;  %v6002_v9 = vadd.s32 1896, %v5361_v63 }
  0xd0   : > { %11054 = vst [vmem:[#allocation330_spill] sm:$0xff] %v5984_v8  ;;  %11055 = vst [vmem:[#allocation331_spill] sm:$0xff] %v5987_v3  ;;  %v6005_v8 = vadd.s32 1904, %v5361_v63  ;;  %v6008_v3 = vadd.s32 1912, %v5361_v63 }
  0xd1   : > { %11056 = vst [vmem:[#allocation332_spill] sm:$0xff] %v5990_v55  ;;  %11057 = vst [vmem:[#allocation333_spill] sm:$0xff] %v5993_v52  ;;  %v6011_v55 = vadd.s32 1920, %v5361_v63  ;;  %v6014_v52 = vadd.s32 1928, %v5361_v63 }
  0xd2   : > { %11058 = vst [vmem:[#allocation334_spill] sm:$0xff] %v5996_v35  ;;  %11059 = vst [vmem:[#allocation335_spill] sm:$0xff] %v5999_v61  ;;  %v6017_v35 = vadd.s32 1936, %v5361_v63  ;;  %v6020_v61 = vadd.s32 1944, %v5361_v63 }
  0xd3   : > { %11060 = vst [vmem:[#allocation336_spill] sm:$0xff] %v6002_v9  ;;  %11061 = vst [vmem:[#allocation337_spill] sm:$0xff] %v6005_v8  ;;  %v6023_v9 = vadd.s32 1952, %v5361_v63  ;;  %v6026_v8 = vadd.s32 1960, %v5361_v63 }
  0xd4   : > { %11062 = vst [vmem:[#allocation338_spill] sm:$0xff] %v6008_v3  ;;  %11063 = vst [vmem:[#allocation339_spill] sm:$0xff] %v6011_v55  ;;  %v6029_v3 = vadd.s32 1968, %v5361_v63  ;;  %v6032_v55 = vadd.s32 1976, %v5361_v63 }
  0xd5   : > { %11064 = vst [vmem:[#allocation340_spill] sm:$0xff] %v6014_v52  ;;  %11065 = vst [vmem:[#allocation341_spill] sm:$0xff] %v6017_v35  ;;  %v6035_v52 = vadd.s32 1984, %v5361_v63  ;;  %v6038_v35 = vadd.s32 1992, %v5361_v63 }
  0xd6   : > { %11066 = vst [vmem:[#allocation342_spill] sm:$0xff] %v6020_v61  ;;  %11067 = vst [vmem:[#allocation343_spill] sm:$0xff] %v6023_v9  ;;  %v6041_v61 = vadd.s32 2000, %v5361_v63  ;;  %v6044_v9 = vadd.s32 2008, %v5361_v63 }
  0xd7   : > { %11068 = vst [vmem:[#allocation344_spill] sm:$0xff] %v6026_v8  ;;  %11069 = vst [vmem:[#allocation345_spill] sm:$0xff] %v6029_v3  ;;  %v6047_v8 = vadd.s32 2016, %v5361_v63  ;;  %v6050_v3 = vadd.s32 2024, %v5361_v63 }
  0xd8   : > { %11070 = vst [vmem:[#allocation346_spill] sm:$0xff] %v6032_v55  ;;  %11071 = vst [vmem:[#allocation347_spill] sm:$0xff] %v6035_v52  ;;  %v6053_v55 = vadd.s32 2032, %v5361_v63  ;;  %v6056_v52 = vadd.s32 2040, %v5361_v63  ;;  %v6686_v63 = vld [vmem:[%s4020_s18 + $0x590] sm:$0xff] }
  0xd9   : > { %11072 = vst [vmem:[#allocation348_spill] sm:$0xff] %v6038_v35  ;;  %11073 = vst [vmem:[#allocation349_spill] sm:$0xff] %v6041_v61  ;;  %v6773_v35 = vld [vmem:[%s4020_s18 + $0x5f8] sm:$0xff]  ;;  %v6799_v61 = vld [vmem:[%s4020_s18 + $0x608] sm:$0xff] }
  0xda   : > { %11074 = vst [vmem:[#allocation350_spill] sm:$0xff] %v6044_v9  ;;  %11075 = vst [vmem:[#allocation351_spill] sm:$0xff] %v6047_v8  ;;  %v6787_v8 = vsel %vm628_vm8, 0.0, %v6371_v11  ;;  %v6796_v9 = vld [vmem:[%s4020_s18 + $0x600] sm:$0xff]  ;;  %v6805_v11 = vld [vmem:[%s4020_s18 + $0x618] sm:$0xff]  ;;  %vm673_vm8 = vcmp.ne.f32.partialorder %v6652_v62, %v6652_v62 }
  0xdb   : > { %11076 = vst [vmem:[#allocation352_spill] sm:$0xff] %v6050_v3  ;;  %11077 = vst [vmem:[#allocation353_spill] sm:$0xff] %v6053_v55  ;;  %v6825_v55 = vsel %vm630_vm4, 0.0, %v6385_v27  ;;  %v6831_v3 = vsel %vm631_vm11, 0.0, %v6388_v36  ;;  %v6846_v27 = vld [vmem:[%s4020_s18 + $0x630] sm:$0xff]  ;;  %vm677_vm11 = vcmp.ne.f32.partialorder %v6680_v59, %v6680_v59  ;;  %vm678_vm4 = vcmp.ne.f32.partialorder %v6683_v10, %v6683_v10 }
  0xdc   : > { %11078 = vst [vmem:[#allocation354_spill] sm:$0xff] %v6056_v52  ;;  %11212 = vst [vmem:[#allocation355_spill] sm:$0xff] %v6540_v39  ;;  %v6745_v39 = vld [vmem:[%s4020_s18 + $0x5d8] sm:$0xff]  ;;  %v6819_v52 = vsel %vm629_vm3, 0.0, %v6382_v23  ;;  %v6837_v23 = vsel %vm632_vm0, 0.0, %v6391_v13  ;;  %vm679_vm3 = vcmp.ne.f32.partialorder %v6686_v63, %v6686_v63  ;;  %v6863_v36 = vsel %vm633_vm5, 0.0, %v6402_v0 }
  0xdd   : > { %11213 = vst [vmem:[#allocation356_spill] sm:$0xff] %v6543_v32  ;;  %11214 = vst [vmem:[#allocation357_spill] sm:$0xff] %v6546_v43  ;;  %v6708_v43 = vld [vmem:[%s4020_s18 + $0x5a0] sm:$0xff]  ;;  %v6711_v32 = vld [vmem:[%s4020_s18 + $0x5a8] sm:$0xff]  ;;  %v6869_v13 = vsel %vm634_vm9, 0.0, %v6405_v14  ;;  %v6881_v0 = vsel %vm636_vm6, 0.0, %v6411_v5  ;;  %vm11262_vm0 = vcmp.ne.f32.partialorder %v6425_v4, %v6425_v4  ;;  %vm11264_vm5 = vcmp.ne.f32.partialorder %v6428_v7, %v6428_v7 }
  0xde   : > { %11215 = vst [vmem:[#allocation358_spill] sm:$0xff] %v6549_v26  ;;  %11220 = vst [vmem:[#allocation359_spill] sm:$0xff] %v6568_v44  ;;  %v6714_v26 = vld [vmem:[%s4020_s18 + $0x5b0] sm:$0xff]  ;;  %v6764_v44 = vld [vmem:[%s4020_s18 + $0x5e0] sm:$0xff]  ;;  %v6913_v5 = vsel %vm11262_vm0, 0.0, %v6425_v4  ;;  %vm11266_vm6 = vcmp.ne.f32.partialorder %v6431_v17, %v6431_v17  ;;  %vm11272_vm9 = vcmp.ne.f32.partialorder %v6442_v57, %v6442_v57  ;;  %vm11280_vm0 = vcmp.ne.f32.partialorder %v6462_v56, %v6462_v56 }
  0xdf   : > { %11221 = vst [vmem:[#allocation360_spill] sm:$0xff] %v6571_v37  ;;  %11222 = vst [vmem:[#allocation361_spill] sm:$0xff] %v6574_v48  ;;  %v6736_v48 = vld [vmem:[%s4020_s18 + $0x5c0] sm:$0xff]  ;;  %v6739_v37 = vld [vmem:[%s4020_s18 + $0x5c8] sm:$0xff] }
  0xe0   : > { %11223 = vst [vmem:[#allocation362_spill] sm:$0xff] %v6577_v15  ;;  %11232 = vst [vmem:[#allocation363_spill] sm:$0xff] %v6633_v45  ;;  %v6742_v15 = vld [vmem:[%s4020_s18 + $0x5d0] sm:$0xff] }
  0xe1   : > { %11249 = vst [vmem:[#allocation364_spill] sm:$0xff] %v6787_v8  ;;  %v6802_v45 = vld [vmem:[%s4020_s18 + $0x610] sm:$0xff]  ;;  %11250 = vst [vmem:[#allocation365_spill] sm:$0xff] %v6819_v52  ;;  %v6840_v52 = vld [vmem:[%s4020_s18 + $0x620] sm:$0xff] }
  0xe2   : > { %11251 = vst [vmem:[#allocation366_spill] sm:$0xff] %v6825_v55  ;;  %11252 = vst [vmem:[#allocation367_spill] sm:$0xff] %v6831_v3  ;;  %v6843_v8 = vld [vmem:[%s4020_s18 + $0x628] sm:$0xff]  ;;  %v6849_v55 = vld [vmem:[%s4020_s18 + $0x638] sm:$0xff] }
  0xe3   : > { %11253 = vst [vmem:[#allocation368_spill] sm:$0xff] %v6837_v23  ;;  %11254 = vst [vmem:[#allocation369_spill] sm:$0xff] %v6863_v36  ;;  %v6875_v23 = vsel %vm635_vm15, 0.0, %v6408_v16  ;;  %v6884_v36 = vld [vmem:[%s4020_s18 + $0x640] sm:$0xff]  ;;  %v6887_v3 = vld [vmem:[%s4020_s18 + $0x648] sm:$0xff]  ;;  %v6907_v16 = vsel %vm637_vm1, 0.0, %v6422_v6  ;;  %vm11274_vm15 = vcmp.ne.f32.partialorder %v6445_v20, %v6445_v20  ;;  %vm11282_vm1 = vcmp.ne.f32.partialorder %v6465_v24, %v6465_v24 }
  0xe4   : > { %11255 = vst [vmem:[#allocation370_spill] sm:$0xff] %v6869_v13  ;;  %11256 = vst [vmem:[#allocation371_spill] sm:$0xff] %v6875_v23  ;;  %v6890_v14 = vld [vmem:[%s4020_s18 + $0x650] sm:$0xff]  ;;  %v6893_v13 = vld [vmem:[%s4020_s18 + $0x658] sm:$0xff]  ;;  %v6925_v6 = vsel %vm11266_vm6, 0.0, %v6431_v17  ;;  %v6957_v17 = vsel %vm11274_vm15, 0.0, %v6445_v20  ;;  %vm11278_vm6 = vcmp.ne.f32.partialorder %v6451_v19, %v6451_v19  ;;  %vm11291_vm15 = vcmp.ne.f32.partialorder %v6487_v28, %v6487_v28 }
  0xe5   : > { %11257 = vst [vmem:[#allocation372_spill] sm:$0xff] %v6881_v0  ;;  %11258 = vst [vmem:[#allocation373_spill] sm:$0xff] %v6887_v3  ;;  %v6919_v0 = vsel %vm11264_vm5, 0.0, %v6428_v7  ;;  %v6931_v23 = vld [vmem:[%s4020_s18 + $0x668] sm:$0xff]  ;;  %v6934_v4 = vld [vmem:[%s4020_s18 + $0x670] sm:$0xff]  ;;  %v6951_v7 = vsel %vm11272_vm9, 0.0, %v6442_v57  ;;  %vm11276_vm5 = vcmp.ne.f32.partialorder %v6448_v18, %v6448_v18  ;;  %vm11289_vm9 = vcmp.ne.f32.partialorder %v6484_v41, %v6484_v41 }
  0xe6   : > { %11259 = vst [vmem:[#allocation374_spill] sm:$0xff] %v6890_v14  ;;  %11260 = vst [vmem:[#allocation375_spill] sm:$0xff] %v6893_v13  ;;  %v6969_v57 = vsel %vm11278_vm6, 0.0, %v6451_v19  ;;  %v6978_v20 = vld [vmem:[%s4020_s18 + $0x690] sm:$0xff]  ;;  %v7001_v19 = vsel %vm11282_vm1, 0.0, %v6465_v24  ;;  %vm11286_vm6 = vcmp.ne.f32.partialorder %v6471_v22, %v6471_v22  ;;  %vm11299_vm1 = vcmp.ne.f32.partialorder %v6515_v25, %v6515_v25  ;;  %v11315_v13 = vld [vmem:[#allocation358_spill] sm:$0xff] }
  0xe7   : > { %11261 = vst [vmem:[#allocation376_spill] sm:$0xff] %v6907_v16  ;;  %11263 = vst [vmem:[#allocation377_spill] sm:$0xff] %v6913_v5  ;;  %v6928_v16 = vld [vmem:[%s4020_s18 + $0x660] sm:$0xff]  ;;  %v6937_v5 = vld [vmem:[%s4020_s18 + $0x678] sm:$0xff] }
  0xe8   : > { %11265 = vst [vmem:[#allocation378_spill] sm:$0xff] %v6919_v0  ;;  %11267 = vst [vmem:[#allocation379_spill] sm:$0xff] %v6925_v6  ;;  %v6963_v6 = vsel %vm11276_vm5, 0.0, %v6448_v18  ;;  %v6975_v0 = vld [vmem:[%s4020_s18 + $0x688] sm:$0xff]  ;;  %v6995_v18 = vsel %vm11280_vm0, 0.0, %v6462_v56  ;;  %vm11284_vm5 = vcmp.ne.f32.partialorder %v6468_v21, %v6468_v21  ;;  %v7013_v56 = vsel %vm11286_vm6, 0.0, %v6471_v22 }
  0xe9   : > { %11268 = vst [vmem:[#allocation380_spill] sm:$0xff] %v6928_v16  ;;  %11269 = vst [vmem:[#allocation381_spill] sm:$0xff] %v6931_v23  ;;  %v7022_v24 = vld [vmem:[%s4020_s18 + $0x6b0] sm:$0xff]  ;;  %v7045_v22 = vsel %vm11291_vm15, 0.0, %v6487_v28  ;;  %vm11295_vm6 = vcmp.ne.f32.partialorder %v6493_v51, %v6493_v51  ;;  %vm11297_vm0 = vcmp.ne.f32.partialorder %v6512_v33, %v6512_v33  ;;  %v7151_v3 = vld [vmem:[%s4020_s18 + $0x708] sm:$0xff] }
  0xea   : > { %11270 = vst [vmem:[#allocation382_spill] sm:$0xff] %v6934_v4  ;;  %11271 = vst [vmem:[#allocation383_spill] sm:$0xff] %v6937_v5  ;;  %v7066_v28 = vld [vmem:[%s4020_s18 + $0x6d0] sm:$0xff]  ;;  %v11327_v5 = vld [vmem:[#allocation362_spill] sm:$0xff] }
  0xeb   : > { %11273 = vst [vmem:[#allocation384_spill] sm:$0xff] %v6951_v7  ;;  %11275 = vst [vmem:[#allocation385_spill] sm:$0xff] %v6957_v17  ;;  %v6972_v7 = vld [vmem:[%s4020_s18 + $0x680] sm:$0xff]  ;;  %v6981_v17 = vld [vmem:[%s4020_s18 + $0x698] sm:$0xff] }
  0xec   : > { %11277 = vst [vmem:[#allocation386_spill] sm:$0xff] %v6963_v6  ;;  %11279 = vst [vmem:[#allocation387_spill] sm:$0xff] %v6969_v57  ;;  %v7007_v57 = vsel %vm11284_vm5, 0.0, %v6468_v21  ;;  %v7019_v6 = vld [vmem:[%s4020_s18 + $0x6a8] sm:$0xff]  ;;  %v7039_v21 = vsel %vm11289_vm9, 0.0, %v6484_v41  ;;  %vm11293_vm5 = vcmp.ne.f32.partialorder %v6490_v29, %v6490_v29  ;;  %v7057_v41 = vsel %vm11295_vm6, 0.0, %v6493_v51 }
  0xed   : > { %11281 = vst [vmem:[#allocation388_spill] sm:$0xff] %v6995_v18  ;;  %11283 = vst [vmem:[#allocation389_spill] sm:$0xff] %v7001_v19  ;;  %v7016_v18 = vld [vmem:[%s4020_s18 + $0x6a0] sm:$0xff]  ;;  %v7025_v19 = vld [vmem:[%s4020_s18 + $0x6b8] sm:$0xff]  ;;  %v7083_v51 = vsel %vm11297_vm0, 0.0, %v6512_v33  ;;  %vm11303_vm6 = vcmp.ne.f32.partialorder %v6521_v46, %v6521_v46 }
  0xee   : > { %11285 = vst [vmem:[#allocation390_spill] sm:$0xff] %v7007_v57  ;;  %11287 = vst [vmem:[#allocation391_spill] sm:$0xff] %v7013_v56  ;;  %v7051_v56 = vsel %vm11293_vm5, 0.0, %v6490_v29  ;;  %v7063_v57 = vld [vmem:[%s4020_s18 + $0x6c8] sm:$0xff]  ;;  %v7089_v29 = vsel %vm11299_vm1, 0.0, %v6515_v25  ;;  %vm11301_vm5 = vcmp.ne.f32.partialorder %v6518_v34, %v6518_v34  ;;  %v7101_v33 = vsel %vm11303_vm6, 0.0, %v6521_v46 }
  0xef   : > { %11288 = vst [vmem:[#allocation392_spill] sm:$0xff] %v7025_v19  ;;  %11290 = vst [vmem:[#allocation393_spill] sm:$0xff] %v7039_v21  ;;  %v7060_v21 = vld [vmem:[%s4020_s18 + $0x6c0] sm:$0xff]  ;;  %v7110_v25 = vld [vmem:[%s4020_s18 + $0x6f0] sm:$0xff]  ;;  %vm11316_vm6 = vcmp.ne.f32.partialorder %v11315_v13, %v11315_v13 }
  0xf0   : > { %11292 = vst [vmem:[#allocation394_spill] sm:$0xff] %v7045_v22  ;;  %11294 = vst [vmem:[#allocation395_spill] sm:$0xff] %v7051_v56  ;;  %v7069_v22 = vld [vmem:[%s4020_s18 + $0x6d8] sm:$0xff]  ;;  %v7107_v56 = vld [vmem:[%s4020_s18 + $0x6e8] sm:$0xff] }
  0xf1   : > { %11296 = vst [vmem:[#allocation396_spill] sm:$0xff] %v7057_v41  ;;  %11298 = vst [vmem:[#allocation397_spill] sm:$0xff] %v7083_v51  ;;  %v7095_v41 = vsel %vm11301_vm5, 0.0, %v6518_v34  ;;  %v7104_v51 = vld [vmem:[%s4020_s18 + $0x6e0] sm:$0xff]  ;;  %v11312_v1 = vld [vmem:[#allocation357_spill] sm:$0xff] }
  0xf2   : > { %11300 = vst [vmem:[#allocation398_spill] sm:$0xff] %v7089_v29  ;;  %11302 = vst [vmem:[#allocation399_spill] sm:$0xff] %v7095_v41  ;;  %v7113_v29 = vld [vmem:[%s4020_s18 + $0x6f8] sm:$0xff]  ;;  %v11306_v46 = vld [vmem:[#allocation355_spill] sm:$0xff]  ;;  %vm11313_vm5 = vcmp.ne.f32.partialorder %v11312_v1, %v11312_v1 }
  0xf3   : > { %11304 = vst [vmem:[#allocation400_spill] sm:$0xff] %v7101_v33  ;;  %11305 = vst [vmem:[#allocation401_spill] sm:$0xff] %v7113_v29  ;;  %vm11307_vm9 = vcmp.ne.f32.partialorder %v11306_v46, %v11306_v46  ;;  %v11309_v33 = vld [vmem:[#allocation356_spill] sm:$0xff]  ;;  %v7139_v14 = vsel %vm11313_vm5, 0.0, %v11312_v1  ;;  %v11318_v1 = vld [vmem:[#allocation359_spill] sm:$0xff] }
  0xf4   : > { %v7127_v34 = vsel %vm11307_vm9, 0.0, %v11306_v46  ;;  %vm11310_vm15 = vcmp.ne.f32.partialorder %v11309_v33, %v11309_v33  ;;  %11314 = vst [vmem:[#allocation357_spill] sm:$0xff] %v7139_v14  ;;  %v7145_v46 = vsel %vm11316_vm6, 0.0, %v11315_v13  ;;  %vm11319_vm0 = vcmp.ne.f32.partialorder %v11318_v1, %v11318_v1  ;;  %v11324_v23 = vld [vmem:[#allocation361_spill] sm:$0xff]  ;;  %v7195_v16 = vld [vmem:[%s4020_s18 + $0x728] sm:$0xff] }
  0xf5   : > { %11308 = vst [vmem:[#allocation355_spill] sm:$0xff] %v7127_v34  ;;  %v7133_v41 = vsel %vm11310_vm15, 0.0, %v11309_v33  ;;  %11317 = vst [vmem:[#allocation358_spill] sm:$0xff] %v7145_v46  ;;  %v7148_v34 = vld [vmem:[%s4020_s18 + $0x700] sm:$0xff]  ;;  %v7154_v33 = vld [vmem:[%s4020_s18 + $0x710] sm:$0xff]  ;;  %v7171_v13 = vsel %vm11319_vm0, 0.0, %v11318_v1  ;;  %vm11325_vm5 = vcmp.ne.f32.partialorder %v11324_v23, %v11324_v23  ;;  %vm11328_vm6 = vcmp.ne.f32.partialorder %v11327_v5, %v11327_v5 }
  0xf6   : > { %11311 = vst [vmem:[#allocation356_spill] sm:$0xff] %v7133_v41  ;;  %v7157_v41 = vld [vmem:[%s4020_s18 + $0x718] sm:$0xff]  ;;  %11320 = vst [vmem:[#allocation359_spill] sm:$0xff] %v7171_v13  ;;  %v11321_v46 = vld [vmem:[#allocation360_spill] sm:$0xff]  ;;  %v7183_v4 = vsel %vm11325_vm5, 0.0, %v11324_v23  ;;  %v7189_v1 = vsel %vm11328_vm6, 0.0, %v11327_v5  ;;  %vm710_vm0 = vcmp.ne.f32.partialorder %v6975_v0, %v6975_v0  ;;  %vm11330_vm9 = vcmp.ne.f32.partialorder %v6596_v49, %v6596_v49 }
  0xf7   : > { %vm11322_vm1 = vcmp.ne.f32.partialorder %v11321_v46, %v11321_v46  ;;  %11326 = vst [vmem:[#allocation361_spill] sm:$0xff] %v7183_v4  ;;  %11329 = vst [vmem:[#allocation362_spill] sm:$0xff] %v7189_v1  ;;  %v7192_v13 = vld [vmem:[%s4020_s18 + $0x720] sm:$0xff]  ;;  %v7215_v23 = vsel %vm11330_vm9, 0.0, %v6596_v49  ;;  %vm11332_vm15 = vcmp.ne.f32.partialorder %v6599_v42, %v6599_v42  ;;  %v7227_v1 = vsel %vm667_vm13, 0.0, %v6602_v53  ;;  %v7239_v4 = vld [vmem:[%s4020_s18 + $0x748] sm:$0xff] }
  0xf8   : > { %v7177_v14 = vsel %vm11322_vm1, 0.0, %v11321_v46  ;;  %v7198_v46 = vld [vmem:[%s4020_s18 + $0x730] sm:$0xff]  ;;  %vm709_vm1 = vcmp.ne.f32.partialorder %v6972_v7, %v6972_v7  ;;  %11331 = vst [vmem:[#allocation402_spill] sm:$0xff] %v7215_v23  ;;  %v7221_v5 = vsel %vm11332_vm15, 0.0, %v6599_v42  ;;  %11334 = vst [vmem:[#allocation404_spill] sm:$0xff] %v7227_v1  ;;  %vm11335_vm6 = vcmp.ne.f32.partialorder %v6605_v38, %v6605_v38  ;;  %v7236_v23 = vld [vmem:[%s4020_s18 + $0x740] sm:$0xff] }
  0xf9   : > { %11323 = vst [vmem:[#allocation360_spill] sm:$0xff] %v7177_v14  ;;  %v7201_v14 = vld [vmem:[%s4020_s18 + $0x738] sm:$0xff]  ;;  %11333 = vst [vmem:[#allocation403_spill] sm:$0xff] %v7221_v5  ;;  %v7233_v49 = vsel %vm11335_vm6, 0.0, %v6605_v38  ;;  %v7242_v42 = vld [vmem:[%s4020_s18 + $0x750] sm:$0xff]  ;;  %vm713_vm13 = vcmp.ne.f32.partialorder %v7016_v18, %v7016_v18  ;;  %vm714_vm15 = vcmp.ne.f32.partialorder %v7019_v6, %v7019_v6  ;;  %vm716_vm6 = vcmp.ne.f32.partialorder %v7025_v19, %v7025_v19 }
  0xfa   : > { %11336 = vst [vmem:[#allocation405_spill] sm:$0xff] %v7233_v49  ;;  %v7245_v5 = vld [vmem:[%s4020_s18 + $0x758] sm:$0xff]  ;;  %v7259_v38 = vsel %vm669_vm14, 0.0, %v6624_v58  ;;  %vm11338_vm5 = vcmp.ne.f32.partialorder %v6627_v54, %v6627_v54  ;;  %vm11340_vm9 = vcmp.ne.f32.partialorder %v6630_v40, %v6630_v40  ;;  %v11342_v1 = vld [vmem:[#allocation363_spill] sm:$0xff]  ;;  %v7283_v19 = vld [vmem:[%s4020_s18 + $0x768] sm:$0xff]  ;;  %vm717_vm14 = vcmp.ne.f32.partialorder %v7060_v21, %v7060_v21 }
  0xfb   : > { %11337 = vst [vmem:[#allocation406_spill] sm:$0xff] %v7259_v38  ;;  %v7265_v53 = vsel %vm11338_vm5, 0.0, %v6627_v54  ;;  %v7271_v49 = vsel %vm11340_vm9, 0.0, %v6630_v40  ;;  %v7277_v58 = vsel %vm672_vm2, 0.0, %v11342_v1  ;;  %v7280_v38 = vld [vmem:[%s4020_s18 + $0x760] sm:$0xff]  ;;  %v7286_v54 = vld [vmem:[%s4020_s18 + $0x770] sm:$0xff]  ;;  %vm718_vm5 = vcmp.ne.f32.partialorder %v7063_v57, %v7063_v57 }
  0xfc   : > { %11339 = vst [vmem:[#allocation407_spill] sm:$0xff] %v7265_v53  ;;  %11341 = vst [vmem:[#allocation408_spill] sm:$0xff] %v7271_v49  ;;  %v7289_v53 = vld [vmem:[%s4020_s18 + $0x778] sm:$0xff]  ;;  %vm719_vm9 = vcmp.ne.f32.partialorder %v7066_v28, %v7066_v28  ;;  %vm720_vm2 = vcmp.ne.f32.partialorder %v7069_v22, %v7069_v22  ;;  %v7303_v40 = vsel %vm673_vm8, 0.0, %v6652_v62  ;;  %v7309_v1 = vsel %vm674_vm10, 0.0, %v6655_v2  ;;  %v7327_v49 = vld [vmem:[%s4020_s18 + $0x788] sm:$0xff] }
  0xfd   : > { %11343 = vst [vmem:[#allocation363_spill] sm:$0xff] %v7277_v58  ;;  %11344 = vst [vmem:[#allocation409_spill] sm:$0xff] %v7303_v40  ;;  %v7315_v58 = vsel %vm675_vm12, 0.0, %v6658_v12  ;;  %v7321_v62 = vsel %vm676_vm7, 0.0, %v6661_v50  ;;  %v7324_v40 = vld [vmem:[%s4020_s18 + $0x780] sm:$0xff]  ;;  %v7330_v2 = vld [vmem:[%s4020_s18 + $0x790] sm:$0xff]  ;;  %vm721_vm12 = vcmp.ne.f32.partialorder %v7104_v51, %v7104_v51  ;;  %vm11350_vm7 = vcmp.ne.f32.partialorder %v6689_v30, %v6689_v30 }
  0xfe   : > { %11345 = vst [vmem:[#allocation410_spill] sm:$0xff] %v7309_v1  ;;  %11346 = vst [vmem:[#allocation411_spill] sm:$0xff] %v7315_v58  ;;  %v7333_v1 = vld [vmem:[%s4020_s18 + $0x798] sm:$0xff]  ;;  %v7347_v50 = vsel %vm677_vm11, 0.0, %v6680_v59  ;;  %v7353_v12 = vsel %vm678_vm4, 0.0, %v6683_v10  ;;  %v7365_v59 = vsel %vm11350_vm7, 0.0, %v6689_v30  ;;  %vm11352_vm8 = vcmp.ne.f32.partialorder %v6708_v43, %v6708_v43 }
  0xff   : > { %11347 = vst [vmem:[#allocation412_spill] sm:$0xff] %v7321_v62  ;;  %11348 = vst [vmem:[#allocation413_spill] sm:$0xff] %v7347_v50  ;;  %v7359_v62 = vsel %vm679_vm3, 0.0, %v6686_v63  ;;  %v7368_v50 = vld [vmem:[%s4020_s18 + $0x7a0] sm:$0xff]  ;;  %v7371_v58 = vld [vmem:[%s4020_s18 + $0x7a8] sm:$0xff]  ;;  %v7391_v63 = vsel %vm11352_vm8, 0.0, %v6708_v43  ;;  %vm11354_vm11 = vcmp.ne.f32.partialorder %v6711_v32, %v6711_v32  ;;  %vm11355_vm3 = vcmp.ne.f32.partialorder %v6714_v26, %v6714_v26 }
 0x100   : > { %11349 = vst [vmem:[#allocation414_spill] sm:$0xff] %v7359_v62  ;;  %11351 = vst [vmem:[#allocation415_spill] sm:$0xff] %v7365_v59  ;;  %v7374_v29 = vld [vmem:[%s4020_s18 + $0x7b0] sm:$0xff]  ;;  %v7377_v10 = vld [vmem:[%s4020_s18 + $0x7b8] sm:$0xff]  ;;  %v7397_v30 = vsel %vm11354_vm11, 0.0, %v6711_v32  ;;  %v7403_v59 = vsel %vm11355_vm3, 0.0, %v6714_v26  ;;  %vm11356_vm7 = vcmp.ne.f32.partialorder %v6717_v47, %v6717_v47  ;;  %vm11360_vm8 = vcmp.ne.f32.partialorder %v6739_v37, %v6739_v37 }
 0x101   : > { %11353 = vst [vmem:[#allocation416_spill] sm:$0xff] %v7391_v63  ;;  %v7409_v62 = vsel %vm11356_vm7, 0.0, %v6717_v47  ;;  %v7412_v43 = vld [vmem:[%s4020_s18 + $0x7c0] sm:$0xff]  ;;  %v7415_v63 = vld [vmem:[%s4020_s18 + $0x7c8] sm:$0xff]  ;;  %vm11358_vm7 = vcmp.ne.f32.partialorder %v6736_v48, %v6736_v48  ;;  %v7435_v32 = vsel %vm11360_vm8, 0.0, %v6739_v37  ;;  %vm11361_vm3 = vcmp.ne.f32.partialorder %v6742_v15, %v6742_v15 }
 0x102   : > { %11357 = vst [vmem:[#allocation417_spill] sm:$0xff] %v7409_v62  ;;  %v7429_v26 = vsel %vm11358_vm7, 0.0, %v6736_v48  ;;  %v7441_v47 = vsel %vm11361_vm3, 0.0, %v6742_v15  ;;  %vm11362_vm4 = vcmp.ne.f32.partialorder %v6745_v39, %v6745_v39  ;;  %v7450_v48 = vld [vmem:[%s4020_s18 + $0x7d0] sm:$0xff]  ;;  %vm11366_vm8 = vcmp.ne.f32.partialorder %v6767_v31, %v6767_v31 }
 0x103   : > { %11359 = vst [vmem:[#allocation418_spill] sm:$0xff] %v7429_v26  ;;  %v7447_v62 = vsel %vm11362_vm4, 0.0, %v6745_v39  ;;  %v7453_v26 = vld [vmem:[%s4020_s18 + $0x7d8] sm:$0xff]  ;;  %vm11364_vm4 = vcmp.ne.f32.partialorder %v6764_v44, %v6764_v44  ;;  %v7473_v39 = vsel %vm11366_vm8, 0.0, %v6767_v31  ;;  %vm11367_vm3 = vcmp.ne.f32.partialorder %v6770_v60, %v6770_v60 }
 0x104   : > { %11363 = vst [vmem:[#allocation419_spill] sm:$0xff] %v7447_v62  ;;  %v7467_v15 = vsel %vm11364_vm4, 0.0, %v6764_v44  ;;  %v7479_v37 = vsel %vm11367_vm3, 0.0, %v6770_v60  ;;  %vm11368_vm11 = vcmp.ne.f32.partialorder %v6773_v35, %v6773_v35  ;;  %v7488_v44 = vld [vmem:[%s4020_s18 + $0x7e0] sm:$0xff]  ;;  %vm11372_vm10 = vcmp.ne.f32.partialorder %v6799_v61, %v6799_v61 }
 0x105   : > { %11365 = vst [vmem:[#allocation420_spill] sm:$0xff] %v7467_v15  ;;  %v7485_v62 = vsel %vm11368_vm11, 0.0, %v6773_v35  ;;  %v7491_v15 = vld [vmem:[%s4020_s18 + $0x7e8] sm:$0xff]  ;;  %vm11370_vm11 = vcmp.ne.f32.partialorder %v6796_v9, %v6796_v9  ;;  %v7511_v60 = vsel %vm11372_vm10, 0.0, %v6799_v61  ;;  %vm11373_vm4 = vcmp.ne.f32.partialorder %v6802_v45, %v6802_v45 }
 0x106   : > { %11369 = vst [vmem:[#allocation421_spill] sm:$0xff] %v7485_v62  ;;  %v7505_v35 = vsel %vm11370_vm11, 0.0, %v6796_v9  ;;  %v7517_v31 = vsel %vm11373_vm4, 0.0, %v6802_v45  ;;  %vm11374_vm7 = vcmp.ne.f32.partialorder %v6805_v11, %v6805_v11  ;;  %v7526_v9 = vld [vmem:[%s4020_s18 + $0x7f0] sm:$0xff]  ;;  %vm11378_vm8 = vcmp.ne.f32.partialorder %v6843_v8, %v6843_v8 }
 0x107   : > { %11371 = vst [vmem:[#allocation422_spill] sm:$0xff] %v7505_v35  ;;  %v7523_v62 = vsel %vm11374_vm7, 0.0, %v6805_v11  ;;  %v7529_v35 = vld [vmem:[%s4020_s18 + $0x7f8] sm:$0xff]  ;;  %vm11376_vm7 = vcmp.ne.f32.partialorder %v6840_v52, %v6840_v52  ;;  %v7549_v45 = vsel %vm11378_vm8, 0.0, %v6843_v8  ;;  %vm11380_vm11 = vcmp.ne.f32.partialorder %v6846_v27, %v6846_v27 }
 0x108   : > { %11375 = vst [vmem:[#allocation423_spill] sm:$0xff] %v7523_v62  ;;  %v7543_v61 = vsel %vm11376_vm7, 0.0, %v6840_v52  ;;  %11379 = vst [vmem:[#allocation425_spill] sm:$0xff] %v7549_v45  ;;  %v7555_v11 = vsel %vm11380_vm11, 0.0, %v6846_v27  ;;  %vm11382_vm3 = vcmp.ne.f32.partialorder %v6849_v55, %v6849_v55  ;;  %vm11384_vm11 = vcmp.ne.f32.partialorder %v6884_v36, %v6884_v36  ;;  %v11389_v27 = vld [vmem:[#allocation374_spill] sm:$0xff] }
 0x109   : > { %11377 = vst [vmem:[#allocation424_spill] sm:$0xff] %v7543_v61  ;;  %11381 = vst [vmem:[#allocation426_spill] sm:$0xff] %v7555_v11  ;;  %v7561_v62 = vsel %vm11382_vm3, 0.0, %v6849_v55  ;;  %v7575_v52 = vsel %vm11384_vm11, 0.0, %v6884_v36  ;;  %v11386_v55 = vld [vmem:[#allocation373_spill] sm:$0xff]  ;;  %vm11390_vm4 = vcmp.ne.f32.partialorder %v11389_v27, %v11389_v27  ;;  %v11392_v11 = vld [vmem:[#allocation375_spill] sm:$0xff]  ;;  %vm756_vm11 = vcmp.ne.f32.partialorder %v7529_v35, %v7529_v35 }
 0x10a   : > { %11383 = vst [vmem:[#allocation427_spill] sm:$0xff] %v7561_v62  ;;  %11385 = vst [vmem:[#allocation428_spill] sm:$0xff] %v7575_v52  ;;  %vm11387_vm3 = vcmp.ne.f32.partialorder %v11386_v55, %v11386_v55  ;;  %v7587_v62 = vsel %vm11390_vm4, 0.0, %v11389_v27  ;;  %vm11393_vm10 = vcmp.ne.f32.partialorder %v11392_v11, %v11392_v11  ;;  %v11395_v36 = vld [vmem:[#allocation380_spill] sm:$0xff] }
 0x10b   : > { %v7581_v8 = vsel %vm11387_vm3, 0.0, %v11386_v55  ;;  %11391 = vst [vmem:[#allocation374_spill] sm:$0xff] %v7587_v62  ;;  %v7593_v45 = vsel %vm11393_vm10, 0.0, %v11392_v11  ;;  %vm11396_vm4 = vcmp.ne.f32.partialorder %v11395_v36, %v11395_v36  ;;  %v11398_v11 = vld [vmem:[#allocation381_spill] sm:$0xff]  ;;  %vm754_vm3 = vcmp.ne.f32.partialorder %v7491_v15, %v7491_v15 }
 0x10c   : > { %11388 = vst [vmem:[#allocation373_spill] sm:$0xff] %v7581_v8  ;;  %11394 = vst [vmem:[#allocation375_spill] sm:$0xff] %v7593_v45  ;;  %v7607_v55 = vsel %vm11396_vm4, 0.0, %v11395_v36  ;;  %vm11399_vm10 = vcmp.ne.f32.partialorder %v11398_v11, %v11398_v11  ;;  %v11401_v45 = vld [vmem:[#allocation382_spill] sm:$0xff]  ;;  %v11404_v8 = vld [vmem:[#allocation383_spill] sm:$0xff]  ;;  %vm753_vm4 = vcmp.ne.f32.partialorder %v7488_v44, %v7488_v44 }
 0x10d   : > { %11397 = vst [vmem:[#allocation380_spill] sm:$0xff] %v7607_v55  ;;  %v7613_v27 = vsel %vm11399_vm10, 0.0, %v11398_v11  ;;  %vm11402_vm8 = vcmp.ne.f32.partialorder %v11401_v45, %v11401_v45  ;;  %vm11405_vm7 = vcmp.ne.f32.partialorder %v11404_v8, %v11404_v8  ;;  %vm755_vm10 = vcmp.ne.f32.partialorder %v7526_v9, %v7526_v9 }
 0x10e   : > { %11400 = vst [vmem:[#allocation381_spill] sm:$0xff] %v7613_v27  ;;  %v7619_v62 = vsel %vm11402_vm8, 0.0, %v11401_v45  ;;  %v7625_v52 = vsel %vm11405_vm7, 0.0, %v11404_v8  ;;  %v7639_v45 = vsel %vm709_vm1, 0.0, %v6972_v7  ;;  %v7645_v8 = vsel %vm710_vm0, 0.0, %v6975_v0 }
 0x10f   : > { %11403 = vst [vmem:[#allocation382_spill] sm:$0xff] %v7619_v62  ;;  %11406 = vst [vmem:[#allocation383_spill] sm:$0xff] %v7625_v52  ;;  %vm11409_vm7 = vcmp.ne.f32.partialorder %v6978_v20, %v6978_v20  ;;  %vm11411_vm8 = vcmp.ne.f32.partialorder %v6981_v17, %v6981_v17  ;;  %v7663_v7 = vsel %vm713_vm13, 0.0, %v7016_v18  ;;  %v7669_v0 = vsel %vm714_vm15, 0.0, %v7019_v6  ;;  %v2042_v62 = vld [vmem:[%s8058_s23 + $0x28] sm:$0xff] }
 0x110   : > { %11407 = vst [vmem:[#allocation429_spill] sm:$0xff] %v7639_v45  ;;  %11408 = vst [vmem:[#allocation430_spill] sm:$0xff] %v7645_v8  ;;  %v7651_v36 = vsel %vm11409_vm7, 0.0, %v6978_v20  ;;  %v7657_v11 = vsel %vm11411_vm8, 0.0, %v6981_v17  ;;  %vm11415_vm1 = vcmp.ne.f32.partialorder %v7022_v24, %v7022_v24  ;;  %v11417_v17 = vld [vmem:[#allocation392_spill] sm:$0xff]  ;;  %v7687_v18 = vsel %vm717_vm14, 0.0, %v7060_v21 }
 0x111   : > { %11410 = vst [vmem:[#allocation431_spill] sm:$0xff] %v7651_v36  ;;  %11412 = vst [vmem:[#allocation432_spill] sm:$0xff] %v7657_v11  ;;  %v7675_v20 = vsel %vm11415_vm1, 0.0, %v7022_v24  ;;  %v7681_v11 = vsel %vm716_vm6, 0.0, %v11417_v17  ;;  %v7693_v6 = vsel %vm718_vm5, 0.0, %v7063_v57  ;;  %v7699_v24 = vsel %vm719_vm9, 0.0, %v7066_v28 }
 0x112   : > { %11413 = vst [vmem:[#allocation433_spill] sm:$0xff] %v7663_v7  ;;  %11414 = vst [vmem:[#allocation434_spill] sm:$0xff] %v7669_v0  ;;  %v7705_v17 = vsel %vm720_vm2, 0.0, %v7069_v22  ;;  %v7711_v21 = vsel %vm721_vm12, 0.0, %v7104_v51  ;;  %vm11424_vm0 = vcmp.ne.f32.partialorder %v7107_v56, %v7107_v56  ;;  %vm11426_vm13 = vcmp.ne.f32.partialorder %v7110_v25, %v7110_v25  ;;  %v11428_v22 = vld [vmem:[#allocation401_spill] sm:$0xff]  ;;  %v11546_v8 = vld [vmem:[#allocation126_spill] sm:$0xff] }
 0x113   : > { %11416 = vst [vmem:[#allocation435_spill] sm:$0xff] %v7675_v20  ;;  %11418 = vst [vmem:[#allocation392_spill] sm:$0xff] %v7681_v11  ;;  %v7717_v57 = vsel %vm11424_vm0, 0.0, %v7107_v56  ;;  %v7723_v28 = vsel %vm11426_vm13, 0.0, %v7110_v25  ;;  %vm11429_vm15 = vcmp.ne.f32.partialorder %v11428_v22, %v11428_v22  ;;  %vm11431_vm6 = vcmp.ne.f32.partialorder %v7148_v34, %v7148_v34  ;;  %v2039_v20 = vld [vmem:[%s8058_s23 + $0x10] sm:$0xff] }
 0x114   : > { %11419 = vst [vmem:[#allocation436_spill] sm:$0xff] %v7687_v18  ;;  %11420 = vst [vmem:[#allocation437_spill] sm:$0xff] %v7693_v6  ;;  %v7735_v51 = vsel %vm11431_vm6, 0.0, %v7148_v34  ;;  %vm11433_vm14 = vcmp.ne.f32.partialorder %v7151_v3, %v7151_v3  ;;  %vm11435_vm5 = vcmp.ne.f32.partialorder %v7154_v33, %v7154_v33  ;;  %vm11437_vm9 = vcmp.ne.f32.partialorder %v7157_v41, %v7157_v41  ;;  %v2037_v6 = vld [vmem:[%s8058_s23] sm:$0xff] }
 0x115   : > { %11421 = vst [vmem:[#allocation438_spill] sm:$0xff] %v7699_v24  ;;  %11422 = vst [vmem:[#allocation439_spill] sm:$0xff] %v7705_v17  ;;  %v7729_v17 = vsel %vm11429_vm15, 0.0, %v11428_v22  ;;  %v7741_v56 = vsel %vm11433_vm14, 0.0, %v7151_v3  ;;  %v7747_v25 = vsel %vm11435_vm5, 0.0, %v7154_v33  ;;  %v7753_v22 = vsel %vm11437_vm9, 0.0, %v7157_v41 }
 0x116   : > { %11423 = vst [vmem:[#allocation440_spill] sm:$0xff] %v7711_v21  ;;  %11425 = vst [vmem:[#allocation441_spill] sm:$0xff] %v7717_v57  ;;  %vm11439_vm2 = vcmp.ne.f32.partialorder %v7192_v13, %v7192_v13  ;;  %vm11441_vm12 = vcmp.ne.f32.partialorder %v7195_v16, %v7195_v16  ;;  %vm11443_vm7 = vcmp.ne.f32.partialorder %v7198_v46, %v7198_v46  ;;  %v11540_v21 = vld [vmem:[#allocation46_spill] sm:$0xff]  ;;  %v11542_v18 = vld [vmem:[#allocation47_spill] sm:$0xff] }
 0x117   : > { %11427 = vst [vmem:[#allocation442_spill] sm:$0xff] %v7723_v28  ;;  %11430 = vst [vmem:[#allocation401_spill] sm:$0xff] %v7729_v17  ;;  %v7759_v34 = vsel %vm11439_vm2, 0.0, %v7192_v13  ;;  %v7765_v3 = vsel %vm11441_vm12, 0.0, %v7195_v16  ;;  %v7771_v33 = vsel %vm11443_vm7, 0.0, %v7198_v46  ;;  %vm11445_vm8 = vcmp.ne.f32.partialorder %v7201_v14, %v7201_v14  ;;  %v11526_v17 = vld [vmem:[#allocation43_spill] sm:$0xff] }
 0x118   : > { %11432 = vst [vmem:[#allocation443_spill] sm:$0xff] %v7735_v51  ;;  %11434 = vst [vmem:[#allocation444_spill] sm:$0xff] %v7741_v56  ;;  %v7777_v41 = vsel %vm11445_vm8, 0.0, %v7201_v14  ;;  %vm11447_vm1 = vcmp.ne.f32.partialorder %v7236_v23, %v7236_v23  ;;  %vm11449_vm0 = vcmp.ne.f32.partialorder %v7239_v4, %v7239_v4  ;;  %vm11451_vm13 = vcmp.ne.f32.partialorder %v7242_v42, %v7242_v42  ;;  %v11531_v28 = vld [vmem:[#allocation45_spill] sm:$0xff] }
 0x119   : > { %11436 = vst [vmem:[#allocation445_spill] sm:$0xff] %v7747_v25  ;;  %11438 = vst [vmem:[#allocation446_spill] sm:$0xff] %v7753_v22  ;;  %v7783_v13 = vsel %vm11447_vm1, 0.0, %v7236_v23  ;;  %v7789_v16 = vsel %vm11449_vm0, 0.0, %v7239_v4  ;;  %v7795_v46 = vsel %vm11451_vm13, 0.0, %v7242_v42  ;;  %vm11453_vm15 = vcmp.ne.f32.partialorder %v7245_v5, %v7245_v5  ;;  %v11521_v25 = vld [vmem:[#allocation41_spill] sm:$0xff] }
 0x11a   : > { %11440 = vst [vmem:[#allocation447_spill] sm:$0xff] %v7759_v34  ;;  %11442 = vst [vmem:[#allocation448_spill] sm:$0xff] %v7765_v3  ;;  %v7801_v14 = vsel %vm11453_vm15, 0.0, %v7245_v5  ;;  %vm11455_vm6 = vcmp.ne.f32.partialorder %v7280_v38, %v7280_v38  ;;  %vm11457_vm14 = vcmp.ne.f32.partialorder %v7283_v19, %v7283_v19  ;;  %vm11459_vm5 = vcmp.ne.f32.partialorder %v7286_v54, %v7286_v54 }
 0x11b   : > { %11444 = vst [vmem:[#allocation449_spill] sm:$0xff] %v7771_v33  ;;  %11446 = vst [vmem:[#allocation450_spill] sm:$0xff] %v7777_v41  ;;  %v7807_v23 = vsel %vm11455_vm6, 0.0, %v7280_v38  ;;  %v7813_v4 = vsel %vm11457_vm14, 0.0, %v7283_v19  ;;  %v7819_v42 = vsel %vm11459_vm5, 0.0, %v7286_v54  ;;  %vm11461_vm9 = vcmp.ne.f32.partialorder %v7289_v53, %v7289_v53  ;;  %v11519_v41 = vld [vmem:[#allocation39_spill] sm:$0xff] }
 0x11c   : > { %11448 = vst [vmem:[#allocation451_spill] sm:$0xff] %v7783_v13  ;;  %11450 = vst [vmem:[#allocation452_spill] sm:$0xff] %v7789_v16  ;;  %v7825_v5 = vsel %vm11461_vm9, 0.0, %v7289_v53  ;;  %vm11463_vm2 = vcmp.ne.f32.partialorder %v7324_v40, %v7324_v40  ;;  %vm11465_vm12 = vcmp.ne.f32.partialorder %v7327_v49, %v7327_v49  ;;  %vm11467_vm7 = vcmp.ne.f32.partialorder %v7330_v2, %v7330_v2  ;;  %v11517_v16 = vld [vmem:[#allocation37_spill] sm:$0xff]  ;;  %v11518_v13 = vld [vmem:[#allocation38_spill] sm:$0xff] }
 0x11d   : > { %11452 = vst [vmem:[#allocation453_spill] sm:$0xff] %v7795_v46  ;;  %11454 = vst [vmem:[#allocation454_spill] sm:$0xff] %v7801_v14  ;;  %v7831_v38 = vsel %vm11463_vm2, 0.0, %v7324_v40  ;;  %v7837_v19 = vsel %vm11465_vm12, 0.0, %v7327_v49  ;;  %v7843_v54 = vsel %vm11467_vm7, 0.0, %v7330_v2  ;;  %vm11469_vm8 = vcmp.ne.f32.partialorder %v7333_v1, %v7333_v1  ;;  %v11515_v14 = vld [vmem:[#allocation35_spill] sm:$0xff] }
 0x11e   : > { %11456 = vst [vmem:[#allocation455_spill] sm:$0xff] %v7807_v23  ;;  %11458 = vst [vmem:[#allocation456_spill] sm:$0xff] %v7813_v4  ;;  %v7849_v53 = vsel %vm11469_vm8, 0.0, %v7333_v1  ;;  %vm11471_vm1 = vcmp.ne.f32.partialorder %v7368_v50, %v7368_v50  ;;  %vm11473_vm0 = vcmp.ne.f32.partialorder %v7371_v58, %v7371_v58  ;;  %vm11475_vm13 = vcmp.ne.f32.partialorder %v7374_v29, %v7374_v29  ;;  %v11513_v4 = vld [vmem:[#allocation33_spill] sm:$0xff]  ;;  %v11514_v23 = vld [vmem:[#allocation34_spill] sm:$0xff] }
 0x11f   : > { %11460 = vst [vmem:[#allocation457_spill] sm:$0xff] %v7819_v42  ;;  %11462 = vst [vmem:[#allocation458_spill] sm:$0xff] %v7825_v5  ;;  %v7855_v40 = vsel %vm11471_vm1, 0.0, %v7368_v50  ;;  %v7861_v49 = vsel %vm11473_vm0, 0.0, %v7371_v58  ;;  %v7867_v2 = vsel %vm11475_vm13, 0.0, %v7374_v29  ;;  %vm11477_vm15 = vcmp.ne.f32.partialorder %v7377_v10, %v7377_v10  ;;  %v11511_v5 = vld [vmem:[#allocation31_spill] sm:$0xff] }
 0x120   : > { %11464 = vst [vmem:[#allocation459_spill] sm:$0xff] %v7831_v38  ;;  %11466 = vst [vmem:[#allocation460_spill] sm:$0xff] %v7837_v19  ;;  %v7873_v1 = vsel %vm11477_vm15, 0.0, %v7377_v10  ;;  %vm11479_vm6 = vcmp.ne.f32.partialorder %v7412_v43, %v7412_v43  ;;  %vm11481_vm14 = vcmp.ne.f32.partialorder %v7415_v63, %v7415_v63  ;;  %vm11483_vm5 = vcmp.ne.f32.partialorder %v7450_v48, %v7450_v48  ;;  %v11509_v19 = vld [vmem:[#allocation29_spill] sm:$0xff]  ;;  %v11510_v38 = vld [vmem:[#allocation30_spill] sm:$0xff] }
 0x121   : > { %11468 = vst [vmem:[#allocation461_spill] sm:$0xff] %v7843_v54  ;;  %11470 = vst [vmem:[#allocation462_spill] sm:$0xff] %v7849_v53  ;;  %v7879_v50 = vsel %vm11479_vm6, 0.0, %v7412_v43  ;;  %v7885_v58 = vsel %vm11481_vm14, 0.0, %v7415_v63  ;;  %v7891_v29 = vsel %vm11483_vm5, 0.0, %v7450_v48  ;;  %vm11485_vm9 = vcmp.ne.f32.partialorder %v7453_v26, %v7453_v26  ;;  %v11507_v53 = vld [vmem:[#allocation27_spill] sm:$0xff] }
 0x122   : > { %11472 = vst [vmem:[#allocation463_spill] sm:$0xff] %v7855_v40  ;;  %11474 = vst [vmem:[#allocation464_spill] sm:$0xff] %v7861_v49  ;;  %v7897_v10 = vsel %vm11485_vm9, 0.0, %v7453_v26  ;;  %v7903_v43 = vsel %vm753_vm4, 0.0, %v7488_v44  ;;  %v7909_v63 = vsel %vm754_vm3, 0.0, %v7491_v15  ;;  %v7915_v48 = vsel %vm755_vm10, 0.0, %v7526_v9 }
 0x123   : > { %11476 = vst [vmem:[#allocation465_spill] sm:$0xff] %v7867_v2  ;;  %11478 = vst [vmem:[#allocation466_spill] sm:$0xff] %v7873_v1  ;;  %v7921_v26 = vsel %vm756_vm11, 0.0, %v7529_v35  ;;  %v11491_v44 = vld [vmem:[#allocation3_spill] sm:$0xff]  ;;  %v11494_v15 = vld [vmem:[#allocation6_spill] sm:$0xff]  ;;  %vm1033_vm13 = vcmp.eq.f32.partialorder %v11511_v5, inf }
 0x124   : > { %11480 = vst [vmem:[#allocation467_spill] sm:$0xff] %v7879_v50  ;;  %11482 = vst [vmem:[#allocation468_spill] sm:$0xff] %v7885_v58  ;;  %vm1013_vm4 = vcmp.eq.f32.partialorder %v11491_v44, inf  ;;  %vm1016_vm3 = vcmp.eq.f32.partialorder %v11494_v15, inf  ;;  %v11497_v9 = vld [vmem:[#allocation9_spill] sm:$0xff]  ;;  %v11499_v58 = vld [vmem:[#allocation11_spill] sm:$0xff] }
 0x125   : > { %11484 = vst [vmem:[#allocation469_spill] sm:$0xff] %v7891_v29  ;;  %11486 = vst [vmem:[#allocation470_spill] sm:$0xff] %v7897_v10  ;;  %v11493_v10 = vld [vmem:[#allocation5_spill] sm:$0xff]  ;;  %v11496_v29 = vld [vmem:[#allocation8_spill] sm:$0xff]  ;;  %vm1035_vm6 = vcmp.eq.f32.partialorder %v11513_v4, inf  ;;  %vm1036_vm14 = vcmp.eq.f32.partialorder %v11514_v23, inf }
 0x126   : > { %11487 = vst [vmem:[#allocation471_spill] sm:$0xff] %v7903_v43  ;;  %11488 = vst [vmem:[#allocation472_spill] sm:$0xff] %v7909_v63  ;;  %v11492_v43 = vld [vmem:[#allocation4_spill] sm:$0xff]  ;;  %vm1015_vm12 = vcmp.eq.f32.partialorder %v11493_v10, inf  ;;  %v11495_v63 = vld [vmem:[#allocation7_spill] sm:$0xff]  ;;  %vm1018_vm8 = vcmp.eq.f32.partialorder %v11496_v29, inf }
 0x127   : > { %11489 = vst [vmem:[#allocation473_spill] sm:$0xff] %v7915_v48  ;;  %11490 = vst [vmem:[#allocation474_spill] sm:$0xff] %v7921_v26  ;;  %vm1014_vm2 = vcmp.eq.f32.partialorder %v11492_v43, inf  ;;  %vm1017_vm7 = vcmp.eq.f32.partialorder %v11495_v63, inf  ;;  %v11498_v48 = vld [vmem:[#allocation10_spill] sm:$0xff]  ;;  %v11500_v35 = vld [vmem:[#allocation12_spill] sm:$0xff] }
 0x128   : > { %v11501_v26 = vld [vmem:[#allocation14_spill] sm:$0xff]  ;;  %v11502_v50 = vld [vmem:[#allocation19_spill] sm:$0xff]  ;;  %v11503_v1 = vld [vmem:[#allocation20_spill] sm:$0xff]  ;;  %vm1037_vm5 = vcmp.eq.f32.partialorder %v11515_v14, inf  ;;  %vm1040_vm1 = vcmp.eq.f32.partialorder %v11518_v13, inf  ;;  %vm1041_vm0 = vcmp.eq.f32.partialorder %v11519_v41, inf }
 0x129   : > { %v11504_v2 = vld [vmem:[#allocation22_spill] sm:$0xff]  ;;  %v11505_v49 = vld [vmem:[#allocation24_spill] sm:$0xff]  ;;  %v1269_v3 = vsel %vm1013_vm4, 3.4028235e+38, %v11491_v44  ;;  %v1270_v34 = vsel %vm1014_vm2, 3.4028235e+38, %v11492_v43 }
 0x12a   : > { %v11506_v40 = vld [vmem:[#allocation26_spill] sm:$0xff]  ;;  %v11508_v54 = vld [vmem:[#allocation28_spill] sm:$0xff]  ;;  %v1271_v22 = vsel %vm1015_vm12, 3.4028235e+38, %v11493_v10  ;;  %vm1043_vm10 = vcmp.eq.f32.partialorder %v11521_v25, inf  ;;  %vm11523_vm2 = vcmp.eq.f32.partialorder %v11497_v9, inf }
 0x12b   : > { %v11512_v42 = vld [vmem:[#allocation32_spill] sm:$0xff]  ;;  %v1272_v56 = vsel %vm1016_vm3, 3.4028235e+38, %v11494_v15  ;;  %v1273_v51 = vsel %vm1017_vm7, 3.4028235e+38, %v11495_v63  ;;  %v11522_v43 = vld [vmem:[#allocation42_spill] sm:$0xff] }
 0x12c   : > { %vm1034_vm15 = vcmp.eq.f32.partialorder %v11512_v42, inf  ;;  %v11516_v46 = vld [vmem:[#allocation36_spill] sm:$0xff]  ;;  %v7972_v44 = vsel %vm1018_vm8, 3.4028235e+38, %v11496_v29  ;;  %v7978_v10 = vsel %vm11523_vm2, 3.4028235e+38, %v11497_v9 }
 0x12d   : > { %vm1038_vm9 = vcmp.eq.f32.partialorder %v11516_v46, inf  ;;  %v11520_v33 = vld [vmem:[#allocation40_spill] sm:$0xff]  ;;  %vm11524_vm12 = vcmp.eq.f32.partialorder %v11498_v48, inf  ;;  %vm11525_vm3 = vcmp.eq.f32.partialorder %v11499_v58, inf  ;;  %vm11527_vm8 = vcmp.eq.f32.partialorder %v11500_v35, inf }
 0x12e   : > { %vm1042_vm11 = vcmp.eq.f32.partialorder %v11520_v33, inf  ;;  %v7983_v15 = vsel %vm11524_vm12, 3.4028235e+38, %v11498_v48  ;;  %v7988_v63 = vsel %vm11525_vm3, 3.4028235e+38, %v11499_v58  ;;  %vm11528_vm2 = vcmp.eq.f32.partialorder %v11501_v26, inf }
 0x12f   : > { %v7994_v29 = vsel %vm11527_vm8, 3.4028235e+38, %v11500_v35  ;;  %v7999_v9 = vsel %vm11528_vm2, 3.4028235e+38, %v11501_v26  ;;  %vm11529_vm12 = vcmp.eq.f32.partialorder %v11502_v50, inf  ;;  %v11530_v58 = vld [vmem:[#allocation44_spill] sm:$0xff] }
 0x130   : > { %v8004_v48 = vsel %vm11529_vm12, 3.4028235e+38, %v11502_v50  ;;  %vm1046_vm3 = vcmp.eq.f32.partialorder %v11530_v58, inf  ;;  %vm11532_vm7 = vcmp.eq.f32.partialorder %v11503_v1, inf  ;;  %vm11533_vm8 = vcmp.eq.f32.partialorder %v11504_v2, inf }
 0x131   : > { %v8011_v57 = vsel %vm11532_vm7, 3.4028235e+38, %v11503_v1  ;;  %v8016_v35 = vsel %vm11533_vm8, 3.4028235e+38, %v11504_v2  ;;  %vm11534_vm2 = vcmp.eq.f32.partialorder %v11505_v49, inf  ;;  %vm11535_vm12 = vcmp.eq.f32.partialorder %v11506_v40, inf }
 0x132   : > { %v8021_v26 = vsel %vm11534_vm2, 3.4028235e+38, %v11505_v49  ;;  %v8026_v50 = vsel %vm11535_vm12, 3.4028235e+38, %v11506_v40  ;;  %vm11536_vm4 = vcmp.eq.f32.partialorder %v11507_v53, inf  ;;  %vm11537_vm7 = vcmp.eq.f32.partialorder %v11508_v54, inf }
 0x133   : > { %v8031_v1 = vsel %vm11536_vm4, 3.4028235e+38, %v11507_v53  ;;  %v8036_v2 = vsel %vm11537_vm7, 3.4028235e+38, %v11508_v54  ;;  %vm11538_vm8 = vcmp.eq.f32.partialorder %v11509_v19, inf  ;;  %vm11539_vm2 = vcmp.eq.f32.partialorder %v11510_v38, inf }
 0x134   : > { %v8041_v49 = vsel %vm11538_vm8, 3.4028235e+38, %v11509_v19  ;;  %v8046_v40 = vsel %vm11539_vm2, 3.4028235e+38, %v11510_v38  ;;  %v8051_v53 = vsel %vm1033_vm13, 3.4028235e+38, %v11511_v5 }
 0x135   : > { %v8063_v19 = vsel %vm1034_vm15, 3.4028235e+38, %v11512_v42  ;;  %v8068_v38 = vsel %vm1035_vm6, 3.4028235e+38, %v11513_v4  ;;  %vm1525_vm13 = vcmp.eq.f32.partialorder %v1269_v3, -inf  ;;  %vm1526_vm4 = vcmp.eq.f32.partialorder %v1270_v34, -inf }
 0x136   : > { %v8073_v5 = vsel %vm1036_vm14, 3.4028235e+38, %v11514_v23  ;;  %v8078_v54 = vsel %vm1037_vm5, 3.4028235e+38, %v11515_v14  ;;  %v8083_v42 = vsel %vm1038_vm9, 3.4028235e+38, %v11516_v46 }
 0x137   : > { %vm1048_vm15 = vcmp.eq.f32.partialorder %v11540_v21, inf  ;;  %vm11541_vm6 = vcmp.eq.f32.partialorder %v11517_v16, inf  ;;  %v8094_v23 = vsel %vm1040_vm1, 3.4028235e+38, %v11518_v13  ;;  %vm1527_vm14 = vcmp.eq.f32.partialorder %v1271_v22, -inf  ;;  %v2038_v46 = vld [vmem:[%s8058_s23 + $0x8] sm:$0xff] }
 0x138   : > { %v8089_v4 = vsel %vm11541_vm6, 3.4028235e+38, %v11517_v16  ;;  %v1781_v14 = vsel %vm1525_vm13, -3.4028235e+38, %v1269_v3  ;;  %v1782_v24 = vsel %vm1526_vm4, -3.4028235e+38, %v1270_v34 }
 0x139   : > { %vm1049_vm5 = vcmp.eq.f32.partialorder %v11542_v18, inf  ;;  %v8102_v11 = vsel %vm1041_vm0, 3.4028235e+38, %v11519_v41  ;;  %v8107_v16 = vsel %vm1042_vm11, 3.4028235e+38, %v11520_v33  ;;  %vm1528_vm1 = vcmp.eq.f32.partialorder %v1272_v56, -inf }
 0x13a   : > { %v11543_v13 = vld [vmem:[#allocation49_spill] sm:$0xff]  ;;  %v8113_v34 = vsel %vm1043_vm10, 3.4028235e+38, %v11521_v25  ;;  %v1783_v3 = vsel %vm1527_vm14, -3.4028235e+38, %v1271_v22  ;;  %vm11544_vm0 = vcmp.eq.f32.partialorder %v11522_v43, inf  ;;  %v2293_v0 = vsub.f32 %v1781_v14, %v2037_v6 }
 0x13b   : > { %vm1050_vm9 = vcmp.eq.f32.partialorder %v11543_v13, inf  ;;  %v8119_v41 = vsel %vm11544_vm0, 3.4028235e+38, %v11522_v43  ;;  %vm1529_vm12 = vcmp.eq.f32.partialorder %v1273_v51, -inf  ;;  %v2294_v33 = vsub.f32 %v1782_v24, %v2038_v46  ;;  %v2040_v25 = vld [vmem:[%s8058_s23 + $0x18] sm:$0xff]  ;;  %v2041_v43 = vld [vmem:[%s8058_s23 + $0x20] sm:$0xff] }
 0x13c   : > { %vm11545_vm11 = vcmp.eq.f32.partialorder %v11526_v17, inf  ;;  %v1784_v36 = vsel %vm1528_vm1, -3.4028235e+38, %v1272_v56  ;;  %v2809_v22 = vadd.s32 8, %v11546_v8  ;;  %v8131_v45 = vsel %vm1046_vm3, 3.4028235e+38, %v11530_v58 }
 0x13d   : > { %v8124_v7 = vsel %vm11545_vm11, 3.4028235e+38, %v11526_v17  ;;  %vm11547_vm10 = vcmp.eq.f32.partialorder %v11531_v28, inf  ;;  %vm1530_vm7 = vcmp.eq.f32.partialorder %v7972_v44, -inf  ;;  %v2295_v24 = vsub.f32 %v1783_v3, %v2039_v20  ;;  %v11548_v3 = vld [vmem:[#allocation134_spill] sm:$0xff] }
 0x13e   : > { %v8136_v6 = vsel %vm11547_vm10, 3.4028235e+38, %v11531_v28  ;;  %v8142_v17 = vsel %vm1048_vm15, 3.4028235e+38, %v11540_v21  ;;  %v1785_v56 = vsel %vm1529_vm12, -3.4028235e+38, %v1273_v51  ;;  %v2296_v58 = vsub.f32 %v1784_v36, %v2040_v25 }
 0x13f   : > { %v2810_v14 = vadd.s32 16, %v11546_v8  ;;  %vm1531_vm3 = vcmp.eq.f32.partialorder %v7978_v10, -inf  ;;  %v2549_v46 = vmul.f32 %v2293_v0, %v2293_v0  ;;  %v2550_v52 = vmul.f32 %v2294_v33, %v2294_v33 }
 0x140   : > { %v1786_v28 = vsel %vm1530_vm7, -3.4028235e+38, %v7972_v44  ;;  %v2811_v20 = vadd.s32 24, %v11546_v8  ;;  %vm3066_vm8 = vcmp.lt.s32.totalorder %v11546_v8, %v11548_v3  ;;  %vm3067_vm2 = vcmp.lt.s32.totalorder %v2809_v22, %v11548_v3  ;;  %v2043_v44 = vld [vmem:[%s8058_s23 + $0x30] sm:$0xff] }
 0x141   : > { %v8156_v21 = vsel %vm1049_vm5, 3.4028235e+38, %v11542_v18  ;;  %vm1532_vm13 = vcmp.eq.f32.partialorder %v7983_v15, -inf  ;;  %v2297_v36 = vsub.f32 %v1785_v56, %v2041_v43  ;;  %v2551_v0 = vmul.f32 %v2295_v24, %v2295_v24  ;;  %v2044_v56 = vld [vmem:[%s8058_s23 + $0x38] sm:$0xff] }
 0x142   : > { %vm1533_vm4 = vcmp.eq.f32.partialorder %v7988_v63, -inf  ;;  %v1787_v51 = vsel %vm1531_vm3, -3.4028235e+38, %v7978_v10  ;;  %v2812_v33 = vadd.s32 32, %v11546_v8  ;;  %vm3068_vm15 = vcmp.lt.s32.totalorder %v2810_v14, %v11548_v3 }
 0x143   : > { %v2298_v25 = vsub.f32 %v1786_v28, %v2042_v62  ;;  %v2552_v22 = vmul.f32 %v2296_v58, %v2296_v58  ;;  %v3322_v27 = vsel %vm3066_vm8, %v2549_v46, 0.0  ;;  %v3323_v55 = vsel %vm3067_vm2, %v2550_v52, 0.0  ;;  %v2045_v58 = vld [vmem:[%s8058_s23 + $0x40] sm:$0xff] }
 0x144   : > { %v8167_v18 = vsel %vm1050_vm9, 3.4028235e+38, %v11543_v13  ;;  %v1788_v24 = vsel %vm1532_vm13, -3.4028235e+38, %v7983_v15  ;;  %v2813_v10 = vadd.s32 40, %v11546_v8  ;;  %vm3069_vm6 = vcmp.lt.s32.totalorder %v2811_v20, %v11548_v3 }
 0x145   : > { %vm1534_vm14 = vcmp.eq.f32.partialorder %v7994_v29, -inf  ;;  %v2299_v43 = vsub.f32 %v1787_v51, %v2043_v44  ;;  %v2553_v62 = vmul.f32 %v2297_v36, %v2297_v36  ;;  %v3324_v14 = vsel %vm3068_vm15, %v2551_v0, 0.0  ;;  %v2046_v36 = vld [vmem:[%s8058_s23 + $0x48] sm:$0xff] }
 0x146   : > { %v1789_v52 = vsel %vm1533_vm4, -3.4028235e+38, %v7988_v63  ;;  %v2814_v13 = vadd.s32 48, %v11546_v8  ;;  %vm3070_vm5 = vcmp.lt.s32.totalorder %v2812_v33, %v11548_v3  ;;  %v3579_v15 = vadd.f32 %v3323_v55, %v3322_v27  ;;  %v2047_v27 = vld [vmem:[%s8058_s23 + $0x50] sm:$0xff] }
 0x147   : > { %vm1535_vm1 = vcmp.eq.f32.partialorder %v7999_v9, -inf  ;;  %v2300_v46 = vsub.f32 %v1788_v24, %v2044_v56  ;;  %v2554_v28 = vmul.f32 %v2298_v25, %v2298_v25  ;;  %v3325_v20 = vsel %vm3069_vm6, %v2552_v22, 0.0 }
 0x148   : > { %v1790_v51 = vsel %vm1534_vm14, -3.4028235e+38, %v7994_v29  ;;  %v2815_v0 = vadd.s32 56, %v11546_v8  ;;  %vm3071_vm9 = vcmp.lt.s32.totalorder %v2813_v10, %v11548_v3  ;;  %v3580_v63 = vadd.f32 %v3579_v15, %v3324_v14  ;;  %v2048_v14 = vld [vmem:[%s8058_s23 + $0x58] sm:$0xff]  ;;  %v2049_v15 = vld [vmem:[%s8058_s23 + $0x60] sm:$0xff] }
 0x149   : > { %vm1536_vm0 = vcmp.eq.f32.partialorder %v8004_v48, -inf  ;;  %v2301_v44 = vsub.f32 %v1789_v52, %v2045_v58  ;;  %v2555_v33 = vmul.f32 %v2299_v43, %v2299_v43  ;;  %v3326_v61 = vsel %vm3070_vm5, %v2553_v62, 0.0 }
 0x14a   : > { %v1791_v55 = vsel %vm1535_vm1, -3.4028235e+38, %v7999_v9  ;;  %v2816_v25 = vadd.s32 64, %v11546_v8  ;;  %vm3072_vm12 = vcmp.lt.s32.totalorder %v2814_v13, %v11548_v3  ;;  %v3581_v29 = vadd.f32 %v3580_v63, %v3325_v20 }
 0x14b   : > { %vm1537_vm11 = vcmp.eq.f32.partialorder %v8011_v57, -inf  ;;  %v2302_v22 = vsub.f32 %v1790_v51, %v2046_v36  ;;  %v2556_v24 = vmul.f32 %v2300_v46, %v2300_v46  ;;  %v3327_v56 = vsel %vm3071_vm9, %v2554_v28, 0.0  ;;  %v2050_v36 = vld [vmem:[%s8058_s23 + $0x68] sm:$0xff] }
 0x14c   : > { %v1792_v10 = vsel %vm1536_vm0, -3.4028235e+38, %v8004_v48  ;;  %v2817_v43 = vadd.s32 72, %v11546_v8  ;;  %vm3073_vm10 = vcmp.lt.s32.totalorder %v2815_v0, %v11548_v3  ;;  %v3582_v9 = vadd.f32 %v3581_v29, %v3326_v61 }
 0x14d   : > { %vm1538_vm7 = vcmp.eq.f32.partialorder %v8016_v35, -inf  ;;  %v2303_v62 = vsub.f32 %v1791_v55, %v2047_v27  ;;  %v2557_v52 = vmul.f32 %v2301_v44, %v2301_v44  ;;  %v3328_v58 = vsel %vm3072_vm12, %v2555_v33, 0.0  ;;  %v2051_v27 = vld [vmem:[%s8058_s23 + $0x70] sm:$0xff] }
 0x14e   : > { %v1793_v13 = vsel %vm1537_vm11, -3.4028235e+38, %v8011_v57  ;;  %v2818_v46 = vadd.s32 80, %v11546_v8  ;;  %vm3074_vm3 = vcmp.lt.s32.totalorder %v2816_v25, %v11548_v3  ;;  %v3583_v48 = vadd.f32 %v3582_v9, %v3327_v56 }
 0x14f   : > { %vm1539_vm8 = vcmp.eq.f32.partialorder %v8021_v26, -inf  ;;  %v2304_v28 = vsub.f32 %v1792_v10, %v2048_v14  ;;  %v2558_v20 = vmul.f32 %v2302_v22, %v2302_v22  ;;  %v3329_v51 = vsel %vm3073_vm10, %v2556_v24, 0.0  ;;  %v2052_v10 = vld [vmem:[%s8058_s23 + $0x78] sm:$0xff] }
 0x150   : > { %v1794_v61 = vsel %vm1538_vm7, -3.4028235e+38, %v8016_v35  ;;  %v2819_v0 = vadd.s32 88, %v11546_v8  ;;  %vm3075_vm2 = vcmp.lt.s32.totalorder %v2817_v43, %v11548_v3  ;;  %v3584_v57 = vadd.f32 %v3583_v48, %v3328_v58  ;;  %v2053_v58 = vld [vmem:[%s8058_s23 + $0x80] sm:$0xff] }
 0x151   : > { %vm1540_vm13 = vcmp.eq.f32.partialorder %v8026_v50, -inf  ;;  %v2305_v63 = vsub.f32 %v1793_v13, %v2049_v15  ;;  %v2559_v44 = vmul.f32 %v2303_v62, %v2303_v62  ;;  %v3330_v33 = vsel %vm3074_vm3, %v2557_v52, 0.0 }
 0x152   : > { %v1795_v55 = vsel %vm1539_vm8, -3.4028235e+38, %v8021_v26  ;;  %v2820_v25 = vadd.s32 96, %v11546_v8  ;;  %vm3076_vm4 = vcmp.lt.s32.totalorder %v2818_v46, %v11548_v3  ;;  %v3585_v35 = vadd.f32 %v3584_v57, %v3329_v51 }
 0x153   : > { %vm1541_vm15 = vcmp.eq.f32.partialorder %v8031_v1, -inf  ;;  %v2306_v29 = vsub.f32 %v1794_v61, %v2050_v36  ;;  %v2560_v22 = vmul.f32 %v2304_v28, %v2304_v28  ;;  %v3331_v24 = vsel %vm3075_vm2, %v2558_v20, 0.0  ;;  %v2054_v20 = vld [vmem:[%s8058_s23 + $0x88] sm:$0xff] }
 0x154   : > { %v1796_v56 = vsel %vm1540_vm13, -3.4028235e+38, %v8026_v50  ;;  %v2821_v14 = vadd.s32 104, %v11546_v8  ;;  %vm3077_vm6 = vcmp.lt.s32.totalorder %v2819_v0, %v11548_v3  ;;  %v3586_v26 = vadd.f32 %v3585_v35, %v3330_v33  ;;  %v2056_v35 = vld [vmem:[%s8058_s23 + $0x98] sm:$0xff] }
 0x155   : > { %vm1542_vm14 = vcmp.eq.f32.partialorder %v8036_v2, -inf  ;;  %v2307_v43 = vsub.f32 %v1795_v55, %v2051_v27  ;;  %v2561_v9 = vmul.f32 %v2305_v63, %v2305_v63  ;;  %v3332_v62 = vsel %vm3076_vm4, %v2559_v44, 0.0  ;;  %v2055_v63 = vld [vmem:[%s8058_s23 + $0x90] sm:$0xff] }
 0x156   : > { %v1797_v52 = vsel %vm1541_vm15, -3.4028235e+38, %v8031_v1  ;;  %v2822_v13 = vadd.s32 112, %v11546_v8  ;;  %vm3078_vm5 = vcmp.lt.s32.totalorder %v2820_v25, %v11548_v3  ;;  %v3587_v50 = vadd.f32 %v3586_v26, %v3331_v24 }
 0x157   : > { %vm1543_vm1 = vcmp.eq.f32.partialorder %v8041_v49, -inf  ;;  %v2308_v15 = vsub.f32 %v1796_v56, %v2052_v10  ;;  %v2562_v46 = vmul.f32 %v2306_v29, %v2306_v29  ;;  %v3333_v48 = vsel %vm3077_vm6, %v2560_v22, 0.0 }
 0x158   : > { %v1798_v28 = vsel %vm1542_vm14, -3.4028235e+38, %v8036_v2  ;;  %v2823_v51 = vadd.s32 120, %v11546_v8  ;;  %vm3079_vm9 = vcmp.lt.s32.totalorder %v2821_v14, %v11548_v3  ;;  %v3588_v1 = vadd.f32 %v3587_v50, %v3332_v62  ;;  %v2057_v14 = vld [vmem:[%s8058_s23 + $0xa0] sm:$0xff] }
 0x159   : > { %vm1544_vm0 = vcmp.eq.f32.partialorder %v8046_v40, -inf  ;;  %v2309_v61 = vsub.f32 %v1797_v52, %v2053_v58  ;;  %v2563_v36 = vmul.f32 %v2307_v43, %v2307_v43  ;;  %v3334_v0 = vsel %vm3078_vm5, %v2561_v9, 0.0  ;;  %v2058_v58 = vld [vmem:[%s8058_s23 + $0xa8] sm:$0xff] }
 0x15a   : > { %v1799_v57 = vsel %vm1543_vm1, -3.4028235e+38, %v8041_v49  ;;  %v2824_v44 = vadd.s32 128, %v11546_v8  ;;  %vm3080_vm12 = vcmp.lt.s32.totalorder %v2822_v13, %v11548_v3  ;;  %v3589_v2 = vadd.f32 %v3588_v1, %v3333_v48 }
 0x15b   : > { %vm1545_vm11 = vcmp.eq.f32.partialorder %v8051_v53, -inf  ;;  %v2310_v33 = vsub.f32 %v1798_v28, %v2054_v20  ;;  %v2564_v55 = vmul.f32 %v2308_v15, %v2308_v15  ;;  %v3335_v27 = vsel %vm3079_vm9, %v2562_v46, 0.0  ;;  %v2059_v28 = vld [vmem:[%s8058_s23 + $0xb0] sm:$0xff] }
 0x15c   : > { %v1800_v25 = vsel %vm1544_vm0, -3.4028235e+38, %v8046_v40  ;;  %v2825_v29 = vadd.s32 136, %v11546_v8  ;;  %vm3081_vm10 = vcmp.lt.s32.totalorder %v2823_v51, %v11548_v3  ;;  %v3590_v49 = vadd.f32 %v3589_v2, %v3334_v0  ;;  %v2060_v0 = vld [vmem:[%s8058_s23 + $0xb8] sm:$0xff] }
 0x15d   : > { %vm1546_vm7 = vcmp.eq.f32.partialorder %v8063_v19, -inf  ;;  %v2311_v22 = vsub.f32 %v1799_v57, %v2055_v63  ;;  %v2565_v24 = vmul.f32 %v2309_v61, %v2309_v61  ;;  %v3336_v56 = vsel %vm3080_vm12, %v2563_v36, 0.0 }
 0x15e   : > { %v1801_v10 = vsel %vm1545_vm11, -3.4028235e+38, %v8051_v53  ;;  %v2826_v26 = vadd.s32 144, %v11546_v8  ;;  %vm3082_vm3 = vcmp.lt.s32.totalorder %v2824_v44, %v11548_v3  ;;  %v3591_v40 = vadd.f32 %v3590_v49, %v3335_v27 }
 0x15f   : > { %vm1547_vm8 = vcmp.eq.f32.partialorder %v8068_v38, -inf  ;;  %v2312_v43 = vsub.f32 %v1800_v25, %v2056_v35  ;;  %v2566_v9 = vmul.f32 %v2310_v33, %v2310_v33  ;;  %v3337_v62 = vsel %vm3081_vm10, %v2564_v55, 0.0  ;;  %v2061_v55 = vld [vmem:[%s8058_s23 + $0xc0] sm:$0xff] }
 0x160   : > { %v1802_v52 = vsel %vm1546_vm7, -3.4028235e+38, %v8063_v19  ;;  %v2827_v13 = vadd.s32 152, %v11546_v8  ;;  %vm3083_vm2 = vcmp.lt.s32.totalorder %v2825_v29, %v11548_v3  ;;  %v3592_v53 = vadd.f32 %v3591_v40, %v3336_v56  ;;  %v2063_v40 = vld [vmem:[%s8058_s23 + $0xd0] sm:$0xff] }
 0x161   : > { %vm1548_vm13 = vcmp.eq.f32.partialorder %v8073_v5, -inf  ;;  %v2313_v50 = vsub.f32 %v1801_v10, %v2057_v14  ;;  %v2567_v15 = vmul.f32 %v2311_v22, %v2311_v22  ;;  %v3338_v46 = vsel %vm3082_vm3, %v2565_v24, 0.0  ;;  %v2062_v22 = vld [vmem:[%s8058_s23 + $0xc8] sm:$0xff] }
 0x162   : > { %v1803_v48 = vsel %vm1547_vm8, -3.4028235e+38, %v8068_v38  ;;  %v2828_v20 = vadd.s32 160, %v11546_v8  ;;  %vm3084_vm4 = vcmp.lt.s32.totalorder %v2826_v26, %v11548_v3  ;;  %v3593_v19 = vadd.f32 %v3592_v53, %v3337_v62 }
 0x163   : > { %vm1549_vm15 = vcmp.eq.f32.partialorder %v8078_v54, -inf  ;;  %v2314_v51 = vsub.f32 %v1802_v52, %v2058_v58  ;;  %v2568_v1 = vmul.f32 %v2312_v43, %v2312_v43  ;;  %v3339_v61 = vsel %vm3083_vm2, %v2566_v9, 0.0 }
 0x164   : > { %v1804_v36 = vsel %vm1548_vm13, -3.4028235e+38, %v8073_v5  ;;  %v2829_v57 = vadd.s32 168, %v11546_v8  ;;  %vm3085_vm6 = vcmp.lt.s32.totalorder %v2827_v13, %v11548_v3  ;;  %v3594_v38 = vadd.f32 %v3593_v19, %v3338_v46  ;;  %v2064_v13 = vld [vmem:[%s8058_s23 + $0xd8] sm:$0xff] }
 0x165   : > { %vm1550_vm14 = vcmp.eq.f32.partialorder %v8083_v42, -inf  ;;  %v2315_v63 = vsub.f32 %v1803_v48, %v2059_v28  ;;  %v2569_v44 = vmul.f32 %v2313_v50, %v2313_v50  ;;  %v3340_v2 = vsel %vm3084_vm4, %v2567_v15, 0.0  ;;  %v2065_v28 = vld [vmem:[%s8058_s23 + $0xe0] sm:$0xff] }
 0x166   : > { %v1805_v33 = vsel %vm1549_vm15, -3.4028235e+38, %v8078_v54  ;;  %v2830_v27 = vadd.s32 176, %v11546_v8  ;;  %vm3086_vm5 = vcmp.lt.s32.totalorder %v2828_v20, %v11548_v3  ;;  %v3595_v5 = vadd.f32 %v3594_v38, %v3339_v61 }
 0x167   : > { %vm1551_vm1 = vcmp.eq.f32.partialorder %v8089_v4, -inf  ;;  %v2316_v25 = vsub.f32 %v1804_v36, %v2060_v0  ;;  %v2570_v35 = vmul.f32 %v2314_v51, %v2314_v51  ;;  %v3341_v29 = vsel %vm3085_vm6, %v2568_v1, 0.0  ;;  %v2066_v36 = vld [vmem:[%s8058_s23 + $0xe8] sm:$0xff] }
 0x168   : > { %v1806_v49 = vsel %vm1550_vm14, -3.4028235e+38, %v8083_v42  ;;  %v2831_v24 = vadd.s32 184, %v11546_v8  ;;  %vm3087_vm9 = vcmp.lt.s32.totalorder %v2829_v57, %v11548_v3  ;;  %v3596_v54 = vadd.f32 %v3595_v5, %v3340_v2  ;;  %v11549_v57 = vld [vmem:[#allocation50_spill] sm:$0xff] }
 0x169   : > { %vm1552_vm0 = vcmp.eq.f32.partialorder %v8094_v23, -inf  ;;  %v2317_v56 = vsub.f32 %v1805_v33, %v2061_v55  ;;  %v2571_v10 = vmul.f32 %v2315_v63, %v2315_v63  ;;  %v3342_v14 = vsel %vm3086_vm5, %v2569_v44, 0.0  ;;  %v2067_v33 = vld [vmem:[%s8058_s23 + $0xf0] sm:$0xff] }
 0x16a   : > { %v1807_v26 = vsel %vm1551_vm1, -3.4028235e+38, %v8089_v4  ;;  %v2832_v43 = vadd.s32 192, %v11546_v8  ;;  %vm3088_vm12 = vcmp.lt.s32.totalorder %v2830_v27, %v11548_v3  ;;  %v3597_v42 = vadd.f32 %v3596_v54, %v3341_v29  ;;  %v11550_v27 = vld [vmem:[#allocation51_spill] sm:$0xff] }
 0x16b   : > { %vm1553_vm11 = vcmp.eq.f32.partialorder %v8102_v11, -inf  ;;  %v2318_v9 = vsub.f32 %v1806_v49, %v2062_v22  ;;  %v2572_v62 = vmul.f32 %v2316_v25, %v2316_v25  ;;  %v3343_v52 = vsel %vm3087_vm9, %v2570_v35, 0.0  ;;  %v2068_v49 = vld [vmem:[%s8058_s23 + $0xf8] sm:$0xff] }
 0x16c   : > { %v1808_v58 = vsel %vm1552_vm0, -3.4028235e+38, %v8094_v23  ;;  %v2833_v53 = vadd.s32 200, %v11546_v8  ;;  %vm3089_vm10 = vcmp.lt.s32.totalorder %v2831_v24, %v11548_v3  ;;  %v3598_v4 = vadd.f32 %v3597_v42, %v3342_v14  ;;  %v11551_v24 = vld [vmem:[#allocation52_spill] sm:$0xff] }
 0x16d   : > { %vm1554_vm7 = vcmp.eq.f32.partialorder %v8107_v16, -inf  ;;  %v2319_v50 = vsub.f32 %v1807_v26, %v2063_v40  ;;  %v2573_v15 = vmul.f32 %v2317_v56, %v2317_v56  ;;  %v3344_v46 = vsel %vm3088_vm12, %v2571_v10, 0.0  ;;  %v2069_v26 = vld [vmem:[%s8058_s23 + $0x100] sm:$0xff] }
 0x16e   : > { %v1809_v48 = vsel %vm1553_vm11, -3.4028235e+38, %v8102_v11  ;;  %v2834_v20 = vadd.s32 208, %v11546_v8  ;;  %vm3090_vm3 = vcmp.lt.s32.totalorder %v2832_v43, %v11548_v3  ;;  %v3599_v23 = vadd.f32 %v3598_v4, %v3343_v52  ;;  %v11552_v43 = vld [vmem:[#allocation53_spill] sm:$0xff] }
 0x16f   : > { %vm1555_vm8 = vcmp.eq.f32.partialorder %v8113_v34, -inf  ;;  %v2320_v19 = vsub.f32 %v1808_v58, %v2064_v13  ;;  %v2574_v51 = vmul.f32 %v2318_v9, %v2318_v9  ;;  %v3345_v1 = vsel %vm3089_vm10, %v2572_v62, 0.0  ;;  %v2070_v58 = vld [vmem:[%s8058_s23 + $0x108] sm:$0xff] }
 0x170   : > { %v1810_v61 = vsel %vm1554_vm7, -3.4028235e+38, %v8107_v16  ;;  %v2835_v0 = vadd.s32 216, %v11546_v8  ;;  %vm3091_vm2 = vcmp.lt.s32.totalorder %v2833_v53, %v11548_v3  ;;  %v3600_v11 = vadd.f32 %v3599_v23, %v3344_v46  ;;  %v2071_v46 = vld [vmem:[%s8058_s23 + $0x110] sm:$0xff] }
 0x171   : > { %vm1051_vm13 = vcmp.eq.f32.partialorder %v11549_v57, inf  ;;  %vm1556_vm4 = vcmp.eq.f32.partialorder %v8119_v41, -inf  ;;  %v2321_v38 = vsub.f32 %v1809_v48, %v2065_v28  ;;  %v2575_v63 = vmul.f32 %v2319_v50, %v2319_v50 }
 0x172   : > { %v3346_v44 = vsel %vm3090_vm3, %v2573_v15, 0.0  ;;  %v1811_v2 = vsel %vm1555_vm8, -3.4028235e+38, %v8113_v34  ;;  %v2836_v55 = vadd.s32 224, %v11546_v8  ;;  %vm3092_vm15 = vcmp.lt.s32.totalorder %v2834_v20, %v11548_v3 }
 0x173   : > { %v3601_v16 = vadd.f32 %v3600_v11, %v3345_v1  ;;  %vm1052_vm6 = vcmp.eq.f32.partialorder %v11550_v27, inf  ;;  %vm1557_vm14 = vcmp.eq.f32.partialorder %v8124_v7, -inf  ;;  %v2322_v5 = vsub.f32 %v1810_v61, %v2066_v36  ;;  %v2072_v1 = vld [vmem:[%s8058_s23 + $0x118] sm:$0xff] }
 0x174   : > { %v2576_v25 = vmul.f32 %v2320_v19, %v2320_v19  ;;  %v3347_v35 = vsel %vm3091_vm2, %v2574_v51, 0.0  ;;  %v1812_v29 = vsel %vm1556_vm4, -3.4028235e+38, %v8119_v41  ;;  %v2837_v34 = vadd.s32 232, %v11546_v8 }
 0x175   : > { %vm3093_vm5 = vcmp.lt.s32.totalorder %v2835_v0, %v11548_v3  ;;  %v3602_v22 = vadd.f32 %v3601_v16, %v3346_v44  ;;  %vm1053_vm1 = vcmp.eq.f32.partialorder %v11551_v24, inf  ;;  %vm1558_vm9 = vcmp.eq.f32.partialorder %v8131_v45, -inf  ;;  %v2074_v16 = vld [vmem:[%s8058_s23 + $0x128] sm:$0xff] }
 0x176   : > { %v2323_v54 = vsub.f32 %v1811_v2, %v2067_v33  ;;  %v2577_v56 = vmul.f32 %v2321_v38, %v2321_v38  ;;  %v3348_v10 = vsel %vm3092_vm15, %v2575_v63, 0.0  ;;  %v1813_v14 = vsel %vm1557_vm14, -3.4028235e+38, %v8124_v7  ;;  %v2073_v38 = vld [vmem:[%s8058_s23 + $0x120] sm:$0xff]  ;;  %v11553_v2 = vld [vmem:[#allocation54_spill] sm:$0xff] }
 0x177   : > { %v2838_v41 = vadd.s32 240, %v11546_v8  ;;  %vm3094_vm0 = vcmp.lt.s32.totalorder %v2836_v55, %v11548_v3  ;;  %v3603_v40 = vadd.f32 %v3602_v22, %v3347_v35  ;;  %vm1054_vm12 = vcmp.eq.f32.partialorder %v11552_v43, inf  ;;  %v11554_v35 = vld [vmem:[#allocation55_spill] sm:$0xff] }
 0x178   : > { %vm1559_vm11 = vcmp.eq.f32.partialorder %v8136_v6, -inf  ;;  %v2324_v42 = vsub.f32 %v1812_v29, %v2068_v49  ;;  %v2578_v9 = vmul.f32 %v2322_v5, %v2322_v5  ;;  %v3349_v62 = vsel %vm3093_vm5, %v2576_v25, 0.0 }
 0x179   : > { %v1814_v52 = vsel %vm1558_vm9, -3.4028235e+38, %v8131_v45  ;;  %v2839_v7 = vadd.s32 248, %v11546_v8  ;;  %vm3095_vm10 = vcmp.lt.s32.totalorder %v2837_v34, %v11548_v3  ;;  %v3604_v13 = vadd.f32 %v3603_v40, %v3348_v10  ;;  %v2075_v34 = vld [vmem:[%s8058_s23 + $0x130] sm:$0xff]  ;;  %v11557_v10 = vld [vmem:[#allocation56_spill] sm:$0xff] }
 0x17a   : > { %vm1560_vm7 = vcmp.eq.f32.partialorder %v8142_v17, -inf  ;;  %v2325_v53 = vsub.f32 %v1813_v14, %v2069_v26  ;;  %v2579_v4 = vmul.f32 %v2323_v54, %v2323_v54  ;;  %v3350_v50 = vsel %vm3094_vm0, %v2577_v56, 0.0  ;;  %v11555_v54 = vld [vmem:[#allocation131_spill] sm:$0xff] }
 0x17b   : > { %v1815_v15 = vsel %vm1559_vm11, -3.4028235e+38, %v8136_v6  ;;  %v2840_v48 = vadd.s32 256, %v11546_v8  ;;  %vm3096_vm3 = vcmp.lt.s32.totalorder %v2838_v41, %v11548_v3  ;;  %v3605_v45 = vadd.f32 %v3604_v13, %v3349_v62  ;;  %v2076_v41 = vld [vmem:[%s8058_s23 + $0x138] sm:$0xff]  ;;  %v2077_v13 = vld [vmem:[%s8058_s23 + $0x140] sm:$0xff] }
 0x17c   : > { %vm1561_vm8 = vcmp.eq.f32.partialorder %v8156_v21, -inf  ;;  %v2326_v28 = vsub.f32 %v1814_v52, %v2070_v58  ;;  %v2580_v20 = vmul.f32 %v2324_v42, %v2324_v42  ;;  %v3351_v23 = vsel %vm3095_vm10, %v2578_v9, 0.0  ;;  %v11558_v9 = vld [vmem:[#allocation132_spill] sm:$0xff]  ;;  %v11560_v52 = vld [vmem:[#allocation57_spill] sm:$0xff] }
 0x17d   : > { %v1307_v19 = vsel %vm1051_vm13, 3.4028235e+38, %v11549_v57  ;;  %v1816_v51 = vsel %vm1560_vm7, -3.4028235e+38, %v8142_v17  ;;  %vm3097_vm2 = vcmp.lt.s32.totalorder %v2839_v7, %v11548_v3  ;;  %v3606_v6 = vadd.f32 %v3605_v45, %v3350_v50 }
 0x17e   : > { %vm1562_vm4 = vcmp.eq.f32.partialorder %v8167_v18, -inf  ;;  %v2327_v8 = vsub.f32 %v1815_v15, %v2071_v46  ;;  %v2581_v61 = vmul.f32 %v2325_v53, %v2325_v53  ;;  %v3352_v36 = vsel %vm3096_vm3, %v2579_v4, 0.0  ;;  %v11561_v15 = vld [vmem:[#allocation133_spill] sm:$0xff] }
 0x17f   : > { %v1308_v0 = vsel %vm1052_vm6, 3.4028235e+38, %v11550_v27  ;;  %v1817_v11 = vsel %vm1561_vm8, -3.4028235e+38, %v8156_v21  ;;  %vm3098_vm13 = vcmp.lt.s32.totalorder %v2840_v48, %v11548_v3  ;;  %v3607_v17 = vadd.f32 %v3606_v6, %v3351_v23  ;;  %v11563_v48 = vld [vmem:[#allocation58_spill] sm:$0xff] }
 0x180   : > { %vm1563_vm15 = vcmp.eq.f32.partialorder %v1307_v19, -inf  ;;  %v2328_v57 = vsub.f32 %v1816_v51, %v2072_v1  ;;  %v2582_v63 = vmul.f32 %v2326_v28, %v2326_v28  ;;  %v3353_v44 = vsel %vm3097_vm2, %v2580_v20, 0.0  ;;  %v2078_v20 = vld [vmem:[%s8058_s23 + $0x148] sm:$0xff]  ;;  %v11564_v1 = vld [vmem:[#allocation135_spill] sm:$0xff] }
 0x181   : > { %vm1055_vm14 = vcmp.eq.f32.partialorder %v11553_v2, inf  ;;  %v1309_v33 = vsel %vm1053_vm1, 3.4028235e+38, %v11551_v24  ;;  %v1818_v55 = vsel %vm1562_vm4, -3.4028235e+38, %v8167_v18  ;;  %v3608_v27 = vadd.f32 %v3607_v17, %v3352_v36 }
 0x182   : > { %vm1564_vm6 = vcmp.eq.f32.partialorder %v1308_v0, -inf  ;;  %v2329_v21 = vsub.f32 %v1817_v11, %v2073_v38  ;;  %v2583_v5 = vmul.f32 %v2327_v8, %v2327_v8  ;;  %v3354_v25 = vsel %vm3098_vm13, %v2581_v61, 0.0  ;;  %v11566_v8 = vld [vmem:[#allocation59_spill] sm:$0xff] }
 0x183   : > { %vm1056_vm5 = vcmp.eq.f32.partialorder %v11554_v35, inf  ;;  %v1310_v29 = vsel %vm1054_vm12, 3.4028235e+38, %v11552_v43  ;;  %v1819_v49 = vsel %vm1563_vm15, -3.4028235e+38, %v1307_v19  ;;  %v3609_v22 = vadd.f32 %v3608_v27, %v3353_v44  ;;  %v11569_v44 = vld [vmem:[#allocation60_spill] sm:$0xff] }
 0x184   : > { %vm1565_vm9 = vcmp.eq.f32.partialorder %v1309_v33, -inf  ;;  %v2330_v24 = vsub.f32 %v1818_v55, %v2074_v16  ;;  %v2584_v18 = vmul.f32 %v2328_v57, %v2328_v57  ;;  %vm11556_vm1 = vcmp.lt.s32.totalorder %v11555_v54, %v11548_v3  ;;  %v11567_v57 = vld [vmem:[#allocation136_spill] sm:$0xff]  ;;  %v2080_v55 = vld [vmem:[%s8058_s23 + $0x158] sm:$0xff] }
 0x185   : > { %v3355_v56 = vsel %vm11556_vm1, %v2582_v63, 0.0  ;;  %vm1057_vm0 = vcmp.eq.f32.partialorder %v11557_v10, inf  ;;  %v1311_v14 = vsel %vm1055_vm14, 3.4028235e+38, %v11553_v2  ;;  %v1820_v26 = vsel %vm1564_vm6, -3.4028235e+38, %v1308_v0 }
 0x186   : > { %v3610_v40 = vadd.f32 %v3609_v22, %v3354_v25  ;;  %vm1566_vm12 = vcmp.eq.f32.partialorder %v1310_v29, -inf  ;;  %v2331_v43 = vsub.f32 %v1819_v49, %v2075_v34  ;;  %v2585_v42 = vmul.f32 %v2329_v21, %v2329_v21  ;;  %v2079_v0 = vld [vmem:[%s8058_s23 + $0x150] sm:$0xff]  ;;  %v2081_v34 = vld [vmem:[%s8058_s23 + $0x160] sm:$0xff]  ;;  %v11573_v54 = vld [vmem:[#allocation138_spill] sm:$0xff] }
 0x187   : > { %vm11559_vm11 = vcmp.lt.s32.totalorder %v11558_v9, %v11548_v3  ;;  %vm1058_vm10 = vcmp.eq.f32.partialorder %v11560_v52, inf  ;;  %v1312_v58 = vsel %vm1056_vm5, 3.4028235e+38, %v11554_v35  ;;  %v1821_v7 = vsel %vm1565_vm9, -3.4028235e+38, %v1309_v33  ;;  %v11572_v35 = vld [vmem:[#allocation61_spill] sm:$0xff] }
 0x188   : > { %v3356_v62 = vsel %vm11559_vm11, %v2583_v5, 0.0  ;;  %v3611_v53 = vadd.f32 %v3610_v40, %v3355_v56  ;;  %vm1567_vm7 = vcmp.eq.f32.partialorder %v1311_v14, -inf  ;;  %v2332_v4 = vsub.f32 %v1820_v26, %v2076_v41  ;;  %v11570_v5 = vld [vmem:[#allocation137_spill] sm:$0xff]  ;;  %v2082_v41 = vld [vmem:[%s8058_s23 + $0x168] sm:$0xff]  ;;  %v11576_v9 = vld [vmem:[#allocation139_spill] sm:$0xff] }
 0x189   : > { %v2586_v50 = vmul.f32 %v2330_v24, %v2330_v24  ;;  %vm11562_vm3 = vcmp.lt.s32.totalorder %v11561_v15, %v11548_v3  ;;  %vm1059_vm8 = vcmp.eq.f32.partialorder %v11563_v48, inf  ;;  %v1313_v45 = vsel %vm1057_vm0, 3.4028235e+38, %v11557_v10  ;;  %v11575_v10 = vld [vmem:[#allocation62_spill] sm:$0xff]  ;;  %v11579_v15 = vld [vmem:[#allocation140_spill] sm:$0xff] }
 0x18a   : > { %v3357_v46 = vsel %vm11562_vm3, %v2584_v18, 0.0  ;;  %v1822_v28 = vsel %vm1566_vm12, -3.4028235e+38, %v1310_v29  ;;  %v3612_v23 = vadd.f32 %v3611_v53, %v3356_v62  ;;  %vm1568_vm2 = vcmp.eq.f32.partialorder %v1312_v58, -inf }
 0x18b   : > { %v2333_v19 = vsub.f32 %v1821_v7, %v2077_v13  ;;  %v2587_v51 = vmul.f32 %v2331_v43, %v2331_v43  ;;  %vm11565_vm4 = vcmp.lt.s32.totalorder %v11564_v1, %v11548_v3  ;;  %vm1060_vm13 = vcmp.eq.f32.partialorder %v11566_v8, inf  ;;  %v2083_v13 = vld [vmem:[%s8058_s23 + $0x170] sm:$0xff] }
 0x18c   : > { %v3358_v6 = vsel %vm11565_vm4, %v2585_v42, 0.0  ;;  %v1314_v61 = vsel %vm1058_vm10, 3.4028235e+38, %v11560_v52  ;;  %v1823_v36 = vsel %vm1567_vm7, -3.4028235e+38, %v1311_v14  ;;  %v3613_v11 = vadd.f32 %v3612_v23, %v3357_v46  ;;  %v11578_v52 = vld [vmem:[#allocation63_spill] sm:$0xff] }
 0x18d   : > { %vm1569_vm15 = vcmp.eq.f32.partialorder %v1313_v45, -inf  ;;  %v2334_v38 = vsub.f32 %v1822_v28, %v2078_v20  ;;  %v2588_v17 = vmul.f32 %v2332_v4, %v2332_v4  ;;  %vm11568_vm14 = vcmp.lt.s32.totalorder %v11567_v57, %v11548_v3  ;;  %v2084_v20 = vld [vmem:[%s8058_s23 + $0x178] sm:$0xff]  ;;  %v11582_v1 = vld [vmem:[#allocation141_spill] sm:$0xff] }
 0x18e   : > { %v3359_v63 = vsel %vm11568_vm14, %v2586_v50, 0.0  ;;  %vm1061_vm6 = vcmp.eq.f32.partialorder %v11569_v44, inf  ;;  %v1315_v2 = vsel %vm1059_vm8, 3.4028235e+38, %v11563_v48  ;;  %v1824_v33 = vsel %vm1568_vm2, -3.4028235e+38, %v1312_v58 }
 0x18f   : > { %v3614_v16 = vadd.f32 %v3613_v11, %v3358_v6  ;;  %vm1570_vm5 = vcmp.eq.f32.partialorder %v1314_v61, -inf  ;;  %v2335_v27 = vsub.f32 %v1823_v36, %v2079_v0  ;;  %v2589_v21 = vmul.f32 %v2333_v19, %v2333_v19  ;;  %v11581_v48 = vld [vmem:[#allocation64_spill] sm:$0xff]  ;;  %v2085_v0 = vld [vmem:[%s8058_s23 + $0x180] sm:$0xff]  ;;  %v11585_v57 = vld [vmem:[#allocation142_spill] sm:$0xff] }
 0x190   : > { %vm11571_vm9 = vcmp.lt.s32.totalorder %v11570_v5, %v11548_v3  ;;  %vm1062_vm1 = vcmp.eq.f32.partialorder %v11572_v35, inf  ;;  %v1316_v29 = vsel %vm1060_vm13, 3.4028235e+38, %v11566_v8  ;;  %v1825_v49 = vsel %vm1569_vm15, -3.4028235e+38, %v1313_v45  ;;  %v11584_v8 = vld [vmem:[#allocation65_spill] sm:$0xff] }
 0x191   : > { %v3360_v25 = vsel %vm11571_vm9, %v2587_v51, 0.0  ;;  %v3615_v22 = vadd.f32 %v3614_v16, %v3359_v63  ;;  %vm1571_vm0 = vcmp.eq.f32.partialorder %v1315_v2, -inf  ;;  %v2336_v24 = vsub.f32 %v1824_v33, %v2080_v55  ;;  %v2086_v55 = vld [vmem:[%s8058_s23 + $0x188] sm:$0xff]  ;;  %v11588_v5 = vld [vmem:[#allocation143_spill] sm:$0xff] }
 0x192   : > { %v2590_v18 = vmul.f32 %v2334_v38, %v2334_v38  ;;  %vm11574_vm12 = vcmp.lt.s32.totalorder %v11573_v54, %v11548_v3  ;;  %vm1063_vm11 = vcmp.eq.f32.partialorder %v11575_v10, inf  ;;  %v1317_v14 = vsel %vm1061_vm6, 3.4028235e+38, %v11569_v44  ;;  %v11587_v44 = vld [vmem:[#allocation13_spill] sm:$0xff]  ;;  %v11591_v54 = vld [vmem:[#allocation144_spill] sm:$0xff] }
 0x193   : > { %v3361_v56 = vsel %vm11574_vm12, %v2588_v17, 0.0  ;;  %v1826_v26 = vsel %vm1570_vm5, -3.4028235e+38, %v1314_v61  ;;  %v3616_v40 = vadd.f32 %v3615_v22, %v3360_v25  ;;  %vm1572_vm10 = vcmp.eq.f32.partialorder %v1316_v29, -inf }
 0x194   : > { %v2337_v43 = vsub.f32 %v1825_v49, %v2081_v34  ;;  %v2591_v42 = vmul.f32 %v2335_v27, %v2335_v27  ;;  %vm11577_vm7 = vcmp.lt.s32.totalorder %v11576_v9, %v11548_v3  ;;  %vm1064_vm3 = vcmp.eq.f32.partialorder %v11578_v52, inf  ;;  %v2087_v34 = vld [vmem:[%s8058_s23 + $0x190] sm:$0xff] }
 0x195   : > { %v3362_v62 = vsel %vm11577_vm7, %v2589_v21, 0.0  ;;  %v1318_v58 = vsel %vm1062_vm1, 3.4028235e+38, %v11572_v35  ;;  %v1827_v7 = vsel %vm1571_vm0, -3.4028235e+38, %v1315_v2  ;;  %v3617_v53 = vadd.f32 %v3616_v40, %v3361_v56  ;;  %v11590_v35 = vld [vmem:[#allocation66_spill] sm:$0xff] }
 0x196   : > { %vm1573_vm8 = vcmp.eq.f32.partialorder %v1317_v14, -inf  ;;  %v2338_v4 = vsub.f32 %v1826_v26, %v2082_v41  ;;  %v2592_v50 = vmul.f32 %v2336_v24, %v2336_v24  ;;  %vm11580_vm2 = vcmp.lt.s32.totalorder %v11579_v15, %v11548_v3  ;;  %v2088_v41 = vld [vmem:[%s8058_s23 + $0x198] sm:$0xff]  ;;  %v11594_v9 = vld [vmem:[#allocation145_spill] sm:$0xff] }
 0x197   : > { %v3363_v46 = vsel %vm11580_vm2, %v2590_v18, 0.0  ;;  %vm1065_vm4 = vcmp.eq.f32.partialorder %v11581_v48, inf  ;;  %v1319_v45 = vsel %vm1063_vm11, 3.4028235e+38, %v11575_v10  ;;  %v1828_v28 = vsel %vm1572_vm10, -3.4028235e+38, %v1316_v29 }
 0x198   : > { %v3618_v23 = vadd.f32 %v3617_v53, %v3362_v62  ;;  %vm1574_vm13 = vcmp.eq.f32.partialorder %v1318_v58, -inf  ;;  %v2339_v19 = vsub.f32 %v1827_v7, %v2083_v13  ;;  %v2593_v51 = vmul.f32 %v2337_v43, %v2337_v43  ;;  %v11593_v10 = vld [vmem:[#allocation67_spill] sm:$0xff]  ;;  %v11597_v15 = vld [vmem:[#allocation146_spill] sm:$0xff] }
 0x199   : > { %vm11583_vm15 = vcmp.lt.s32.totalorder %v11582_v1, %v11548_v3  ;;  %vm1066_vm14 = vcmp.eq.f32.partialorder %v11584_v8, inf  ;;  %v1320_v61 = vsel %vm1064_vm3, 3.4028235e+38, %v11578_v52  ;;  %v1829_v36 = vsel %vm1573_vm8, -3.4028235e+38, %v1317_v14  ;;  %v11596_v52 = vld [vmem:[#allocation15_spill] sm:$0xff] }
 0x19a   : > { %v3364_v6 = vsel %vm11583_vm15, %v2591_v42, 0.0  ;;  %v3619_v11 = vadd.f32 %v3618_v23, %v3363_v46  ;;  %vm1575_vm6 = vcmp.eq.f32.partialorder %v1319_v45, -inf  ;;  %v2340_v38 = vsub.f32 %v1828_v28, %v2084_v20  ;;  %v2089_v13 = vld [vmem:[%s8058_s23 + $0x1a0] sm:$0xff]  ;;  %v2090_v20 = vld [vmem:[%s8058_s23 + $0x1a8] sm:$0xff] }
 0x19b   : > { %v2594_v17 = vmul.f32 %v2338_v4, %v2338_v4  ;;  %vm11586_vm5 = vcmp.lt.s32.totalorder %v11585_v57, %v11548_v3  ;;  %vm1067_vm9 = vcmp.eq.f32.partialorder %v11587_v44, inf  ;;  %v1321_v2 = vsel %vm1065_vm4, 3.4028235e+38, %v11581_v48  ;;  %v11599_v48 = vld [vmem:[#allocation16_spill] sm:$0xff]  ;;  %v11600_v1 = vld [vmem:[#allocation147_spill] sm:$0xff] }
 0x19c   : > { %v3365_v63 = vsel %vm11586_vm5, %v2592_v50, 0.0  ;;  %v1830_v33 = vsel %vm1574_vm13, -3.4028235e+38, %v1318_v58  ;;  %v3620_v16 = vadd.f32 %v3619_v11, %v3364_v6  ;;  %vm1576_vm1 = vcmp.eq.f32.partialorder %v1320_v61, -inf  ;;  %v11603_v57 = vld [vmem:[#allocation148_spill] sm:$0xff] }
 0x19d   : > { %v2341_v27 = vsub.f32 %v1829_v36, %v2085_v0  ;;  %v2595_v21 = vmul.f32 %v2339_v19, %v2339_v19  ;;  %vm11589_vm0 = vcmp.lt.s32.totalorder %v11588_v5, %v11548_v3  ;;  %vm1068_vm12 = vcmp.eq.f32.partialorder %v11590_v35, inf  ;;  %v2091_v0 = vld [vmem:[%s8058_s23 + $0x1b0] sm:$0xff] }
 0x19e   : > { %v3366_v25 = vsel %vm11589_vm0, %v2593_v51, 0.0  ;;  %v1322_v29 = vsel %vm1066_vm14, 3.4028235e+38, %v11584_v8  ;;  %v1831_v49 = vsel %vm1575_vm6, -3.4028235e+38, %v1319_v45  ;;  %v3621_v22 = vadd.f32 %v3620_v16, %v3365_v63  ;;  %v11602_v8 = vld [vmem:[#allocation17_spill] sm:$0xff] }
 0x19f   : > { %vm1577_vm11 = vcmp.eq.f32.partialorder %v1321_v2, -inf  ;;  %v2342_v24 = vsub.f32 %v1830_v33, %v2086_v55  ;;  %v2596_v18 = vmul.f32 %v2340_v38, %v2340_v38  ;;  %vm11592_vm10 = vcmp.lt.s32.totalorder %v11591_v54, %v11548_v3  ;;  %v2092_v55 = vld [vmem:[%s8058_s23 + $0x1b8] sm:$0xff]  ;;  %v11606_v5 = vld [vmem:[#allocation149_spill] sm:$0xff] }
 0x1a0   : > { %v3367_v56 = vsel %vm11592_vm10, %v2594_v17, 0.0  ;;  %vm1069_vm7 = vcmp.eq.f32.partialorder %v11593_v10, inf  ;;  %v1323_v14 = vsel %vm1067_vm9, 3.4028235e+38, %v11587_v44  ;;  %v1832_v26 = vsel %vm1576_vm1, -3.4028235e+38, %v1320_v61 }
 0x1a1   : > { %v3622_v40 = vadd.f32 %v3621_v22, %v3366_v25  ;;  %vm1578_vm3 = vcmp.eq.f32.partialorder %v1322_v29, -inf  ;;  %v2343_v43 = vsub.f32 %v1831_v49, %v2087_v34  ;;  %v2597_v42 = vmul.f32 %v2341_v27, %v2341_v27  ;;  %v11605_v44 = vld [vmem:[#allocation18_spill] sm:$0xff]  ;;  %v2093_v34 = vld [vmem:[%s8058_s23 + $0x1c0] sm:$0xff] }
 0x1a2   : > { %vm11595_vm8 = vcmp.lt.s32.totalorder %v11594_v9, %v11548_v3  ;;  %vm1070_vm2 = vcmp.eq.f32.partialorder %v11596_v52, inf  ;;  %v1324_v58 = vsel %vm1068_vm12, 3.4028235e+38, %v11590_v35  ;;  %v1833_v7 = vsel %vm1577_vm11, -3.4028235e+38, %v1321_v2  ;;  %v11608_v35 = vld [vmem:[#allocation68_spill] sm:$0xff] }
 0x1a3   : > { %v3368_v62 = vsel %vm11595_vm8, %v2595_v21, 0.0  ;;  %v3623_v53 = vadd.f32 %v3622_v40, %v3367_v56  ;;  %vm1579_vm4 = vcmp.eq.f32.partialorder %v1323_v14, -inf  ;;  %v2344_v4 = vsub.f32 %v1832_v26, %v2088_v41  ;;  %v11609_v54 = vld [vmem:[#allocation150_spill] sm:$0xff]  ;;  %v2094_v41 = vld [vmem:[%s8058_s23 + $0x1c8] sm:$0xff]  ;;  %v11612_v9 = vld [vmem:[#allocation151_spill] sm:$0xff] }
 0x1a4   : > { %v2598_v50 = vmul.f32 %v2342_v24, %v2342_v24  ;;  %vm11598_vm13 = vcmp.lt.s32.totalorder %v11597_v15, %v11548_v3  ;;  %vm1071_vm15 = vcmp.eq.f32.partialorder %v11599_v48, inf  ;;  %v1325_v45 = vsel %vm1069_vm7, 3.4028235e+38, %v11593_v10  ;;  %v11611_v10 = vld [vmem:[#allocation69_spill] sm:$0xff]  ;;  %v11615_v15 = vld [vmem:[#allocation152_spill] sm:$0xff] }
 0x1a5   : > { %v3369_v46 = vsel %vm11598_vm13, %v2596_v18, 0.0  ;;  %v1834_v28 = vsel %vm1578_vm3, -3.4028235e+38, %v1322_v29  ;;  %v3624_v23 = vadd.f32 %v3623_v53, %v3368_v62  ;;  %vm1580_vm14 = vcmp.eq.f32.partialorder %v1324_v58, -inf }
 0x1a6   : > { %v2345_v19 = vsub.f32 %v1833_v7, %v2089_v13  ;;  %v2599_v51 = vmul.f32 %v2343_v43, %v2343_v43  ;;  %vm11601_vm6 = vcmp.lt.s32.totalorder %v11600_v1, %v11548_v3  ;;  %vm1072_vm5 = vcmp.eq.f32.partialorder %v11602_v8, inf  ;;  %v2095_v13 = vld [vmem:[%s8058_s23 + $0x1d0] sm:$0xff] }
 0x1a7   : > { %v3370_v6 = vsel %vm11601_vm6, %v2597_v42, 0.0  ;;  %v1326_v61 = vsel %vm1070_vm2, 3.4028235e+38, %v11596_v52  ;;  %v1835_v36 = vsel %vm1579_vm4, -3.4028235e+38, %v1323_v14  ;;  %v3625_v11 = vadd.f32 %v3624_v23, %v3369_v46  ;;  %v11614_v52 = vld [vmem:[#allocation70_spill] sm:$0xff] }
 0x1a8   : > { %vm1581_vm9 = vcmp.eq.f32.partialorder %v1325_v45, -inf  ;;  %v2346_v38 = vsub.f32 %v1834_v28, %v2090_v20  ;;  %v2600_v17 = vmul.f32 %v2344_v4, %v2344_v4  ;;  %vm11604_vm1 = vcmp.lt.s32.totalorder %v11603_v57, %v11548_v3  ;;  %v2096_v20 = vld [vmem:[%s8058_s23 + $0x1d8] sm:$0xff]  ;;  %v11618_v1 = vld [vmem:[#allocation153_spill] sm:$0xff] }
 0x1a9   : > { %v3371_v63 = vsel %vm11604_vm1, %v2598_v50, 0.0  ;;  %vm1073_vm0 = vcmp.eq.f32.partialorder %v11605_v44, inf  ;;  %v1327_v2 = vsel %vm1071_vm15, 3.4028235e+38, %v11599_v48  ;;  %v1836_v33 = vsel %vm1580_vm14, -3.4028235e+38, %v1324_v58 }
 0x1aa   : > { %v3626_v16 = vadd.f32 %v3625_v11, %v3370_v6  ;;  %vm1582_vm12 = vcmp.eq.f32.partialorder %v1326_v61, -inf  ;;  %v2347_v27 = vsub.f32 %v1835_v36, %v2091_v0  ;;  %v2601_v21 = vmul.f32 %v2345_v19, %v2345_v19  ;;  %v11617_v48 = vld [vmem:[#allocation21_spill] sm:$0xff]  ;;  %v2097_v0 = vld [vmem:[%s8058_s23 + $0x1e0] sm:$0xff]  ;;  %v11621_v57 = vld [vmem:[#allocation154_spill] sm:$0xff] }
 0x1ab   : > { %vm11607_vm11 = vcmp.lt.s32.totalorder %v11606_v5, %v11548_v3  ;;  %vm1074_vm10 = vcmp.eq.f32.partialorder %v11608_v35, inf  ;;  %v1328_v29 = vsel %vm1072_vm5, 3.4028235e+38, %v11602_v8  ;;  %v1837_v49 = vsel %vm1581_vm9, -3.4028235e+38, %v1325_v45  ;;  %v11620_v8 = vld [vmem:[#allocation71_spill] sm:$0xff] }
 0x1ac   : > { %v3372_v25 = vsel %vm11607_vm11, %v2599_v51, 0.0  ;;  %v3627_v22 = vadd.f32 %v3626_v16, %v3371_v63  ;;  %vm1583_vm7 = vcmp.eq.f32.partialorder %v1327_v2, -inf  ;;  %v2348_v24 = vsub.f32 %v1836_v33, %v2092_v55  ;;  %v2098_v55 = vld [vmem:[%s8058_s23 + $0x1e8] sm:$0xff]  ;;  %v11624_v5 = vld [vmem:[#allocation155_spill] sm:$0xff] }
 0x1ad   : > { %v2602_v18 = vmul.f32 %v2346_v38, %v2346_v38  ;;  %vm11610_vm3 = vcmp.lt.s32.totalorder %v11609_v54, %v11548_v3  ;;  %vm1075_vm8 = vcmp.eq.f32.partialorder %v11611_v10, inf  ;;  %v1329_v14 = vsel %vm1073_vm0, 3.4028235e+38, %v11605_v44  ;;  %v11623_v44 = vld [vmem:[#allocation72_spill] sm:$0xff] }
 0x1ae   : > { %v3373_v56 = vsel %vm11610_vm3, %v2600_v17, 0.0  ;;  %v1838_v26 = vsel %vm1582_vm12, -3.4028235e+38, %v1326_v61  ;;  %v3628_v40 = vadd.f32 %v3627_v22, %v3372_v25  ;;  %vm1584_vm2 = vcmp.eq.f32.partialorder %v1328_v29, -inf  ;;  %v11627_v54 = vld [vmem:[#allocation156_spill] sm:$0xff] }
 0x1af   : > { %v2349_v43 = vsub.f32 %v1837_v49, %v2093_v34  ;;  %v2603_v42 = vmul.f32 %v2347_v27, %v2347_v27  ;;  %vm11613_vm4 = vcmp.lt.s32.totalorder %v11612_v9, %v11548_v3  ;;  %vm1076_vm13 = vcmp.eq.f32.partialorder %v11614_v52, inf  ;;  %v2099_v34 = vld [vmem:[%s8058_s23 + $0x1f0] sm:$0xff] }
 0x1b0   : > { %v3374_v62 = vsel %vm11613_vm4, %v2601_v21, 0.0  ;;  %v1330_v58 = vsel %vm1074_vm10, 3.4028235e+38, %v11608_v35  ;;  %v1839_v7 = vsel %vm1583_vm7, -3.4028235e+38, %v1327_v2  ;;  %v3629_v53 = vadd.f32 %v3628_v40, %v3373_v56  ;;  %v11626_v35 = vld [vmem:[#allocation73_spill] sm:$0xff] }
 0x1b1   : > { %vm1585_vm15 = vcmp.eq.f32.partialorder %v1329_v14, -inf  ;;  %v2350_v4 = vsub.f32 %v1838_v26, %v2094_v41  ;;  %v2604_v50 = vmul.f32 %v2348_v24, %v2348_v24  ;;  %vm11616_vm14 = vcmp.lt.s32.totalorder %v11615_v15, %v11548_v3  ;;  %v2100_v41 = vld [vmem:[%s8058_s23 + $0x1f8] sm:$0xff]  ;;  %v11630_v9 = vld [vmem:[#allocation157_spill] sm:$0xff] }
 0x1b2   : > { %v3375_v46 = vsel %vm11616_vm14, %v2602_v18, 0.0  ;;  %vm1077_vm6 = vcmp.eq.f32.partialorder %v11617_v48, inf  ;;  %v1331_v45 = vsel %vm1075_vm8, 3.4028235e+38, %v11611_v10  ;;  %v1840_v28 = vsel %vm1584_vm2, -3.4028235e+38, %v1328_v29 }
 0x1b3   : > { %v3630_v23 = vadd.f32 %v3629_v53, %v3374_v62  ;;  %vm1586_vm5 = vcmp.eq.f32.partialorder %v1330_v58, -inf  ;;  %v2351_v19 = vsub.f32 %v1839_v7, %v2095_v13  ;;  %v2605_v51 = vmul.f32 %v2349_v43, %v2349_v43  ;;  %v11629_v10 = vld [vmem:[#allocation23_spill] sm:$0xff]  ;;  %v11633_v15 = vld [vmem:[#allocation158_spill] sm:$0xff] }
 0x1b4   : > { %vm11619_vm9 = vcmp.lt.s32.totalorder %v11618_v1, %v11548_v3  ;;  %vm1078_vm1 = vcmp.eq.f32.partialorder %v11620_v8, inf  ;;  %v1332_v61 = vsel %vm1076_vm13, 3.4028235e+38, %v11614_v52  ;;  %v1841_v36 = vsel %vm1585_vm15, -3.4028235e+38, %v1329_v14  ;;  %v11632_v52 = vld [vmem:[#allocation74_spill] sm:$0xff] }
 0x1b5   : > { %v3376_v6 = vsel %vm11619_vm9, %v2603_v42, 0.0  ;;  %v3631_v11 = vadd.f32 %v3630_v23, %v3375_v46  ;;  %vm1587_vm0 = vcmp.eq.f32.partialorder %v1331_v45, -inf  ;;  %v2352_v38 = vsub.f32 %v1840_v28, %v2096_v20  ;;  %v2101_v13 = vld [vmem:[%s8058_s23 + $0x200] sm:$0xff]  ;;  %v2102_v20 = vld [vmem:[%s8058_s23 + $0x208] sm:$0xff] }
 0x1b6   : > { %v2606_v17 = vmul.f32 %v2350_v4, %v2350_v4  ;;  %vm11622_vm12 = vcmp.lt.s32.totalorder %v11621_v57, %v11548_v3  ;;  %vm1079_vm11 = vcmp.eq.f32.partialorder %v11623_v44, inf  ;;  %v1333_v2 = vsel %vm1077_vm6, 3.4028235e+38, %v11617_v48  ;;  %v11635_v48 = vld [vmem:[#allocation75_spill] sm:$0xff]  ;;  %v11639_v57 = vld [vmem:[#allocation160_spill] sm:$0xff] }
 0x1b7   : > { %v3377_v63 = vsel %vm11622_vm12, %v2604_v50, 0.0  ;;  %v1842_v33 = vsel %vm1586_vm5, -3.4028235e+38, %v1330_v58  ;;  %v3632_v16 = vadd.f32 %v3631_v11, %v3376_v6  ;;  %vm1588_vm10 = vcmp.eq.f32.partialorder %v1332_v61, -inf  ;;  %v11636_v1 = vld [vmem:[#allocation159_spill] sm:$0xff] }
 0x1b8   : > { %v2353_v27 = vsub.f32 %v1841_v36, %v2097_v0  ;;  %v2607_v21 = vmul.f32 %v2351_v19, %v2351_v19  ;;  %vm11625_vm7 = vcmp.lt.s32.totalorder %v11624_v5, %v11548_v3  ;;  %vm1080_vm3 = vcmp.eq.f32.partialorder %v11626_v35, inf  ;;  %v2103_v0 = vld [vmem:[%s8058_s23 + $0x210] sm:$0xff] }
 0x1b9   : > { %v3378_v25 = vsel %vm11625_vm7, %v2605_v51, 0.0  ;;  %v1334_v29 = vsel %vm1078_vm1, 3.4028235e+38, %v11620_v8  ;;  %v1843_v49 = vsel %vm1587_vm0, -3.4028235e+38, %v1331_v45  ;;  %v3633_v22 = vadd.f32 %v3632_v16, %v3377_v63  ;;  %v11638_v8 = vld [vmem:[#allocation76_spill] sm:$0xff] }
 0x1ba   : > { %vm1589_vm8 = vcmp.eq.f32.partialorder %v1333_v2, -inf  ;;  %v2354_v24 = vsub.f32 %v1842_v33, %v2098_v55  ;;  %v2608_v18 = vmul.f32 %v2352_v38, %v2352_v38  ;;  %vm11628_vm2 = vcmp.lt.s32.totalorder %v11627_v54, %v11548_v3  ;;  %v2104_v55 = vld [vmem:[%s8058_s23 + $0x218] sm:$0xff]  ;;  %v11642_v5 = vld [vmem:[#allocation161_spill] sm:$0xff] }
 0x1bb   : > { %v3379_v56 = vsel %vm11628_vm2, %v2606_v17, 0.0  ;;  %vm1081_vm4 = vcmp.eq.f32.partialorder %v11629_v10, inf  ;;  %v1335_v14 = vsel %vm1079_vm11, 3.4028235e+38, %v11623_v44  ;;  %v1844_v26 = vsel %vm1588_vm10, -3.4028235e+38, %v1332_v61 }
 0x1bc   : > { %v3634_v40 = vadd.f32 %v3633_v22, %v3378_v25  ;;  %vm1590_vm13 = vcmp.eq.f32.partialorder %v1334_v29, -inf  ;;  %v2355_v43 = vsub.f32 %v1843_v49, %v2099_v34  ;;  %v2609_v42 = vmul.f32 %v2353_v27, %v2353_v27  ;;  %v11641_v44 = vld [vmem:[#allocation25_spill] sm:$0xff]  ;;  %v2105_v34 = vld [vmem:[%s8058_s23 + $0x220] sm:$0xff]  ;;  %v11645_v54 = vld [vmem:[#allocation162_spill] sm:$0xff] }
 0x1bd   : > { %vm11631_vm15 = vcmp.lt.s32.totalorder %v11630_v9, %v11548_v3  ;;  %vm1082_vm14 = vcmp.eq.f32.partialorder %v11632_v52, inf  ;;  %v1336_v58 = vsel %vm1080_vm3, 3.4028235e+38, %v11626_v35  ;;  %v1845_v7 = vsel %vm1589_vm8, -3.4028235e+38, %v1333_v2  ;;  %v11644_v35 = vld [vmem:[#allocation77_spill] sm:$0xff] }
 0x1be   : > { %v3380_v62 = vsel %vm11631_vm15, %v2607_v21, 0.0  ;;  %v3635_v53 = vadd.f32 %v3634_v40, %v3379_v56  ;;  %vm1591_vm6 = vcmp.eq.f32.partialorder %v1335_v14, -inf  ;;  %v2356_v4 = vsub.f32 %v1844_v26, %v2100_v41  ;;  %v2106_v41 = vld [vmem:[%s8058_s23 + $0x228] sm:$0xff]  ;;  %v11648_v9 = vld [vmem:[#allocation163_spill] sm:$0xff] }
 0x1bf   : > { %v2610_v50 = vmul.f32 %v2354_v24, %v2354_v24  ;;  %vm11634_vm5 = vcmp.lt.s32.totalorder %v11633_v15, %v11548_v3  ;;  %vm1083_vm9 = vcmp.eq.f32.partialorder %v11635_v48, inf  ;;  %v1337_v45 = vsel %vm1081_vm4, 3.4028235e+38, %v11629_v10  ;;  %v11647_v10 = vld [vmem:[#allocation78_spill] sm:$0xff]  ;;  %v11651_v15 = vld [vmem:[#allocation164_spill] sm:$0xff] }
 0x1c0   : > { %v3381_v46 = vsel %vm11634_vm5, %v2608_v18, 0.0  ;;  %v1846_v28 = vsel %vm1590_vm13, -3.4028235e+38, %v1334_v29  ;;  %v3636_v23 = vadd.f32 %v3635_v53, %v3380_v62  ;;  %vm1592_vm1 = vcmp.eq.f32.partialorder %v1336_v58, -inf }
 0x1c1   : > { %v2357_v19 = vsub.f32 %v1845_v7, %v2101_v13  ;;  %v2611_v51 = vmul.f32 %v2355_v43, %v2355_v43  ;;  %vm11637_vm0 = vcmp.lt.s32.totalorder %v11636_v1, %v11548_v3  ;;  %vm1084_vm12 = vcmp.eq.f32.partialorder %v11638_v8, inf  ;;  %v2107_v13 = vld [vmem:[%s8058_s23 + $0x230] sm:$0xff] }
 0x1c2   : > { %v3382_v6 = vsel %vm11637_vm0, %v2609_v42, 0.0  ;;  %v1338_v61 = vsel %vm1082_vm14, 3.4028235e+38, %v11632_v52  ;;  %v1847_v36 = vsel %vm1591_vm6, -3.4028235e+38, %v1335_v14  ;;  %v3637_v11 = vadd.f32 %v3636_v23, %v3381_v46  ;;  %v11650_v52 = vld [vmem:[#allocation79_spill] sm:$0xff] }
 0x1c3   : > { %vm1593_vm11 = vcmp.eq.f32.partialorder %v1337_v45, -inf  ;;  %v2358_v38 = vsub.f32 %v1846_v28, %v2102_v20  ;;  %v2612_v17 = vmul.f32 %v2356_v4, %v2356_v4  ;;  %vm11640_vm10 = vcmp.lt.s32.totalorder %v11639_v57, %v11548_v3  ;;  %v2108_v20 = vld [vmem:[%s8058_s23 + $0x238] sm:$0xff]  ;;  %v11654_v1 = vld [vmem:[#allocation165_spill] sm:$0xff] }
 0x1c4   : > { %v3383_v63 = vsel %vm11640_vm10, %v2610_v50, 0.0  ;;  %vm1085_vm7 = vcmp.eq.f32.partialorder %v11641_v44, inf  ;;  %v1339_v2 = vsel %vm1083_vm9, 3.4028235e+38, %v11635_v48  ;;  %v1848_v33 = vsel %vm1592_vm1, -3.4028235e+38, %v1336_v58 }
 0x1c5   : > { %v3638_v16 = vadd.f32 %v3637_v11, %v3382_v6  ;;  %vm1594_vm3 = vcmp.eq.f32.partialorder %v1338_v61, -inf  ;;  %v2359_v27 = vsub.f32 %v1847_v36, %v2103_v0  ;;  %v2613_v21 = vmul.f32 %v2357_v19, %v2357_v19  ;;  %v11653_v48 = vld [vmem:[#allocation80_spill] sm:$0xff]  ;;  %v2109_v0 = vld [vmem:[%s8058_s23 + $0x240] sm:$0xff]  ;;  %v11657_v57 = vld [vmem:[#allocation166_spill] sm:$0xff] }
 0x1c6   : > { %vm11643_vm8 = vcmp.lt.s32.totalorder %v11642_v5, %v11548_v3  ;;  %vm1086_vm2 = vcmp.eq.f32.partialorder %v11644_v35, inf  ;;  %v1340_v29 = vsel %vm1084_vm12, 3.4028235e+38, %v11638_v8  ;;  %v1849_v49 = vsel %vm1593_vm11, -3.4028235e+38, %v1337_v45  ;;  %v11656_v8 = vld [vmem:[#allocation81_spill] sm:$0xff] }
 0x1c7   : > { %v3384_v25 = vsel %vm11643_vm8, %v2611_v51, 0.0  ;;  %v3639_v22 = vadd.f32 %v3638_v16, %v3383_v63  ;;  %vm1595_vm4 = vcmp.eq.f32.partialorder %v1339_v2, -inf  ;;  %v2360_v24 = vsub.f32 %v1848_v33, %v2104_v55  ;;  %v2110_v55 = vld [vmem:[%s8058_s23 + $0x248] sm:$0xff]  ;;  %v11660_v5 = vld [vmem:[#allocation167_spill] sm:$0xff] }
 0x1c8   : > { %v2614_v18 = vmul.f32 %v2358_v38, %v2358_v38  ;;  %vm11646_vm13 = vcmp.lt.s32.totalorder %v11645_v54, %v11548_v3  ;;  %vm1087_vm15 = vcmp.eq.f32.partialorder %v11647_v10, inf  ;;  %v1341_v14 = vsel %vm1085_vm7, 3.4028235e+38, %v11641_v44  ;;  %v11659_v44 = vld [vmem:[#allocation82_spill] sm:$0xff]  ;;  %v11663_v54 = vld [vmem:[#allocation168_spill] sm:$0xff] }
 0x1c9   : > { %v3385_v56 = vsel %vm11646_vm13, %v2612_v17, 0.0  ;;  %v1850_v26 = vsel %vm1594_vm3, -3.4028235e+38, %v1338_v61  ;;  %v3640_v40 = vadd.f32 %v3639_v22, %v3384_v25  ;;  %vm1596_vm14 = vcmp.eq.f32.partialorder %v1340_v29, -inf }
 0x1ca   : > { %v2361_v43 = vsub.f32 %v1849_v49, %v2105_v34  ;;  %v2615_v42 = vmul.f32 %v2359_v27, %v2359_v27  ;;  %vm11649_vm6 = vcmp.lt.s32.totalorder %v11648_v9, %v11548_v3  ;;  %vm1088_vm5 = vcmp.eq.f32.partialorder %v11650_v52, inf  ;;  %v2111_v34 = vld [vmem:[%s8058_s23 + $0x250] sm:$0xff] }
 0x1cb   : > { %v3386_v62 = vsel %vm11649_vm6, %v2613_v21, 0.0  ;;  %v1342_v58 = vsel %vm1086_vm2, 3.4028235e+38, %v11644_v35  ;;  %v1851_v7 = vsel %vm1595_vm4, -3.4028235e+38, %v1339_v2  ;;  %v3641_v53 = vadd.f32 %v3640_v40, %v3385_v56  ;;  %v11662_v35 = vld [vmem:[#allocation83_spill] sm:$0xff] }
 0x1cc   : > { %vm1597_vm9 = vcmp.eq.f32.partialorder %v1341_v14, -inf  ;;  %v2362_v4 = vsub.f32 %v1850_v26, %v2106_v41  ;;  %v2616_v50 = vmul.f32 %v2360_v24, %v2360_v24  ;;  %vm11652_vm1 = vcmp.lt.s32.totalorder %v11651_v15, %v11548_v3  ;;  %v2112_v41 = vld [vmem:[%s8058_s23 + $0x258] sm:$0xff]  ;;  %v11666_v9 = vld [vmem:[#allocation169_spill] sm:$0xff] }
 0x1cd   : > { %v3387_v46 = vsel %vm11652_vm1, %v2614_v18, 0.0  ;;  %vm1089_vm0 = vcmp.eq.f32.partialorder %v11653_v48, inf  ;;  %v1343_v45 = vsel %vm1087_vm15, 3.4028235e+38, %v11647_v10  ;;  %v1852_v28 = vsel %vm1596_vm14, -3.4028235e+38, %v1340_v29 }
 0x1ce   : > { %v3642_v23 = vadd.f32 %v3641_v53, %v3386_v62  ;;  %vm1598_vm12 = vcmp.eq.f32.partialorder %v1342_v58, -inf  ;;  %v2363_v19 = vsub.f32 %v1851_v7, %v2107_v13  ;;  %v2617_v51 = vmul.f32 %v2361_v43, %v2361_v43  ;;  %v11665_v10 = vld [vmem:[#allocation84_spill] sm:$0xff]  ;;  %v2113_v13 = vld [vmem:[%s8058_s23 + $0x260] sm:$0xff]  ;;  %v11669_v15 = vld [vmem:[#allocation170_spill] sm:$0xff] }
 0x1cf   : > { %vm11655_vm11 = vcmp.lt.s32.totalorder %v11654_v1, %v11548_v3  ;;  %vm1090_vm10 = vcmp.eq.f32.partialorder %v11656_v8, inf  ;;  %v1344_v61 = vsel %vm1088_vm5, 3.4028235e+38, %v11650_v52  ;;  %v1853_v36 = vsel %vm1597_vm9, -3.4028235e+38, %v1341_v14  ;;  %v11668_v52 = vld [vmem:[#allocation85_spill] sm:$0xff] }
 0x1d0   : > { %v3388_v6 = vsel %vm11655_vm11, %v2615_v42, 0.0  ;;  %v3643_v11 = vadd.f32 %v3642_v23, %v3387_v46  ;;  %vm1599_vm7 = vcmp.eq.f32.partialorder %v1343_v45, -inf  ;;  %v2364_v38 = vsub.f32 %v1852_v28, %v2108_v20  ;;  %v2114_v20 = vld [vmem:[%s8058_s23 + $0x268] sm:$0xff]  ;;  %v11672_v1 = vld [vmem:[#allocation171_spill] sm:$0xff] }
 0x1d1   : > { %v2618_v17 = vmul.f32 %v2362_v4, %v2362_v4  ;;  %vm11658_vm3 = vcmp.lt.s32.totalorder %v11657_v57, %v11548_v3  ;;  %vm1091_vm8 = vcmp.eq.f32.partialorder %v11659_v44, inf  ;;  %v1345_v2 = vsel %vm1089_vm0, 3.4028235e+38, %v11653_v48  ;;  %v11671_v48 = vld [vmem:[#allocation86_spill] sm:$0xff]  ;;  %v11675_v57 = vld [vmem:[#allocation172_spill] sm:$0xff] }
 0x1d2   : > { %v3389_v63 = vsel %vm11658_vm3, %v2616_v50, 0.0  ;;  %v1854_v33 = vsel %vm1598_vm12, -3.4028235e+38, %v1342_v58  ;;  %v3644_v16 = vadd.f32 %v3643_v11, %v3388_v6  ;;  %vm1600_vm2 = vcmp.eq.f32.partialorder %v1344_v61, -inf }
 0x1d3   : > { %v2365_v27 = vsub.f32 %v1853_v36, %v2109_v0  ;;  %v2619_v21 = vmul.f32 %v2363_v19, %v2363_v19  ;;  %vm11661_vm4 = vcmp.lt.s32.totalorder %v11660_v5, %v11548_v3  ;;  %vm1092_vm13 = vcmp.eq.f32.partialorder %v11662_v35, inf  ;;  %v2115_v0 = vld [vmem:[%s8058_s23 + $0x270] sm:$0xff] }
 0x1d4   : > { %v3390_v25 = vsel %vm11661_vm4, %v2617_v51, 0.0  ;;  %v1346_v29 = vsel %vm1090_vm10, 3.4028235e+38, %v11656_v8  ;;  %v1855_v49 = vsel %vm1599_vm7, -3.4028235e+38, %v1343_v45  ;;  %v3645_v22 = vadd.f32 %v3644_v16, %v3389_v63  ;;  %v11674_v8 = vld [vmem:[#allocation87_spill] sm:$0xff] }
 0x1d5   : > { %vm1601_vm15 = vcmp.eq.f32.partialorder %v1345_v2, -inf  ;;  %v2366_v24 = vsub.f32 %v1854_v33, %v2110_v55  ;;  %v2620_v18 = vmul.f32 %v2364_v38, %v2364_v38  ;;  %vm11664_vm14 = vcmp.lt.s32.totalorder %v11663_v54, %v11548_v3  ;;  %v2116_v55 = vld [vmem:[%s8058_s23 + $0x278] sm:$0xff]  ;;  %v11678_v5 = vld [vmem:[#allocation173_spill] sm:$0xff] }
 0x1d6   : > { %v3391_v56 = vsel %vm11664_vm14, %v2618_v17, 0.0  ;;  %vm1093_vm6 = vcmp.eq.f32.partialorder %v11665_v10, inf  ;;  %v1347_v14 = vsel %vm1091_vm8, 3.4028235e+38, %v11659_v44  ;;  %v1856_v26 = vsel %vm1600_vm2, -3.4028235e+38, %v1344_v61 }
 0x1d7   : > { %v3646_v40 = vadd.f32 %v3645_v22, %v3390_v25  ;;  %vm1602_vm5 = vcmp.eq.f32.partialorder %v1346_v29, -inf  ;;  %v2367_v43 = vsub.f32 %v1855_v49, %v2111_v34  ;;  %v2621_v42 = vmul.f32 %v2365_v27, %v2365_v27  ;;  %v11677_v44 = vld [vmem:[#allocation88_spill] sm:$0xff]  ;;  %v2117_v34 = vld [vmem:[%s8058_s23 + $0x280] sm:$0xff]  ;;  %v11681_v54 = vld [vmem:[#allocation174_spill] sm:$0xff] }
 0x1d8   : > { %vm11667_vm9 = vcmp.lt.s32.totalorder %v11666_v9, %v11548_v3  ;;  %vm1094_vm1 = vcmp.eq.f32.partialorder %v11668_v52, inf  ;;  %v1348_v58 = vsel %vm1092_vm13, 3.4028235e+38, %v11662_v35  ;;  %v1857_v7 = vsel %vm1601_vm15, -3.4028235e+38, %v1345_v2  ;;  %v11680_v35 = vld [vmem:[#allocation89_spill] sm:$0xff] }
 0x1d9   : > { %v3392_v62 = vsel %vm11667_vm9, %v2619_v21, 0.0  ;;  %v3647_v53 = vadd.f32 %v3646_v40, %v3391_v56  ;;  %vm1603_vm0 = vcmp.eq.f32.partialorder %v1347_v14, -inf  ;;  %v2368_v4 = vsub.f32 %v1856_v26, %v2112_v41  ;;  %v2118_v41 = vld [vmem:[%s8058_s23 + $0x288] sm:$0xff]  ;;  %v11684_v9 = vld [vmem:[#allocation175_spill] sm:$0xff] }
 0x1da   : > { %v2622_v50 = vmul.f32 %v2366_v24, %v2366_v24  ;;  %vm11670_vm12 = vcmp.lt.s32.totalorder %v11669_v15, %v11548_v3  ;;  %vm1095_vm11 = vcmp.eq.f32.partialorder %v11671_v48, inf  ;;  %v1349_v45 = vsel %vm1093_vm6, 3.4028235e+38, %v11665_v10  ;;  %v11683_v10 = vld [vmem:[#allocation90_spill] sm:$0xff]  ;;  %v11687_v15 = vld [vmem:[#allocation176_spill] sm:$0xff] }
 0x1db   : > { %v3393_v46 = vsel %vm11670_vm12, %v2620_v18, 0.0  ;;  %v1858_v28 = vsel %vm1602_vm5, -3.4028235e+38, %v1346_v29  ;;  %v3648_v23 = vadd.f32 %v3647_v53, %v3392_v62  ;;  %vm1604_vm10 = vcmp.eq.f32.partialorder %v1348_v58, -inf }
 0x1dc   : > { %v2369_v19 = vsub.f32 %v1857_v7, %v2113_v13  ;;  %v2623_v51 = vmul.f32 %v2367_v43, %v2367_v43  ;;  %vm11673_vm7 = vcmp.lt.s32.totalorder %v11672_v1, %v11548_v3  ;;  %vm1096_vm3 = vcmp.eq.f32.partialorder %v11674_v8, inf  ;;  %v2119_v13 = vld [vmem:[%s8058_s23 + $0x290] sm:$0xff] }
 0x1dd   : > { %v3394_v6 = vsel %vm11673_vm7, %v2621_v42, 0.0  ;;  %v1350_v61 = vsel %vm1094_vm1, 3.4028235e+38, %v11668_v52  ;;  %v1859_v36 = vsel %vm1603_vm0, -3.4028235e+38, %v1347_v14  ;;  %v3649_v11 = vadd.f32 %v3648_v23, %v3393_v46  ;;  %v11686_v52 = vld [vmem:[#allocation91_spill] sm:$0xff] }
 0x1de   : > { %vm1605_vm8 = vcmp.eq.f32.partialorder %v1349_v45, -inf  ;;  %v2370_v38 = vsub.f32 %v1858_v28, %v2114_v20  ;;  %v2624_v17 = vmul.f32 %v2368_v4, %v2368_v4  ;;  %vm11676_vm2 = vcmp.lt.s32.totalorder %v11675_v57, %v11548_v3  ;;  %v2120_v20 = vld [vmem:[%s8058_s23 + $0x298] sm:$0xff]  ;;  %v11690_v1 = vld [vmem:[#allocation177_spill] sm:$0xff] }
 0x1df   : > { %v3395_v63 = vsel %vm11676_vm2, %v2622_v50, 0.0  ;;  %vm1097_vm4 = vcmp.eq.f32.partialorder %v11677_v44, inf  ;;  %v1351_v2 = vsel %vm1095_vm11, 3.4028235e+38, %v11671_v48  ;;  %v1860_v33 = vsel %vm1604_vm10, -3.4028235e+38, %v1348_v58 }
 0x1e0   : > { %v3650_v16 = vadd.f32 %v3649_v11, %v3394_v6  ;;  %vm1606_vm13 = vcmp.eq.f32.partialorder %v1350_v61, -inf  ;;  %v2371_v27 = vsub.f32 %v1859_v36, %v2115_v0  ;;  %v2625_v21 = vmul.f32 %v2369_v19, %v2369_v19  ;;  %v11689_v48 = vld [vmem:[#allocation92_spill] sm:$0xff]  ;;  %v2121_v0 = vld [vmem:[%s8058_s23 + $0x2a0] sm:$0xff]  ;;  %v11693_v57 = vld [vmem:[#allocation178_spill] sm:$0xff] }
 0x1e1   : > { %vm11679_vm15 = vcmp.lt.s32.totalorder %v11678_v5, %v11548_v3  ;;  %vm1098_vm14 = vcmp.eq.f32.partialorder %v11680_v35, inf  ;;  %v1352_v29 = vsel %vm1096_vm3, 3.4028235e+38, %v11674_v8  ;;  %v1861_v49 = vsel %vm1605_vm8, -3.4028235e+38, %v1349_v45  ;;  %v11692_v8 = vld [vmem:[#allocation93_spill] sm:$0xff] }
 0x1e2   : > { %v3396_v25 = vsel %vm11679_vm15, %v2623_v51, 0.0  ;;  %v3651_v22 = vadd.f32 %v3650_v16, %v3395_v63  ;;  %vm1607_vm6 = vcmp.eq.f32.partialorder %v1351_v2, -inf  ;;  %v2372_v24 = vsub.f32 %v1860_v33, %v2116_v55  ;;  %v2122_v55 = vld [vmem:[%s8058_s23 + $0x2a8] sm:$0xff]  ;;  %v11696_v5 = vld [vmem:[#allocation179_spill] sm:$0xff] }
 0x1e3   : > { %v2626_v18 = vmul.f32 %v2370_v38, %v2370_v38  ;;  %vm11682_vm5 = vcmp.lt.s32.totalorder %v11681_v54, %v11548_v3  ;;  %vm1099_vm9 = vcmp.eq.f32.partialorder %v11683_v10, inf  ;;  %v1353_v14 = vsel %vm1097_vm4, 3.4028235e+38, %v11677_v44  ;;  %v11695_v44 = vld [vmem:[#allocation94_spill] sm:$0xff]  ;;  %v11699_v54 = vld [vmem:[#allocation180_spill] sm:$0xff] }
 0x1e4   : > { %v3397_v56 = vsel %vm11682_vm5, %v2624_v17, 0.0  ;;  %v1862_v26 = vsel %vm1606_vm13, -3.4028235e+38, %v1350_v61  ;;  %v3652_v40 = vadd.f32 %v3651_v22, %v3396_v25  ;;  %vm1608_vm1 = vcmp.eq.f32.partialorder %v1352_v29, -inf }
 0x1e5   : > { %v2373_v43 = vsub.f32 %v1861_v49, %v2117_v34  ;;  %v2627_v42 = vmul.f32 %v2371_v27, %v2371_v27  ;;  %vm11685_vm0 = vcmp.lt.s32.totalorder %v11684_v9, %v11548_v3  ;;  %vm1100_vm12 = vcmp.eq.f32.partialorder %v11686_v52, inf  ;;  %v2123_v34 = vld [vmem:[%s8058_s23 + $0x2b0] sm:$0xff] }
 0x1e6   : > { %v3398_v62 = vsel %vm11685_vm0, %v2625_v21, 0.0  ;;  %v1354_v58 = vsel %vm1098_vm14, 3.4028235e+38, %v11680_v35  ;;  %v1863_v7 = vsel %vm1607_vm6, -3.4028235e+38, %v1351_v2  ;;  %v3653_v53 = vadd.f32 %v3652_v40, %v3397_v56  ;;  %v11698_v35 = vld [vmem:[#allocation95_spill] sm:$0xff] }
 0x1e7   : > { %vm1609_vm11 = vcmp.eq.f32.partialorder %v1353_v14, -inf  ;;  %v2374_v4 = vsub.f32 %v1862_v26, %v2118_v41  ;;  %v2628_v50 = vmul.f32 %v2372_v24, %v2372_v24  ;;  %vm11688_vm10 = vcmp.lt.s32.totalorder %v11687_v15, %v11548_v3  ;;  %v2124_v41 = vld [vmem:[%s8058_s23 + $0x2b8] sm:$0xff]  ;;  %v11702_v9 = vld [vmem:[#allocation181_spill] sm:$0xff] }
 0x1e8   : > { %v3399_v46 = vsel %vm11688_vm10, %v2626_v18, 0.0  ;;  %vm1101_vm7 = vcmp.eq.f32.partialorder %v11689_v48, inf  ;;  %v1355_v45 = vsel %vm1099_vm9, 3.4028235e+38, %v11683_v10  ;;  %v1864_v28 = vsel %vm1608_vm1, -3.4028235e+38, %v1352_v29 }
 0x1e9   : > { %v3654_v23 = vadd.f32 %v3653_v53, %v3398_v62  ;;  %vm1610_vm3 = vcmp.eq.f32.partialorder %v1354_v58, -inf  ;;  %v2375_v19 = vsub.f32 %v1863_v7, %v2119_v13  ;;  %v2629_v51 = vmul.f32 %v2373_v43, %v2373_v43  ;;  %v11701_v10 = vld [vmem:[#allocation96_spill] sm:$0xff]  ;;  %v2125_v13 = vld [vmem:[%s8058_s23 + $0x2c0] sm:$0xff]  ;;  %v11705_v15 = vld [vmem:[#allocation182_spill] sm:$0xff] }
 0x1ea   : > { %vm11691_vm8 = vcmp.lt.s32.totalorder %v11690_v1, %v11548_v3  ;;  %vm1102_vm2 = vcmp.eq.f32.partialorder %v11692_v8, inf  ;;  %v1356_v61 = vsel %vm1100_vm12, 3.4028235e+38, %v11686_v52  ;;  %v1865_v36 = vsel %vm1609_vm11, -3.4028235e+38, %v1353_v14  ;;  %v11704_v52 = vld [vmem:[#allocation97_spill] sm:$0xff] }
 0x1eb   : > { %v3400_v6 = vsel %vm11691_vm8, %v2627_v42, 0.0  ;;  %v3655_v11 = vadd.f32 %v3654_v23, %v3399_v46  ;;  %vm1611_vm4 = vcmp.eq.f32.partialorder %v1355_v45, -inf  ;;  %v2376_v38 = vsub.f32 %v1864_v28, %v2120_v20  ;;  %v2126_v20 = vld [vmem:[%s8058_s23 + $0x2c8] sm:$0xff]  ;;  %v11708_v1 = vld [vmem:[#allocation183_spill] sm:$0xff] }
 0x1ec   : > { %v2630_v17 = vmul.f32 %v2374_v4, %v2374_v4  ;;  %vm11694_vm13 = vcmp.lt.s32.totalorder %v11693_v57, %v11548_v3  ;;  %vm1103_vm15 = vcmp.eq.f32.partialorder %v11695_v44, inf  ;;  %v1357_v2 = vsel %vm1101_vm7, 3.4028235e+38, %v11689_v48  ;;  %v11707_v48 = vld [vmem:[#allocation98_spill] sm:$0xff]  ;;  %v11711_v57 = vld [vmem:[#allocation184_spill] sm:$0xff] }
 0x1ed   : > { %v3401_v63 = vsel %vm11694_vm13, %v2628_v50, 0.0  ;;  %v1866_v33 = vsel %vm1610_vm3, -3.4028235e+38, %v1354_v58  ;;  %v3656_v16 = vadd.f32 %v3655_v11, %v3400_v6  ;;  %vm1612_vm14 = vcmp.eq.f32.partialorder %v1356_v61, -inf }
 0x1ee   : > { %v2377_v27 = vsub.f32 %v1865_v36, %v2121_v0  ;;  %v2631_v21 = vmul.f32 %v2375_v19, %v2375_v19  ;;  %vm11697_vm6 = vcmp.lt.s32.totalorder %v11696_v5, %v11548_v3  ;;  %vm1104_vm5 = vcmp.eq.f32.partialorder %v11698_v35, inf  ;;  %v2127_v0 = vld [vmem:[%s8058_s23 + $0x2d0] sm:$0xff] }
 0x1ef   : > { %v3402_v25 = vsel %vm11697_vm6, %v2629_v51, 0.0  ;;  %v1358_v29 = vsel %vm1102_vm2, 3.4028235e+38, %v11692_v8  ;;  %v1867_v49 = vsel %vm1611_vm4, -3.4028235e+38, %v1355_v45  ;;  %v3657_v22 = vadd.f32 %v3656_v16, %v3401_v63  ;;  %v11710_v8 = vld [vmem:[#allocation99_spill] sm:$0xff] }
 0x1f0   : > { %vm1613_vm9 = vcmp.eq.f32.partialorder %v1357_v2, -inf  ;;  %v2378_v24 = vsub.f32 %v1866_v33, %v2122_v55  ;;  %v2632_v18 = vmul.f32 %v2376_v38, %v2376_v38  ;;  %vm11700_vm1 = vcmp.lt.s32.totalorder %v11699_v54, %v11548_v3  ;;  %v2128_v55 = vld [vmem:[%s8058_s23 + $0x2d8] sm:$0xff]  ;;  %v11714_v5 = vld [vmem:[#allocation185_spill] sm:$0xff] }
 0x1f1   : > { %v3403_v56 = vsel %vm11700_vm1, %v2630_v17, 0.0  ;;  %vm1105_vm0 = vcmp.eq.f32.partialorder %v11701_v10, inf  ;;  %v1359_v14 = vsel %vm1103_vm15, 3.4028235e+38, %v11695_v44  ;;  %v1868_v26 = vsel %vm1612_vm14, -3.4028235e+38, %v1356_v61 }
 0x1f2   : > { %v3658_v40 = vadd.f32 %v3657_v22, %v3402_v25  ;;  %vm1614_vm12 = vcmp.eq.f32.partialorder %v1358_v29, -inf  ;;  %v2379_v43 = vsub.f32 %v1867_v49, %v2123_v34  ;;  %v2633_v42 = vmul.f32 %v2377_v27, %v2377_v27  ;;  %v11713_v44 = vld [vmem:[#allocation100_spill] sm:$0xff]  ;;  %v2129_v34 = vld [vmem:[%s8058_s23 + $0x2e0] sm:$0xff]  ;;  %v11717_v54 = vld [vmem:[#allocation186_spill] sm:$0xff] }
 0x1f3   : > { %vm11703_vm11 = vcmp.lt.s32.totalorder %v11702_v9, %v11548_v3  ;;  %vm1106_vm10 = vcmp.eq.f32.partialorder %v11704_v52, inf  ;;  %v1360_v58 = vsel %vm1104_vm5, 3.4028235e+38, %v11698_v35  ;;  %v1869_v7 = vsel %vm1613_vm9, -3.4028235e+38, %v1357_v2  ;;  %v11716_v35 = vld [vmem:[#allocation101_spill] sm:$0xff] }
 0x1f4   : > { %v3404_v62 = vsel %vm11703_vm11, %v2631_v21, 0.0  ;;  %v3659_v53 = vadd.f32 %v3658_v40, %v3403_v56  ;;  %vm1615_vm7 = vcmp.eq.f32.partialorder %v1359_v14, -inf  ;;  %v2380_v4 = vsub.f32 %v1868_v26, %v2124_v41  ;;  %v2130_v41 = vld [vmem:[%s8058_s23 + $0x2e8] sm:$0xff]  ;;  %v11720_v9 = vld [vmem:[#allocation187_spill] sm:$0xff] }
 0x1f5   : > { %v2634_v50 = vmul.f32 %v2378_v24, %v2378_v24  ;;  %vm11706_vm3 = vcmp.lt.s32.totalorder %v11705_v15, %v11548_v3  ;;  %vm1107_vm8 = vcmp.eq.f32.partialorder %v11707_v48, inf  ;;  %v1361_v45 = vsel %vm1105_vm0, 3.4028235e+38, %v11701_v10  ;;  %v11719_v10 = vld [vmem:[#allocation102_spill] sm:$0xff]  ;;  %v11723_v15 = vld [vmem:[#allocation188_spill] sm:$0xff] }
 0x1f6   : > { %v3405_v46 = vsel %vm11706_vm3, %v2632_v18, 0.0  ;;  %v1870_v28 = vsel %vm1614_vm12, -3.4028235e+38, %v1358_v29  ;;  %v3660_v23 = vadd.f32 %v3659_v53, %v3404_v62  ;;  %vm1616_vm2 = vcmp.eq.f32.partialorder %v1360_v58, -inf }
 0x1f7   : > { %v2381_v19 = vsub.f32 %v1869_v7, %v2125_v13  ;;  %v2635_v51 = vmul.f32 %v2379_v43, %v2379_v43  ;;  %vm11709_vm4 = vcmp.lt.s32.totalorder %v11708_v1, %v11548_v3  ;;  %vm1108_vm13 = vcmp.eq.f32.partialorder %v11710_v8, inf  ;;  %v2131_v13 = vld [vmem:[%s8058_s23 + $0x2f0] sm:$0xff] }
 0x1f8   : > { %v3406_v6 = vsel %vm11709_vm4, %v2633_v42, 0.0  ;;  %v1362_v61 = vsel %vm1106_vm10, 3.4028235e+38, %v11704_v52  ;;  %v1871_v36 = vsel %vm1615_vm7, -3.4028235e+38, %v1359_v14  ;;  %v3661_v11 = vadd.f32 %v3660_v23, %v3405_v46  ;;  %v11722_v52 = vld [vmem:[#allocation103_spill] sm:$0xff] }
 0x1f9   : > { %vm1617_vm15 = vcmp.eq.f32.partialorder %v1361_v45, -inf  ;;  %v2382_v38 = vsub.f32 %v1870_v28, %v2126_v20  ;;  %v2636_v17 = vmul.f32 %v2380_v4, %v2380_v4  ;;  %vm11712_vm14 = vcmp.lt.s32.totalorder %v11711_v57, %v11548_v3  ;;  %v2132_v20 = vld [vmem:[%s8058_s23 + $0x2f8] sm:$0xff]  ;;  %v11726_v1 = vld [vmem:[#allocation189_spill] sm:$0xff] }
 0x1fa   : > { %v3407_v63 = vsel %vm11712_vm14, %v2634_v50, 0.0  ;;  %vm1109_vm6 = vcmp.eq.f32.partialorder %v11713_v44, inf  ;;  %v1363_v2 = vsel %vm1107_vm8, 3.4028235e+38, %v11707_v48  ;;  %v1872_v33 = vsel %vm1616_vm2, -3.4028235e+38, %v1360_v58 }
 0x1fb   : > { %v3662_v16 = vadd.f32 %v3661_v11, %v3406_v6  ;;  %vm1618_vm5 = vcmp.eq.f32.partialorder %v1362_v61, -inf  ;;  %v2383_v27 = vsub.f32 %v1871_v36, %v2127_v0  ;;  %v2637_v21 = vmul.f32 %v2381_v19, %v2381_v19  ;;  %v11725_v48 = vld [vmem:[#allocation104_spill] sm:$0xff]  ;;  %v2133_v0 = vld [vmem:[%s8058_s23 + $0x300] sm:$0xff]  ;;  %v11729_v57 = vld [vmem:[#allocation190_spill] sm:$0xff] }
 0x1fc   : > { %vm11715_vm9 = vcmp.lt.s32.totalorder %v11714_v5, %v11548_v3  ;;  %vm1110_vm1 = vcmp.eq.f32.partialorder %v11716_v35, inf  ;;  %v1364_v29 = vsel %vm1108_vm13, 3.4028235e+38, %v11710_v8  ;;  %v1873_v49 = vsel %vm1617_vm15, -3.4028235e+38, %v1361_v45  ;;  %v11728_v8 = vld [vmem:[#allocation105_spill] sm:$0xff] }
 0x1fd   : > { %v3408_v25 = vsel %vm11715_vm9, %v2635_v51, 0.0  ;;  %v3663_v22 = vadd.f32 %v3662_v16, %v3407_v63  ;;  %vm1619_vm0 = vcmp.eq.f32.partialorder %v1363_v2, -inf  ;;  %v2384_v24 = vsub.f32 %v1872_v33, %v2128_v55  ;;  %v2134_v55 = vld [vmem:[%s8058_s23 + $0x308] sm:$0xff]  ;;  %v11732_v5 = vld [vmem:[#allocation191_spill] sm:$0xff] }
 0x1fe   : > { %v2638_v18 = vmul.f32 %v2382_v38, %v2382_v38  ;;  %vm11718_vm12 = vcmp.lt.s32.totalorder %v11717_v54, %v11548_v3  ;;  %vm1111_vm11 = vcmp.eq.f32.partialorder %v11719_v10, inf  ;;  %v1365_v14 = vsel %vm1109_vm6, 3.4028235e+38, %v11713_v44  ;;  %v11731_v44 = vld [vmem:[#allocation106_spill] sm:$0xff]  ;;  %v11735_v54 = vld [vmem:[#allocation192_spill] sm:$0xff] }
 0x1ff   : > { %v3409_v56 = vsel %vm11718_vm12, %v2636_v17, 0.0  ;;  %v1874_v26 = vsel %vm1618_vm5, -3.4028235e+38, %v1362_v61  ;;  %v3664_v40 = vadd.f32 %v3663_v22, %v3408_v25  ;;  %vm1620_vm10 = vcmp.eq.f32.partialorder %v1364_v29, -inf }
 0x200   : > { %v2385_v43 = vsub.f32 %v1873_v49, %v2129_v34  ;;  %v2639_v42 = vmul.f32 %v2383_v27, %v2383_v27  ;;  %vm11721_vm7 = vcmp.lt.s32.totalorder %v11720_v9, %v11548_v3  ;;  %vm1112_vm3 = vcmp.eq.f32.partialorder %v11722_v52, inf  ;;  %v2135_v34 = vld [vmem:[%s8058_s23 + $0x310] sm:$0xff] }
 0x201   : > { %v3410_v62 = vsel %vm11721_vm7, %v2637_v21, 0.0  ;;  %v1366_v58 = vsel %vm1110_vm1, 3.4028235e+38, %v11716_v35  ;;  %v1875_v7 = vsel %vm1619_vm0, -3.4028235e+38, %v1363_v2  ;;  %v3665_v53 = vadd.f32 %v3664_v40, %v3409_v56  ;;  %v11734_v35 = vld [vmem:[#allocation107_spill] sm:$0xff] }
 0x202   : > { %vm1621_vm8 = vcmp.eq.f32.partialorder %v1365_v14, -inf  ;;  %v2386_v4 = vsub.f32 %v1874_v26, %v2130_v41  ;;  %v2640_v50 = vmul.f32 %v2384_v24, %v2384_v24  ;;  %vm11724_vm2 = vcmp.lt.s32.totalorder %v11723_v15, %v11548_v3  ;;  %v2136_v41 = vld [vmem:[%s8058_s23 + $0x318] sm:$0xff]  ;;  %v11738_v9 = vld [vmem:[#allocation193_spill] sm:$0xff] }
 0x203   : > { %v3411_v46 = vsel %vm11724_vm2, %v2638_v18, 0.0  ;;  %vm1113_vm4 = vcmp.eq.f32.partialorder %v11725_v48, inf  ;;  %v1367_v45 = vsel %vm1111_vm11, 3.4028235e+38, %v11719_v10  ;;  %v1876_v28 = vsel %vm1620_vm10, -3.4028235e+38, %v1364_v29 }
 0x204   : > { %v3666_v23 = vadd.f32 %v3665_v53, %v3410_v62  ;;  %vm1622_vm13 = vcmp.eq.f32.partialorder %v1366_v58, -inf  ;;  %v2387_v19 = vsub.f32 %v1875_v7, %v2131_v13  ;;  %v2641_v51 = vmul.f32 %v2385_v43, %v2385_v43  ;;  %v11737_v10 = vld [vmem:[#allocation48_spill] sm:$0xff]  ;;  %v2137_v13 = vld [vmem:[%s8058_s23 + $0x320] sm:$0xff]  ;;  %v11741_v15 = vld [vmem:[#allocation194_spill] sm:$0xff] }
 0x205   : > { %vm11727_vm15 = vcmp.lt.s32.totalorder %v11726_v1, %v11548_v3  ;;  %vm1114_vm14 = vcmp.eq.f32.partialorder %v11728_v8, inf  ;;  %v1368_v61 = vsel %vm1112_vm3, 3.4028235e+38, %v11722_v52  ;;  %v1877_v36 = vsel %vm1621_vm8, -3.4028235e+38, %v1365_v14  ;;  %v11740_v52 = vld [vmem:[#allocation108_spill] sm:$0xff] }
 0x206   : > { %v3412_v6 = vsel %vm11727_vm15, %v2639_v42, 0.0  ;;  %v3667_v11 = vadd.f32 %v3666_v23, %v3411_v46  ;;  %vm1623_vm6 = vcmp.eq.f32.partialorder %v1367_v45, -inf  ;;  %v2388_v38 = vsub.f32 %v1876_v28, %v2132_v20  ;;  %v2138_v20 = vld [vmem:[%s8058_s23 + $0x328] sm:$0xff]  ;;  %v11744_v1 = vld [vmem:[#allocation195_spill] sm:$0xff] }
 0x207   : > { %v2642_v17 = vmul.f32 %v2386_v4, %v2386_v4  ;;  %vm11730_vm5 = vcmp.lt.s32.totalorder %v11729_v57, %v11548_v3  ;;  %vm1115_vm9 = vcmp.eq.f32.partialorder %v11731_v44, inf  ;;  %v1369_v2 = vsel %vm1113_vm4, 3.4028235e+38, %v11725_v48  ;;  %v11743_v48 = vld [vmem:[#allocation109_spill] sm:$0xff]  ;;  %v11747_v57 = vld [vmem:[#allocation196_spill] sm:$0xff] }
 0x208   : > { %v3413_v63 = vsel %vm11730_vm5, %v2640_v50, 0.0  ;;  %v1878_v33 = vsel %vm1622_vm13, -3.4028235e+38, %v1366_v58  ;;  %v3668_v16 = vadd.f32 %v3667_v11, %v3412_v6  ;;  %vm1624_vm1 = vcmp.eq.f32.partialorder %v1368_v61, -inf }
 0x209   : > { %v2389_v27 = vsub.f32 %v1877_v36, %v2133_v0  ;;  %v2643_v21 = vmul.f32 %v2387_v19, %v2387_v19  ;;  %vm11733_vm0 = vcmp.lt.s32.totalorder %v11732_v5, %v11548_v3  ;;  %vm1116_vm12 = vcmp.eq.f32.partialorder %v11734_v35, inf  ;;  %v2139_v0 = vld [vmem:[%s8058_s23 + $0x330] sm:$0xff] }
 0x20a   : > { %v3414_v25 = vsel %vm11733_vm0, %v2641_v51, 0.0  ;;  %v1370_v29 = vsel %vm1114_vm14, 3.4028235e+38, %v11728_v8  ;;  %v1879_v49 = vsel %vm1623_vm6, -3.4028235e+38, %v1367_v45  ;;  %v3669_v22 = vadd.f32 %v3668_v16, %v3413_v63  ;;  %v11746_v8 = vld [vmem:[#allocation110_spill] sm:$0xff] }
 0x20b   : > { %vm1625_vm11 = vcmp.eq.f32.partialorder %v1369_v2, -inf  ;;  %v2390_v24 = vsub.f32 %v1878_v33, %v2134_v55  ;;  %v2644_v18 = vmul.f32 %v2388_v38, %v2388_v38  ;;  %vm11736_vm10 = vcmp.lt.s32.totalorder %v11735_v54, %v11548_v3  ;;  %v2140_v55 = vld [vmem:[%s8058_s23 + $0x338] sm:$0xff]  ;;  %v11750_v5 = vld [vmem:[#allocation197_spill] sm:$0xff] }
 0x20c   : > { %v3415_v56 = vsel %vm11736_vm10, %v2642_v17, 0.0  ;;  %vm1117_vm7 = vcmp.eq.f32.partialorder %v11737_v10, inf  ;;  %v1371_v14 = vsel %vm1115_vm9, 3.4028235e+38, %v11731_v44  ;;  %v1880_v26 = vsel %vm1624_vm1, -3.4028235e+38, %v1368_v61 }
 0x20d   : > { %v3670_v40 = vadd.f32 %v3669_v22, %v3414_v25  ;;  %vm1626_vm3 = vcmp.eq.f32.partialorder %v1370_v29, -inf  ;;  %v2391_v43 = vsub.f32 %v1879_v49, %v2135_v34  ;;  %v2645_v42 = vmul.f32 %v2389_v27, %v2389_v27  ;;  %v11749_v44 = vld [vmem:[#allocation111_spill] sm:$0xff]  ;;  %v11753_v54 = vld [vmem:[#allocation198_spill] sm:$0xff] }
 0x20e   : > { %vm11739_vm8 = vcmp.lt.s32.totalorder %v11738_v9, %v11548_v3  ;;  %vm1118_vm2 = vcmp.eq.f32.partialorder %v11740_v52, inf  ;;  %v1372_v58 = vsel %vm1116_vm12, 3.4028235e+38, %v11734_v35  ;;  %v1881_v7 = vsel %vm1625_vm11, -3.4028235e+38, %v1369_v2  ;;  %v11752_v35 = vld [vmem:[#allocation112_spill] sm:$0xff] }
 0x20f   : > { %v3416_v62 = vsel %vm11739_vm8, %v2643_v21, 0.0  ;;  %v3671_v53 = vadd.f32 %v3670_v40, %v3415_v56  ;;  %vm1627_vm4 = vcmp.eq.f32.partialorder %v1371_v14, -inf  ;;  %v2392_v4 = vsub.f32 %v1880_v26, %v2136_v41  ;;  %v2141_v34 = vld [vmem:[%s8058_s23 + $0x340] sm:$0xff]  ;;  %v2142_v41 = vld [vmem:[%s8058_s23 + $0x348] sm:$0xff] }
 0x210   : > { %v2646_v50 = vmul.f32 %v2390_v24, %v2390_v24  ;;  %vm11742_vm13 = vcmp.lt.s32.totalorder %v11741_v15, %v11548_v3  ;;  %vm1119_vm15 = vcmp.eq.f32.partialorder %v11743_v48, inf  ;;  %v1373_v45 = vsel %vm1117_vm7, 3.4028235e+38, %v11737_v10  ;;  %v11755_v10 = vld [vmem:[#allocation113_spill] sm:$0xff]  ;;  %v11756_v9 = vld [vmem:[#allocation199_spill] sm:$0xff]  ;;  %v11759_v15 = vld [vmem:[#allocation200_spill] sm:$0xff] }
 0x211   : > { %v3417_v46 = vsel %vm11742_vm13, %v2644_v18, 0.0  ;;  %v1882_v28 = vsel %vm1626_vm3, -3.4028235e+38, %v1370_v29  ;;  %v3672_v23 = vadd.f32 %v3671_v53, %v3416_v62  ;;  %vm1628_vm14 = vcmp.eq.f32.partialorder %v1372_v58, -inf }
 0x212   : > { %v2393_v19 = vsub.f32 %v1881_v7, %v2137_v13  ;;  %v2647_v51 = vmul.f32 %v2391_v43, %v2391_v43  ;;  %vm11745_vm6 = vcmp.lt.s32.totalorder %v11744_v1, %v11548_v3  ;;  %vm1120_vm5 = vcmp.eq.f32.partialorder %v11746_v8, inf  ;;  %v2143_v13 = vld [vmem:[%s8058_s23 + $0x350] sm:$0xff] }
 0x213   : > { %v3418_v6 = vsel %vm11745_vm6, %v2645_v42, 0.0  ;;  %v1374_v61 = vsel %vm1118_vm2, 3.4028235e+38, %v11740_v52  ;;  %v1883_v36 = vsel %vm1627_vm4, -3.4028235e+38, %v1371_v14  ;;  %v3673_v11 = vadd.f32 %v3672_v23, %v3417_v46  ;;  %v11758_v52 = vld [vmem:[#allocation114_spill] sm:$0xff] }
 0x214   : > { %vm1629_vm9 = vcmp.eq.f32.partialorder %v1373_v45, -inf  ;;  %v2394_v38 = vsub.f32 %v1882_v28, %v2138_v20  ;;  %v2648_v17 = vmul.f32 %v2392_v4, %v2392_v4  ;;  %vm11748_vm1 = vcmp.lt.s32.totalorder %v11747_v57, %v11548_v3  ;;  %v2144_v20 = vld [vmem:[%s8058_s23 + $0x358] sm:$0xff]  ;;  %v11762_v1 = vld [vmem:[#allocation201_spill] sm:$0xff] }
 0x215   : > { %v3419_v63 = vsel %vm11748_vm1, %v2646_v50, 0.0  ;;  %vm1121_vm0 = vcmp.eq.f32.partialorder %v11749_v44, inf  ;;  %v1375_v2 = vsel %vm1119_vm15, 3.4028235e+38, %v11743_v48  ;;  %v1884_v33 = vsel %vm1628_vm14, -3.4028235e+38, %v1372_v58 }
 0x216   : > { %v3674_v16 = vadd.f32 %v3673_v11, %v3418_v6  ;;  %vm1630_vm12 = vcmp.eq.f32.partialorder %v1374_v61, -inf  ;;  %v2395_v27 = vsub.f32 %v1883_v36, %v2139_v0  ;;  %v2649_v21 = vmul.f32 %v2393_v19, %v2393_v19  ;;  %v11761_v48 = vld [vmem:[#allocation115_spill] sm:$0xff]  ;;  %v11765_v57 = vld [vmem:[#allocation202_spill] sm:$0xff] }
 0x217   : > { %vm11751_vm11 = vcmp.lt.s32.totalorder %v11750_v5, %v11548_v3  ;;  %vm1122_vm10 = vcmp.eq.f32.partialorder %v11752_v35, inf  ;;  %v1376_v29 = vsel %vm1120_vm5, 3.4028235e+38, %v11746_v8  ;;  %v1885_v49 = vsel %vm1629_vm9, -3.4028235e+38, %v1373_v45  ;;  %v11764_v8 = vld [vmem:[#allocation116_spill] sm:$0xff] }
 0x218   : > { %v3420_v25 = vsel %vm11751_vm11, %v2647_v51, 0.0  ;;  %v3675_v22 = vadd.f32 %v3674_v16, %v3419_v63  ;;  %vm1631_vm7 = vcmp.eq.f32.partialorder %v1375_v2, -inf  ;;  %v2396_v24 = vsub.f32 %v1884_v33, %v2140_v55  ;;  %v2145_v0 = vld [vmem:[%s8058_s23 + $0x360] sm:$0xff]  ;;  %v2146_v55 = vld [vmem:[%s8058_s23 + $0x368] sm:$0xff] }
 0x219   : > { %v2650_v18 = vmul.f32 %v2394_v38, %v2394_v38  ;;  %vm11754_vm3 = vcmp.lt.s32.totalorder %v11753_v54, %v11548_v3  ;;  %vm1123_vm8 = vcmp.eq.f32.partialorder %v11755_v10, inf  ;;  %v1377_v14 = vsel %vm1121_vm0, 3.4028235e+38, %v11749_v44  ;;  %v11767_v44 = vld [vmem:[#allocation117_spill] sm:$0xff]  ;;  %v11768_v5 = vld [vmem:[#allocation203_spill] sm:$0xff]  ;;  %v11771_v54 = vld [vmem:[#allocation204_spill] sm:$0xff] }
 0x21a   : > { %v3421_v56 = vsel %vm11754_vm3, %v2648_v17, 0.0  ;;  %v1886_v26 = vsel %vm1630_vm12, -3.4028235e+38, %v1374_v61  ;;  %v3676_v40 = vadd.f32 %v3675_v22, %v3420_v25  ;;  %vm1632_vm2 = vcmp.eq.f32.partialorder %v1376_v29, -inf }
 0x21b   : > { %v2397_v43 = vsub.f32 %v1885_v49, %v2141_v34  ;;  %v2651_v42 = vmul.f32 %v2395_v27, %v2395_v27  ;;  %vm11757_vm4 = vcmp.lt.s32.totalorder %v11756_v9, %v11548_v3  ;;  %vm1124_vm13 = vcmp.eq.f32.partialorder %v11758_v52, inf  ;;  %v2147_v34 = vld [vmem:[%s8058_s23 + $0x370] sm:$0xff] }
 0x21c   : > { %v3422_v62 = vsel %vm11757_vm4, %v2649_v21, 0.0  ;;  %v1378_v58 = vsel %vm1122_vm10, 3.4028235e+38, %v11752_v35  ;;  %v1887_v7 = vsel %vm1631_vm7, -3.4028235e+38, %v1375_v2  ;;  %v3677_v53 = vadd.f32 %v3676_v40, %v3421_v56  ;;  %v11770_v35 = vld [vmem:[#allocation118_spill] sm:$0xff] }
 0x21d   : > { %vm1633_vm15 = vcmp.eq.f32.partialorder %v1377_v14, -inf  ;;  %v2398_v4 = vsub.f32 %v1886_v26, %v2142_v41  ;;  %v2652_v50 = vmul.f32 %v2396_v24, %v2396_v24  ;;  %vm11760_vm14 = vcmp.lt.s32.totalorder %v11759_v15, %v11548_v3  ;;  %v2148_v41 = vld [vmem:[%s8058_s23 + $0x378] sm:$0xff]  ;;  %v11774_v9 = vld [vmem:[#allocation205_spill] sm:$0xff] }
 0x21e   : > { %v3423_v46 = vsel %vm11760_vm14, %v2650_v18, 0.0  ;;  %vm1125_vm6 = vcmp.eq.f32.partialorder %v11761_v48, inf  ;;  %v1379_v45 = vsel %vm1123_vm8, 3.4028235e+38, %v11755_v10  ;;  %v1888_v28 = vsel %vm1632_vm2, -3.4028235e+38, %v1376_v29 }
 0x21f   : > { %v3678_v23 = vadd.f32 %v3677_v53, %v3422_v62  ;;  %vm1634_vm5 = vcmp.eq.f32.partialorder %v1378_v58, -inf  ;;  %v2399_v19 = vsub.f32 %v1887_v7, %v2143_v13  ;;  %v2653_v51 = vmul.f32 %v2397_v43, %v2397_v43  ;;  %v11773_v10 = vld [vmem:[#allocation119_spill] sm:$0xff]  ;;  %v11777_v15 = vld [vmem:[#allocation206_spill] sm:$0xff] }
 0x220   : > { %vm11763_vm9 = vcmp.lt.s32.totalorder %v11762_v1, %v11548_v3  ;;  %vm1126_vm1 = vcmp.eq.f32.partialorder %v11764_v8, inf  ;;  %v1380_v61 = vsel %vm1124_vm13, 3.4028235e+38, %v11758_v52  ;;  %v1889_v36 = vsel %vm1633_vm15, -3.4028235e+38, %v1377_v14  ;;  %v11776_v52 = vld [vmem:[#allocation120_spill] sm:$0xff] }
 0x221   : > { %v3424_v6 = vsel %vm11763_vm9, %v2651_v42, 0.0  ;;  %v3679_v11 = vadd.f32 %v3678_v23, %v3423_v46  ;;  %vm1635_vm0 = vcmp.eq.f32.partialorder %v1379_v45, -inf  ;;  %v2400_v38 = vsub.f32 %v1888_v28, %v2144_v20  ;;  %v2149_v13 = vld [vmem:[%s8058_s23 + $0x380] sm:$0xff]  ;;  %v2150_v20 = vld [vmem:[%s8058_s23 + $0x388] sm:$0xff] }
 0x222   : > { %v2654_v17 = vmul.f32 %v2398_v4, %v2398_v4  ;;  %vm11766_vm12 = vcmp.lt.s32.totalorder %v11765_v57, %v11548_v3  ;;  %vm1127_vm11 = vcmp.eq.f32.partialorder %v11767_v44, inf  ;;  %v1381_v2 = vsel %vm1125_vm6, 3.4028235e+38, %v11761_v48  ;;  %v11779_v48 = vld [vmem:[#allocation121_spill] sm:$0xff]  ;;  %v11780_v1 = vld [vmem:[#allocation207_spill] sm:$0xff]  ;;  %v11783_v57 = vld [vmem:[#allocation208_spill] sm:$0xff] }
 0x223   : > { %v3425_v63 = vsel %vm11766_vm12, %v2652_v50, 0.0  ;;  %v1890_v33 = vsel %vm1634_vm5, -3.4028235e+38, %v1378_v58  ;;  %v3680_v16 = vadd.f32 %v3679_v11, %v3424_v6  ;;  %vm1636_vm10 = vcmp.eq.f32.partialorder %v1380_v61, -inf }
 0x224   : > { %v2401_v27 = vsub.f32 %v1889_v36, %v2145_v0  ;;  %v2655_v21 = vmul.f32 %v2399_v19, %v2399_v19  ;;  %vm11769_vm7 = vcmp.lt.s32.totalorder %v11768_v5, %v11548_v3  ;;  %vm1128_vm3 = vcmp.eq.f32.partialorder %v11770_v35, inf  ;;  %v2151_v0 = vld [vmem:[%s8058_s23 + $0x390] sm:$0xff] }
 0x225   : > { %v3426_v25 = vsel %vm11769_vm7, %v2653_v51, 0.0  ;;  %v1382_v29 = vsel %vm1126_vm1, 3.4028235e+38, %v11764_v8  ;;  %v1891_v49 = vsel %vm1635_vm0, -3.4028235e+38, %v1379_v45  ;;  %v3681_v22 = vadd.f32 %v3680_v16, %v3425_v63  ;;  %v11782_v8 = vld [vmem:[#allocation122_spill] sm:$0xff] }
 0x226   : > { %vm1637_vm8 = vcmp.eq.f32.partialorder %v1381_v2, -inf  ;;  %v2402_v24 = vsub.f32 %v1890_v33, %v2146_v55  ;;  %v2656_v18 = vmul.f32 %v2400_v38, %v2400_v38  ;;  %vm11772_vm2 = vcmp.lt.s32.totalorder %v11771_v54, %v11548_v3  ;;  %v2152_v55 = vld [vmem:[%s8058_s23 + $0x398] sm:$0xff]  ;;  %v11786_v5 = vld [vmem:[#allocation209_spill] sm:$0xff] }
 0x227   : > { %v3427_v56 = vsel %vm11772_vm2, %v2654_v17, 0.0  ;;  %vm1129_vm4 = vcmp.eq.f32.partialorder %v11773_v10, inf  ;;  %v1383_v14 = vsel %vm1127_vm11, 3.4028235e+38, %v11767_v44  ;;  %v1892_v26 = vsel %vm1636_vm10, -3.4028235e+38, %v1380_v61 }
 0x228   : > { %v3682_v40 = vadd.f32 %v3681_v22, %v3426_v25  ;;  %vm1638_vm13 = vcmp.eq.f32.partialorder %v1382_v29, -inf  ;;  %v2403_v43 = vsub.f32 %v1891_v49, %v2147_v34  ;;  %v2657_v42 = vmul.f32 %v2401_v27, %v2401_v27  ;;  %v11785_v44 = vld [vmem:[#allocation123_spill] sm:$0xff]  ;;  %v11789_v54 = vld [vmem:[#allocation210_spill] sm:$0xff] }
 0x229   : > { %vm11775_vm15 = vcmp.lt.s32.totalorder %v11774_v9, %v11548_v3  ;;  %vm1130_vm14 = vcmp.eq.f32.partialorder %v11776_v52, inf  ;;  %v1384_v58 = vsel %vm1128_vm3, 3.4028235e+38, %v11770_v35  ;;  %v1893_v7 = vsel %vm1637_vm8, -3.4028235e+38, %v1381_v2  ;;  %v11788_v35 = vld [vmem:[#allocation124_spill] sm:$0xff] }
 0x22a   : > { %v3428_v62 = vsel %vm11775_vm15, %v2655_v21, 0.0  ;;  %v3683_v53 = vadd.f32 %v3682_v40, %v3427_v56  ;;  %vm1639_vm6 = vcmp.eq.f32.partialorder %v1383_v14, -inf  ;;  %v2404_v4 = vsub.f32 %v1892_v26, %v2148_v41  ;;  %v2153_v34 = vld [vmem:[%s8058_s23 + $0x3a0] sm:$0xff]  ;;  %v2154_v41 = vld [vmem:[%s8058_s23 + $0x3a8] sm:$0xff] }
 0x22b   : > { %v2658_v50 = vmul.f32 %v2402_v24, %v2402_v24  ;;  %vm11778_vm5 = vcmp.lt.s32.totalorder %v11777_v15, %v11548_v3  ;;  %vm1131_vm9 = vcmp.eq.f32.partialorder %v11779_v48, inf  ;;  %v1385_v45 = vsel %vm1129_vm4, 3.4028235e+38, %v11773_v10  ;;  %v11791_v10 = vld [vmem:[#allocation125_spill] sm:$0xff]  ;;  %v11792_v9 = vld [vmem:[#allocation211_spill] sm:$0xff]  ;;  %v11795_v15 = vld [vmem:[#allocation212_spill] sm:$0xff] }
 0x22c   : > { %v3429_v46 = vsel %vm11778_vm5, %v2656_v18, 0.0  ;;  %v1894_v28 = vsel %vm1638_vm13, -3.4028235e+38, %v1382_v29  ;;  %v3684_v23 = vadd.f32 %v3683_v53, %v3428_v62  ;;  %vm1640_vm1 = vcmp.eq.f32.partialorder %v1384_v58, -inf }
 0x22d   : > { %v2405_v19 = vsub.f32 %v1893_v7, %v2149_v13  ;;  %v2659_v51 = vmul.f32 %v2403_v43, %v2403_v43  ;;  %vm11781_vm0 = vcmp.lt.s32.totalorder %v11780_v1, %v11548_v3  ;;  %vm1132_vm12 = vcmp.eq.f32.partialorder %v11782_v8, inf  ;;  %v2155_v13 = vld [vmem:[%s8058_s23 + $0x3b0] sm:$0xff] }
 0x22e   : > { %v3430_v6 = vsel %vm11781_vm0, %v2657_v42, 0.0  ;;  %v1386_v61 = vsel %vm1130_vm14, 3.4028235e+38, %v11776_v52  ;;  %v1895_v36 = vsel %vm1639_vm6, -3.4028235e+38, %v1383_v14  ;;  %v3685_v11 = vadd.f32 %v3684_v23, %v3429_v46  ;;  %v11794_v52 = vld [vmem:[#allocation127_spill] sm:$0xff] }
 0x22f   : > { %vm1641_vm11 = vcmp.eq.f32.partialorder %v1385_v45, -inf  ;;  %v2406_v38 = vsub.f32 %v1894_v28, %v2150_v20  ;;  %v2660_v17 = vmul.f32 %v2404_v4, %v2404_v4  ;;  %vm11784_vm10 = vcmp.lt.s32.totalorder %v11783_v57, %v11548_v3  ;;  %v2156_v20 = vld [vmem:[%s8058_s23 + $0x3b8] sm:$0xff]  ;;  %v11798_v1 = vld [vmem:[#allocation213_spill] sm:$0xff] }
 0x230   : > { %v3431_v63 = vsel %vm11784_vm10, %v2658_v50, 0.0  ;;  %vm1133_vm7 = vcmp.eq.f32.partialorder %v11785_v44, inf  ;;  %v1387_v2 = vsel %vm1131_vm9, 3.4028235e+38, %v11779_v48  ;;  %v1896_v33 = vsel %vm1640_vm1, -3.4028235e+38, %v1384_v58 }
 0x231   : > { %v3686_v16 = vadd.f32 %v3685_v11, %v3430_v6  ;;  %vm1642_vm3 = vcmp.eq.f32.partialorder %v1386_v61, -inf  ;;  %v2407_v27 = vsub.f32 %v1895_v36, %v2151_v0  ;;  %v2661_v21 = vmul.f32 %v2405_v19, %v2405_v19  ;;  %v11797_v48 = vld [vmem:[#allocation128_spill] sm:$0xff]  ;;  %v2157_v0 = vld [vmem:[%s8058_s23 + $0x3c0] sm:$0xff]  ;;  %v11801_v57 = vld [vmem:[#allocation214_spill] sm:$0xff] }
 0x232   : > { %vm11787_vm8 = vcmp.lt.s32.totalorder %v11786_v5, %v11548_v3  ;;  %vm1134_vm2 = vcmp.eq.f32.partialorder %v11788_v35, inf  ;;  %v1388_v29 = vsel %vm1132_vm12, 3.4028235e+38, %v11782_v8  ;;  %v1897_v49 = vsel %vm1641_vm11, -3.4028235e+38, %v1385_v45  ;;  %v11800_v8 = vld [vmem:[#allocation129_spill] sm:$0xff] }
 0x233   : > { %v3432_v25 = vsel %vm11787_vm8, %v2659_v51, 0.0  ;;  %v3687_v22 = vadd.f32 %v3686_v16, %v3431_v63  ;;  %vm1643_vm4 = vcmp.eq.f32.partialorder %v1387_v2, -inf  ;;  %v2408_v24 = vsub.f32 %v1896_v33, %v2152_v55  ;;  %v2158_v55 = vld [vmem:[%s8058_s23 + $0x3c8] sm:$0xff]  ;;  %v11804_v5 = vld [vmem:[#allocation215_spill] sm:$0xff] }
 0x234   : > { %v2662_v18 = vmul.f32 %v2406_v38, %v2406_v38  ;;  %vm11790_vm13 = vcmp.lt.s32.totalorder %v11789_v54, %v11548_v3  ;;  %vm1135_vm15 = vcmp.eq.f32.partialorder %v11791_v10, inf  ;;  %v1389_v14 = vsel %vm1133_vm7, 3.4028235e+38, %v11785_v44  ;;  %v11803_v44 = vld [vmem:[#allocation130_spill] sm:$0xff]  ;;  %v11807_v54 = vld [vmem:[#allocation216_spill] sm:$0xff] }
 0x235   : > { %v3433_v56 = vsel %vm11790_vm13, %v2660_v17, 0.0  ;;  %v1898_v26 = vsel %vm1642_vm3, -3.4028235e+38, %v1386_v61  ;;  %v3688_v40 = vadd.f32 %v3687_v22, %v3432_v25  ;;  %vm1644_vm14 = vcmp.eq.f32.partialorder %v1388_v29, -inf }
 0x236   : > { %v2409_v43 = vsub.f32 %v1897_v49, %v2153_v34  ;;  %v2663_v42 = vmul.f32 %v2407_v27, %v2407_v27  ;;  %vm11793_vm6 = vcmp.lt.s32.totalorder %v11792_v9, %v11548_v3  ;;  %vm1136_vm5 = vcmp.eq.f32.partialorder %v11794_v52, inf  ;;  %v2159_v34 = vld [vmem:[%s8058_s23 + $0x3d0] sm:$0xff] }
 0x237   : > { %v3434_v62 = vsel %vm11793_vm6, %v2661_v21, 0.0  ;;  %v1390_v58 = vsel %vm1134_vm2, 3.4028235e+38, %v11788_v35  ;;  %v1899_v7 = vsel %vm1643_vm4, -3.4028235e+38, %v1387_v2  ;;  %v3689_v53 = vadd.f32 %v3688_v40, %v3433_v56  ;;  %v11806_v35 = vld [vmem:[#allocation364_spill] sm:$0xff] }
 0x238   : > { %vm1645_vm9 = vcmp.eq.f32.partialorder %v1389_v14, -inf  ;;  %v2410_v4 = vsub.f32 %v1898_v26, %v2154_v41  ;;  %v2664_v50 = vmul.f32 %v2408_v24, %v2408_v24  ;;  %vm11796_vm1 = vcmp.lt.s32.totalorder %v11795_v15, %v11548_v3  ;;  %v2160_v41 = vld [vmem:[%s8058_s23 + $0x3d8] sm:$0xff]  ;;  %v11810_v9 = vld [vmem:[#allocation217_spill] sm:$0xff] }
 0x239   : > { %v3435_v46 = vsel %vm11796_vm1, %v2662_v18, 0.0  ;;  %vm1137_vm0 = vcmp.eq.f32.partialorder %v11797_v48, inf  ;;  %v1391_v45 = vsel %vm1135_vm15, 3.4028235e+38, %v11791_v10  ;;  %v1900_v28 = vsel %vm1644_vm14, -3.4028235e+38, %v1388_v29 }
 0x23a   : > { %v3690_v23 = vadd.f32 %v3689_v53, %v3434_v62  ;;  %vm1646_vm12 = vcmp.eq.f32.partialorder %v1390_v58, -inf  ;;  %v2411_v19 = vsub.f32 %v1899_v7, %v2155_v13  ;;  %v2665_v51 = vmul.f32 %v2409_v43, %v2409_v43  ;;  %v11809_v10 = vld [vmem:[#allocation365_spill] sm:$0xff]  ;;  %v2161_v13 = vld [vmem:[%s8058_s23 + $0x3e0] sm:$0xff]  ;;  %v11813_v15 = vld [vmem:[#allocation218_spill] sm:$0xff] }
 0x23b   : > { %vm11799_vm11 = vcmp.lt.s32.totalorder %v11798_v1, %v11548_v3  ;;  %vm1138_vm10 = vcmp.eq.f32.partialorder %v11800_v8, inf  ;;  %v1392_v61 = vsel %vm1136_vm5, 3.4028235e+38, %v11794_v52  ;;  %v1901_v36 = vsel %vm1645_vm9, -3.4028235e+38, %v1389_v14  ;;  %v11812_v52 = vld [vmem:[#allocation366_spill] sm:$0xff] }
 0x23c   : > { %v3436_v6 = vsel %vm11799_vm11, %v2663_v42, 0.0  ;;  %v3691_v11 = vadd.f32 %v3690_v23, %v3435_v46  ;;  %vm1647_vm7 = vcmp.eq.f32.partialorder %v1391_v45, -inf  ;;  %v2412_v38 = vsub.f32 %v1900_v28, %v2156_v20  ;;  %v2162_v20 = vld [vmem:[%s8058_s23 + $0x3e8] sm:$0xff]  ;;  %v11816_v1 = vld [vmem:[#allocation219_spill] sm:$0xff] }
 0x23d   : > { %v2666_v17 = vmul.f32 %v2410_v4, %v2410_v4  ;;  %vm11802_vm3 = vcmp.lt.s32.totalorder %v11801_v57, %v11548_v3  ;;  %vm1139_vm8 = vcmp.eq.f32.partialorder %v11803_v44, inf  ;;  %v1393_v2 = vsel %vm1137_vm0, 3.4028235e+38, %v11797_v48  ;;  %v11815_v48 = vld [vmem:[#allocation367_spill] sm:$0xff]  ;;  %v11819_v57 = vld [vmem:[#allocation220_spill] sm:$0xff] }
 0x23e   : > { %v3437_v63 = vsel %vm11802_vm3, %v2664_v50, 0.0  ;;  %v1902_v33 = vsel %vm1646_vm12, -3.4028235e+38, %v1390_v58  ;;  %v3692_v16 = vadd.f32 %v3691_v11, %v3436_v6  ;;  %vm1648_vm2 = vcmp.eq.f32.partialorder %v1392_v61, -inf }
 0x23f   : > { %v2413_v27 = vsub.f32 %v1901_v36, %v2157_v0  ;;  %v2667_v21 = vmul.f32 %v2411_v19, %v2411_v19  ;;  %vm11805_vm4 = vcmp.lt.s32.totalorder %v11804_v5, %v11548_v3  ;;  %vm1140_vm13 = vcmp.eq.f32.partialorder %v11806_v35, inf  ;;  %v2163_v0 = vld [vmem:[%s8058_s23 + $0x3f0] sm:$0xff] }
 0x240   : > { %v3438_v25 = vsel %vm11805_vm4, %v2665_v51, 0.0  ;;  %v1394_v29 = vsel %vm1138_vm10, 3.4028235e+38, %v11800_v8  ;;  %v1903_v49 = vsel %vm1647_vm7, -3.4028235e+38, %v1391_v45  ;;  %v3693_v22 = vadd.f32 %v3692_v16, %v3437_v63  ;;  %v11818_v8 = vld [vmem:[#allocation368_spill] sm:$0xff] }
 0x241   : > { %vm1649_vm15 = vcmp.eq.f32.partialorder %v1393_v2, -inf  ;;  %v2414_v24 = vsub.f32 %v1902_v33, %v2158_v55  ;;  %v2668_v18 = vmul.f32 %v2412_v38, %v2412_v38  ;;  %vm11808_vm14 = vcmp.lt.s32.totalorder %v11807_v54, %v11548_v3  ;;  %v2164_v55 = vld [vmem:[%s8058_s23 + $0x3f8] sm:$0xff]  ;;  %v11822_v5 = vld [vmem:[#allocation221_spill] sm:$0xff] }
 0x242   : > { %v3439_v56 = vsel %vm11808_vm14, %v2666_v17, 0.0  ;;  %vm1141_vm6 = vcmp.eq.f32.partialorder %v11809_v10, inf  ;;  %v1395_v14 = vsel %vm1139_vm8, 3.4028235e+38, %v11803_v44  ;;  %v1904_v26 = vsel %vm1648_vm2, -3.4028235e+38, %v1392_v61 }
 0x243   : > { %v3694_v40 = vadd.f32 %v3693_v22, %v3438_v25  ;;  %vm1650_vm5 = vcmp.eq.f32.partialorder %v1394_v29, -inf  ;;  %v2415_v43 = vsub.f32 %v1903_v49, %v2159_v34  ;;  %v2669_v42 = vmul.f32 %v2413_v27, %v2413_v27  ;;  %v11821_v44 = vld [vmem:[#allocation369_spill] sm:$0xff]  ;;  %v2165_v34 = vld [vmem:[%s8058_s23 + $0x400] sm:$0xff]  ;;  %v11825_v54 = vld [vmem:[#allocation222_spill] sm:$0xff] }
 0x244   : > { %vm11811_vm9 = vcmp.lt.s32.totalorder %v11810_v9, %v11548_v3  ;;  %vm1142_vm1 = vcmp.eq.f32.partialorder %v11812_v52, inf  ;;  %v1396_v58 = vsel %vm1140_vm13, 3.4028235e+38, %v11806_v35  ;;  %v1905_v7 = vsel %vm1649_vm15, -3.4028235e+38, %v1393_v2  ;;  %v11824_v35 = vld [vmem:[#allocation370_spill] sm:$0xff] }
 0x245   : > { %v3440_v62 = vsel %vm11811_vm9, %v2667_v21, 0.0  ;;  %v3695_v53 = vadd.f32 %v3694_v40, %v3439_v56  ;;  %vm1651_vm0 = vcmp.eq.f32.partialorder %v1395_v14, -inf  ;;  %v2416_v4 = vsub.f32 %v1904_v26, %v2160_v41  ;;  %v2166_v41 = vld [vmem:[%s8058_s23 + $0x408] sm:$0xff]  ;;  %v11828_v9 = vld [vmem:[#allocation223_spill] sm:$0xff] }
 0x246   : > { %v2670_v50 = vmul.f32 %v2414_v24, %v2414_v24  ;;  %vm11814_vm12 = vcmp.lt.s32.totalorder %v11813_v15, %v11548_v3  ;;  %vm1143_vm11 = vcmp.eq.f32.partialorder %v11815_v48, inf  ;;  %v1397_v45 = vsel %vm1141_vm6, 3.4028235e+38, %v11809_v10  ;;  %v11827_v10 = vld [vmem:[#allocation371_spill] sm:$0xff]  ;;  %v11831_v15 = vld [vmem:[#allocation224_spill] sm:$0xff] }
 0x247   : > { %v3441_v46 = vsel %vm11814_vm12, %v2668_v18, 0.0  ;;  %v1906_v28 = vsel %vm1650_vm5, -3.4028235e+38, %v1394_v29  ;;  %v3696_v23 = vadd.f32 %v3695_v53, %v3440_v62  ;;  %vm1652_vm10 = vcmp.eq.f32.partialorder %v1396_v58, -inf }
 0x248   : > { %v2417_v19 = vsub.f32 %v1905_v7, %v2161_v13  ;;  %v2671_v51 = vmul.f32 %v2415_v43, %v2415_v43  ;;  %vm11817_vm7 = vcmp.lt.s32.totalorder %v11816_v1, %v11548_v3  ;;  %vm1144_vm3 = vcmp.eq.f32.partialorder %v11818_v8, inf  ;;  %v2167_v13 = vld [vmem:[%s8058_s23 + $0x410] sm:$0xff] }
 0x249   : > { %v3442_v6 = vsel %vm11817_vm7, %v2669_v42, 0.0  ;;  %v1398_v61 = vsel %vm1142_vm1, 3.4028235e+38, %v11812_v52  ;;  %v1907_v36 = vsel %vm1651_vm0, -3.4028235e+38, %v1395_v14  ;;  %v3697_v11 = vadd.f32 %v3696_v23, %v3441_v46  ;;  %v11830_v52 = vld [vmem:[#allocation372_spill] sm:$0xff] }
 0x24a   : > { %vm1653_vm8 = vcmp.eq.f32.partialorder %v1397_v45, -inf  ;;  %v2418_v38 = vsub.f32 %v1906_v28, %v2162_v20  ;;  %v2672_v17 = vmul.f32 %v2416_v4, %v2416_v4  ;;  %vm11820_vm2 = vcmp.lt.s32.totalorder %v11819_v57, %v11548_v3  ;;  %v2168_v20 = vld [vmem:[%s8058_s23 + $0x418] sm:$0xff]  ;;  %v11834_v1 = vld [vmem:[#allocation225_spill] sm:$0xff] }
 0x24b   : > { %v3443_v63 = vsel %vm11820_vm2, %v2670_v50, 0.0  ;;  %vm1145_vm4 = vcmp.eq.f32.partialorder %v11821_v44, inf  ;;  %v1399_v2 = vsel %vm1143_vm11, 3.4028235e+38, %v11815_v48  ;;  %v1908_v33 = vsel %vm1652_vm10, -3.4028235e+38, %v1396_v58 }
 0x24c   : > { %v3698_v16 = vadd.f32 %v3697_v11, %v3442_v6  ;;  %vm1654_vm13 = vcmp.eq.f32.partialorder %v1398_v61, -inf  ;;  %v2419_v27 = vsub.f32 %v1907_v36, %v2163_v0  ;;  %v2673_v21 = vmul.f32 %v2417_v19, %v2417_v19  ;;  %v11833_v48 = vld [vmem:[#allocation376_spill] sm:$0xff]  ;;  %v2169_v0 = vld [vmem:[%s8058_s23 + $0x420] sm:$0xff]  ;;  %v11837_v57 = vld [vmem:[#allocation226_spill] sm:$0xff] }
 0x24d   : > { %vm11823_vm15 = vcmp.lt.s32.totalorder %v11822_v5, %v11548_v3  ;;  %vm1146_vm14 = vcmp.eq.f32.partialorder %v11824_v35, inf  ;;  %v1400_v29 = vsel %vm1144_vm3, 3.4028235e+38, %v11818_v8  ;;  %v1909_v49 = vsel %vm1653_vm8, -3.4028235e+38, %v1397_v45  ;;  %v11836_v8 = vld [vmem:[#allocation377_spill] sm:$0xff] }
 0x24e   : > { %v3444_v25 = vsel %vm11823_vm15, %v2671_v51, 0.0  ;;  %v3699_v22 = vadd.f32 %v3698_v16, %v3443_v63  ;;  %vm1655_vm6 = vcmp.eq.f32.partialorder %v1399_v2, -inf  ;;  %v2420_v24 = vsub.f32 %v1908_v33, %v2164_v55  ;;  %v2170_v55 = vld [vmem:[%s8058_s23 + $0x428] sm:$0xff]  ;;  %v11840_v5 = vld [vmem:[#allocation227_spill] sm:$0xff] }
 0x24f   : > { %v2674_v18 = vmul.f32 %v2418_v38, %v2418_v38  ;;  %vm11826_vm5 = vcmp.lt.s32.totalorder %v11825_v54, %v11548_v3  ;;  %vm1147_vm9 = vcmp.eq.f32.partialorder %v11827_v10, inf  ;;  %v1401_v14 = vsel %vm1145_vm4, 3.4028235e+38, %v11821_v44  ;;  %v11839_v44 = vld [vmem:[#allocation378_spill] sm:$0xff]  ;;  %v11843_v54 = vld [vmem:[#allocation228_spill] sm:$0xff] }
 0x250   : > { %v3445_v56 = vsel %vm11826_vm5, %v2672_v17, 0.0  ;;  %v1910_v26 = vsel %vm1654_vm13, -3.4028235e+38, %v1398_v61  ;;  %v3700_v40 = vadd.f32 %v3699_v22, %v3444_v25  ;;  %vm1656_vm1 = vcmp.eq.f32.partialorder %v1400_v29, -inf }
 0x251   : > { %v2421_v43 = vsub.f32 %v1909_v49, %v2165_v34  ;;  %v2675_v42 = vmul.f32 %v2419_v27, %v2419_v27  ;;  %vm11829_vm0 = vcmp.lt.s32.totalorder %v11828_v9, %v11548_v3  ;;  %vm1148_vm12 = vcmp.eq.f32.partialorder %v11830_v52, inf  ;;  %v2171_v34 = vld [vmem:[%s8058_s23 + $0x430] sm:$0xff] }
 0x252   : > { %v3446_v62 = vsel %vm11829_vm0, %v2673_v21, 0.0  ;;  %v1402_v58 = vsel %vm1146_vm14, 3.4028235e+38, %v11824_v35  ;;  %v1911_v7 = vsel %vm1655_vm6, -3.4028235e+38, %v1399_v2  ;;  %v3701_v53 = vadd.f32 %v3700_v40, %v3445_v56  ;;  %v11842_v35 = vld [vmem:[#allocation379_spill] sm:$0xff] }
 0x253   : > { %vm1657_vm11 = vcmp.eq.f32.partialorder %v1401_v14, -inf  ;;  %v2422_v4 = vsub.f32 %v1910_v26, %v2166_v41  ;;  %v2676_v50 = vmul.f32 %v2420_v24, %v2420_v24  ;;  %vm11832_vm10 = vcmp.lt.s32.totalorder %v11831_v15, %v11548_v3  ;;  %v2172_v41 = vld [vmem:[%s8058_s23 + $0x438] sm:$0xff]  ;;  %v11846_v9 = vld [vmem:[#allocation229_spill] sm:$0xff] }
 0x254   : > { %v3447_v46 = vsel %vm11832_vm10, %v2674_v18, 0.0  ;;  %vm1149_vm7 = vcmp.eq.f32.partialorder %v11833_v48, inf  ;;  %v1403_v45 = vsel %vm1147_vm9, 3.4028235e+38, %v11827_v10  ;;  %v1912_v28 = vsel %vm1656_vm1, -3.4028235e+38, %v1400_v29 }
 0x255   : > { %v3702_v23 = vadd.f32 %v3701_v53, %v3446_v62  ;;  %vm1658_vm3 = vcmp.eq.f32.partialorder %v1402_v58, -inf  ;;  %v2423_v19 = vsub.f32 %v1911_v7, %v2167_v13  ;;  %v2677_v51 = vmul.f32 %v2421_v43, %v2421_v43  ;;  %v11845_v10 = vld [vmem:[#allocation384_spill] sm:$0xff]  ;;  %v2173_v13 = vld [vmem:[%s8058_s23 + $0x440] sm:$0xff]  ;;  %v11849_v15 = vld [vmem:[#allocation230_spill] sm:$0xff] }
 0x256   : > { %vm11835_vm8 = vcmp.lt.s32.totalorder %v11834_v1, %v11548_v3  ;;  %vm1150_vm2 = vcmp.eq.f32.partialorder %v11836_v8, inf  ;;  %v1404_v61 = vsel %vm1148_vm12, 3.4028235e+38, %v11830_v52  ;;  %v1913_v36 = vsel %vm1657_vm11, -3.4028235e+38, %v1401_v14  ;;  %v11848_v52 = vld [vmem:[#allocation385_spill] sm:$0xff] }
 0x257   : > { %v3448_v6 = vsel %vm11835_vm8, %v2675_v42, 0.0  ;;  %v3703_v11 = vadd.f32 %v3702_v23, %v3447_v46  ;;  %vm1659_vm4 = vcmp.eq.f32.partialorder %v1403_v45, -inf  ;;  %v2424_v38 = vsub.f32 %v1912_v28, %v2168_v20  ;;  %v2174_v20 = vld [vmem:[%s8058_s23 + $0x448] sm:$0xff]  ;;  %v11852_v1 = vld [vmem:[#allocation231_spill] sm:$0xff] }
 0x258   : > { %v2678_v17 = vmul.f32 %v2422_v4, %v2422_v4  ;;  %vm11838_vm13 = vcmp.lt.s32.totalorder %v11837_v57, %v11548_v3  ;;  %vm1151_vm15 = vcmp.eq.f32.partialorder %v11839_v44, inf  ;;  %v1405_v2 = vsel %vm1149_vm7, 3.4028235e+38, %v11833_v48  ;;  %v11851_v48 = vld [vmem:[#allocation386_spill] sm:$0xff]  ;;  %v11855_v57 = vld [vmem:[#allocation232_spill] sm:$0xff] }
 0x259   : > { %v3449_v63 = vsel %vm11838_vm13, %v2676_v50, 0.0  ;;  %v1914_v33 = vsel %vm1658_vm3, -3.4028235e+38, %v1402_v58  ;;  %v3704_v16 = vadd.f32 %v3703_v11, %v3448_v6  ;;  %vm1660_vm14 = vcmp.eq.f32.partialorder %v1404_v61, -inf }
 0x25a   : > { %v2425_v27 = vsub.f32 %v1913_v36, %v2169_v0  ;;  %v2679_v21 = vmul.f32 %v2423_v19, %v2423_v19  ;;  %vm11841_vm6 = vcmp.lt.s32.totalorder %v11840_v5, %v11548_v3  ;;  %vm1152_vm5 = vcmp.eq.f32.partialorder %v11842_v35, inf  ;;  %v2175_v0 = vld [vmem:[%s8058_s23 + $0x450] sm:$0xff] }
 0x25b   : > { %v3450_v25 = vsel %vm11841_vm6, %v2677_v51, 0.0  ;;  %v1406_v29 = vsel %vm1150_vm2, 3.4028235e+38, %v11836_v8  ;;  %v1915_v49 = vsel %vm1659_vm4, -3.4028235e+38, %v1403_v45  ;;  %v3705_v22 = vadd.f32 %v3704_v16, %v3449_v63  ;;  %v11854_v8 = vld [vmem:[#allocation387_spill] sm:$0xff] }
 0x25c   : > { %vm1661_vm9 = vcmp.eq.f32.partialorder %v1405_v2, -inf  ;;  %v2426_v24 = vsub.f32 %v1914_v33, %v2170_v55  ;;  %v2680_v18 = vmul.f32 %v2424_v38, %v2424_v38  ;;  %vm11844_vm1 = vcmp.lt.s32.totalorder %v11843_v54, %v11548_v3  ;;  %v2176_v55 = vld [vmem:[%s8058_s23 + $0x458] sm:$0xff]  ;;  %v11858_v5 = vld [vmem:[#allocation233_spill] sm:$0xff] }
 0x25d   : > { %v3451_v56 = vsel %vm11844_vm1, %v2678_v17, 0.0  ;;  %vm1153_vm0 = vcmp.eq.f32.partialorder %v11845_v10, inf  ;;  %v1407_v14 = vsel %vm1151_vm15, 3.4028235e+38, %v11839_v44  ;;  %v1916_v26 = vsel %vm1660_vm14, -3.4028235e+38, %v1404_v61 }
 0x25e   : > { %v3706_v40 = vadd.f32 %v3705_v22, %v3450_v25  ;;  %vm1662_vm12 = vcmp.eq.f32.partialorder %v1406_v29, -inf  ;;  %v2427_v43 = vsub.f32 %v1915_v49, %v2171_v34  ;;  %v2681_v42 = vmul.f32 %v2425_v27, %v2425_v27  ;;  %v11857_v44 = vld [vmem:[#allocation388_spill] sm:$0xff]  ;;  %v2177_v34 = vld [vmem:[%s8058_s23 + $0x460] sm:$0xff]  ;;  %v11861_v54 = vld [vmem:[#allocation234_spill] sm:$0xff] }
 0x25f   : > { %vm11847_vm11 = vcmp.lt.s32.totalorder %v11846_v9, %v11548_v3  ;;  %vm1154_vm10 = vcmp.eq.f32.partialorder %v11848_v52, inf  ;;  %v1408_v58 = vsel %vm1152_vm5, 3.4028235e+38, %v11842_v35  ;;  %v1917_v7 = vsel %vm1661_vm9, -3.4028235e+38, %v1405_v2  ;;  %v11860_v35 = vld [vmem:[#allocation389_spill] sm:$0xff] }
 0x260   : > { %v3452_v62 = vsel %vm11847_vm11, %v2679_v21, 0.0  ;;  %v3707_v53 = vadd.f32 %v3706_v40, %v3451_v56  ;;  %vm1663_vm7 = vcmp.eq.f32.partialorder %v1407_v14, -inf  ;;  %v2428_v4 = vsub.f32 %v1916_v26, %v2172_v41  ;;  %v2178_v41 = vld [vmem:[%s8058_s23 + $0x468] sm:$0xff]  ;;  %v11864_v9 = vld [vmem:[#allocation235_spill] sm:$0xff] }
 0x261   : > { %v2682_v50 = vmul.f32 %v2426_v24, %v2426_v24  ;;  %vm11850_vm3 = vcmp.lt.s32.totalorder %v11849_v15, %v11548_v3  ;;  %vm1155_vm8 = vcmp.eq.f32.partialorder %v11851_v48, inf  ;;  %v1409_v45 = vsel %vm1153_vm0, 3.4028235e+38, %v11845_v10  ;;  %v11863_v10 = vld [vmem:[#allocation390_spill] sm:$0xff]  ;;  %v11867_v15 = vld [vmem:[#allocation236_spill] sm:$0xff] }
 0x262   : > { %v3453_v46 = vsel %vm11850_vm3, %v2680_v18, 0.0  ;;  %v1918_v28 = vsel %vm1662_vm12, -3.4028235e+38, %v1406_v29  ;;  %v3708_v23 = vadd.f32 %v3707_v53, %v3452_v62  ;;  %vm1664_vm2 = vcmp.eq.f32.partialorder %v1408_v58, -inf }
 0x263   : > { %v2429_v19 = vsub.f32 %v1917_v7, %v2173_v13  ;;  %v2683_v51 = vmul.f32 %v2427_v43, %v2427_v43  ;;  %vm11853_vm4 = vcmp.lt.s32.totalorder %v11852_v1, %v11548_v3  ;;  %vm1156_vm13 = vcmp.eq.f32.partialorder %v11854_v8, inf  ;;  %v2179_v13 = vld [vmem:[%s8058_s23 + $0x470] sm:$0xff] }
 0x264   : > { %v3454_v6 = vsel %vm11853_vm4, %v2681_v42, 0.0  ;;  %v1410_v61 = vsel %vm1154_vm10, 3.4028235e+38, %v11848_v52  ;;  %v1919_v36 = vsel %vm1663_vm7, -3.4028235e+38, %v1407_v14  ;;  %v3709_v11 = vadd.f32 %v3708_v23, %v3453_v46  ;;  %v11866_v52 = vld [vmem:[#allocation391_spill] sm:$0xff] }
 0x265   : > { %vm1665_vm15 = vcmp.eq.f32.partialorder %v1409_v45, -inf  ;;  %v2430_v38 = vsub.f32 %v1918_v28, %v2174_v20  ;;  %v2684_v17 = vmul.f32 %v2428_v4, %v2428_v4  ;;  %vm11856_vm14 = vcmp.lt.s32.totalorder %v11855_v57, %v11548_v3  ;;  %v2180_v20 = vld [vmem:[%s8058_s23 + $0x478] sm:$0xff]  ;;  %v11870_v1 = vld [vmem:[#allocation237_spill] sm:$0xff] }
 0x266   : > { %v3455_v63 = vsel %vm11856_vm14, %v2682_v50, 0.0  ;;  %vm1157_vm6 = vcmp.eq.f32.partialorder %v11857_v44, inf  ;;  %v1411_v2 = vsel %vm1155_vm8, 3.4028235e+38, %v11851_v48  ;;  %v1920_v33 = vsel %vm1664_vm2, -3.4028235e+38, %v1408_v58 }
 0x267   : > { %v3710_v16 = vadd.f32 %v3709_v11, %v3454_v6  ;;  %vm1666_vm5 = vcmp.eq.f32.partialorder %v1410_v61, -inf  ;;  %v2431_v27 = vsub.f32 %v1919_v36, %v2175_v0  ;;  %v2685_v21 = vmul.f32 %v2429_v19, %v2429_v19  ;;  %v11869_v48 = vld [vmem:[#allocation393_spill] sm:$0xff]  ;;  %v2181_v0 = vld [vmem:[%s8058_s23 + $0x480] sm:$0xff]  ;;  %v11873_v57 = vld [vmem:[#allocation238_spill] sm:$0xff] }
 0x268   : > { %vm11859_vm9 = vcmp.lt.s32.totalorder %v11858_v5, %v11548_v3  ;;  %vm1158_vm1 = vcmp.eq.f32.partialorder %v11860_v35, inf  ;;  %v1412_v29 = vsel %vm1156_vm13, 3.4028235e+38, %v11854_v8  ;;  %v1921_v49 = vsel %vm1665_vm15, -3.4028235e+38, %v1409_v45  ;;  %v11872_v8 = vld [vmem:[#allocation394_spill] sm:$0xff] }
 0x269   : > { %v3456_v25 = vsel %vm11859_vm9, %v2683_v51, 0.0  ;;  %v3711_v22 = vadd.f32 %v3710_v16, %v3455_v63  ;;  %vm1667_vm0 = vcmp.eq.f32.partialorder %v1411_v2, -inf  ;;  %v2432_v24 = vsub.f32 %v1920_v33, %v2176_v55  ;;  %v2182_v55 = vld [vmem:[%s8058_s23 + $0x488] sm:$0xff]  ;;  %v11876_v5 = vld [vmem:[#allocation239_spill] sm:$0xff] }
 0x26a   : > { %v2686_v18 = vmul.f32 %v2430_v38, %v2430_v38  ;;  %vm11862_vm12 = vcmp.lt.s32.totalorder %v11861_v54, %v11548_v3  ;;  %vm1159_vm11 = vcmp.eq.f32.partialorder %v11863_v10, inf  ;;  %v1413_v14 = vsel %vm1157_vm6, 3.4028235e+38, %v11857_v44  ;;  %v11875_v44 = vld [vmem:[#allocation395_spill] sm:$0xff]  ;;  %v11879_v54 = vld [vmem:[#allocation240_spill] sm:$0xff] }
 0x26b   : > { %v3457_v56 = vsel %vm11862_vm12, %v2684_v17, 0.0  ;;  %v1922_v26 = vsel %vm1666_vm5, -3.4028235e+38, %v1410_v61  ;;  %v3712_v40 = vadd.f32 %v3711_v22, %v3456_v25  ;;  %vm1668_vm10 = vcmp.eq.f32.partialorder %v1412_v29, -inf }
 0x26c   : > { %v2433_v43 = vsub.f32 %v1921_v49, %v2177_v34  ;;  %v2687_v42 = vmul.f32 %v2431_v27, %v2431_v27  ;;  %vm11865_vm7 = vcmp.lt.s32.totalorder %v11864_v9, %v11548_v3  ;;  %vm1160_vm3 = vcmp.eq.f32.partialorder %v11866_v52, inf  ;;  %v2183_v34 = vld [vmem:[%s8058_s23 + $0x490] sm:$0xff] }
 0x26d   : > { %v3458_v62 = vsel %vm11865_vm7, %v2685_v21, 0.0  ;;  %v1414_v58 = vsel %vm1158_vm1, 3.4028235e+38, %v11860_v35  ;;  %v1923_v7 = vsel %vm1667_vm0, -3.4028235e+38, %v1411_v2  ;;  %v3713_v53 = vadd.f32 %v3712_v40, %v3457_v56  ;;  %v11878_v35 = vld [vmem:[#allocation396_spill] sm:$0xff] }
 0x26e   : > { %vm1669_vm8 = vcmp.eq.f32.partialorder %v1413_v14, -inf  ;;  %v2434_v4 = vsub.f32 %v1922_v26, %v2178_v41  ;;  %v2688_v50 = vmul.f32 %v2432_v24, %v2432_v24  ;;  %vm11868_vm2 = vcmp.lt.s32.totalorder %v11867_v15, %v11548_v3  ;;  %v2184_v41 = vld [vmem:[%s8058_s23 + $0x498] sm:$0xff]  ;;  %v11882_v9 = vld [vmem:[#allocation241_spill] sm:$0xff] }
 0x26f   : > { %v3459_v46 = vsel %vm11868_vm2, %v2686_v18, 0.0  ;;  %vm1161_vm4 = vcmp.eq.f32.partialorder %v11869_v48, inf  ;;  %v1415_v45 = vsel %vm1159_vm11, 3.4028235e+38, %v11863_v10  ;;  %v1924_v28 = vsel %vm1668_vm10, -3.4028235e+38, %v1412_v29 }
 0x270   : > { %v3714_v23 = vadd.f32 %v3713_v53, %v3458_v62  ;;  %vm1670_vm13 = vcmp.eq.f32.partialorder %v1414_v58, -inf  ;;  %v2435_v19 = vsub.f32 %v1923_v7, %v2179_v13  ;;  %v2689_v51 = vmul.f32 %v2433_v43, %v2433_v43  ;;  %v11881_v10 = vld [vmem:[#allocation397_spill] sm:$0xff]  ;;  %v2185_v13 = vld [vmem:[%s8058_s23 + $0x4a0] sm:$0xff]  ;;  %v11885_v15 = vld [vmem:[#allocation242_spill] sm:$0xff] }
 0x271   : > { %vm11871_vm15 = vcmp.lt.s32.totalorder %v11870_v1, %v11548_v3  ;;  %vm1162_vm14 = vcmp.eq.f32.partialorder %v11872_v8, inf  ;;  %v1416_v61 = vsel %vm1160_vm3, 3.4028235e+38, %v11866_v52  ;;  %v1925_v36 = vsel %vm1669_vm8, -3.4028235e+38, %v1413_v14  ;;  %v11884_v52 = vld [vmem:[#allocation398_spill] sm:$0xff] }
 0x272   : > { %v3460_v6 = vsel %vm11871_vm15, %v2687_v42, 0.0  ;;  %v3715_v11 = vadd.f32 %v3714_v23, %v3459_v46  ;;  %vm1671_vm6 = vcmp.eq.f32.partialorder %v1415_v45, -inf  ;;  %v2436_v38 = vsub.f32 %v1924_v28, %v2180_v20  ;;  %v2186_v20 = vld [vmem:[%s8058_s23 + $0x4a8] sm:$0xff]  ;;  %v11888_v1 = vld [vmem:[#allocation243_spill] sm:$0xff] }
 0x273   : > { %v2690_v17 = vmul.f32 %v2434_v4, %v2434_v4  ;;  %vm11874_vm5 = vcmp.lt.s32.totalorder %v11873_v57, %v11548_v3  ;;  %vm1163_vm9 = vcmp.eq.f32.partialorder %v11875_v44, inf  ;;  %v1417_v2 = vsel %vm1161_vm4, 3.4028235e+38, %v11869_v48  ;;  %v11887_v48 = vld [vmem:[#allocation399_spill] sm:$0xff]  ;;  %v11891_v57 = vld [vmem:[#allocation244_spill] sm:$0xff] }
 0x274   : > { %v3461_v63 = vsel %vm11874_vm5, %v2688_v50, 0.0  ;;  %v1926_v33 = vsel %vm1670_vm13, -3.4028235e+38, %v1414_v58  ;;  %v3716_v16 = vadd.f32 %v3715_v11, %v3460_v6  ;;  %vm1672_vm1 = vcmp.eq.f32.partialorder %v1416_v61, -inf }
 0x275   : > { %v2437_v27 = vsub.f32 %v1925_v36, %v2181_v0  ;;  %v2691_v21 = vmul.f32 %v2435_v19, %v2435_v19  ;;  %vm11877_vm0 = vcmp.lt.s32.totalorder %v11876_v5, %v11548_v3  ;;  %vm1164_vm12 = vcmp.eq.f32.partialorder %v11878_v35, inf  ;;  %v2187_v0 = vld [vmem:[%s8058_s23 + $0x4b0] sm:$0xff] }
 0x276   : > { %v3462_v25 = vsel %vm11877_vm0, %v2689_v51, 0.0  ;;  %v1418_v29 = vsel %vm1162_vm14, 3.4028235e+38, %v11872_v8  ;;  %v1927_v49 = vsel %vm1671_vm6, -3.4028235e+38, %v1415_v45  ;;  %v3717_v22 = vadd.f32 %v3716_v16, %v3461_v63  ;;  %v11890_v8 = vld [vmem:[#allocation400_spill] sm:$0xff] }
 0x277   : > { %vm1673_vm11 = vcmp.eq.f32.partialorder %v1417_v2, -inf  ;;  %v2438_v24 = vsub.f32 %v1926_v33, %v2182_v55  ;;  %v2692_v18 = vmul.f32 %v2436_v38, %v2436_v38  ;;  %vm11880_vm10 = vcmp.lt.s32.totalorder %v11879_v54, %v11548_v3  ;;  %v2188_v55 = vld [vmem:[%s8058_s23 + $0x4b8] sm:$0xff]  ;;  %v11894_v5 = vld [vmem:[#allocation245_spill] sm:$0xff] }
 0x278   : > { %v3463_v56 = vsel %vm11880_vm10, %v2690_v17, 0.0  ;;  %vm1165_vm7 = vcmp.eq.f32.partialorder %v11881_v10, inf  ;;  %v1419_v14 = vsel %vm1163_vm9, 3.4028235e+38, %v11875_v44  ;;  %v1928_v26 = vsel %vm1672_vm1, -3.4028235e+38, %v1416_v61 }
 0x279   : > { %v3718_v40 = vadd.f32 %v3717_v22, %v3462_v25  ;;  %vm1674_vm3 = vcmp.eq.f32.partialorder %v1418_v29, -inf  ;;  %v2439_v43 = vsub.f32 %v1927_v49, %v2183_v34  ;;  %v2693_v42 = vmul.f32 %v2437_v27, %v2437_v27  ;;  %v11893_v44 = vld [vmem:[#allocation355_spill] sm:$0xff]  ;;  %v11897_v54 = vld [vmem:[#allocation246_spill] sm:$0xff] }
 0x27a   : > { %vm11883_vm8 = vcmp.lt.s32.totalorder %v11882_v9, %v11548_v3  ;;  %vm1166_vm2 = vcmp.eq.f32.partialorder %v11884_v52, inf  ;;  %v1420_v58 = vsel %vm1164_vm12, 3.4028235e+38, %v11878_v35  ;;  %v1929_v7 = vsel %vm1673_vm11, -3.4028235e+38, %v1417_v2  ;;  %v11896_v35 = vld [vmem:[#allocation356_spill] sm:$0xff] }
 0x27b   : > { %v3464_v62 = vsel %vm11883_vm8, %v2691_v21, 0.0  ;;  %v3719_v53 = vadd.f32 %v3718_v40, %v3463_v56  ;;  %vm1675_vm4 = vcmp.eq.f32.partialorder %v1419_v14, -inf  ;;  %v2440_v4 = vsub.f32 %v1928_v26, %v2184_v41  ;;  %v2189_v34 = vld [vmem:[%s8058_s23 + $0x4c0] sm:$0xff]  ;;  %v2190_v41 = vld [vmem:[%s8058_s23 + $0x4c8] sm:$0xff] }
 0x27c   : > { %v2694_v50 = vmul.f32 %v2438_v24, %v2438_v24  ;;  %vm11886_vm13 = vcmp.lt.s32.totalorder %v11885_v15, %v11548_v3  ;;  %vm1167_vm15 = vcmp.eq.f32.partialorder %v11887_v48, inf  ;;  %v1421_v45 = vsel %vm1165_vm7, 3.4028235e+38, %v11881_v10  ;;  %v11899_v10 = vld [vmem:[#allocation357_spill] sm:$0xff]  ;;  %v11900_v9 = vld [vmem:[#allocation247_spill] sm:$0xff]  ;;  %v11903_v15 = vld [vmem:[#allocation248_spill] sm:$0xff] }
 0x27d   : > { %v3465_v46 = vsel %vm11886_vm13, %v2692_v18, 0.0  ;;  %v1930_v28 = vsel %vm1674_vm3, -3.4028235e+38, %v1418_v29  ;;  %v3720_v23 = vadd.f32 %v3719_v53, %v3464_v62  ;;  %vm1676_vm14 = vcmp.eq.f32.partialorder %v1420_v58, -inf }
 0x27e   : > { %v2441_v19 = vsub.f32 %v1929_v7, %v2185_v13  ;;  %v2695_v51 = vmul.f32 %v2439_v43, %v2439_v43  ;;  %vm11889_vm6 = vcmp.lt.s32.totalorder %v11888_v1, %v11548_v3  ;;  %vm1168_vm5 = vcmp.eq.f32.partialorder %v11890_v8, inf  ;;  %v2191_v13 = vld [vmem:[%s8058_s23 + $0x4d0] sm:$0xff] }
 0x27f   : > { %v3466_v6 = vsel %vm11889_vm6, %v2693_v42, 0.0  ;;  %v1422_v61 = vsel %vm1166_vm2, 3.4028235e+38, %v11884_v52  ;;  %v1931_v36 = vsel %vm1675_vm4, -3.4028235e+38, %v1419_v14  ;;  %v3721_v11 = vadd.f32 %v3720_v23, %v3465_v46  ;;  %v11902_v52 = vld [vmem:[#allocation358_spill] sm:$0xff] }
 0x280   : > { %vm1677_vm9 = vcmp.eq.f32.partialorder %v1421_v45, -inf  ;;  %v2442_v38 = vsub.f32 %v1930_v28, %v2186_v20  ;;  %v2696_v17 = vmul.f32 %v2440_v4, %v2440_v4  ;;  %vm11892_vm1 = vcmp.lt.s32.totalorder %v11891_v57, %v11548_v3  ;;  %v2192_v20 = vld [vmem:[%s8058_s23 + $0x4d8] sm:$0xff]  ;;  %v11906_v1 = vld [vmem:[#allocation249_spill] sm:$0xff] }
 0x281   : > { %v3467_v63 = vsel %vm11892_vm1, %v2694_v50, 0.0  ;;  %vm1169_vm0 = vcmp.eq.f32.partialorder %v11893_v44, inf  ;;  %v1423_v2 = vsel %vm1167_vm15, 3.4028235e+38, %v11887_v48  ;;  %v1932_v33 = vsel %vm1676_vm14, -3.4028235e+38, %v1420_v58 }
 0x282   : > { %v3722_v16 = vadd.f32 %v3721_v11, %v3466_v6  ;;  %vm1678_vm12 = vcmp.eq.f32.partialorder %v1422_v61, -inf  ;;  %v2443_v27 = vsub.f32 %v1931_v36, %v2187_v0  ;;  %v2697_v21 = vmul.f32 %v2441_v19, %v2441_v19  ;;  %v11905_v48 = vld [vmem:[#allocation359_spill] sm:$0xff]  ;;  %v11909_v57 = vld [vmem:[#allocation250_spill] sm:$0xff] }
 0x283   : > { %vm11895_vm11 = vcmp.lt.s32.totalorder %v11894_v5, %v11548_v3  ;;  %vm1170_vm10 = vcmp.eq.f32.partialorder %v11896_v35, inf  ;;  %v1424_v29 = vsel %vm1168_vm5, 3.4028235e+38, %v11890_v8  ;;  %v1933_v49 = vsel %vm1677_vm9, -3.4028235e+38, %v1421_v45  ;;  %v11908_v8 = vld [vmem:[#allocation360_spill] sm:$0xff] }
 0x284   : > { %v3468_v25 = vsel %vm11895_vm11, %v2695_v51, 0.0  ;;  %v3723_v22 = vadd.f32 %v3722_v16, %v3467_v63  ;;  %vm1679_vm7 = vcmp.eq.f32.partialorder %v1423_v2, -inf  ;;  %v2444_v24 = vsub.f32 %v1932_v33, %v2188_v55  ;;  %v2193_v0 = vld [vmem:[%s8058_s23 + $0x4e0] sm:$0xff]  ;;  %v2194_v55 = vld [vmem:[%s8058_s23 + $0x4e8] sm:$0xff] }
 0x285   : > { %v2698_v18 = vmul.f32 %v2442_v38, %v2442_v38  ;;  %vm11898_vm3 = vcmp.lt.s32.totalorder %v11897_v54, %v11548_v3  ;;  %vm1171_vm8 = vcmp.eq.f32.partialorder %v11899_v10, inf  ;;  %v1425_v14 = vsel %vm1169_vm0, 3.4028235e+38, %v11893_v44  ;;  %v11911_v44 = vld [vmem:[#allocation361_spill] sm:$0xff]  ;;  %v11912_v5 = vld [vmem:[#allocation251_spill] sm:$0xff]  ;;  %v11915_v54 = vld [vmem:[#allocation252_spill] sm:$0xff] }
 0x286   : > { %v3469_v56 = vsel %vm11898_vm3, %v2696_v17, 0.0  ;;  %v1934_v26 = vsel %vm1678_vm12, -3.4028235e+38, %v1422_v61  ;;  %v3724_v40 = vadd.f32 %v3723_v22, %v3468_v25  ;;  %vm1680_vm2 = vcmp.eq.f32.partialorder %v1424_v29, -inf }
 0x287   : > { %v2445_v43 = vsub.f32 %v1933_v49, %v2189_v34  ;;  %v2699_v42 = vmul.f32 %v2443_v27, %v2443_v27  ;;  %vm11901_vm4 = vcmp.lt.s32.totalorder %v11900_v9, %v11548_v3  ;;  %vm1172_vm13 = vcmp.eq.f32.partialorder %v11902_v52, inf  ;;  %v2195_v34 = vld [vmem:[%s8058_s23 + $0x4f0] sm:$0xff] }
 0x288   : > { %v3470_v62 = vsel %vm11901_vm4, %v2697_v21, 0.0  ;;  %v1426_v58 = vsel %vm1170_vm10, 3.4028235e+38, %v11896_v35  ;;  %v1935_v7 = vsel %vm1679_vm7, -3.4028235e+38, %v1423_v2  ;;  %v3725_v53 = vadd.f32 %v3724_v40, %v3469_v56  ;;  %v11914_v35 = vld [vmem:[#allocation362_spill] sm:$0xff] }
 0x289   : > { %vm1681_vm15 = vcmp.eq.f32.partialorder %v1425_v14, -inf  ;;  %v2446_v4 = vsub.f32 %v1934_v26, %v2190_v41  ;;  %v2700_v50 = vmul.f32 %v2444_v24, %v2444_v24  ;;  %vm11904_vm14 = vcmp.lt.s32.totalorder %v11903_v15, %v11548_v3  ;;  %v2196_v41 = vld [vmem:[%s8058_s23 + $0x4f8] sm:$0xff]  ;;  %v11918_v9 = vld [vmem:[#allocation253_spill] sm:$0xff] }
 0x28a   : > { %v3471_v46 = vsel %vm11904_vm14, %v2698_v18, 0.0  ;;  %vm1173_vm6 = vcmp.eq.f32.partialorder %v11905_v48, inf  ;;  %v1427_v45 = vsel %vm1171_vm8, 3.4028235e+38, %v11899_v10  ;;  %v1936_v28 = vsel %vm1680_vm2, -3.4028235e+38, %v1424_v29 }
 0x28b   : > { %v3726_v23 = vadd.f32 %v3725_v53, %v3470_v62  ;;  %vm1682_vm5 = vcmp.eq.f32.partialorder %v1426_v58, -inf  ;;  %v2447_v19 = vsub.f32 %v1935_v7, %v2191_v13  ;;  %v2701_v51 = vmul.f32 %v2445_v43, %v2445_v43  ;;  %v11917_v10 = vld [vmem:[#allocation402_spill] sm:$0xff]  ;;  %v2197_v13 = vld [vmem:[%s8058_s23 + $0x500] sm:$0xff] }
 0x28c   : > { %vm11907_vm9 = vcmp.lt.s32.totalorder %v11906_v1, %v11548_v3  ;;  %vm1174_vm1 = vcmp.eq.f32.partialorder %v11908_v8, inf  ;;  %v1428_v61 = vsel %vm1172_vm13, 3.4028235e+38, %v11902_v52  ;;  %v1937_v36 = vsel %vm1681_vm15, -3.4028235e+38, %v1425_v14  ;;  %v11920_v52 = vld [vmem:[#allocation403_spill] sm:$0xff] }
 0x28d   : > { %v3472_v6 = vsel %vm11907_vm9, %v2699_v42, 0.0  ;;  %v3727_v11 = vadd.f32 %v3726_v23, %v3471_v46  ;;  %vm1683_vm0 = vcmp.eq.f32.partialorder %v1427_v45, -inf  ;;  %v2448_v38 = vsub.f32 %v1936_v28, %v2192_v20  ;;  %v11921_v15 = vld [vmem:[#allocation254_spill] sm:$0xff]  ;;  %v2198_v20 = vld [vmem:[%s8058_s23 + $0x508] sm:$0xff]  ;;  %v11924_v1 = vld [vmem:[#allocation255_spill] sm:$0xff] }
 0x28e   : > { %v2702_v17 = vmul.f32 %v2446_v4, %v2446_v4  ;;  %vm11910_vm12 = vcmp.lt.s32.totalorder %v11909_v57, %v11548_v3  ;;  %vm1175_vm11 = vcmp.eq.f32.partialorder %v11911_v44, inf  ;;  %v1429_v2 = vsel %vm1173_vm6, 3.4028235e+38, %v11905_v48  ;;  %v11923_v48 = vld [vmem:[#allocation404_spill] sm:$0xff] }
 0x28f   : > { %v3473_v63 = vsel %vm11910_vm12, %v2700_v50, 0.0  ;;  %v1938_v33 = vsel %vm1682_vm5, -3.4028235e+38, %v1426_v58  ;;  %v3728_v16 = vadd.f32 %v3727_v11, %v3472_v6  ;;  %vm1684_vm10 = vcmp.eq.f32.partialorder %v1428_v61, -inf  ;;  %v11927_v57 = vld [vmem:[#allocation256_spill] sm:$0xff] }
 0x290   : > { %v2449_v27 = vsub.f32 %v1937_v36, %v2193_v0  ;;  %v2703_v21 = vmul.f32 %v2447_v19, %v2447_v19  ;;  %vm11913_vm7 = vcmp.lt.s32.totalorder %v11912_v5, %v11548_v3  ;;  %vm1176_vm3 = vcmp.eq.f32.partialorder %v11914_v35, inf  ;;  %v2199_v0 = vld [vmem:[%s8058_s23 + $0x510] sm:$0xff] }
 0x291   : > { %v3474_v25 = vsel %vm11913_vm7, %v2701_v51, 0.0  ;;  %v1430_v29 = vsel %vm1174_vm1, 3.4028235e+38, %v11908_v8  ;;  %v1939_v49 = vsel %vm1683_vm0, -3.4028235e+38, %v1427_v45  ;;  %v3729_v22 = vadd.f32 %v3728_v16, %v3473_v63  ;;  %v11926_v8 = vld [vmem:[#allocation405_spill] sm:$0xff] }
 0x292   : > { %vm1685_vm8 = vcmp.eq.f32.partialorder %v1429_v2, -inf  ;;  %v2450_v24 = vsub.f32 %v1938_v33, %v2194_v55  ;;  %v2704_v18 = vmul.f32 %v2448_v38, %v2448_v38  ;;  %vm11916_vm2 = vcmp.lt.s32.totalorder %v11915_v54, %v11548_v3  ;;  %v2200_v55 = vld [vmem:[%s8058_s23 + $0x518] sm:$0xff]  ;;  %v11930_v5 = vld [vmem:[#allocation257_spill] sm:$0xff] }
 0x293   : > { %v3475_v56 = vsel %vm11916_vm2, %v2702_v17, 0.0  ;;  %vm1177_vm4 = vcmp.eq.f32.partialorder %v11917_v10, inf  ;;  %v1431_v14 = vsel %vm1175_vm11, 3.4028235e+38, %v11911_v44  ;;  %v1940_v26 = vsel %vm1684_vm10, -3.4028235e+38, %v1428_v61 }
 0x294   : > { %v3730_v40 = vadd.f32 %v3729_v22, %v3474_v25  ;;  %vm1686_vm13 = vcmp.eq.f32.partialorder %v1430_v29, -inf  ;;  %v2451_v43 = vsub.f32 %v1939_v49, %v2195_v34  ;;  %v2705_v42 = vmul.f32 %v2449_v27, %v2449_v27  ;;  %v11929_v44 = vld [vmem:[#allocation406_spill] sm:$0xff]  ;;  %v2201_v34 = vld [vmem:[%s8058_s23 + $0x520] sm:$0xff] }
 0x295   : > { %vm11919_vm15 = vcmp.lt.s32.totalorder %v11918_v9, %v11548_v3  ;;  %vm1178_vm14 = vcmp.eq.f32.partialorder %v11920_v52, inf  ;;  %v1432_v58 = vsel %vm1176_vm3, 3.4028235e+38, %v11914_v35  ;;  %v1941_v7 = vsel %vm1685_vm8, -3.4028235e+38, %v1429_v2  ;;  %v11932_v35 = vld [vmem:[#allocation407_spill] sm:$0xff] }
 0x296   : > { %v3476_v62 = vsel %vm11919_vm15, %v2703_v21, 0.0  ;;  %v3731_v53 = vadd.f32 %v3730_v40, %v3475_v56  ;;  %vm1687_vm6 = vcmp.eq.f32.partialorder %v1431_v14, -inf  ;;  %v2452_v4 = vsub.f32 %v1940_v26, %v2196_v41  ;;  %v11933_v54 = vld [vmem:[#allocation258_spill] sm:$0xff]  ;;  %v2202_v41 = vld [vmem:[%s8058_s23 + $0x528] sm:$0xff]  ;;  %v11936_v9 = vld [vmem:[#allocation259_spill] sm:$0xff] }
 0x297   : > { %v2706_v50 = vmul.f32 %v2450_v24, %v2450_v24  ;;  %vm11922_vm5 = vcmp.lt.s32.totalorder %v11921_v15, %v11548_v3  ;;  %vm1179_vm9 = vcmp.eq.f32.partialorder %v11923_v48, inf  ;;  %v1433_v45 = vsel %vm1177_vm4, 3.4028235e+38, %v11917_v10  ;;  %v11935_v10 = vld [vmem:[#allocation408_spill] sm:$0xff] }
 0x298   : > { %v3477_v46 = vsel %vm11922_vm5, %v2704_v18, 0.0  ;;  %v1942_v28 = vsel %vm1686_vm13, -3.4028235e+38, %v1430_v29  ;;  %v3732_v23 = vadd.f32 %v3731_v53, %v3476_v62  ;;  %vm1688_vm1 = vcmp.eq.f32.partialorder %v1432_v58, -inf  ;;  %v11939_v15 = vld [vmem:[#allocation260_spill] sm:$0xff] }
 0x299   : > { %v2453_v19 = vsub.f32 %v1941_v7, %v2197_v13  ;;  %v2707_v51 = vmul.f32 %v2451_v43, %v2451_v43  ;;  %vm11925_vm0 = vcmp.lt.s32.totalorder %v11924_v1, %v11548_v3  ;;  %vm1180_vm12 = vcmp.eq.f32.partialorder %v11926_v8, inf  ;;  %v2203_v13 = vld [vmem:[%s8058_s23 + $0x530] sm:$0xff] }
 0x29a   : > { %v3478_v6 = vsel %vm11925_vm0, %v2705_v42, 0.0  ;;  %v1434_v61 = vsel %vm1178_vm14, 3.4028235e+38, %v11920_v52  ;;  %v1943_v36 = vsel %vm1687_vm6, -3.4028235e+38, %v1431_v14  ;;  %v3733_v11 = vadd.f32 %v3732_v23, %v3477_v46  ;;  %v11938_v52 = vld [vmem:[#allocation363_spill] sm:$0xff] }
 0x29b   : > { %vm1689_vm11 = vcmp.eq.f32.partialorder %v1433_v45, -inf  ;;  %v2454_v38 = vsub.f32 %v1942_v28, %v2198_v20  ;;  %v2708_v17 = vmul.f32 %v2452_v4, %v2452_v4  ;;  %vm11928_vm10 = vcmp.lt.s32.totalorder %v11927_v57, %v11548_v3  ;;  %v2204_v20 = vld [vmem:[%s8058_s23 + $0x538] sm:$0xff]  ;;  %v11942_v1 = vld [vmem:[#allocation261_spill] sm:$0xff] }
 0x29c   : > { %v3479_v63 = vsel %vm11928_vm10, %v2706_v50, 0.0  ;;  %vm1181_vm7 = vcmp.eq.f32.partialorder %v11929_v44, inf  ;;  %v1435_v2 = vsel %vm1179_vm9, 3.4028235e+38, %v11923_v48  ;;  %v1944_v33 = vsel %vm1688_vm1, -3.4028235e+38, %v1432_v58 }
 0x29d   : > { %v3734_v16 = vadd.f32 %v3733_v11, %v3478_v6  ;;  %vm1690_vm3 = vcmp.eq.f32.partialorder %v1434_v61, -inf  ;;  %v2455_v27 = vsub.f32 %v1943_v36, %v2199_v0  ;;  %v2709_v21 = vmul.f32 %v2453_v19, %v2453_v19  ;;  %v11941_v48 = vld [vmem:[#allocation409_spill] sm:$0xff]  ;;  %v2205_v0 = vld [vmem:[%s8058_s23 + $0x540] sm:$0xff]  ;;  %v11945_v57 = vld [vmem:[#allocation262_spill] sm:$0xff] }
 0x29e   : > { %vm11931_vm8 = vcmp.lt.s32.totalorder %v11930_v5, %v11548_v3  ;;  %vm1182_vm2 = vcmp.eq.f32.partialorder %v11932_v35, inf  ;;  %v1436_v29 = vsel %vm1180_vm12, 3.4028235e+38, %v11926_v8  ;;  %v1945_v49 = vsel %vm1689_vm11, -3.4028235e+38, %v1433_v45  ;;  %v11944_v8 = vld [vmem:[#allocation410_spill] sm:$0xff] }
 0x29f   : > { %v3480_v25 = vsel %vm11931_vm8, %v2707_v51, 0.0  ;;  %v3735_v22 = vadd.f32 %v3734_v16, %v3479_v63  ;;  %vm1691_vm4 = vcmp.eq.f32.partialorder %v1435_v2, -inf  ;;  %v2456_v24 = vsub.f32 %v1944_v33, %v2200_v55  ;;  %v2206_v55 = vld [vmem:[%s8058_s23 + $0x548] sm:$0xff]  ;;  %v11948_v5 = vld [vmem:[#allocation263_spill] sm:$0xff] }
 0x2a0   : > { %v2710_v18 = vmul.f32 %v2454_v38, %v2454_v38  ;;  %vm11934_vm13 = vcmp.lt.s32.totalorder %v11933_v54, %v11548_v3  ;;  %vm1183_vm15 = vcmp.eq.f32.partialorder %v11935_v10, inf  ;;  %v1437_v14 = vsel %vm1181_vm7, 3.4028235e+38, %v11929_v44  ;;  %v11947_v44 = vld [vmem:[#allocation411_spill] sm:$0xff]  ;;  %v11951_v54 = vld [vmem:[#allocation264_spill] sm:$0xff] }
 0x2a1   : > { %v3481_v56 = vsel %vm11934_vm13, %v2708_v17, 0.0  ;;  %v1946_v26 = vsel %vm1690_vm3, -3.4028235e+38, %v1434_v61  ;;  %v3736_v40 = vadd.f32 %v3735_v22, %v3480_v25  ;;  %vm1692_vm14 = vcmp.eq.f32.partialorder %v1436_v29, -inf }
 0x2a2   : > { %v2457_v43 = vsub.f32 %v1945_v49, %v2201_v34  ;;  %v2711_v42 = vmul.f32 %v2455_v27, %v2455_v27  ;;  %vm11937_vm6 = vcmp.lt.s32.totalorder %v11936_v9, %v11548_v3  ;;  %vm1184_vm5 = vcmp.eq.f32.partialorder %v11938_v52, inf  ;;  %v2207_v34 = vld [vmem:[%s8058_s23 + $0x550] sm:$0xff] }
 0x2a3   : > { %v3482_v62 = vsel %vm11937_vm6, %v2709_v21, 0.0  ;;  %v1438_v58 = vsel %vm1182_vm2, 3.4028235e+38, %v11932_v35  ;;  %v1947_v7 = vsel %vm1691_vm4, -3.4028235e+38, %v1435_v2  ;;  %v3737_v53 = vadd.f32 %v3736_v40, %v3481_v56  ;;  %v11950_v35 = vld [vmem:[#allocation412_spill] sm:$0xff] }
 0x2a4   : > { %vm1693_vm9 = vcmp.eq.f32.partialorder %v1437_v14, -inf  ;;  %v2458_v4 = vsub.f32 %v1946_v26, %v2202_v41  ;;  %v2712_v50 = vmul.f32 %v2456_v24, %v2456_v24  ;;  %vm11940_vm1 = vcmp.lt.s32.totalorder %v11939_v15, %v11548_v3  ;;  %v2208_v41 = vld [vmem:[%s8058_s23 + $0x558] sm:$0xff]  ;;  %v11954_v9 = vld [vmem:[#allocation265_spill] sm:$0xff] }
 0x2a5   : > { %v3483_v46 = vsel %vm11940_vm1, %v2710_v18, 0.0  ;;  %vm1185_vm0 = vcmp.eq.f32.partialorder %v11941_v48, inf  ;;  %v1439_v45 = vsel %vm1183_vm15, 3.4028235e+38, %v11935_v10  ;;  %v1948_v28 = vsel %vm1692_vm14, -3.4028235e+38, %v1436_v29 }
 0x2a6   : > { %v3738_v23 = vadd.f32 %v3737_v53, %v3482_v62  ;;  %vm1694_vm12 = vcmp.eq.f32.partialorder %v1438_v58, -inf  ;;  %v2459_v19 = vsub.f32 %v1947_v7, %v2203_v13  ;;  %v2713_v51 = vmul.f32 %v2457_v43, %v2457_v43  ;;  %v11953_v10 = vld [vmem:[#allocation413_spill] sm:$0xff]  ;;  %v2209_v7 = vld [vmem:[%s8058_s23 + $0x560] sm:$0xff] }
 0x2a7   : > { %vm11943_vm11 = vcmp.lt.s32.totalorder %v11942_v1, %v11548_v3  ;;  %vm1186_vm10 = vcmp.eq.f32.partialorder %v11944_v8, inf  ;;  %v1440_v61 = vsel %vm1184_vm5, 3.4028235e+38, %v11938_v52  ;;  %v1949_v36 = vsel %vm1693_vm9, -3.4028235e+38, %v1437_v14 }
 0x2a8   : > { %v3484_v6 = vsel %vm11943_vm11, %v2711_v42, 0.0  ;;  %v3739_v11 = vadd.f32 %v3738_v23, %v3483_v46  ;;  %vm1695_vm7 = vcmp.eq.f32.partialorder %v1439_v45, -inf  ;;  %v2460_v38 = vsub.f32 %v1948_v28, %v2204_v20  ;;  %v11958_v46 = vld [vmem:[#allocation414_spill] sm:$0xff]  ;;  %v2210_v28 = vld [vmem:[%s8058_s23 + $0x568] sm:$0xff] }
 0x2a9   : > { %v2714_v17 = vmul.f32 %v2458_v4, %v2458_v4  ;;  %vm11946_vm3 = vcmp.lt.s32.totalorder %v11945_v57, %v11548_v3  ;;  %vm1187_vm8 = vcmp.eq.f32.partialorder %v11947_v44, inf  ;;  %v1441_v2 = vsel %vm1185_vm0, 3.4028235e+38, %v11941_v48 }
 0x2aa   : > { %v3485_v63 = vsel %vm11946_vm3, %v2712_v50, 0.0  ;;  %v1950_v33 = vsel %vm1694_vm12, -3.4028235e+38, %v1438_v58  ;;  %v3740_v16 = vadd.f32 %v3739_v11, %v3484_v6  ;;  %vm1696_vm2 = vcmp.eq.f32.partialorder %v1440_v61, -inf  ;;  %v11956_v50 = vld [vmem:[#allocation266_spill] sm:$0xff]  ;;  %v11961_v6 = vld [vmem:[#allocation415_spill] sm:$0xff] }
 0x2ab   : > { %v2461_v27 = vsub.f32 %v1949_v36, %v2205_v0  ;;  %v2715_v21 = vmul.f32 %v2459_v19, %v2459_v19  ;;  %vm11949_vm4 = vcmp.lt.s32.totalorder %v11948_v5, %v11548_v3  ;;  %vm1188_vm13 = vcmp.eq.f32.partialorder %v11950_v35, inf  ;;  %v2211_v36 = vld [vmem:[%s8058_s23 + $0x570] sm:$0xff] }
 0x2ac   : > { %v3486_v25 = vsel %vm11949_vm4, %v2713_v51, 0.0  ;;  %v1442_v29 = vsel %vm1186_vm10, 3.4028235e+38, %v11944_v8  ;;  %v1951_v49 = vsel %vm1695_vm7, -3.4028235e+38, %v1439_v45  ;;  %v3741_v22 = vadd.f32 %v3740_v16, %v3485_v63  ;;  %v11959_v51 = vld [vmem:[#allocation267_spill] sm:$0xff] }
 0x2ad   : > { %vm1697_vm15 = vcmp.eq.f32.partialorder %v1441_v2, -inf  ;;  %v2462_v24 = vsub.f32 %v1950_v33, %v2206_v55  ;;  %v2716_v18 = vmul.f32 %v2460_v38, %v2460_v38  ;;  %vm11952_vm14 = vcmp.lt.s32.totalorder %v11951_v54, %v11548_v3  ;;  %v11964_v63 = vld [vmem:[#allocation416_spill] sm:$0xff]  ;;  %v2212_v33 = vld [vmem:[%s8058_s23 + $0x578] sm:$0xff] }
 0x2ae   : > { %v3487_v56 = vsel %vm11952_vm14, %v2714_v17, 0.0  ;;  %vm1189_vm6 = vcmp.eq.f32.partialorder %v11953_v10, inf  ;;  %v1443_v14 = vsel %vm1187_vm8, 3.4028235e+38, %v11947_v44  ;;  %v1952_v26 = vsel %vm1696_vm2, -3.4028235e+38, %v1440_v61 }
 0x2af   : > { %v3742_v40 = vadd.f32 %v3741_v22, %v3486_v25  ;;  %vm1698_vm5 = vcmp.eq.f32.partialorder %v1442_v29, -inf  ;;  %v2463_v43 = vsub.f32 %v1951_v49, %v2207_v34  ;;  %v2717_v42 = vmul.f32 %v2461_v27, %v2461_v27  ;;  %v11962_v17 = vld [vmem:[#allocation268_spill] sm:$0xff]  ;;  %v11965_v27 = vld [vmem:[#allocation269_spill] sm:$0xff]  ;;  %v11967_v22 = vld [vmem:[#allocation270_spill] sm:$0xff] }
 0x2b0   : > { %vm11955_vm9 = vcmp.lt.s32.totalorder %v11954_v9, %v11548_v3  ;;  %vm1190_vm1 = vcmp.eq.f32.partialorder %v7353_v12, inf  ;;  %v1444_v52 = vsel %vm1188_vm13, 3.4028235e+38, %v11950_v35  ;;  %v1953_v58 = vsel %vm1697_vm15, -3.4028235e+38, %v1441_v2  ;;  %v2213_v35 = vld [vmem:[%s8058_s23 + $0x580] sm:$0xff] }
 0x2b1   : > { %v3488_v62 = vsel %vm11955_vm9, %v2715_v21, 0.0  ;;  %v3743_v13 = vadd.f32 %v3742_v40, %v3487_v56  ;;  %vm1699_vm0 = vcmp.eq.f32.partialorder %v1443_v14, -inf  ;;  %v2464_v53 = vsub.f32 %v1952_v26, %v2208_v41  ;;  %v2214_v56 = vld [vmem:[%s8058_s23 + $0x588] sm:$0xff]  ;;  %v11969_v41 = vld [vmem:[#allocation271_spill] sm:$0xff] }
 0x2b2   : > { %v2718_v4 = vmul.f32 %v2462_v24, %v2462_v24  ;;  %vm11957_vm12 = vcmp.lt.s32.totalorder %v11956_v50, %v11548_v3  ;;  %vm1191_vm11 = vcmp.eq.f32.partialorder %v11958_v46, inf  ;;  %v1445_v48 = vsel %vm1189_vm6, 3.4028235e+38, %v11953_v10 }
 0x2b3   : > { %v3489_v15 = vsel %vm11957_vm12, %v2716_v18, 0.0  ;;  %v1954_v45 = vsel %vm1698_vm5, -3.4028235e+38, %v1442_v29  ;;  %v3744_v20 = vadd.f32 %v3743_v13, %v3488_v62  ;;  %vm1700_vm10 = vcmp.eq.f32.partialorder %v1444_v52, -inf  ;;  %v2215_v62 = vld [vmem:[%s8058_s23 + $0x590] sm:$0xff]  ;;  %v11972_v13 = vld [vmem:[#allocation272_spill] sm:$0xff] }
 0x2b4   : > { %v2465_v23 = vsub.f32 %v1953_v58, %v2209_v7  ;;  %v2719_v19 = vmul.f32 %v2463_v43, %v2463_v43  ;;  %vm11960_vm7 = vcmp.lt.s32.totalorder %v11959_v51, %v11548_v3  ;;  %vm1192_vm3 = vcmp.eq.f32.partialorder %v11961_v6, inf  ;;  %v11971_v43 = vld [vmem:[#allocation417_spill] sm:$0xff]  ;;  %v2217_v51 = vld [vmem:[%s8058_s23 + $0x5a0] sm:$0xff] }
 0x2b5   : > { %v3490_v1 = vsel %vm11960_vm7, %v2717_v42, 0.0  ;;  %v1446_v8 = vsel %vm1190_vm1, 3.4028235e+38, %v7353_v12  ;;  %v1955_v61 = vsel %vm1699_vm0, -3.4028235e+38, %v1443_v14  ;;  %v3745_v0 = vadd.f32 %v3744_v20, %v3489_v15 }
 0x2b6   : > { %vm1701_vm8 = vcmp.eq.f32.partialorder %v1445_v48, -inf  ;;  %v2466_v11 = vsub.f32 %v1954_v45, %v2210_v28  ;;  %v2720_v38 = vmul.f32 %v2464_v53, %v2464_v53  ;;  %vm11963_vm2 = vcmp.lt.s32.totalorder %v11962_v17, %v11548_v3  ;;  %v11975_v28 = vld [vmem:[#allocation273_spill] sm:$0xff] }
 0x2b7   : > { %v3491_v57 = vsel %vm11963_vm2, %v2718_v4, 0.0  ;;  %vm1193_vm4 = vcmp.eq.f32.partialorder %v11964_v63, inf  ;;  %v1447_v44 = vsel %vm1191_vm11, 3.4028235e+38, %v11958_v46  ;;  %v1956_v2 = vsel %vm1700_vm10, -3.4028235e+38, %v1444_v52 }
 0x2b8   : > { %v3746_v12 = vadd.f32 %v3745_v0, %v3490_v1  ;;  %vm1702_vm13 = vcmp.eq.f32.partialorder %v1446_v8, -inf  ;;  %v2467_v55 = vsub.f32 %v1955_v61, %v2211_v36  ;;  %v2721_v16 = vmul.f32 %v2465_v23, %v2465_v23  ;;  %v11974_v4 = vld [vmem:[#allocation418_spill] sm:$0xff] }
 0x2b9   : > { %vm11966_vm15 = vcmp.lt.s32.totalorder %v11965_v27, %v11548_v3  ;;  %vm1194_vm14 = vcmp.eq.f32.partialorder %v7397_v30, inf  ;;  %v1448_v5 = vsel %vm1192_vm3, 3.4028235e+38, %v11961_v6  ;;  %v1957_v25 = vsel %vm1701_vm8, -3.4028235e+38, %v1445_v48  ;;  %v2216_v46 = vld [vmem:[%s8058_s23 + $0x598] sm:$0xff] }
 0x2ba   : > { %v3492_v21 = vsel %vm11966_vm15, %v2719_v19, 0.0  ;;  %v3747_v29 = vadd.f32 %v3746_v12, %v3491_v57  ;;  %vm1703_vm6 = vcmp.eq.f32.partialorder %v1447_v44, -inf  ;;  %v2468_v49 = vsub.f32 %v1956_v2, %v2212_v33  ;;  %v11981_v2 = vld [vmem:[#allocation419_spill] sm:$0xff] }
 0x2bb   : > { %v2722_v34 = vmul.f32 %v2466_v11, %v2466_v11  ;;  %vm11968_vm5 = vcmp.lt.s32.totalorder %v11967_v22, %v11548_v3  ;;  %vm1195_vm9 = vcmp.eq.f32.partialorder %v7403_v59, inf  ;;  %v1449_v18 = vsel %vm1193_vm4, 3.4028235e+38, %v11964_v63  ;;  %v2218_v11 = vld [vmem:[%s8058_s23 + $0x5a8] sm:$0xff]  ;;  %v11979_v63 = vld [vmem:[#allocation275_spill] sm:$0xff] }
 0x2bc   : > { %v3493_v24 = vsel %vm11968_vm5, %v2720_v38, 0.0  ;;  %v1958_v54 = vsel %vm1702_vm13, -3.4028235e+38, %v1446_v8  ;;  %v3748_v10 = vadd.f32 %v3747_v29, %v3492_v21  ;;  %vm1704_vm1 = vcmp.eq.f32.partialorder %v1448_v5, -inf  ;;  %v11977_v8 = vld [vmem:[#allocation274_spill] sm:$0xff] }
 0x2bd   : > { %v2469_v14 = vsub.f32 %v1957_v25, %v2213_v35  ;;  %v2723_v26 = vmul.f32 %v2467_v55, %v2467_v55  ;;  %vm11970_vm0 = vcmp.lt.s32.totalorder %v11969_v41, %v11548_v3  ;;  %vm1196_vm12 = vcmp.eq.f32.partialorder %v11971_v43, inf  ;;  %v2219_v55 = vld [vmem:[%s8058_s23 + $0x5b0] sm:$0xff]  ;;  %v11984_v35 = vld [vmem:[#allocation420_spill] sm:$0xff] }
 0x2be   : > { %v3494_v40 = vsel %vm11970_vm0, %v2721_v16, 0.0  ;;  %v1450_v42 = vsel %vm1194_vm14, 3.4028235e+38, %v7397_v30  ;;  %v1959_v9 = vsel %vm1703_vm6, -3.4028235e+38, %v1447_v44  ;;  %v3749_v52 = vadd.f32 %v3748_v10, %v3493_v24 }
 0x2bf   : > { %vm1705_vm11 = vcmp.eq.f32.partialorder %v1449_v18, -inf  ;;  %v2470_v58 = vsub.f32 %v1958_v54, %v2214_v56  ;;  %v2724_v7 = vmul.f32 %v2468_v49, %v2468_v49  ;;  %vm11973_vm10 = vcmp.lt.s32.totalorder %v11972_v13, %v11548_v3  ;;  %v11989_v13 = vld [vmem:[#allocation279_spill] sm:$0xff] }
 0x2c0   : > { %v3495_v53 = vsel %vm11973_vm10, %v2722_v34, 0.0  ;;  %vm1197_vm7 = vcmp.eq.f32.partialorder %v11974_v4, inf  ;;  %v1451_v50 = vsel %vm1195_vm9, 3.4028235e+38, %v7403_v59  ;;  %v1960_v15 = vsel %vm1704_vm1, -3.4028235e+38, %v1448_v5 }
 0x2c1   : > { %v3750_v30 = vadd.f32 %v3749_v52, %v3494_v40  ;;  %vm1706_vm3 = vcmp.eq.f32.partialorder %v1450_v42, -inf  ;;  %v2471_v48 = vsub.f32 %v1959_v9, %v2215_v62  ;;  %v2725_v45 = vmul.f32 %v2469_v14, %v2469_v14  ;;  %v11982_v5 = vld [vmem:[#allocation276_spill] sm:$0xff]  ;;  %v2220_v34 = vld [vmem:[%s8058_s23 + $0x5b8] sm:$0xff]  ;;  %v2221_v14 = vld [vmem:[%s8058_s23 + $0x5c0] sm:$0xff] }
 0x2c2   : > { %vm11976_vm8 = vcmp.lt.s32.totalorder %v11975_v28, %v11548_v3  ;;  %vm1198_vm2 = vcmp.eq.f32.partialorder %v7435_v32, inf  ;;  %v1452_v23 = vsel %vm1196_vm12, 3.4028235e+38, %v11971_v43  ;;  %v1961_v19 = vsel %vm1705_vm11, -3.4028235e+38, %v1449_v18  ;;  %v11985_v18 = vld [vmem:[#allocation277_spill] sm:$0xff] }
 0x2c3   : > { %v3496_v20 = vsel %vm11976_vm8, %v2723_v26, 0.0  ;;  %v3751_v59 = vadd.f32 %v3750_v30, %v3495_v53  ;;  %vm1707_vm4 = vcmp.eq.f32.partialorder %v1451_v50, -inf  ;;  %v2472_v1 = vsub.f32 %v1960_v15, %v2216_v46  ;;  %v11987_v40 = vld [vmem:[#allocation278_spill] sm:$0xff]  ;;  %v2222_v62 = vld [vmem:[%s8058_s23 + $0x5c8] sm:$0xff]  ;;  %v2223_v46 = vld [vmem:[%s8058_s23 + $0x5d0] sm:$0xff] }
 0x2c4   : > { %v2726_v6 = vmul.f32 %v2470_v58, %v2470_v58  ;;  %vm11978_vm13 = vcmp.lt.s32.totalorder %v11977_v8, %v11548_v3  ;;  %vm1199_vm15 = vcmp.eq.f32.partialorder %v7441_v47, inf  ;;  %v1453_v36 = vsel %vm1197_vm7, 3.4028235e+38, %v11974_v4  ;;  %v11991_v4 = vld [vmem:[#allocation421_spill] sm:$0xff]  ;;  %v11992_v28 = vld [vmem:[#allocation280_spill] sm:$0xff] }
 0x2c5   : > { %v3497_v61 = vsel %vm11978_vm13, %v2724_v7, 0.0  ;;  %v1962_v0 = vsel %vm1706_vm3, -3.4028235e+38, %v1450_v42  ;;  %v3752_v38 = vadd.f32 %v3751_v59, %v3496_v20  ;;  %vm1708_vm14 = vcmp.eq.f32.partialorder %v1452_v23, -inf  ;;  %v2224_v59 = vld [vmem:[%s8058_s23 + $0x5d8] sm:$0xff]  ;;  %v11995_v8 = vld [vmem:[#allocation281_spill] sm:$0xff] }
 0x2c6   : > { %v2473_v17 = vsub.f32 %v1961_v19, %v2217_v51  ;;  %v2727_v57 = vmul.f32 %v2471_v48, %v2471_v48  ;;  %vm11980_vm6 = vcmp.lt.s32.totalorder %v11979_v63, %v11548_v3  ;;  %vm1200_vm5 = vcmp.eq.f32.partialorder %v11981_v2, inf }
 0x2c7   : > { %v3498_v44 = vsel %vm11980_vm6, %v2725_v45, 0.0  ;;  %v1454_v33 = vsel %vm1198_vm2, 3.4028235e+38, %v7435_v32  ;;  %v1963_v12 = vsel %vm1707_vm4, -3.4028235e+38, %v1451_v50  ;;  %v3753_v16 = vadd.f32 %v3752_v38, %v3497_v61 }
 0x2c8   : > { %vm1709_vm9 = vcmp.eq.f32.partialorder %v1453_v36, -inf  ;;  %v2474_v27 = vsub.f32 %v1962_v0, %v2218_v11  ;;  %v2728_v21 = vmul.f32 %v2472_v1, %v2472_v1  ;;  %vm11983_vm1 = vcmp.lt.s32.totalorder %v11982_v5, %v11548_v3  ;;  %v2225_v11 = vld [vmem:[%s8058_s23 + $0x5e0] sm:$0xff] }
 0x2c9   : > { %v3499_v25 = vsel %vm11983_vm1, %v2726_v6, 0.0  ;;  %vm1201_vm0 = vcmp.eq.f32.partialorder %v11984_v35, inf  ;;  %v1455_v29 = vsel %vm1199_vm15, 3.4028235e+38, %v7441_v47  ;;  %v1964_v49 = vsel %vm1708_vm14, -3.4028235e+38, %v1452_v23 }
 0x2ca   : > { %v3754_v32 = vadd.f32 %v3753_v16, %v3498_v44  ;;  %vm1710_vm12 = vcmp.eq.f32.partialorder %v1454_v33, -inf  ;;  %v2475_v22 = vsub.f32 %v1963_v12, %v2219_v55  ;;  %v2729_v24 = vmul.f32 %v2473_v17, %v2473_v17  ;;  %v11994_v23 = vld [vmem:[#allocation422_spill] sm:$0xff]  ;;  %v12001_v5 = vld [vmem:[#allocation423_spill] sm:$0xff] }
 0x2cb   : > { %vm11986_vm11 = vcmp.lt.s32.totalorder %v11985_v18, %v11548_v3  ;;  %vm1202_vm10 = vcmp.eq.f32.partialorder %v7473_v39, inf  ;;  %v1456_v56 = vsel %vm1200_vm5, 3.4028235e+38, %v11981_v2  ;;  %v1965_v10 = vsel %vm1709_vm9, -3.4028235e+38, %v1453_v36  ;;  %v12004_v18 = vld [vmem:[#allocation424_spill] sm:$0xff] }
 0x2cc   : > { %v3500_v54 = vsel %vm11986_vm11, %v2727_v57, 0.0  ;;  %v3755_v47 = vadd.f32 %v3754_v32, %v3499_v25  ;;  %vm1711_vm7 = vcmp.eq.f32.partialorder %v1455_v29, -inf  ;;  %v2476_v26 = vsub.f32 %v1964_v49, %v2220_v34  ;;  %v11997_v57 = vld [vmem:[#allocation282_spill] sm:$0xff] }
 0x2cd   : > { %v2730_v41 = vmul.f32 %v2474_v27, %v2474_v27  ;;  %vm11988_vm3 = vcmp.lt.s32.totalorder %v11987_v40, %v11548_v3  ;;  %vm1203_vm8 = vcmp.eq.f32.partialorder %v7479_v37, inf  ;;  %v1457_v42 = vsel %vm1201_vm0, 3.4028235e+38, %v11984_v35  ;;  %v11999_v27 = vld [vmem:[#allocation283_spill] sm:$0xff]  ;;  %v12007_v40 = vld [vmem:[#allocation425_spill] sm:$0xff] }
 0x2ce   : > { %v3501_v43 = vsel %vm11988_vm3, %v2728_v21, 0.0  ;;  %v1966_v9 = vsel %vm1710_vm12, -3.4028235e+38, %v1454_v33  ;;  %v3756_v52 = vadd.f32 %v3755_v47, %v3500_v54  ;;  %vm1712_vm2 = vcmp.eq.f32.partialorder %v1456_v56, -inf  ;;  %v2226_v33 = vld [vmem:[%s8058_s23 + $0x5e8] sm:$0xff] }
 0x2cf   : > { %v2477_v58 = vsub.f32 %v1965_v10, %v2221_v14  ;;  %v2731_v7 = vmul.f32 %v2475_v22, %v2475_v22  ;;  %vm11990_vm4 = vcmp.lt.s32.totalorder %v11989_v13, %v11548_v3  ;;  %vm1204_vm13 = vcmp.eq.f32.partialorder %v11991_v4, inf  ;;  %v12002_v22 = vld [vmem:[#allocation284_spill] sm:$0xff]  ;;  %v2228_v10 = vld [vmem:[%s8058_s23 + $0x5f8] sm:$0xff] }
 0x2d0   : > { %v3502_v53 = vsel %vm11990_vm4, %v2729_v24, 0.0  ;;  %v1458_v50 = vsel %vm1202_vm10, 3.4028235e+38, %v7473_v39  ;;  %v1967_v15 = vsel %vm1711_vm7, -3.4028235e+38, %v1455_v29  ;;  %v3757_v30 = vadd.f32 %v3756_v52, %v3501_v43  ;;  %v2227_v29 = vld [vmem:[%s8058_s23 + $0x5f0] sm:$0xff] }
 0x2d1   : > { %vm1713_vm15 = vcmp.eq.f32.partialorder %v1457_v42, -inf  ;;  %v2478_v48 = vsub.f32 %v1966_v9, %v2222_v62  ;;  %v2732_v45 = vmul.f32 %v2476_v26, %v2476_v26  ;;  %vm11993_vm14 = vcmp.lt.s32.totalorder %v11992_v28, %v11548_v3  ;;  %v12005_v26 = vld [vmem:[#allocation285_spill] sm:$0xff]  ;;  %v2229_v9 = vld [vmem:[%s8058_s23 + $0x600] sm:$0xff]  ;;  %v12010_v13 = vld [vmem:[#allocation426_spill] sm:$0xff] }
 0x2d2   : > { %v3503_v20 = vsel %vm11993_vm14, %v2730_v41, 0.0  ;;  %vm1205_vm6 = vcmp.eq.f32.partialorder %v11994_v23, inf  ;;  %v1459_v19 = vsel %vm1203_vm8, 3.4028235e+38, %v7479_v37  ;;  %v1968_v51 = vsel %vm1712_vm2, -3.4028235e+38, %v1456_v56 }
 0x2d3   : > { %v3758_v39 = vadd.f32 %v3757_v30, %v3502_v53  ;;  %vm1714_vm5 = vcmp.eq.f32.partialorder %v1458_v50, -inf  ;;  %v2479_v1 = vsub.f32 %v1967_v15, %v2223_v46  ;;  %v2733_v6 = vmul.f32 %v2477_v58, %v2477_v58  ;;  %v12008_v58 = vld [vmem:[#allocation286_spill] sm:$0xff]  ;;  %v12013_v28 = vld [vmem:[#allocation427_spill] sm:$0xff] }
 0x2d4   : > { %vm11996_vm9 = vcmp.lt.s32.totalorder %v11995_v8, %v11548_v3  ;;  %vm1206_vm1 = vcmp.eq.f32.partialorder %v7511_v60, inf  ;;  %v1460_v36 = vsel %vm1204_vm13, 3.4028235e+38, %v11991_v4  ;;  %v1969_v0 = vsel %vm1713_vm15, -3.4028235e+38, %v1457_v42  ;;  %v12016_v8 = vld [vmem:[#allocation428_spill] sm:$0xff] }
 0x2d5   : > { %v3504_v61 = vsel %vm11996_vm9, %v2731_v7, 0.0  ;;  %v3759_v37 = vadd.f32 %v3758_v39, %v3503_v20  ;;  %vm1715_vm0 = vcmp.eq.f32.partialorder %v1459_v19, -inf  ;;  %v2480_v38 = vsub.f32 %v1968_v51, %v2224_v59 }
 0x2d6   : > { %v2734_v17 = vmul.f32 %v2478_v48, %v2478_v48  ;;  %vm11998_vm12 = vcmp.lt.s32.totalorder %v11997_v57, %v11548_v3  ;;  %vm1207_vm11 = vcmp.eq.f32.partialorder %v7517_v31, inf  ;;  %v1461_v44 = vsel %vm1205_vm6, 3.4028235e+38, %v11994_v23  ;;  %v12011_v48 = vld [vmem:[#allocation287_spill] sm:$0xff] }
 0x2d7   : > { %v3505_v63 = vsel %vm11998_vm12, %v2732_v45, 0.0  ;;  %v1970_v2 = vsel %vm1714_vm5, -3.4028235e+38, %v1458_v50  ;;  %v3760_v12 = vadd.f32 %v3759_v37, %v3504_v61  ;;  %vm1716_vm10 = vcmp.eq.f32.partialorder %v1460_v36, -inf  ;;  %v2230_v50 = vld [vmem:[%s8058_s23 + $0x608] sm:$0xff] }
 0x2d8   : > { %v2481_v55 = vsub.f32 %v1969_v0, %v2225_v11  ;;  %v2735_v16 = vmul.f32 %v2479_v1, %v2479_v1  ;;  %vm12000_vm7 = vcmp.lt.s32.totalorder %v11999_v27, %v11548_v3  ;;  %vm1208_vm3 = vcmp.eq.f32.partialorder %v12001_v5, inf  ;;  %v12014_v1 = vld [vmem:[#allocation288_spill] sm:$0xff]  ;;  %v2232_v0 = vld [vmem:[%s8058_s23 + $0x618] sm:$0xff] }
 0x2d9   : > { %v3506_v21 = vsel %vm12000_vm7, %v2733_v6, 0.0  ;;  %v1462_v25 = vsel %vm1206_vm1, 3.4028235e+38, %v7511_v60  ;;  %v1971_v35 = vsel %vm1715_vm0, -3.4028235e+38, %v1459_v19  ;;  %v3761_v49 = vadd.f32 %v3760_v12, %v3505_v63  ;;  %v2231_v19 = vld [vmem:[%s8058_s23 + $0x610] sm:$0xff] }
 0x2da   : > { %vm1717_vm8 = vcmp.eq.f32.partialorder %v1461_v44, -inf  ;;  %v2482_v34 = vsub.f32 %v1970_v2, %v2226_v33  ;;  %v2736_v32 = vmul.f32 %v2480_v38, %v2480_v38  ;;  %vm12003_vm2 = vcmp.lt.s32.totalorder %v12002_v22, %v11548_v3  ;;  %v12019_v63 = vld [vmem:[#allocation373_spill] sm:$0xff]  ;;  %v2233_v33 = vld [vmem:[%s8058_s23 + $0x620] sm:$0xff]  ;;  %v12020_v27 = vld [vmem:[#allocation290_spill] sm:$0xff] }
 0x2db   : > { %v3507_v24 = vsel %vm12003_vm2, %v2734_v17, 0.0  ;;  %vm1209_vm4 = vcmp.eq.f32.partialorder %v12004_v18, inf  ;;  %v1463_v54 = vsel %vm1207_vm11, 3.4028235e+38, %v7517_v31  ;;  %v1972_v56 = vsel %vm1716_vm10, -3.4028235e+38, %v1460_v36 }
 0x2dc   : > { %v3762_v60 = vadd.f32 %v3761_v49, %v3506_v21  ;;  %vm1718_vm13 = vcmp.eq.f32.partialorder %v1462_v25, -inf  ;;  %v2483_v14 = vsub.f32 %v1971_v35, %v2227_v29  ;;  %v2737_v47 = vmul.f32 %v2481_v55, %v2481_v55  ;;  %v12017_v17 = vld [vmem:[#allocation289_spill] sm:$0xff]  ;;  %v2234_v29 = vld [vmem:[%s8058_s23 + $0x628] sm:$0xff]  ;;  %v12023_v22 = vld [vmem:[#allocation291_spill] sm:$0xff] }
 0x2dd   : > { %vm12006_vm15 = vcmp.lt.s32.totalorder %v12005_v26, %v11548_v3  ;;  %vm1210_vm14 = vcmp.eq.f32.partialorder %v12007_v40, inf  ;;  %v1464_v43 = vsel %vm1208_vm3, 3.4028235e+38, %v12001_v5  ;;  %v1973_v42 = vsel %vm1717_vm8, -3.4028235e+38, %v1461_v44  ;;  %v12022_v5 = vld [vmem:[#allocation374_spill] sm:$0xff] }
 0x2de   : > { %v3508_v41 = vsel %vm12006_vm15, %v2735_v16, 0.0  ;;  %v3763_v31 = vadd.f32 %v3762_v60, %v3507_v24  ;;  %vm1719_vm6 = vcmp.eq.f32.partialorder %v1463_v54, -inf  ;;  %v2484_v62 = vsub.f32 %v1972_v56, %v2228_v10  ;;  %v2235_v10 = vld [vmem:[%s8058_s23 + $0x630] sm:$0xff]  ;;  %v12026_v26 = vld [vmem:[#allocation292_spill] sm:$0xff] }
 0x2df   : > { %v2738_v52 = vmul.f32 %v2482_v34, %v2482_v34  ;;  %vm12009_vm5 = vcmp.lt.s32.totalorder %v12008_v58, %v11548_v3  ;;  %vm1211_vm9 = vcmp.eq.f32.partialorder %v12010_v13, inf  ;;  %v1465_v53 = vsel %vm1209_vm4, 3.4028235e+38, %v12004_v18  ;;  %v12025_v18 = vld [vmem:[#allocation375_spill] sm:$0xff]  ;;  %v12029_v58 = vld [vmem:[#allocation293_spill] sm:$0xff] }
 0x2e0   : > { %v3509_v7 = vsel %vm12009_vm5, %v2736_v32, 0.0  ;;  %v1974_v4 = vsel %vm1718_vm13, -3.4028235e+38, %v1462_v25  ;;  %v3764_v15 = vadd.f32 %v3763_v31, %v3508_v41  ;;  %vm1720_vm1 = vcmp.eq.f32.partialorder %v1464_v43, -inf }
 0x2e1   : > { %v2485_v46 = vsub.f32 %v1973_v42, %v2229_v9  ;;  %v2739_v30 = vmul.f32 %v2483_v14, %v2483_v14  ;;  %vm12012_vm0 = vcmp.lt.s32.totalorder %v12011_v48, %v11548_v3  ;;  %vm1212_vm12 = vcmp.eq.f32.partialorder %v12013_v28, inf  ;;  %v2236_v9 = vld [vmem:[%s8058_s23 + $0x638] sm:$0xff] }
 0x2e2   : > { %v3510_v45 = vsel %vm12012_vm0, %v2737_v47, 0.0  ;;  %v1466_v20 = vsel %vm1210_vm14, 3.4028235e+38, %v12007_v40  ;;  %v1975_v23 = vsel %vm1719_vm6, -3.4028235e+38, %v1463_v54  ;;  %v3765_v51 = vadd.f32 %v3764_v15, %v3509_v7  ;;  %v12028_v40 = vld [vmem:[#allocation380_spill] sm:$0xff] }
 0x2e3   : > { %vm1721_vm11 = vcmp.eq.f32.partialorder %v1465_v53, -inf  ;;  %v2486_v59 = vsub.f32 %v1974_v4, %v2230_v50  ;;  %v2740_v39 = vmul.f32 %v2484_v62, %v2484_v62  ;;  %vm12015_vm10 = vcmp.lt.s32.totalorder %v12014_v1, %v11548_v3  ;;  %v2237_v50 = vld [vmem:[%s8058_s23 + $0x640] sm:$0xff]  ;;  %v12032_v48 = vld [vmem:[#allocation294_spill] sm:$0xff] }
 0x2e4   : > { %v3511_v6 = vsel %vm12015_vm10, %v2738_v52, 0.0  ;;  %vm1213_vm7 = vcmp.eq.f32.partialorder %v12016_v8, inf  ;;  %v1467_v61 = vsel %vm1211_vm9, 3.4028235e+38, %v12010_v13  ;;  %v1976_v36 = vsel %vm1720_vm1, -3.4028235e+38, %v1464_v43 }
 0x2e5   : > { %v3766_v11 = vadd.f32 %v3765_v51, %v3510_v45  ;;  %vm1722_vm3 = vcmp.eq.f32.partialorder %v1466_v20, -inf  ;;  %v2487_v37 = vsub.f32 %v1975_v23, %v2231_v19  ;;  %v2741_v38 = vmul.f32 %v2485_v46, %v2485_v46  ;;  %v12031_v13 = vld [vmem:[#allocation381_spill] sm:$0xff]  ;;  %v2238_v19 = vld [vmem:[%s8058_s23 + $0x648] sm:$0xff]  ;;  %v12035_v1 = vld [vmem:[#allocation295_spill] sm:$0xff] }
 0x2e6   : > { %vm12018_vm8 = vcmp.lt.s32.totalorder %v12017_v17, %v11548_v3  ;;  %vm1214_vm2 = vcmp.eq.f32.partialorder %v12019_v63, inf  ;;  %v1468_v44 = vsel %vm1212_vm12, 3.4028235e+38, %v12013_v28  ;;  %v1977_v2 = vsel %vm1721_vm11, -3.4028235e+38, %v1465_v53  ;;  %v12034_v28 = vld [vmem:[#allocation382_spill] sm:$0xff] }
 0x2e7   : > { %v3512_v57 = vsel %vm12018_vm8, %v2739_v30, 0.0  ;;  %v3767_v12 = vadd.f32 %v3766_v11, %v3511_v6  ;;  %vm1723_vm4 = vcmp.eq.f32.partialorder %v1467_v61, -inf  ;;  %v2488_v55 = vsub.f32 %v1976_v36, %v2232_v0  ;;  %v2239_v0 = vld [vmem:[%s8058_s23 + $0x650] sm:$0xff]  ;;  %v12038_v17 = vld [vmem:[#allocation296_spill] sm:$0xff] }
 0x2e8   : > { %v2742_v16 = vmul.f32 %v2486_v59, %v2486_v59  ;;  %vm12021_vm13 = vcmp.lt.s32.totalorder %v12020_v27, %v11548_v3  ;;  %vm1215_vm15 = vcmp.eq.f32.partialorder %v12022_v5, inf  ;;  %v1469_v25 = vsel %vm1213_vm7, 3.4028235e+38, %v12016_v8  ;;  %v12037_v8 = vld [vmem:[#allocation383_spill] sm:$0xff]  ;;  %v12041_v27 = vld [vmem:[#allocation297_spill] sm:$0xff] }
 0x2e9   : > { %v3513_v21 = vsel %vm12021_vm13, %v2740_v39, 0.0  ;;  %v1978_v35 = vsel %vm1722_vm3, -3.4028235e+38, %v1466_v20  ;;  %v3768_v49 = vadd.f32 %v3767_v12, %v3512_v57  ;;  %vm1724_vm14 = vcmp.eq.f32.partialorder %v1468_v44, -inf }
 0x2ea   : > { %v2489_v34 = vsub.f32 %v1977_v2, %v2233_v33  ;;  %v2743_v32 = vmul.f32 %v2487_v37, %v2487_v37  ;;  %vm12024_vm6 = vcmp.lt.s32.totalorder %v12023_v22, %v11548_v3  ;;  %vm1216_vm5 = vcmp.eq.f32.partialorder %v12025_v18, inf  ;;  %v2240_v33 = vld [vmem:[%s8058_s23 + $0x658] sm:$0xff] }
 0x2eb   : > { %v3514_v24 = vsel %vm12024_vm6, %v2741_v38, 0.0  ;;  %v1470_v54 = vsel %vm1214_vm2, 3.4028235e+38, %v12019_v63  ;;  %v1979_v56 = vsel %vm1723_vm4, -3.4028235e+38, %v1467_v61  ;;  %v3769_v60 = vadd.f32 %v3768_v49, %v3513_v21  ;;  %v12040_v63 = vld [vmem:[#allocation429_spill] sm:$0xff] }
 0x2ec   : > { %vm1725_vm9 = vcmp.eq.f32.partialorder %v1469_v25, -inf  ;;  %v2490_v14 = vsub.f32 %v1978_v35, %v2234_v29  ;;  %v2744_v47 = vmul.f32 %v2488_v55, %v2488_v55  ;;  %vm12027_vm1 = vcmp.lt.s32.totalorder %v12026_v26, %v11548_v3  ;;  %v2241_v29 = vld [vmem:[%s8058_s23 + $0x660] sm:$0xff]  ;;  %v12044_v22 = vld [vmem:[#allocation298_spill] sm:$0xff] }
 0x2ed   : > { %v3515_v41 = vsel %vm12027_vm1, %v2742_v16, 0.0  ;;  %vm1217_vm0 = vcmp.eq.f32.partialorder %v12028_v40, inf  ;;  %v1471_v43 = vsel %vm1215_vm15, 3.4028235e+38, %v12022_v5  ;;  %v1980_v42 = vsel %vm1724_vm14, -3.4028235e+38, %v1468_v44 }
 0x2ee   : > { %v3770_v31 = vadd.f32 %v3769_v60, %v3514_v24  ;;  %vm1726_vm12 = vcmp.eq.f32.partialorder %v1470_v54, -inf  ;;  %v2491_v62 = vsub.f32 %v1979_v56, %v2235_v10  ;;  %v2745_v52 = vmul.f32 %v2489_v34, %v2489_v34  ;;  %v12043_v5 = vld [vmem:[#allocation430_spill] sm:$0xff]  ;;  %v2242_v10 = vld [vmem:[%s8058_s23 + $0x668] sm:$0xff]  ;;  %v12047_v26 = vld [vmem:[#allocation299_spill] sm:$0xff] }
 0x2ef   : > { %vm12030_vm11 = vcmp.lt.s32.totalorder %v12029_v58, %v11548_v3  ;;  %vm1218_vm10 = vcmp.eq.f32.partialorder %v12031_v13, inf  ;;  %v1472_v53 = vsel %vm1216_vm5, 3.4028235e+38, %v12025_v18  ;;  %v1981_v4 = vsel %vm1725_vm9, -3.4028235e+38, %v1469_v25  ;;  %v12046_v18 = vld [vmem:[#allocation431_spill] sm:$0xff] }
 0x2f0   : > { %v3516_v7 = vsel %vm12030_vm11, %v2743_v32, 0.0  ;;  %v3771_v15 = vadd.f32 %v3770_v31, %v3515_v41  ;;  %vm1727_vm7 = vcmp.eq.f32.partialorder %v1471_v43, -inf  ;;  %v2492_v46 = vsub.f32 %v1980_v42, %v2236_v9  ;;  %v2243_v9 = vld [vmem:[%s8058_s23 + $0x670] sm:$0xff]  ;;  %v12050_v58 = vld [vmem:[#allocation300_spill] sm:$0xff] }
 0x2f1   : > { %v2746_v30 = vmul.f32 %v2490_v14, %v2490_v14  ;;  %vm12033_vm3 = vcmp.lt.s32.totalorder %v12032_v48, %v11548_v3  ;;  %vm1219_vm8 = vcmp.eq.f32.partialorder %v12034_v28, inf  ;;  %v1473_v20 = vsel %vm1217_vm0, 3.4028235e+38, %v12028_v40  ;;  %v12049_v40 = vld [vmem:[#allocation432_spill] sm:$0xff]  ;;  %v12053_v48 = vld [vmem:[#allocation301_spill] sm:$0xff] }
 0x2f2   : > { %v3517_v45 = vsel %vm12033_vm3, %v2744_v47, 0.0  ;;  %v1982_v23 = vsel %vm1726_vm12, -3.4028235e+38, %v1470_v54  ;;  %v3772_v51 = vadd.f32 %v3771_v15, %v3516_v7  ;;  %vm1728_vm2 = vcmp.eq.f32.partialorder %v1472_v53, -inf }
 0x2f3   : > { %v2493_v59 = vsub.f32 %v1981_v4, %v2237_v50  ;;  %v2747_v39 = vmul.f32 %v2491_v62, %v2491_v62  ;;  %vm12036_vm4 = vcmp.lt.s32.totalorder %v12035_v1, %v11548_v3  ;;  %vm1220_vm13 = vcmp.eq.f32.partialorder %v12037_v8, inf  ;;  %v2244_v50 = vld [vmem:[%s8058_s23 + $0x678] sm:$0xff] }
 0x2f4   : > { %v3518_v6 = vsel %vm12036_vm4, %v2745_v52, 0.0  ;;  %v1474_v61 = vsel %vm1218_vm10, 3.4028235e+38, %v12031_v13  ;;  %v1983_v36 = vsel %vm1727_vm7, -3.4028235e+38, %v1471_v43  ;;  %v3773_v11 = vadd.f32 %v3772_v51, %v3517_v45  ;;  %v12052_v13 = vld [vmem:[#allocation433_spill] sm:$0xff] }
 0x2f5   : > { %vm1729_vm15 = vcmp.eq.f32.partialorder %v1473_v20, -inf  ;;  %v2494_v37 = vsub.f32 %v1982_v23, %v2238_v19  ;;  %v2748_v38 = vmul.f32 %v2492_v46, %v2492_v46  ;;  %vm12039_vm14 = vcmp.lt.s32.totalorder %v12038_v17, %v11548_v3  ;;  %v2245_v19 = vld [vmem:[%s8058_s23 + $0x680] sm:$0xff]  ;;  %v12056_v1 = vld [vmem:[#allocation302_spill] sm:$0xff] }
 0x2f6   : > { %v3519_v57 = vsel %vm12039_vm14, %v2746_v30, 0.0  ;;  %vm1221_vm6 = vcmp.eq.f32.partialorder %v12040_v63, inf  ;;  %v1475_v44 = vsel %vm1219_vm8, 3.4028235e+38, %v12034_v28  ;;  %v1984_v2 = vsel %vm1728_vm2, -3.4028235e+38, %v1472_v53 }
 0x2f7   : > { %v3774_v12 = vadd.f32 %v3773_v11, %v3518_v6  ;;  %vm1730_vm5 = vcmp.eq.f32.partialorder %v1474_v61, -inf  ;;  %v2495_v55 = vsub.f32 %v1983_v36, %v2239_v0  ;;  %v2749_v16 = vmul.f32 %v2493_v59, %v2493_v59  ;;  %v12055_v28 = vld [vmem:[#allocation434_spill] sm:$0xff]  ;;  %v2246_v0 = vld [vmem:[%s8058_s23 + $0x688] sm:$0xff]  ;;  %v12059_v17 = vld [vmem:[#allocation303_spill] sm:$0xff] }
 0x2f8   : > { %vm12042_vm9 = vcmp.lt.s32.totalorder %v12041_v27, %v11548_v3  ;;  %vm1222_vm1 = vcmp.eq.f32.partialorder %v12043_v5, inf  ;;  %v1476_v25 = vsel %vm1220_vm13, 3.4028235e+38, %v12037_v8  ;;  %v1985_v35 = vsel %vm1729_vm15, -3.4028235e+38, %v1473_v20  ;;  %v12058_v8 = vld [vmem:[#allocation435_spill] sm:$0xff] }
 0x2f9   : > { %v3520_v21 = vsel %vm12042_vm9, %v2747_v39, 0.0  ;;  %v3775_v49 = vadd.f32 %v3774_v12, %v3519_v57  ;;  %vm1731_vm0 = vcmp.eq.f32.partialorder %v1475_v44, -inf  ;;  %v2496_v34 = vsub.f32 %v1984_v2, %v2240_v33  ;;  %v2247_v33 = vld [vmem:[%s8058_s23 + $0x690] sm:$0xff]  ;;  %v12062_v27 = vld [vmem:[#allocation304_spill] sm:$0xff] }
 0x2fa   : > { %v2750_v32 = vmul.f32 %v2494_v37, %v2494_v37  ;;  %vm12045_vm12 = vcmp.lt.s32.totalorder %v12044_v22, %v11548_v3  ;;  %vm1223_vm11 = vcmp.eq.f32.partialorder %v12046_v18, inf  ;;  %v1477_v54 = vsel %vm1221_vm6, 3.4028235e+38, %v12040_v63  ;;  %v12061_v63 = vld [vmem:[#allocation392_spill] sm:$0xff]  ;;  %v12065_v22 = vld [vmem:[#allocation305_spill] sm:$0xff] }
 0x2fb   : > { %v3521_v24 = vsel %vm12045_vm12, %v2748_v38, 0.0  ;;  %v1986_v56 = vsel %vm1730_vm5, -3.4028235e+38, %v1474_v61  ;;  %v3776_v60 = vadd.f32 %v3775_v49, %v3520_v21  ;;  %vm1732_vm10 = vcmp.eq.f32.partialorder %v1476_v25, -inf }
 0x2fc   : > { %v2497_v14 = vsub.f32 %v1985_v35, %v2241_v29  ;;  %v2751_v47 = vmul.f32 %v2495_v55, %v2495_v55  ;;  %vm12048_vm7 = vcmp.lt.s32.totalorder %v12047_v26, %v11548_v3  ;;  %vm1224_vm3 = vcmp.eq.f32.partialorder %v12049_v40, inf  ;;  %v2248_v29 = vld [vmem:[%s8058_s23 + $0x698] sm:$0xff] }
 0x2fd   : > { %v3522_v41 = vsel %vm12048_vm7, %v2749_v16, 0.0  ;;  %v1478_v43 = vsel %vm1222_vm1, 3.4028235e+38, %v12043_v5  ;;  %v1987_v42 = vsel %vm1731_vm0, -3.4028235e+38, %v1475_v44  ;;  %v3777_v31 = vadd.f32 %v3776_v60, %v3521_v24  ;;  %v12064_v5 = vld [vmem:[#allocation436_spill] sm:$0xff] }
 0x2fe   : > { %vm1733_vm8 = vcmp.eq.f32.partialorder %v1477_v54, -inf  ;;  %v2498_v62 = vsub.f32 %v1986_v56, %v2242_v10  ;;  %v2752_v52 = vmul.f32 %v2496_v34, %v2496_v34  ;;  %vm12051_vm2 = vcmp.lt.s32.totalorder %v12050_v58, %v11548_v3  ;;  %v2249_v10 = vld [vmem:[%s8058_s23 + $0x6a0] sm:$0xff]  ;;  %v12068_v26 = vld [vmem:[#allocation306_spill] sm:$0xff] }
 0x2ff   : > { %v3523_v7 = vsel %vm12051_vm2, %v2750_v32, 0.0  ;;  %vm1225_vm4 = vcmp.eq.f32.partialorder %v12052_v13, inf  ;;  %v1479_v53 = vsel %vm1223_vm11, 3.4028235e+38, %v12046_v18  ;;  %v1988_v4 = vsel %vm1732_vm10, -3.4028235e+38, %v1476_v25 }
 0x300   : > { %v3778_v15 = vadd.f32 %v3777_v31, %v3522_v41  ;;  %vm1734_vm13 = vcmp.eq.f32.partialorder %v1478_v43, -inf  ;;  %v2499_v46 = vsub.f32 %v1987_v42, %v2243_v9  ;;  %v2753_v30 = vmul.f32 %v2497_v14, %v2497_v14  ;;  %v12067_v18 = vld [vmem:[#allocation437_spill] sm:$0xff]  ;;  %v2250_v9 = vld [vmem:[%s8058_s23 + $0x6a8] sm:$0xff]  ;;  %v12071_v58 = vld [vmem:[#allocation307_spill] sm:$0xff] }
 0x301   : > { %vm12054_vm15 = vcmp.lt.s32.totalorder %v12053_v48, %v11548_v3  ;;  %vm1226_vm14 = vcmp.eq.f32.partialorder %v12055_v28, inf  ;;  %v1480_v20 = vsel %vm1224_vm3, 3.4028235e+38, %v12049_v40  ;;  %v1989_v23 = vsel %vm1733_vm8, -3.4028235e+38, %v1477_v54  ;;  %v12070_v40 = vld [vmem:[#allocation438_spill] sm:$0xff] }
 0x302   : > { %v3524_v45 = vsel %vm12054_vm15, %v2751_v47, 0.0  ;;  %v3779_v51 = vadd.f32 %v3778_v15, %v3523_v7  ;;  %vm1735_vm6 = vcmp.eq.f32.partialorder %v1479_v53, -inf  ;;  %v2500_v59 = vsub.f32 %v1988_v4, %v2244_v50  ;;  %v2251_v50 = vld [vmem:[%s8058_s23 + $0x6b0] sm:$0xff]  ;;  %v12074_v48 = vld [vmem:[#allocation308_spill] sm:$0xff] }
 0x303   : > { %v2754_v39 = vmul.f32 %v2498_v62, %v2498_v62  ;;  %vm12057_vm5 = vcmp.lt.s32.totalorder %v12056_v1, %v11548_v3  ;;  %vm1227_vm9 = vcmp.eq.f32.partialorder %v12058_v8, inf  ;;  %v1481_v61 = vsel %vm1225_vm4, 3.4028235e+38, %v12052_v13  ;;  %v12073_v13 = vld [vmem:[#allocation439_spill] sm:$0xff]  ;;  %v12077_v1 = vld [vmem:[#allocation309_spill] sm:$0xff] }
 0x304   : > { %v3525_v6 = vsel %vm12057_vm5, %v2752_v52, 0.0  ;;  %v1990_v36 = vsel %vm1734_vm13, -3.4028235e+38, %v1478_v43  ;;  %v3780_v11 = vadd.f32 %v3779_v51, %v3524_v45  ;;  %vm1736_vm1 = vcmp.eq.f32.partialorder %v1480_v20, -inf }
 0x305   : > { %v2501_v37 = vsub.f32 %v1989_v23, %v2245_v19  ;;  %v2755_v38 = vmul.f32 %v2499_v46, %v2499_v46  ;;  %vm12060_vm0 = vcmp.lt.s32.totalorder %v12059_v17, %v11548_v3  ;;  %vm1228_vm12 = vcmp.eq.f32.partialorder %v12061_v63, inf  ;;  %v2252_v19 = vld [vmem:[%s8058_s23 + $0x6b8] sm:$0xff] }
 0x306   : > { %v3526_v57 = vsel %vm12060_vm0, %v2753_v30, 0.0  ;;  %v1482_v44 = vsel %vm1226_vm14, 3.4028235e+38, %v12055_v28  ;;  %v1991_v2 = vsel %vm1735_vm6, -3.4028235e+38, %v1479_v53  ;;  %v3781_v12 = vadd.f32 %v3780_v11, %v3525_v6  ;;  %v12076_v28 = vld [vmem:[#allocation440_spill] sm:$0xff] }
 0x307   : > { %vm1737_vm11 = vcmp.eq.f32.partialorder %v1481_v61, -inf  ;;  %v2502_v55 = vsub.f32 %v1990_v36, %v2246_v0  ;;  %v2756_v16 = vmul.f32 %v2500_v59, %v2500_v59  ;;  %vm12063_vm10 = vcmp.lt.s32.totalorder %v12062_v27, %v11548_v3  ;;  %v2253_v0 = vld [vmem:[%s8058_s23 + $0x6c0] sm:$0xff]  ;;  %v12080_v17 = vld [vmem:[#allocation310_spill] sm:$0xff] }
 0x308   : > { %v3527_v21 = vsel %vm12063_vm10, %v2754_v39, 0.0  ;;  %vm1229_vm7 = vcmp.eq.f32.partialorder %v12064_v5, inf  ;;  %v1483_v25 = vsel %vm1227_vm9, 3.4028235e+38, %v12058_v8  ;;  %v1992_v35 = vsel %vm1736_vm1, -3.4028235e+38, %v1480_v20 }
 0x309   : > { %v3782_v49 = vadd.f32 %v3781_v12, %v3526_v57  ;;  %vm1738_vm3 = vcmp.eq.f32.partialorder %v1482_v44, -inf  ;;  %v2503_v34 = vsub.f32 %v1991_v2, %v2247_v33  ;;  %v2757_v32 = vmul.f32 %v2501_v37, %v2501_v37  ;;  %v12079_v8 = vld [vmem:[#allocation441_spill] sm:$0xff]  ;;  %v2254_v33 = vld [vmem:[%s8058_s23 + $0x6c8] sm:$0xff]  ;;  %v12083_v27 = vld [vmem:[#allocation311_spill] sm:$0xff] }
 0x30a   : > { %vm12066_vm8 = vcmp.lt.s32.totalorder %v12065_v22, %v11548_v3  ;;  %vm1230_vm2 = vcmp.eq.f32.partialorder %v12067_v18, inf  ;;  %v1484_v54 = vsel %vm1228_vm12, 3.4028235e+38, %v12061_v63  ;;  %v1993_v56 = vsel %vm1737_vm11, -3.4028235e+38, %v1481_v61  ;;  %v12082_v63 = vld [vmem:[#allocation442_spill] sm:$0xff] }
 0x30b   : > { %v3528_v24 = vsel %vm12066_vm8, %v2755_v38, 0.0  ;;  %v3783_v60 = vadd.f32 %v3782_v49, %v3527_v21  ;;  %vm1739_vm4 = vcmp.eq.f32.partialorder %v1483_v25, -inf  ;;  %v2504_v14 = vsub.f32 %v1992_v35, %v2248_v29  ;;  %v2255_v29 = vld [vmem:[%s8058_s23 + $0x6d0] sm:$0xff]  ;;  %v12086_v22 = vld [vmem:[#allocation312_spill] sm:$0xff] }
 0x30c   : > { %v2758_v47 = vmul.f32 %v2502_v55, %v2502_v55  ;;  %vm12069_vm13 = vcmp.lt.s32.totalorder %v12068_v26, %v11548_v3  ;;  %vm1231_vm15 = vcmp.eq.f32.partialorder %v12070_v40, inf  ;;  %v1485_v43 = vsel %vm1229_vm7, 3.4028235e+38, %v12064_v5  ;;  %v12085_v5 = vld [vmem:[#allocation401_spill] sm:$0xff] }
 0x30d   : > { %v3529_v41 = vsel %vm12069_vm13, %v2756_v16, 0.0  ;;  %v1994_v42 = vsel %vm1738_vm3, -3.4028235e+38, %v1482_v44  ;;  %v3784_v31 = vadd.f32 %v3783_v60, %v3528_v24  ;;  %vm1740_vm14 = vcmp.eq.f32.partialorder %v1484_v54, -inf  ;;  %v12089_v26 = vld [vmem:[#allocation313_spill] sm:$0xff] }
 0x30e   : > { %v2505_v62 = vsub.f32 %v1993_v56, %v2249_v10  ;;  %v2759_v52 = vmul.f32 %v2503_v34, %v2503_v34  ;;  %vm12072_vm6 = vcmp.lt.s32.totalorder %v12071_v58, %v11548_v3  ;;  %vm1232_vm5 = vcmp.eq.f32.partialorder %v12073_v13, inf  ;;  %v2256_v10 = vld [vmem:[%s8058_s23 + $0x6d8] sm:$0xff] }
 0x30f   : > { %v3530_v7 = vsel %vm12072_vm6, %v2757_v32, 0.0  ;;  %v1486_v53 = vsel %vm1230_vm2, 3.4028235e+38, %v12067_v18  ;;  %v1995_v4 = vsel %vm1739_vm4, -3.4028235e+38, %v1483_v25  ;;  %v3785_v15 = vadd.f32 %v3784_v31, %v3529_v41  ;;  %v12088_v18 = vld [vmem:[#allocation443_spill] sm:$0xff] }
 0x310   : > { %vm1741_vm9 = vcmp.eq.f32.partialorder %v1485_v43, -inf  ;;  %v2506_v46 = vsub.f32 %v1994_v42, %v2250_v9  ;;  %v2760_v30 = vmul.f32 %v2504_v14, %v2504_v14  ;;  %vm12075_vm1 = vcmp.lt.s32.totalorder %v12074_v48, %v11548_v3  ;;  %v2257_v9 = vld [vmem:[%s8058_s23 + $0x6e0] sm:$0xff]  ;;  %v12092_v58 = vld [vmem:[#allocation314_spill] sm:$0xff] }
 0x311   : > { %v3531_v45 = vsel %vm12075_vm1, %v2758_v47, 0.0  ;;  %vm1233_vm0 = vcmp.eq.f32.partialorder %v12076_v28, inf  ;;  %v1487_v20 = vsel %vm1231_vm15, 3.4028235e+38, %v12070_v40  ;;  %v1996_v23 = vsel %vm1740_vm14, -3.4028235e+38, %v1484_v54 }
 0x312   : > { %v3786_v51 = vadd.f32 %v3785_v15, %v3530_v7  ;;  %vm1742_vm12 = vcmp.eq.f32.partialorder %v1486_v53, -inf  ;;  %v2507_v59 = vsub.f32 %v1995_v4, %v2251_v50  ;;  %v2761_v39 = vmul.f32 %v2505_v62, %v2505_v62  ;;  %v12091_v40 = vld [vmem:[#allocation444_spill] sm:$0xff]  ;;  %v12095_v48 = vld [vmem:[#allocation315_spill] sm:$0xff] }
 0x313   : > { %vm12078_vm11 = vcmp.lt.s32.totalorder %v12077_v1, %v11548_v3  ;;  %vm1234_vm10 = vcmp.eq.f32.partialorder %v12079_v8, inf  ;;  %v1488_v61 = vsel %vm1232_vm5, 3.4028235e+38, %v12073_v13  ;;  %v1997_v36 = vsel %vm1741_vm9, -3.4028235e+38, %v1485_v43  ;;  %v12094_v13 = vld [vmem:[#allocation445_spill] sm:$0xff] }
 0x314   : > { %v3532_v6 = vsel %vm12078_vm11, %v2759_v52, 0.0  ;;  %v3787_v11 = vadd.f32 %v3786_v51, %v3531_v45  ;;  %vm1743_vm7 = vcmp.eq.f32.partialorder %v1487_v20, -inf  ;;  %v2508_v37 = vsub.f32 %v1996_v23, %v2252_v19  ;;  %v2258_v50 = vld [vmem:[%s8058_s23 + $0x6e8] sm:$0xff]  ;;  %v2259_v19 = vld [vmem:[%s8058_s23 + $0x6f0] sm:$0xff] }
 0x315   : > { %v2762_v38 = vmul.f32 %v2506_v46, %v2506_v46  ;;  %vm12081_vm3 = vcmp.lt.s32.totalorder %v12080_v17, %v11548_v3  ;;  %vm1235_vm8 = vcmp.eq.f32.partialorder %v12082_v63, inf  ;;  %v1489_v44 = vsel %vm1233_vm0, 3.4028235e+38, %v12076_v28  ;;  %v12097_v28 = vld [vmem:[#allocation446_spill] sm:$0xff]  ;;  %v12098_v1 = vld [vmem:[#allocation316_spill] sm:$0xff]  ;;  %v12101_v17 = vld [vmem:[#allocation317_spill] sm:$0xff] }
 0x316   : > { %v3533_v57 = vsel %vm12081_vm3, %v2760_v30, 0.0  ;;  %v1998_v2 = vsel %vm1742_vm12, -3.4028235e+38, %v1486_v53  ;;  %v3788_v12 = vadd.f32 %v3787_v11, %v3532_v6  ;;  %vm1744_vm2 = vcmp.eq.f32.partialorder %v1488_v61, -inf }
 0x317   : > { %v2509_v55 = vsub.f32 %v1997_v36, %v2253_v0  ;;  %v2763_v16 = vmul.f32 %v2507_v59, %v2507_v59  ;;  %vm12084_vm4 = vcmp.lt.s32.totalorder %v12083_v27, %v11548_v3  ;;  %vm1236_vm13 = vcmp.eq.f32.partialorder %v12085_v5, inf  ;;  %v2260_v0 = vld [vmem:[%s8058_s23 + $0x6f8] sm:$0xff] }
 0x318   : > { %v3534_v21 = vsel %vm12084_vm4, %v2761_v39, 0.0  ;;  %v1490_v25 = vsel %vm1234_vm10, 3.4028235e+38, %v12079_v8  ;;  %v1999_v35 = vsel %vm1743_vm7, -3.4028235e+38, %v1487_v20  ;;  %v3789_v49 = vadd.f32 %v3788_v12, %v3533_v57  ;;  %v12100_v8 = vld [vmem:[#allocation447_spill] sm:$0xff] }
 0x319   : > { %vm1745_vm15 = vcmp.eq.f32.partialorder %v1489_v44, -inf  ;;  %v2510_v34 = vsub.f32 %v1998_v2, %v2254_v33  ;;  %v2764_v32 = vmul.f32 %v2508_v37, %v2508_v37  ;;  %vm12087_vm14 = vcmp.lt.s32.totalorder %v12086_v22, %v11548_v3  ;;  %v2261_v33 = vld [vmem:[%s8058_s23 + $0x700] sm:$0xff]  ;;  %v12104_v27 = vld [vmem:[#allocation318_spill] sm:$0xff] }
 0x31a   : > { %v3535_v24 = vsel %vm12087_vm14, %v2762_v38, 0.0  ;;  %vm1237_vm6 = vcmp.eq.f32.partialorder %v12088_v18, inf  ;;  %v1491_v54 = vsel %vm1235_vm8, 3.4028235e+38, %v12082_v63  ;;  %v2000_v56 = vsel %vm1744_vm2, -3.4028235e+38, %v1488_v61 }
 0x31b   : > { %v3790_v60 = vadd.f32 %v3789_v49, %v3534_v21  ;;  %vm1746_vm5 = vcmp.eq.f32.partialorder %v1490_v25, -inf  ;;  %v2511_v14 = vsub.f32 %v1999_v35, %v2255_v29  ;;  %v2765_v47 = vmul.f32 %v2509_v55, %v2509_v55  ;;  %v12103_v63 = vld [vmem:[#allocation448_spill] sm:$0xff]  ;;  %v12107_v22 = vld [vmem:[#allocation319_spill] sm:$0xff] }
 0x31c   : > { %vm12090_vm9 = vcmp.lt.s32.totalorder %v12089_v26, %v11548_v3  ;;  %vm1238_vm1 = vcmp.eq.f32.partialorder %v12091_v40, inf  ;;  %v1492_v43 = vsel %vm1236_vm13, 3.4028235e+38, %v12085_v5  ;;  %v2001_v42 = vsel %vm1745_vm15, -3.4028235e+38, %v1489_v44  ;;  %v12106_v5 = vld [vmem:[#allocation449_spill] sm:$0xff] }
 0x31d   : > { %v3536_v41 = vsel %vm12090_vm9, %v2763_v16, 0.0  ;;  %v3791_v31 = vadd.f32 %v3790_v60, %v3535_v24  ;;  %vm1747_vm0 = vcmp.eq.f32.partialorder %v1491_v54, -inf  ;;  %v2512_v62 = vsub.f32 %v2000_v56, %v2256_v10  ;;  %v2262_v29 = vld [vmem:[%s8058_s23 + $0x708] sm:$0xff]  ;;  %v2263_v10 = vld [vmem:[%s8058_s23 + $0x710] sm:$0xff] }
 0x31e   : > { %v2766_v52 = vmul.f32 %v2510_v34, %v2510_v34  ;;  %vm12093_vm12 = vcmp.lt.s32.totalorder %v12092_v58, %v11548_v3  ;;  %vm1239_vm11 = vcmp.eq.f32.partialorder %v12094_v13, inf  ;;  %v1493_v53 = vsel %vm1237_vm6, 3.4028235e+38, %v12088_v18  ;;  %v12109_v18 = vld [vmem:[#allocation450_spill] sm:$0xff]  ;;  %v12110_v26 = vld [vmem:[#allocation320_spill] sm:$0xff]  ;;  %v12113_v58 = vld [vmem:[#allocation321_spill] sm:$0xff] }
 0x31f   : > { %v3537_v7 = vsel %vm12093_vm12, %v2764_v32, 0.0  ;;  %v2002_v4 = vsel %vm1746_vm5, -3.4028235e+38, %v1490_v25  ;;  %v3792_v15 = vadd.f32 %v3791_v31, %v3536_v41  ;;  %vm1748_vm10 = vcmp.eq.f32.partialorder %v1492_v43, -inf }
 0x320   : > { %v2513_v46 = vsub.f32 %v2001_v42, %v2257_v9  ;;  %v2767_v30 = vmul.f32 %v2511_v14, %v2511_v14  ;;  %vm12096_vm7 = vcmp.lt.s32.totalorder %v12095_v48, %v11548_v3  ;;  %vm1240_vm3 = vcmp.eq.f32.partialorder %v12097_v28, inf  ;;  %v2264_v9 = vld [vmem:[%s8058_s23 + $0x718] sm:$0xff] }
 0x321   : > { %v3538_v45 = vsel %vm12096_vm7, %v2765_v47, 0.0  ;;  %v1494_v20 = vsel %vm1238_vm1, 3.4028235e+38, %v12091_v40  ;;  %v2003_v23 = vsel %vm1747_vm0, -3.4028235e+38, %v1491_v54  ;;  %v3793_v51 = vadd.f32 %v3792_v15, %v3537_v7  ;;  %v12112_v40 = vld [vmem:[#allocation451_spill] sm:$0xff] }
 0x322   : > { %vm1749_vm8 = vcmp.eq.f32.partialorder %v1493_v53, -inf  ;;  %v2514_v59 = vsub.f32 %v2002_v4, %v2258_v50  ;;  %v2768_v39 = vmul.f32 %v2512_v62, %v2512_v62  ;;  %vm12099_vm2 = vcmp.lt.s32.totalorder %v12098_v1, %v11548_v3  ;;  %v2265_v50 = vld [vmem:[%s8058_s23 + $0x720] sm:$0xff]  ;;  %v12116_v48 = vld [vmem:[#allocation322_spill] sm:$0xff] }
 0x323   : > { %v3539_v6 = vsel %vm12099_vm2, %v2766_v52, 0.0  ;;  %vm1241_vm4 = vcmp.eq.f32.partialorder %v12100_v8, inf  ;;  %v1495_v61 = vsel %vm1239_vm11, 3.4028235e+38, %v12094_v13  ;;  %v2004_v36 = vsel %vm1748_vm10, -3.4028235e+38, %v1492_v43 }
 0x324   : > { %v3794_v11 = vadd.f32 %v3793_v51, %v3538_v45  ;;  %vm1750_vm13 = vcmp.eq.f32.partialorder %v1494_v20, -inf  ;;  %v2515_v37 = vsub.f32 %v2003_v23, %v2259_v19  ;;  %v2769_v38 = vmul.f32 %v2513_v46, %v2513_v46  ;;  %v12115_v13 = vld [vmem:[#allocation452_spill] sm:$0xff]  ;;  %v12119_v1 = vld [vmem:[#allocation323_spill] sm:$0xff] }
 0x325   : > { %vm12102_vm15 = vcmp.lt.s32.totalorder %v12101_v17, %v11548_v3  ;;  %vm1242_vm14 = vcmp.eq.f32.partialorder %v12103_v63, inf  ;;  %v1496_v44 = vsel %vm1240_vm3, 3.4028235e+38, %v12097_v28  ;;  %v2005_v2 = vsel %vm1749_vm8, -3.4028235e+38, %v1493_v53  ;;  %v12118_v28 = vld [vmem:[#allocation453_spill] sm:$0xff] }
 0x326   : > { %v3540_v57 = vsel %vm12102_vm15, %v2767_v30, 0.0  ;;  %v3795_v12 = vadd.f32 %v3794_v11, %v3539_v6  ;;  %vm1751_vm6 = vcmp.eq.f32.partialorder %v1495_v61, -inf  ;;  %v2516_v55 = vsub.f32 %v2004_v36, %v2260_v0  ;;  %v2266_v19 = vld [vmem:[%s8058_s23 + $0x728] sm:$0xff]  ;;  %v2267_v0 = vld [vmem:[%s8058_s23 + $0x730] sm:$0xff] }
 0x327   : > { %v2770_v16 = vmul.f32 %v2514_v59, %v2514_v59  ;;  %vm12105_vm5 = vcmp.lt.s32.totalorder %v12104_v27, %v11548_v3  ;;  %vm1243_vm9 = vcmp.eq.f32.partialorder %v12106_v5, inf  ;;  %v1497_v25 = vsel %vm1241_vm4, 3.4028235e+38, %v12100_v8  ;;  %v12121_v8 = vld [vmem:[#allocation454_spill] sm:$0xff]  ;;  %v12122_v17 = vld [vmem:[#allocation324_spill] sm:$0xff]  ;;  %v12125_v27 = vld [vmem:[#allocation325_spill] sm:$0xff] }
 0x328   : > { %v3541_v21 = vsel %vm12105_vm5, %v2768_v39, 0.0  ;;  %v2006_v35 = vsel %vm1750_vm13, -3.4028235e+38, %v1494_v20  ;;  %v3796_v49 = vadd.f32 %v3795_v12, %v3540_v57  ;;  %vm1752_vm1 = vcmp.eq.f32.partialorder %v1496_v44, -inf }
 0x329   : > { %v2517_v34 = vsub.f32 %v2005_v2, %v2261_v33  ;;  %v2771_v32 = vmul.f32 %v2515_v37, %v2515_v37  ;;  %vm12108_vm0 = vcmp.lt.s32.totalorder %v12107_v22, %v11548_v3  ;;  %vm1244_vm12 = vcmp.eq.f32.partialorder %v12109_v18, inf  ;;  %v2268_v33 = vld [vmem:[%s8058_s23 + $0x738] sm:$0xff] }
 0x32a   : > { %v3542_v24 = vsel %vm12108_vm0, %v2769_v38, 0.0  ;;  %v1498_v54 = vsel %vm1242_vm14, 3.4028235e+38, %v12103_v63  ;;  %v2007_v56 = vsel %vm1751_vm6, -3.4028235e+38, %v1495_v61  ;;  %v3797_v60 = vadd.f32 %v3796_v49, %v3541_v21  ;;  %v12124_v63 = vld [vmem:[#allocation455_spill] sm:$0xff] }
 0x32b   : > { %vm1753_vm11 = vcmp.eq.f32.partialorder %v1497_v25, -inf  ;;  %v2518_v14 = vsub.f32 %v2006_v35, %v2262_v29  ;;  %v2772_v47 = vmul.f32 %v2516_v55, %v2516_v55  ;;  %vm12111_vm10 = vcmp.lt.s32.totalorder %v12110_v26, %v11548_v3  ;;  %v2269_v29 = vld [vmem:[%s8058_s23 + $0x740] sm:$0xff]  ;;  %v12128_v22 = vld [vmem:[#allocation326_spill] sm:$0xff] }
 0x32c   : > { %v3543_v41 = vsel %vm12111_vm10, %v2770_v16, 0.0  ;;  %vm1245_vm7 = vcmp.eq.f32.partialorder %v12112_v40, inf  ;;  %v1499_v43 = vsel %vm1243_vm9, 3.4028235e+38, %v12106_v5  ;;  %v2008_v42 = vsel %vm1752_vm1, -3.4028235e+38, %v1496_v44 }
 0x32d   : > { %v3798_v31 = vadd.f32 %v3797_v60, %v3542_v24  ;;  %vm1754_vm3 = vcmp.eq.f32.partialorder %v1498_v54, -inf  ;;  %v2519_v62 = vsub.f32 %v2007_v56, %v2263_v10  ;;  %v2773_v52 = vmul.f32 %v2517_v34, %v2517_v34  ;;  %v12127_v5 = vld [vmem:[#allocation456_spill] sm:$0xff]  ;;  %v12131_v26 = vld [vmem:[#allocation327_spill] sm:$0xff] }
 0x32e   : > { %vm12114_vm8 = vcmp.lt.s32.totalorder %v12113_v58, %v11548_v3  ;;  %vm1246_vm2 = vcmp.eq.f32.partialorder %v12115_v13, inf  ;;  %v1500_v53 = vsel %vm1244_vm12, 3.4028235e+38, %v12109_v18  ;;  %v2009_v4 = vsel %vm1753_vm11, -3.4028235e+38, %v1497_v25  ;;  %v12130_v18 = vld [vmem:[#allocation457_spill] sm:$0xff] }
 0x32f   : > { %v3544_v7 = vsel %vm12114_vm8, %v2771_v32, 0.0  ;;  %v3799_v15 = vadd.f32 %v3798_v31, %v3543_v41  ;;  %vm1755_vm4 = vcmp.eq.f32.partialorder %v1499_v43, -inf  ;;  %v2520_v46 = vsub.f32 %v2008_v42, %v2264_v9  ;;  %v2270_v10 = vld [vmem:[%s8058_s23 + $0x748] sm:$0xff]  ;;  %v2271_v9 = vld [vmem:[%s8058_s23 + $0x750] sm:$0xff] }
 0x330   : > { %v2774_v30 = vmul.f32 %v2518_v14, %v2518_v14  ;;  %vm12117_vm13 = vcmp.lt.s32.totalorder %v12116_v48, %v11548_v3  ;;  %vm1247_vm15 = vcmp.eq.f32.partialorder %v12118_v28, inf  ;;  %v1501_v20 = vsel %vm1245_vm7, 3.4028235e+38, %v12112_v40  ;;  %v12133_v40 = vld [vmem:[#allocation458_spill] sm:$0xff]  ;;  %v12134_v58 = vld [vmem:[#allocation328_spill] sm:$0xff]  ;;  %v12137_v48 = vld [vmem:[#allocation329_spill] sm:$0xff] }
 0x331   : > { %v3545_v45 = vsel %vm12117_vm13, %v2772_v47, 0.0  ;;  %v2010_v23 = vsel %vm1754_vm3, -3.4028235e+38, %v1498_v54  ;;  %v3800_v51 = vadd.f32 %v3799_v15, %v3544_v7  ;;  %vm1756_vm14 = vcmp.eq.f32.partialorder %v1500_v53, -inf }
 0x332   : > { %v2521_v59 = vsub.f32 %v2009_v4, %v2265_v50  ;;  %v2775_v39 = vmul.f32 %v2519_v62, %v2519_v62  ;;  %vm12120_vm6 = vcmp.lt.s32.totalorder %v12119_v1, %v11548_v3  ;;  %vm1248_vm5 = vcmp.eq.f32.partialorder %v12121_v8, inf  ;;  %v2272_v50 = vld [vmem:[%s8058_s23 + $0x758] sm:$0xff] }
 0x333   : > { %v3546_v6 = vsel %vm12120_vm6, %v2773_v52, 0.0  ;;  %v1502_v61 = vsel %vm1246_vm2, 3.4028235e+38, %v12115_v13  ;;  %v2011_v36 = vsel %vm1755_vm4, -3.4028235e+38, %v1499_v43  ;;  %v3801_v11 = vadd.f32 %v3800_v51, %v3545_v45  ;;  %v12136_v13 = vld [vmem:[#allocation459_spill] sm:$0xff] }
 0x334   : > { %vm1757_vm9 = vcmp.eq.f32.partialorder %v1501_v20, -inf  ;;  %v2522_v37 = vsub.f32 %v2010_v23, %v2266_v19  ;;  %v2776_v38 = vmul.f32 %v2520_v46, %v2520_v46  ;;  %vm12123_vm1 = vcmp.lt.s32.totalorder %v12122_v17, %v11548_v3  ;;  %v2273_v19 = vld [vmem:[%s8058_s23 + $0x760] sm:$0xff]  ;;  %v12140_v1 = vld [vmem:[#allocation330_spill] sm:$0xff] }
 0x335   : > { %v3547_v57 = vsel %vm12123_vm1, %v2774_v30, 0.0  ;;  %vm1249_vm0 = vcmp.eq.f32.partialorder %v12124_v63, inf  ;;  %v1503_v44 = vsel %vm1247_vm15, 3.4028235e+38, %v12118_v28  ;;  %v2012_v2 = vsel %vm1756_vm14, -3.4028235e+38, %v1500_v53 }
 0x336   : > { %v3802_v12 = vadd.f32 %v3801_v11, %v3546_v6  ;;  %vm1758_vm12 = vcmp.eq.f32.partialorder %v1502_v61, -inf  ;;  %v2523_v55 = vsub.f32 %v2011_v36, %v2267_v0  ;;  %v2777_v16 = vmul.f32 %v2521_v59, %v2521_v59  ;;  %v12139_v28 = vld [vmem:[#allocation460_spill] sm:$0xff]  ;;  %v12143_v17 = vld [vmem:[#allocation331_spill] sm:$0xff] }
 0x337   : > { %vm12126_vm11 = vcmp.lt.s32.totalorder %v12125_v27, %v11548_v3  ;;  %vm1250_vm10 = vcmp.eq.f32.partialorder %v12127_v5, inf  ;;  %v1504_v25 = vsel %vm1248_vm5, 3.4028235e+38, %v12121_v8  ;;  %v2013_v35 = vsel %vm1757_vm9, -3.4028235e+38, %v1501_v20  ;;  %v12142_v8 = vld [vmem:[#allocation461_spill] sm:$0xff] }
 0x338   : > { %v3548_v21 = vsel %vm12126_vm11, %v2775_v39, 0.0  ;;  %v3803_v49 = vadd.f32 %v3802_v12, %v3547_v57  ;;  %vm1759_vm7 = vcmp.eq.f32.partialorder %v1503_v44, -inf  ;;  %v2524_v34 = vsub.f32 %v2012_v2, %v2268_v33  ;;  %v2274_v0 = vld [vmem:[%s8058_s23 + $0x768] sm:$0xff]  ;;  %v2275_v33 = vld [vmem:[%s8058_s23 + $0x770] sm:$0xff] }
 0x339   : > { %v2778_v32 = vmul.f32 %v2522_v37, %v2522_v37  ;;  %vm12129_vm3 = vcmp.lt.s32.totalorder %v12128_v22, %v11548_v3  ;;  %vm1251_vm8 = vcmp.eq.f32.partialorder %v12130_v18, inf  ;;  %v1505_v54 = vsel %vm1249_vm0, 3.4028235e+38, %v12124_v63  ;;  %v12145_v63 = vld [vmem:[#allocation462_spill] sm:$0xff]  ;;  %v12146_v27 = vld [vmem:[#allocation332_spill] sm:$0xff]  ;;  %v12149_v22 = vld [vmem:[#allocation333_spill] sm:$0xff] }
 0x33a   : > { %v3549_v24 = vsel %vm12129_vm3, %v2776_v38, 0.0  ;;  %v2014_v56 = vsel %vm1758_vm12, -3.4028235e+38, %v1502_v61  ;;  %v3804_v60 = vadd.f32 %v3803_v49, %v3548_v21  ;;  %vm1760_vm2 = vcmp.eq.f32.partialorder %v1504_v25, -inf }
 0x33b   : > { %v2525_v14 = vsub.f32 %v2013_v35, %v2269_v29  ;;  %v2779_v47 = vmul.f32 %v2523_v55, %v2523_v55  ;;  %vm12132_vm4 = vcmp.lt.s32.totalorder %v12131_v26, %v11548_v3  ;;  %vm1252_vm13 = vcmp.eq.f32.partialorder %v12133_v40, inf  ;;  %v2276_v29 = vld [vmem:[%s8058_s23 + $0x778] sm:$0xff] }
 0x33c   : > { %v3550_v41 = vsel %vm12132_vm4, %v2777_v16, 0.0  ;;  %v1506_v43 = vsel %vm1250_vm10, 3.4028235e+38, %v12127_v5  ;;  %v2015_v42 = vsel %vm1759_vm7, -3.4028235e+38, %v1503_v44  ;;  %v3805_v31 = vadd.f32 %v3804_v60, %v3549_v24  ;;  %v12148_v5 = vld [vmem:[#allocation463_spill] sm:$0xff] }
 0x33d   : > { %vm1761_vm15 = vcmp.eq.f32.partialorder %v1505_v54, -inf  ;;  %v2526_v62 = vsub.f32 %v2014_v56, %v2270_v10  ;;  %v2780_v52 = vmul.f32 %v2524_v34, %v2524_v34  ;;  %vm12135_vm14 = vcmp.lt.s32.totalorder %v12134_v58, %v11548_v3  ;;  %v2277_v10 = vld [vmem:[%s8058_s23 + $0x780] sm:$0xff]  ;;  %v12152_v26 = vld [vmem:[#allocation334_spill] sm:$0xff] }
 0x33e   : > { %v3551_v7 = vsel %vm12135_vm14, %v2778_v32, 0.0  ;;  %vm1253_vm6 = vcmp.eq.f32.partialorder %v12136_v13, inf  ;;  %v1507_v53 = vsel %vm1251_vm8, 3.4028235e+38, %v12130_v18  ;;  %v2016_v4 = vsel %vm1760_vm2, -3.4028235e+38, %v1504_v25 }
 0x33f   : > { %v3806_v15 = vadd.f32 %v3805_v31, %v3550_v41  ;;  %vm1762_vm5 = vcmp.eq.f32.partialorder %v1506_v43, -inf  ;;  %v2527_v46 = vsub.f32 %v2015_v42, %v2271_v9  ;;  %v2781_v30 = vmul.f32 %v2525_v14, %v2525_v14  ;;  %v12151_v18 = vld [vmem:[#allocation464_spill] sm:$0xff]  ;;  %v12155_v58 = vld [vmem:[#allocation335_spill] sm:$0xff] }
 0x340   : > { %vm12138_vm9 = vcmp.lt.s32.totalorder %v12137_v48, %v11548_v3  ;;  %vm1254_vm1 = vcmp.eq.f32.partialorder %v12139_v28, inf  ;;  %v1508_v20 = vsel %vm1252_vm13, 3.4028235e+38, %v12133_v40  ;;  %v2017_v23 = vsel %vm1761_vm15, -3.4028235e+38, %v1505_v54  ;;  %v12154_v40 = vld [vmem:[#allocation465_spill] sm:$0xff] }
 0x341   : > { %v3552_v45 = vsel %vm12138_vm9, %v2779_v47, 0.0  ;;  %v3807_v51 = vadd.f32 %v3806_v15, %v3551_v7  ;;  %vm1763_vm0 = vcmp.eq.f32.partialorder %v1507_v53, -inf  ;;  %v2528_v59 = vsub.f32 %v2016_v4, %v2272_v50  ;;  %v2278_v9 = vld [vmem:[%s8058_s23 + $0x788] sm:$0xff]  ;;  %v2279_v50 = vld [vmem:[%s8058_s23 + $0x790] sm:$0xff] }
 0x342   : > { %v2782_v39 = vmul.f32 %v2526_v62, %v2526_v62  ;;  %vm12141_vm12 = vcmp.lt.s32.totalorder %v12140_v1, %v11548_v3  ;;  %vm1255_vm11 = vcmp.eq.f32.partialorder %v12142_v8, inf  ;;  %v1509_v61 = vsel %vm1253_vm6, 3.4028235e+38, %v12136_v13  ;;  %v12157_v13 = vld [vmem:[#allocation466_spill] sm:$0xff]  ;;  %v12158_v48 = vld [vmem:[#allocation336_spill] sm:$0xff]  ;;  %v12161_v1 = vld [vmem:[#allocation337_spill] sm:$0xff] }
 0x343   : > { %v3553_v6 = vsel %vm12141_vm12, %v2780_v52, 0.0  ;;  %v2018_v36 = vsel %vm1762_vm5, -3.4028235e+38, %v1506_v43  ;;  %v3808_v11 = vadd.f32 %v3807_v51, %v3552_v45  ;;  %vm1764_vm10 = vcmp.eq.f32.partialorder %v1508_v20, -inf }
 0x344   : > { %v2529_v37 = vsub.f32 %v2017_v23, %v2273_v19  ;;  %v2783_v38 = vmul.f32 %v2527_v46, %v2527_v46  ;;  %vm12144_vm7 = vcmp.lt.s32.totalorder %v12143_v17, %v11548_v3  ;;  %vm1256_vm3 = vcmp.eq.f32.partialorder %v12145_v63, inf  ;;  %v2280_v19 = vld [vmem:[%s8058_s23 + $0x798] sm:$0xff] }
 0x345   : > { %v3554_v57 = vsel %vm12144_vm7, %v2781_v30, 0.0  ;;  %v1510_v44 = vsel %vm1254_vm1, 3.4028235e+38, %v12139_v28  ;;  %v2019_v2 = vsel %vm1763_vm0, -3.4028235e+38, %v1507_v53  ;;  %v3809_v12 = vadd.f32 %v3808_v11, %v3553_v6  ;;  %v12160_v28 = vld [vmem:[#allocation467_spill] sm:$0xff] }
 0x346   : > { %vm1765_vm8 = vcmp.eq.f32.partialorder %v1509_v61, -inf  ;;  %v2530_v55 = vsub.f32 %v2018_v36, %v2274_v0  ;;  %v2784_v16 = vmul.f32 %v2528_v59, %v2528_v59  ;;  %vm12147_vm2 = vcmp.lt.s32.totalorder %v12146_v27, %v11548_v3  ;;  %v2281_v0 = vld [vmem:[%s8058_s23 + $0x7a0] sm:$0xff]  ;;  %v12164_v17 = vld [vmem:[#allocation338_spill] sm:$0xff] }
 0x347   : > { %v3555_v21 = vsel %vm12147_vm2, %v2782_v39, 0.0  ;;  %vm1257_vm4 = vcmp.eq.f32.partialorder %v12148_v5, inf  ;;  %v1511_v25 = vsel %vm1255_vm11, 3.4028235e+38, %v12142_v8  ;;  %v2020_v35 = vsel %vm1764_vm10, -3.4028235e+38, %v1508_v20 }
 0x348   : > { %v3810_v49 = vadd.f32 %v3809_v12, %v3554_v57  ;;  %vm1766_vm13 = vcmp.eq.f32.partialorder %v1510_v44, -inf  ;;  %v2531_v34 = vsub.f32 %v2019_v2, %v2275_v33  ;;  %v2785_v32 = vmul.f32 %v2529_v37, %v2529_v37  ;;  %v12163_v8 = vld [vmem:[#allocation468_spill] sm:$0xff]  ;;  %v12167_v27 = vld [vmem:[#allocation339_spill] sm:$0xff] }
 0x349   : > { %vm12150_vm15 = vcmp.lt.s32.totalorder %v12149_v22, %v11548_v3  ;;  %vm1258_vm14 = vcmp.eq.f32.partialorder %v12151_v18, inf  ;;  %v1512_v54 = vsel %vm1256_vm3, 3.4028235e+38, %v12145_v63  ;;  %v2021_v56 = vsel %vm1765_vm8, -3.4028235e+38, %v1509_v61  ;;  %v12166_v63 = vld [vmem:[#allocation469_spill] sm:$0xff] }
 0x34a   : > { %v3556_v24 = vsel %vm12150_vm15, %v2783_v38, 0.0  ;;  %v3811_v60 = vadd.f32 %v3810_v49, %v3555_v21  ;;  %vm1767_vm6 = vcmp.eq.f32.partialorder %v1511_v25, -inf  ;;  %v2532_v14 = vsub.f32 %v2020_v35, %v2276_v29  ;;  %v2282_v33 = vld [vmem:[%s8058_s23 + $0x7a8] sm:$0xff]  ;;  %v2283_v29 = vld [vmem:[%s8058_s23 + $0x7b0] sm:$0xff] }
 0x34b   : > { %v2786_v47 = vmul.f32 %v2530_v55, %v2530_v55  ;;  %vm12153_vm5 = vcmp.lt.s32.totalorder %v12152_v26, %v11548_v3  ;;  %vm1259_vm9 = vcmp.eq.f32.partialorder %v12154_v40, inf  ;;  %v1513_v43 = vsel %vm1257_vm4, 3.4028235e+38, %v12148_v5  ;;  %v12169_v5 = vld [vmem:[#allocation470_spill] sm:$0xff]  ;;  %v12170_v22 = vld [vmem:[#allocation340_spill] sm:$0xff]  ;;  %v12173_v26 = vld [vmem:[#allocation341_spill] sm:$0xff] }
 0x34c   : > { %v3557_v41 = vsel %vm12153_vm5, %v2784_v16, 0.0  ;;  %v2022_v42 = vsel %vm1766_vm13, -3.4028235e+38, %v1510_v44  ;;  %v3812_v31 = vadd.f32 %v3811_v60, %v3556_v24  ;;  %vm1768_vm1 = vcmp.eq.f32.partialorder %v1512_v54, -inf }
 0x34d   : > { %v2533_v62 = vsub.f32 %v2021_v56, %v2277_v10  ;;  %v2787_v52 = vmul.f32 %v2531_v34, %v2531_v34  ;;  %vm12156_vm0 = vcmp.lt.s32.totalorder %v12155_v58, %v11548_v3  ;;  %vm1260_vm12 = vcmp.eq.f32.partialorder %v12157_v13, inf  ;;  %v2284_v10 = vld [vmem:[%s8058_s23 + $0x7b8] sm:$0xff] }
 0x34e   : > { %v3558_v7 = vsel %vm12156_vm0, %v2785_v32, 0.0  ;;  %v1514_v53 = vsel %vm1258_vm14, 3.4028235e+38, %v12151_v18  ;;  %v2023_v4 = vsel %vm1767_vm6, -3.4028235e+38, %v1511_v25  ;;  %v3813_v15 = vadd.f32 %v3812_v31, %v3557_v41  ;;  %v12172_v18 = vld [vmem:[#allocation471_spill] sm:$0xff] }
 0x34f   : > { %vm1769_vm11 = vcmp.eq.f32.partialorder %v1513_v43, -inf  ;;  %v2534_v46 = vsub.f32 %v2022_v42, %v2278_v9  ;;  %v2788_v30 = vmul.f32 %v2532_v14, %v2532_v14  ;;  %vm12159_vm10 = vcmp.lt.s32.totalorder %v12158_v48, %v11548_v3  ;;  %v2285_v9 = vld [vmem:[%s8058_s23 + $0x7c0] sm:$0xff]  ;;  %v12176_v58 = vld [vmem:[#allocation342_spill] sm:$0xff] }
 0x350   : > { %v3559_v45 = vsel %vm12159_vm10, %v2786_v47, 0.0  ;;  %vm1261_vm7 = vcmp.eq.f32.partialorder %v12160_v28, inf  ;;  %v1515_v20 = vsel %vm1259_vm9, 3.4028235e+38, %v12154_v40  ;;  %v2024_v23 = vsel %vm1768_vm1, -3.4028235e+38, %v1512_v54 }
 0x351   : > { %v3814_v51 = vadd.f32 %v3813_v15, %v3558_v7  ;;  %vm1770_vm3 = vcmp.eq.f32.partialorder %v1514_v53, -inf  ;;  %v2535_v59 = vsub.f32 %v2023_v4, %v2279_v50  ;;  %v2789_v39 = vmul.f32 %v2533_v62, %v2533_v62  ;;  %v12175_v40 = vld [vmem:[#allocation472_spill] sm:$0xff]  ;;  %v12179_v48 = vld [vmem:[#allocation343_spill] sm:$0xff] }
 0x352   : > { %vm12162_vm8 = vcmp.lt.s32.totalorder %v12161_v1, %v11548_v3  ;;  %vm1262_vm2 = vcmp.eq.f32.partialorder %v12163_v8, inf  ;;  %v1516_v61 = vsel %vm1260_vm12, 3.4028235e+38, %v12157_v13  ;;  %v2025_v36 = vsel %vm1769_vm11, -3.4028235e+38, %v1513_v43  ;;  %v12178_v13 = vld [vmem:[#allocation473_spill] sm:$0xff] }
 0x353   : > { %v3560_v6 = vsel %vm12162_vm8, %v2787_v52, 0.0  ;;  %v3815_v11 = vadd.f32 %v3814_v51, %v3559_v45  ;;  %vm1771_vm4 = vcmp.eq.f32.partialorder %v1515_v20, -inf  ;;  %v2536_v37 = vsub.f32 %v2024_v23, %v2280_v19  ;;  %v2286_v50 = vld [vmem:[%s8058_s23 + $0x7c8] sm:$0xff]  ;;  %v2287_v19 = vld [vmem:[%s8058_s23 + $0x7d0] sm:$0xff] }
 0x354   : > { %v2790_v38 = vmul.f32 %v2534_v46, %v2534_v46  ;;  %vm12165_vm13 = vcmp.lt.s32.totalorder %v12164_v17, %v11548_v3  ;;  %vm1263_vm15 = vcmp.eq.f32.partialorder %v12166_v63, inf  ;;  %v1517_v44 = vsel %vm1261_vm7, 3.4028235e+38, %v12160_v28  ;;  %v12181_v28 = vld [vmem:[#allocation474_spill] sm:$0xff]  ;;  %v12182_v1 = vld [vmem:[#allocation344_spill] sm:$0xff] }
 0x355   : > { %v3561_v57 = vsel %vm12165_vm13, %v2788_v30, 0.0  ;;  %v2026_v2 = vsel %vm1770_vm3, -3.4028235e+38, %v1514_v53  ;;  %v3816_v12 = vadd.f32 %v3815_v11, %v3560_v6  ;;  %vm1772_vm14 = vcmp.eq.f32.partialorder %v1516_v61, -inf }
 0x356   : > { %v2537_v55 = vsub.f32 %v2025_v36, %v2281_v0  ;;  %v2791_v16 = vmul.f32 %v2535_v59, %v2535_v59  ;;  %vm12168_vm6 = vcmp.lt.s32.totalorder %v12167_v27, %v11548_v3  ;;  %vm1264_vm5 = vcmp.eq.f32.partialorder %v12169_v5, inf  ;;  %v2288_v36 = vld [vmem:[%s8058_s23 + $0x7d8] sm:$0xff] }
 0x357   : > { %v3562_v21 = vsel %vm12168_vm6, %v2789_v39, 0.0  ;;  %v1518_v25 = vsel %vm1262_vm2, 3.4028235e+38, %v12163_v8  ;;  %v2027_v35 = vsel %vm1771_vm4, -3.4028235e+38, %v1515_v20  ;;  %v3817_v49 = vadd.f32 %v3816_v12, %v3561_v57 }
 0x358   : > { %vm1773_vm9 = vcmp.eq.f32.partialorder %v1517_v44, -inf  ;;  %v2538_v34 = vsub.f32 %v2026_v2, %v2282_v33  ;;  %v2792_v32 = vmul.f32 %v2536_v37, %v2536_v37  ;;  %vm12171_vm1 = vcmp.lt.s32.totalorder %v12170_v22, %v11548_v3 }
 0x359   : > { %v3563_v24 = vsel %vm12171_vm1, %v2790_v38, 0.0  ;;  %vm1265_vm0 = vcmp.eq.f32.partialorder %v12172_v18, inf  ;;  %v1519_v54 = vsel %vm1263_vm15, 3.4028235e+38, %v12166_v63  ;;  %v2028_v56 = vsel %vm1772_vm14, -3.4028235e+38, %v1516_v61 }
 0x35a   : > { %v3818_v60 = vadd.f32 %v3817_v49, %v3562_v21  ;;  %vm1774_vm12 = vcmp.eq.f32.partialorder %v1518_v25, -inf  ;;  %v2539_v14 = vsub.f32 %v2027_v35, %v2283_v29  ;;  %v2793_v47 = vmul.f32 %v2537_v55, %v2537_v55  ;;  %v12184_v38 = vld [vmem:[#allocation345_spill] sm:$0xff]  ;;  %v12186_v55 = vld [vmem:[#allocation346_spill] sm:$0xff]  ;;  %v2290_v21 = vld [vmem:[%s8058_s23 + $0x7e8] sm:$0xff] }
 0x35b   : > { %vm12174_vm11 = vcmp.lt.s32.totalorder %v12173_v26, %v11548_v3  ;;  %vm1266_vm10 = vcmp.eq.f32.partialorder %v12175_v40, inf  ;;  %v1520_v43 = vsel %vm1264_vm5, 3.4028235e+38, %v12169_v5  ;;  %v2029_v42 = vsel %vm1773_vm9, -3.4028235e+38, %v1517_v44  ;;  %v2289_v44 = vld [vmem:[%s8058_s23 + $0x7e0] sm:$0xff] }
 0x35c   : > { %v3564_v41 = vsel %vm12174_vm11, %v2791_v16, 0.0  ;;  %v3819_v31 = vadd.f32 %v3818_v60, %v3563_v24  ;;  %vm1775_vm7 = vcmp.eq.f32.partialorder %v1519_v54, -inf  ;;  %v2540_v62 = vsub.f32 %v2028_v56, %v2284_v10  ;;  %v12188_v29 = vld [vmem:[#allocation347_spill] sm:$0xff]  ;;  %v2292_v60 = vld [vmem:[%s8058_s23 + $0x7f8] sm:$0xff] }
 0x35d   : > { %v2794_v52 = vmul.f32 %v2538_v34, %v2538_v34  ;;  %vm12177_vm3 = vcmp.lt.s32.totalorder %v12176_v58, %v11548_v3  ;;  %vm1267_vm8 = vcmp.eq.f32.partialorder %v12178_v13, inf  ;;  %v1521_v53 = vsel %vm1265_vm0, 3.4028235e+38, %v12172_v18 }
 0x35e   : > { %v3565_v7 = vsel %vm12177_vm3, %v2792_v32, 0.0  ;;  %v2030_v4 = vsel %vm1774_vm12, -3.4028235e+38, %v1518_v25  ;;  %v3820_v15 = vadd.f32 %v3819_v31, %v3564_v41  ;;  %vm1776_vm2 = vcmp.eq.f32.partialorder %v1520_v43, -inf  ;;  %v2291_v32 = vld [vmem:[%s8058_s23 + $0x7f0] sm:$0xff]  ;;  %v12194_v31 = vld [vmem:[#allocation350_spill] sm:$0xff] }
 0x35f   : > { %v2541_v46 = vsub.f32 %v2029_v42, %v2285_v9  ;;  %v2795_v30 = vmul.f32 %v2539_v14, %v2539_v14  ;;  %vm12180_vm4 = vcmp.lt.s32.totalorder %v12179_v48, %v11548_v3  ;;  %vm1268_vm13 = vcmp.eq.f32.partialorder %v12181_v28, inf  ;;  %v12192_v41 = vld [vmem:[#allocation349_spill] sm:$0xff] }
 0x360   : > { %v3566_v45 = vsel %vm12180_vm4, %v2793_v47, 0.0  ;;  %v1522_v20 = vsel %vm1266_vm10, 3.4028235e+38, %v12175_v40  ;;  %v2031_v23 = vsel %vm1775_vm7, -3.4028235e+38, %v1519_v54  ;;  %v3821_v51 = vadd.f32 %v3820_v15, %v3565_v7  ;;  %v12190_v54 = vld [vmem:[#allocation348_spill] sm:$0xff] }
 0x361   : > { %vm1777_vm15 = vcmp.eq.f32.partialorder %v1521_v53, -inf  ;;  %v2542_v59 = vsub.f32 %v2030_v4, %v2286_v50  ;;  %v2796_v39 = vmul.f32 %v2540_v62, %v2540_v62  ;;  %vm12183_vm14 = vcmp.lt.s32.totalorder %v12182_v1, %v11548_v3  ;;  %v12196_v7 = vld [vmem:[#allocation351_spill] sm:$0xff]  ;;  %v12198_v50 = vld [vmem:[#allocation352_spill] sm:$0xff] }
 0x362   : > { %v3567_v6 = vsel %vm12183_vm14, %v2794_v52, 0.0  ;;  %v1523_v8 = vsel %vm1267_vm8, 3.4028235e+38, %v12178_v13  ;;  %v2032_v61 = vsel %vm1776_vm2, -3.4028235e+38, %v1520_v43  ;;  %v3822_v0 = vadd.f32 %v3821_v51, %v3566_v45 }
 0x363   : > { %vm1778_vm6 = vcmp.eq.f32.partialorder %v1522_v20, -inf  ;;  %v2543_v11 = vsub.f32 %v2031_v23, %v2287_v19  ;;  %v2797_v37 = vmul.f32 %v2541_v46, %v2541_v46  ;;  %vm12185_vm5 = vcmp.lt.s32.totalorder %v12184_v38, %v11548_v3 }
 0x364   : > { %v3568_v17 = vsel %vm12185_vm5, %v2795_v30, 0.0  ;;  %v1524_v57 = vsel %vm1268_vm13, 3.4028235e+38, %v12181_v28  ;;  %v2033_v63 = vsel %vm1777_vm15, -3.4028235e+38, %v1521_v53  ;;  %v3823_v2 = vadd.f32 %v3822_v0, %v3567_v6  ;;  %v12200_v30 = vld [vmem:[#allocation353_spill] sm:$0xff] }
 0x365   : > { %vm1779_vm9 = vcmp.eq.f32.partialorder %v1523_v8, -inf  ;;  %v2544_v33 = vsub.f32 %v2032_v61, %v2288_v36  ;;  %v2798_v12 = vmul.f32 %v2542_v59, %v2542_v59  ;;  %vm12187_vm1 = vcmp.lt.s32.totalorder %v12186_v55, %v11548_v3  ;;  %v12202_v28 = vld [vmem:[#allocation354_spill] sm:$0xff] }
 0x366   : > { %v3569_v16 = vsel %vm12187_vm1, %v2796_v39, 0.0  ;;  %v2034_v27 = vsel %vm1778_vm6, -3.4028235e+38, %v1522_v20  ;;  %v3824_v5 = vadd.f32 %v3823_v2, %v3568_v17  ;;  %vm1780_vm0 = vcmp.eq.f32.partialorder %v1524_v57, -inf }
 0x367   : > { %v2545_v25 = vsub.f32 %v2033_v63, %v2289_v44  ;;  %v2799_v35 = vmul.f32 %v2543_v11, %v2543_v11  ;;  %vm12189_vm12 = vcmp.lt.s32.totalorder %v12188_v29, %v11548_v3  ;;  %v2035_v34 = vsel %vm1779_vm9, -3.4028235e+38, %v1523_v8 }
 0x368   : > { %v3570_v49 = vsel %vm12189_vm12, %v2797_v37, 0.0  ;;  %v3825_v22 = vadd.f32 %v3824_v5, %v3569_v16  ;;  %v2546_v24 = vsub.f32 %v2034_v27, %v2290_v21  ;;  %v2800_v18 = vmul.f32 %v2544_v33, %v2544_v33 }
 0x369   : > { %vm12191_vm11 = vcmp.lt.s32.totalorder %v12190_v54, %v11548_v3  ;;  %v2036_v10 = vsel %vm1780_vm0, -3.4028235e+38, %v1524_v57  ;;  %v2547_v47 = vsub.f32 %v2035_v34, %v2291_v32  ;;  %v2801_v26 = vmul.f32 %v2545_v25, %v2545_v25 }
 0x36a   : > { %v3571_v56 = vsel %vm12191_vm11, %v2798_v12, 0.0  ;;  %v3826_v14 = vadd.f32 %v3825_v22, %v3570_v49  ;;  %vm12193_vm10 = vcmp.lt.s32.totalorder %v12192_v41, %v11548_v3  ;;  %v2548_v42 = vsub.f32 %v2036_v10, %v2292_v60 }
 0x36b   : > { %v3572_v40 = vsel %vm12193_vm10, %v2799_v35, 0.0  ;;  %v2802_v9 = vmul.f32 %v2546_v24, %v2546_v24  ;;  %vm12195_vm7 = vcmp.lt.s32.totalorder %v12194_v31, %v11548_v3  ;;  %v2803_v58 = vmul.f32 %v2547_v47, %v2547_v47 }
 0x36c   : > { %v3827_v43 = vadd.f32 %v3826_v14, %v3571_v56  ;;  %v3573_v62 = vsel %vm12195_vm7, %v2800_v18, 0.0  ;;  %vm12197_vm3 = vcmp.lt.s32.totalorder %v12196_v7, %v11548_v3  ;;  %v2804_v4 = vmul.f32 %v2548_v42, %v2548_v42 }
 0x36d   : > { %v3574_v13 = vsel %vm12197_vm3, %v2801_v26, 0.0  ;;  %vm12199_vm8 = vcmp.lt.s32.totalorder %v12198_v50, %v11548_v3  ;;  %vm12201_vm2 = vcmp.lt.s32.totalorder %v12200_v30, %v11548_v3  ;;  %vm12203_vm4 = vcmp.lt.s32.totalorder %v12202_v28, %v11548_v3 }
 0x36e   : > { %v3828_v52 = vadd.f32 %v3827_v43, %v3572_v40  ;;  %v3575_v15 = vsel %vm12199_vm8, %v2802_v9, 0.0  ;;  %v3576_v48 = vsel %vm12201_vm2, %v2803_v58, 0.0  ;;  %v3577_v20 = vsel %vm12203_vm4, %v2804_v4, 0.0 }
 0x370   : > { %v3829_v53 = vadd.f32 %v3828_v52, %v3573_v62 }
 0x372   : > { %v3830_v46 = vadd.f32 %v3829_v53, %v3574_v13 }
 0x374   : > { %v3831_v45 = vadd.f32 %v3830_v46, %v3575_v15 }
 0x376   : > { %v3832_v23 = vadd.f32 %v3831_v45, %v3576_v48 }
 0x378   : > { %v3833_v19 = vadd.f32 %v3832_v23, %v3577_v20 }
 0x37a   : > { %3840 = vst [vmem:[%s239_s27] sm:$0xff] %v3833_v19 }
 0x37b PF: > { %s12_s11 = sadd.s32 1, %s3973_s11   ;;  %s12204_s9 = smov %s3969_s10 }
 0x37c   : > { %p9_p7 = scmp.ge.s32.totalorder %s12_s11, 4   ;;  %s12205_s10 = smov %s12207_s12 }
 0x37e   :  { %11 = sbr.rel (!%p9_p7) target bundleno = 2 (0x2), region = 69 }

</bundles_post_ra>
